<compile_context>
chip_gen: v7x
topology: tpu7x:2x2x1
jax: 0.10.0
libtpu: 0.0.40
codegen_flags: <defaults>
</compile_context>

<pallas_src>
import jax
import jax.numpy as jnp
import numpy as np
from jax.experimental import pallas as pl
from jax.experimental.pallas import tpu as pltpu


def _ceil8(x):
    return ((x + 7) // 8) * 8


_PARAM_ORDER = ("c1w", "c1b", "c2w", "c2b", "c3w", "c3b", "c4w", "c4b",
                "f1w", "f1b", "f2w", "f2b", "f3w", "f3b")


# --------------------------------------------------------------------------------------
# Fused kernel builder
# --------------------------------------------------------------------------------------
def _make_kernel(num_channels, image_size, block_b):
    S = image_size
    S2, S4, S8 = S // 2, S // 4, S // 8
    R = S8 * S8                       # pooled conv4 rows per image (FC input rows)
    B = block_b

    off1 = _ceil8(S + 1)
    off3 = _ceil8(S2 + 1)
    off4 = _ceil8(S4 + 1)

    def conv3x3_chunks(pad_ref, h, w, off, w_ref, b_ref, emit):
        """3x3 SAME conv + bias + ReLU over the (h, w) image stored row-major
        (channels on lanes) in pad_ref's data region [off, off + h*w).
        Calls emit(r0, rc, y) with y an (rc*w, Cout) f32 value per row chunk."""
        cout = w_ref.shape[-1]
        # Even row-chunk, ~<=256 flat rows, so the f32 accumulator stays in vregs.
        rc_t = min(h, max(2, (256 // w) // 2 * 2))
        r0 = 0
        while r0 < h:
            rc = min(rc_t, h - r0)                 # h, r0, rc_t even -> rc even
            p = rc * w
            col = jax.lax.broadcasted_iota(jnp.int32, (p, 1), 0) % w
            left_ok = col >= 1                     # kx == 0 tap reads column j-1
            right_ok = col <= (w - 2)              # kx == 2 tap reads column j+1
            acc = jnp.zeros((p, cout), jnp.float32)
            for ky in range(3):
                for kx in range(3):
                    start = off + (r0 + ky - 1) * w + (kx - 1)
                    tap = pad_ref[start:start + p, :]          # (p, Cin) f32
                    if kx == 0:
                        tap = jnp.where(left_ok, tap, 0.0)
                    elif kx == 2:
                        tap = jnp.where(right_ok, tap, 0.0)
                    acc = acc + jnp.dot(tap.astype(jnp.bfloat16),
                                        w_ref[3 * ky + kx],
                                        preferred_element_type=jnp.float32)
            emit(r0, rc, jnp.maximum(acc + b_ref[...], 0.0))   # fused bias + ReLU
            r0 += rc

    def pool2x2_store(y, rc, w, t_ref, dst_ref, dst_start):
        """2x2 / stride-2 max pool of y ((rc*w, C) f32, rc even), written as ONE
        contiguous (rc/2 * w/2, C) block into dst_ref starting at row dst_start."""
        h2, w2 = rc // 2, w // 2
        for i2 in range(h2):                       # vertical max: bulk (w, C) slices
            top = y[(2 * i2) * w:(2 * i2) * w + w, :]
            bot = y[(2 * i2 + 1) * w:(2 * i2 + 1) * w + w, :]
            t_ref[i2 * w:(i2 + 1) * w, :] = jnp.maximum(top, bot)
        q = h2 * w2
        # horizontal max: even/odd strided loads, one bulk store
        even = t_ref[pl.ds(0, q, stride=2), :]
        odd = t_ref[pl.ds(1, q, stride=2), :]
        dst_ref[pl.ds(dst_start, q), :] = jnp.maximum(even, odd).astype(dst_ref.dtype)

    def kernel(x_ref,
               c1w, c1b, c2w, c2b, c3w, c3b, c4w, c4b,
               f1w, f1b, f2w, f2b, f3w, f3b,
               o_ref,
               pad1, pad2, pad3, pad4, t2, t3, t4, fc_scr):
        # Re-zero only the (never-written) margins, once per grid step.  Interior
        # rows are fully overwritten per image, so margins stay zero for the whole
        # step and provide the convs' zero padding.
        pad1[0:off1, :] = jnp.zeros((off1, num_channels), jnp.float32)
        pad1[off1 + S * S:2 * off1 + S * S, :] = jnp.zeros((off1, num_channels), jnp.float32)
        pad2[0:off1, :] = jnp.zeros((off1, 32), jnp.float32)
        pad2[off1 + S * S:2 * off1 + S * S, :] = jnp.zeros((off1, 32), jnp.float32)
        pad3[0:off3, :] = jnp.zeros((off3, 64), jnp.float32)
        pad3[off3 + S2 * S2:2 * off3 + S2 * S2, :] = jnp.zeros((off3, 64), jnp.float32)
        pad4[0:off4, :] = jnp.zeros((off4, 64), jnp.float32)
        pad4[off4 + S4 * S4:2 * off4 + S4 * S4, :] = jnp.zeros((off4, 64), jnp.float32)

        def per_image(b, carry):
            # conv1 (Cin -> 32) + ReLU
            pad1[off1:off1 + S * S, :] = x_ref[b]

            def emit1(r0, rc, y):                  # conv1 output -> conv2 input
                pad2[off1 + r0 * S:off1 + r0 * S + rc * S, :] = y
            conv3x3_chunks(pad1, S, S, off1, c1w, c1b, emit1)

            def emit2(r0, rc, y):                  # conv2 + fused pool -> conv3 input
                pool2x2_store(y, rc, S, t2, pad3, off3 + (r0 // 2) * S2)
            conv3x3_chunks(pad2, S, S, off1, c2w, c2b, emit2)

            def emit3(r0, rc, y):                  # conv3 + fused pool -> conv4 input
                pool2x2_store(y, rc, S2, t3, pad4, off4 + (r0 // 2) * S4)
            conv3x3_chunks(pad3, S2, S2, off3, c3w, c3b, emit3)

            def emit4(r0, rc, y):                  # conv4 + fused pool -> FC input rows
                pool2x2_store(y, rc, S4, t4, fc_scr, b * R + (r0 // 2) * S8)
            conv3x3_chunks(pad4, S4, S4, off4, c4w, c4b, emit4)
            return carry

        jax.lax.fori_loop(0, B, per_image, 0)

        # FC head, batched over the whole image tile (matmul M = B).
        acc = jnp.zeros((B, 512), jnp.float32)
        for r in range(R):
            if B == 1:
                lhs = fc_scr[pl.ds(r, 1), :]
            else:
                lhs = fc_scr[pl.ds(r, B, stride=R), :]      # row r of every image
            acc = acc + jnp.dot(lhs.astype(jnp.bfloat16), f1w[r],
                                preferred_element_type=jnp.float32)
        h = jnp.maximum(acc + f1b[...], 0.0)
        # TODO(synk): nn.Dropout(0.5) is inference-mode identity (torch eval semantics).
        h = jnp.maximum(jnp.dot(h.astype(jnp.bfloat16), f2w[...],
                                preferred_element_type=jnp.float32) + f2b[...], 0.0)
        o_ref[...] = jnp.dot(h.astype(jnp.bfloat16), f3w[...],
                             preferred_element_type=jnp.float32) + f3b[...]

    return kernel


# --------------------------------------------------------------------------------------
# Forward pass wrapper
# --------------------------------------------------------------------------------------
def cnn500k_forward(params, x_nchw, *, block_b=None):
    n, cin, s, s2 = x_nchw.shape
    assert s == s2 and s % 8 == 0, "image_size must be a multiple of 8"
    num_classes = params["f3b"].shape[-1]
    s8 = s // 8
    R = s8 * s8
    npad = ((num_classes + 127) // 128) * 128              # lane-dense output width

    # Batch tile per grid step.  Default keeps the tile a multiple of 8 (or the
    # whole batch), so the output BlockSpec stays (8,128)-friendly; with n >= 16
    # the grid has >= 2 steps so ("parallel",) still shards across v7x's 2 TCs.
    B = block_b if block_b is not None else max(1, min(8, n))
    n_pad = ((n + B - 1) // B) * B
    assert B % 8 == 0 or n_pad == B, "block_b must be a multiple of 8 or cover the batch"

    # NCHW -> NHWC, flatten spatial (rows = h*W + w, channels on lanes); pad batch.
    x = jnp.transpose(x_nchw, (0, 2, 3, 1)).astype(jnp.float32).reshape(n, s * s, cin)
    if n_pad != n:
        x = jnp.concatenate([x, jnp.zeros((n_pad - n, s * s, cin), jnp.float32)], axis=0)

    # Pad FC3 to 128 output lanes (lane-dense final store); wrapper slices it back.
    wdict = dict(params)
    wdict["f3w"] = jnp.pad(params["f3w"], ((0, 0), (0, npad - num_classes)))
    wdict["f3b"] = jnp.pad(params["f3b"], ((0, 0), (0, npad - num_classes)))
    weights = [wdict[k] for k in _PARAM_ORDER]

    kernel = _make_kernel(cin, s, B)

    in_specs = [pl.BlockSpec((B, s * s, cin), lambda i: (i, 0, 0))]
    for w in weights:   # weights are VMEM-resident: full-array block, constant index
        in_specs.append(pl.BlockSpec(w.shape, lambda i, nd=w.ndim: (0,) * nd))

    off1 = _ceil8(s + 1)
    off3 = _ceil8(s // 2 + 1)
    off4 = _ceil8(s // 4 + 1)

    # Per-step scratch is ~a few hundred KB regardless of B (per-image reuse), so
    # the default scoped-VMEM limit is ample on v5e/v6e/v7x.
    out = pl.pallas_call(
        kernel,
        out_shape=jax.ShapeDtypeStruct((n_pad, npad), jnp.float32),
        grid=(n_pad // B,),
        in_specs=in_specs,
        out_specs=pl.BlockSpec((B, npad), lambda i: (i, 0)),
        scratch_shapes=[
            pltpu.VMEM((s * s + 2 * off1, cin), jnp.float32),         # pad1: conv1 input
            pltpu.VMEM((s * s + 2 * off1, 32), jnp.float32),          # pad2: conv2 input
            pltpu.VMEM(((s // 2) ** 2 + 2 * off3, 64), jnp.float32),  # pad3: conv3 input
            pltpu.VMEM(((s // 4) ** 2 + 2 * off4, 64), jnp.float32),  # pad4: conv4 input
            pltpu.VMEM(((s // 2) * s, 64), jnp.float32),              # t2: pool temp
            pltpu.VMEM(((s // 4) * (s // 2), 64), jnp.float32),       # t3: pool temp
            pltpu.VMEM(((s // 8) * (s // 4), 32), jnp.float32),       # t4: pool temp
            pltpu.VMEM((B * R, 32), jnp.float32),                     # fc_scr: FC inputs
        ],
        compiler_params=pltpu.CompilerParams(
            dimension_semantics=("parallel",),
        ),
    )(x, *weights)
    return out[:n, :num_classes]


# --------------------------------------------------------------------------------------
# Parameters (deterministic synthetic init; shapes follow CNN500k.__init__)
# --------------------------------------------------------------------------------------
def make_params(key, num_channels, image_size, num_classes):
    s8 = image_size // 8
    ks = jax.random.split(key, 14)

    def conv(kw, kb, cin, cout):
        w = jax.random.normal(kw, (cout, cin, 3, 3), jnp.float32) / jnp.sqrt(9.0 * cin)
        b = jax.random.normal(kb, (cout,), jnp.float32) * 0.01
        # (cout, cin, ky, kx) -> (ky*3+kx, cin, cout), bf16 operands for the MXU.
        w9 = jnp.transpose(w, (2, 3, 1, 0)).reshape(9, cin, cout)
        return w9.astype(jnp.bfloat16), b.reshape(1, cout)

    def lin(kw, kb, fin, fout):
        w = jax.random.normal(kw, (fout, fin), jnp.float32) / jnp.sqrt(float(fin))
        b = jax.random.normal(kb, (fout,), jnp.float32) * 0.01
        return jnp.transpose(w).astype(jnp.bfloat16), b.reshape(1, fout)  # (in, out)

    p = {}
    p["c1w"], p["c1b"] = conv(ks[0], ks[1], num_channels, 32)
    p["c2w"], p["c2b"] = conv(ks[2], ks[3], 32, 64)
    p["c3w"], p["c3b"] = conv(ks[4], ks[5], 64, 64)
    p["c4w"], p["c4b"] = conv(ks[6], ks[7], 64, 32)

    feat = 32 * s8 * s8
    f1w, p["f1b"] = lin(ks[8], ks[9], feat, 512)   # rows in PyTorch NCHW-flatten order
    # Permute FC1 rows ONCE so the kernel's NHWC flatten needs no runtime transpose:
    #   PyTorch row  c*s8*s8 + h*s8 + w   ->   kernel row (h*s8 + w), channel c.
    p["f1w"] = (f1w.reshape(32, s8, s8, 512)
                   .transpose(1, 2, 0, 3)
                   .reshape(s8 * s8, 32, 512))
    p["f2w"], p["f2b"] = lin(ks[10], ks[11], 512, 256)
    p["f3w"], p["f3b"] = lin(ks[12], ks[13], 256, num_classes)
    return p


# --------------------------------------------------------------------------------------
# Pure-JAX reference (same weights) for a numerical sanity check
# --------------------------------------------------------------------------------------
def _reference_forward(params, x_nchw):
    f32 = lambda a: a.astype(jnp.float32)
    x = jnp.transpose(x_nchw, (0, 2, 3, 1)).astype(jnp.float32)  # NHWC

    def conv(x, w9, b):
        cin, cout = w9.shape[1], w9.shape[2]
        w = f32(w9).reshape(3, 3, cin, cout)  # HWIO
        y = jax.lax.conv_general_dilated(
            x, w, window_strides=(1, 1), padding="SAME",
            dimension_numbers=("NHWC", "HWIO", "NHWC"))
        return jax.nn.relu(y + f32(b).reshape(1, 1, 1, cout))

    def pool(x):
        return jax.lax.reduce_window(x, -jnp.inf, jax.lax.max,
                                     (1, 2, 2, 1), (1, 2, 2, 1), "VALID")

    x = conv(x, params["c1w"], params["c1b"])
    x = conv(x, params["c2w"], params["c2b"])
    x = pool(x)
    x = conv(x, params["c3w"], params["c3b"])
    x = pool(x)
    x = conv(x, params["c4w"], params["c4b"])
    x = pool(x)
    n, s8 = x.shape[0], x.shape[1]
    x = x.reshape(n, s8 * s8 * 32)                               # NHWC flatten
    f1w = f32(params["f1w"]).reshape(s8 * s8 * 32, 512)          # rows already NHWC order
    x = jax.nn.relu(x @ f1w + f32(params["f1b"]))
    x = jax.nn.relu(x @ f32(params["f2w"]) + f32(params["f2b"]))
    return x @ f32(params["f3w"]) + f32(params["f3b"])


if __name__ == "__main__":
    num_channels, image_size, num_classes = 4, 16, 10

    key = jax.random.PRNGKey(0)
    k_params, k_x1, k_x2 = jax.random.split(key, 3)
    params = make_params(k_params, num_channels, image_size, num_classes)

    fwd = jax.jit(cnn500k_forward)
    ref = jax.jit(_reference_forward)

    # Small demo batch: one grid step with a 2-image tile.
    x1 = jax.random.normal(k_x1, (2, num_channels, image_size, image_size), jnp.float32)
    out1 = fwd(params, x1)
    jax.block_until_ready(out1)
    assert out1.shape == (2, num_classes), out1.shape
    assert bool(jnp.all(jnp.isfinite(out1)))
    np.testing.assert_allclose(np.asarray(out1), np.asarray(ref(params, x1)),
                               rtol=5e-2, atol=5e-2)

    # Larger batch: exercises batch padding (10 -> 16), an 8-image tile and a
    # 2-step grid (megacore sharding on v7x).
    x2 = jax.random.normal(k_x2, (10, num_channels, image_size, image_size), jnp.float32)
    out2 = fwd(params, x2)
    jax.block_until_ready(out2)
    assert out2.shape == (10, num_classes), out2.shape
    assert bool(jnp.all(jnp.isfinite(out2)))
    np.testing.assert_allclose(np.asarray(out2), np.asarray(ref(params, x2)),
                               rtol=5e-2, atol=5e-2)

    print("KERNEL_OK")
</pallas_src>

<mosaic_0001>
module attributes {stable_mosaic.version = 11 : i64} {
  func.func @kernel(%arg0: i32, %arg1: memref<2x256x4xf32, #tpu.memory_space<vmem>>, %arg2: memref<9x4x32xbf16, #tpu.memory_space<vmem>>, %arg3: memref<1x32xf32, #tpu.memory_space<vmem>>, %arg4: memref<9x32x64xbf16, #tpu.memory_space<vmem>>, %arg5: memref<1x64xf32, #tpu.memory_space<vmem>>, %arg6: memref<9x64x64xbf16, #tpu.memory_space<vmem>>, %arg7: memref<1x64xf32, #tpu.memory_space<vmem>>, %arg8: memref<9x64x32xbf16, #tpu.memory_space<vmem>>, %arg9: memref<1x32xf32, #tpu.memory_space<vmem>>, %arg10: memref<4x32x512xbf16, #tpu.memory_space<vmem>>, %arg11: memref<1x512xf32, #tpu.memory_space<vmem>>, %arg12: memref<512x256xbf16, #tpu.memory_space<vmem>>, %arg13: memref<1x256xf32, #tpu.memory_space<vmem>>, %arg14: memref<256x128xbf16, #tpu.memory_space<vmem>>, %arg15: memref<1x128xf32, #tpu.memory_space<vmem>>, %arg16: memref<2x128xf32, #tpu.memory_space<vmem>>, %arg17: memref<304x4xf32, #tpu.memory_space<vmem>>, %arg18: memref<304x32xf32, #tpu.memory_space<vmem>>, %arg19: memref<96x64xf32, #tpu.memory_space<vmem>>, %arg20: memref<32x64xf32, #tpu.memory_space<vmem>>, %arg21: memref<128x64xf32, #tpu.memory_space<vmem>>, %arg22: memref<32x64xf32, #tpu.memory_space<vmem>>, %arg23: memref<8x32xf32, #tpu.memory_space<vmem>>, %arg24: memref<8x32xf32, #tpu.memory_space<vmem>>) attributes {dimension_semantics = [#tpu.dimension_semantics<parallel>], iteration_bounds = array<i64: 1>, scalar_prefetch = 0 : i64, scratch_operands = 8 : i64, tpu.core_type = #tpu.core_type<tc>, window_params = [{transform_indices = @transform_0, window_bounds = array<i64: 2, 256, 4>}, {pipeline_mode = #tpu.pipeline_mode<synchronous>, transform_indices = @transform_1, window_bounds = array<i64: 9, 4, 32>}, {pipeline_mode = #tpu.pipeline_mode<synchronous>, transform_indices = @transform_2, window_bounds = array<i64: 1, 32>}, {pipeline_mode = #tpu.pipeline_mode<synchronous>, transform_indices = @transform_3, window_bounds = array<i64: 9, 32, 64>}, {pipeline_mode = #tpu.pipeline_mode<synchronous>, transform_indices = @transform_4, window_bounds = array<i64: 1, 64>}, {pipeline_mode = #tpu.pipeline_mode<synchronous>, transform_indices = @transform_5, window_bounds = array<i64: 9, 64, 64>}, {pipeline_mode = #tpu.pipeline_mode<synchronous>, transform_indices = @transform_6, window_bounds = array<i64: 1, 64>}, {pipeline_mode = #tpu.pipeline_mode<synchronous>, transform_indices = @transform_7, window_bounds = array<i64: 9, 64, 32>}, {pipeline_mode = #tpu.pipeline_mode<synchronous>, transform_indices = @transform_8, window_bounds = array<i64: 1, 32>}, {pipeline_mode = #tpu.pipeline_mode<synchronous>, transform_indices = @transform_9, window_bounds = array<i64: 4, 32, 512>}, {pipeline_mode = #tpu.pipeline_mode<synchronous>, transform_indices = @transform_10, window_bounds = array<i64: 1, 512>}, {pipeline_mode = #tpu.pipeline_mode<synchronous>, transform_indices = @transform_11, window_bounds = array<i64: 512, 256>}, {pipeline_mode = #tpu.pipeline_mode<synchronous>, transform_indices = @transform_12, window_bounds = array<i64: 1, 256>}, {pipeline_mode = #tpu.pipeline_mode<synchronous>, transform_indices = @transform_13, window_bounds = array<i64: 256, 128>}, {pipeline_mode = #tpu.pipeline_mode<synchronous>, transform_indices = @transform_14, window_bounds = array<i64: 1, 128>}, {transform_indices = @transform_15, window_bounds = array<i64: 2, 128>}]} {
    %cst = arith.constant 0.000000e+00 : f32
    %0 = vector.broadcast %cst : f32 to vector<24x4xf32>
    %c0 = arith.constant 0 : index
    %c0_0 = arith.constant 0 : index
    %1 = vector.load %arg17[%c0, %c0_0] : memref<304x4xf32, #tpu.memory_space<vmem>>, vector<24x4xf32>
    tpu.vector_store %arg17[%c0, %c0_0], %0 {strides = array<i32>} : memref<304x4xf32, #tpu.memory_space<vmem>>, vector<24x4xf32>,
    %cst_1 = arith.constant 0.000000e+00 : f32
    %2 = vector.broadcast %cst_1 : f32 to vector<24x4xf32>
    %c280 = arith.constant 280 : index
    %c0_2 = arith.constant 0 : index
    %3 = vector.load %arg17[%c280, %c0_2] : memref<304x4xf32, #tpu.memory_space<vmem>>, vector<24x4xf32>
    tpu.vector_store %arg17[%c280, %c0_2], %2 {strides = array<i32>} : memref<304x4xf32, #tpu.memory_space<vmem>>, vector<24x4xf32>,
    %cst_3 = arith.constant 0.000000e+00 : f32
    %4 = vector.broadcast %cst_3 : f32 to vector<24x32xf32>
    %c0_4 = arith.constant 0 : index
    %c0_5 = arith.constant 0 : index
    %5 = vector.load %arg18[%c0_4, %c0_5] : memref<304x32xf32, #tpu.memory_space<vmem>>, vector<24x32xf32>
    tpu.vector_store %arg18[%c0_4, %c0_5], %4 {strides = array<i32>} : memref<304x32xf32, #tpu.memory_space<vmem>>, vector<24x32xf32>,
    %cst_6 = arith.constant 0.000000e+00 : f32
    %6 = vector.broadcast %cst_6 : f32 to vector<24x32xf32>
    %c280_7 = arith.constant 280 : index
    %c0_8 = arith.constant 0 : index
    %7 = vector.load %arg18[%c280_7, %c0_8] : memref<304x32xf32, #tpu.memory_space<vmem>>, vector<24x32xf32>
    tpu.vector_store %arg18[%c280_7, %c0_8], %6 {strides = array<i32>} : memref<304x32xf32, #tpu.memory_space<vmem>>, vector<24x32xf32>,
    %cst_9 = arith.constant 0.000000e+00 : f32
    %8 = vector.broadcast %cst_9 : f32 to vector<16x64xf32>
    %c0_10 = arith.constant 0 : index
    %c0_11 = arith.constant 0 : index
    %9 = vector.load %arg19[%c0_10, %c0_11] : memref<96x64xf32, #tpu.memory_space<vmem>>, vector<16x64xf32>
    tpu.vector_store %arg19[%c0_10, %c0_11], %8 {strides = array<i32>} : memref<96x64xf32, #tpu.memory_space<vmem>>, vector<16x64xf32>,
    %cst_12 = arith.constant 0.000000e+00 : f32
    %10 = vector.broadcast %cst_12 : f32 to vector<16x64xf32>
    %c80 = arith.constant 80 : index
    %c0_13 = arith.constant 0 : index
    %11 = vector.load %arg19[%c80, %c0_13] : memref<96x64xf32, #tpu.memory_space<vmem>>, vector<16x64xf32>
    tpu.vector_store %arg19[%c80, %c0_13], %10 {strides = array<i32>} : memref<96x64xf32, #tpu.memory_space<vmem>>, vector<16x64xf32>,
    %cst_14 = arith.constant 0.000000e+00 : f32
    %12 = vector.broadcast %cst_14 : f32 to vector<8x64xf32>
    %c0_15 = arith.constant 0 : index
    %c0_16 = arith.constant 0 : index
    %13 = vector.load %arg20[%c0_15, %c0_16] : memref<32x64xf32, #tpu.memory_space<vmem>>, vector<8x64xf32>
    tpu.vector_store %arg20[%c0_15, %c0_16], %12 {strides = array<i32>} : memref<32x64xf32, #tpu.memory_space<vmem>>, vector<8x64xf32>,
    %cst_17 = arith.constant 0.000000e+00 : f32
    %14 = vector.broadcast %cst_17 : f32 to vector<8x64xf32>
    %c24 = arith.constant 24 : index
    %c0_18 = arith.constant 0 : index
    %15 = vector.load %arg20[%c24, %c0_18] : memref<32x64xf32, #tpu.memory_space<vmem>>, vector<8x64xf32>
    tpu.vector_store %arg20[%c24, %c0_18], %14 {strides = array<i32>} : memref<32x64xf32, #tpu.memory_space<vmem>>, vector<8x64xf32>,
    %c0_i32 = arith.constant 0 : i32
    %c2_i32 = arith.constant 2 : i32
    %16 = arith.addi %c0_i32, %c2_i32 : i32
    %c1_i32 = arith.constant 1 : i32
    scf.for %arg25 = %c0_i32 to %16 step %c1_i32  : i32 {
      %62 = arith.index_cast %arg25 : i32 to index
      %c0_58 = arith.constant 0 : index
      %c0_59 = arith.constant 0 : index
      %63 = vector.load %arg1[%62, %c0_58, %c0_59] : memref<2x256x4xf32, #tpu.memory_space<vmem>>, vector<1x256x4xf32>
      %64 = vector.shape_cast %63 : vector<1x256x4xf32> to vector<256x4xf32>
      %c24_60 = arith.constant 24 : index
      %c0_61 = arith.constant 0 : index
      %65 = vector.load %arg17[%c24_60, %c0_61] : memref<304x4xf32, #tpu.memory_space<vmem>>, vector<256x4xf32>
      tpu.vector_store %arg17[%c24_60, %c0_61], %64 {strides = array<i32>} : memref<304x4xf32, #tpu.memory_space<vmem>>, vector<256x4xf32>,
      %66 = tpu.iota {dimensions = array<i32: 0>} : vector<256x1xi32>
      %c16_i32 = arith.constant 16 : i32
      %c0_i32_62 = arith.constant 0 : i32
      %67 = arith.cmpi eq, %c16_i32, %c0_i32_62 : i32
      %c1_i32_63 = arith.constant 1 : i32
      %68 = arith.select %67, %c1_i32_63, %c16_i32 : i32
      %69 = vector.broadcast %68 : i32 to vector<256x1xi32>
      %70 = arith.remsi %66, %69 : vector<256x1xi32>
      %c0_i32_64 = arith.constant 0 : i32
      %71 = vector.broadcast %c0_i32_64 : i32 to vector<256x1xi32>
      %72 = arith.cmpi ne, %70, %71 : vector<256x1xi32>
      %c0_i32_65 = arith.constant 0 : i32
      %73 = vector.broadcast %c0_i32_65 : i32 to vector<256x1xi32>
      %74 = arith.cmpi slt, %70, %73 : vector<256x1xi32>
      %c0_i32_66 = arith.constant 0 : i32
      %75 = arith.cmpi slt, %68, %c0_i32_66 : i32
      %76 = vector.broadcast %75 : i1 to vector<256x1xi1>
      %77 = vector.broadcast %76 : vector<256x1xi1> to vector<256x1xi1>
      %78 = arith.xori %74, %77 : vector<256x1xi1>
      %79 = arith.andi %78, %72 : vector<256x1xi1>
      %80 = vector.broadcast %68 : i32 to vector<256x1xi32>
      %81 = arith.addi %70, %80 : vector<256x1xi32>
      %82 = arith.select %79, %81, %70 : vector<256x1xi1>, vector<256x1xi32>
      %c1_i32_67 = arith.constant 1 : i32
      %83 = vector.broadcast %c1_i32_67 : i32 to vector<256x1xi32>
      %84 = arith.cmpi sge, %82, %83 : vector<256x1xi32>
      %c14_i32 = arith.constant 14 : i32
      %85 = vector.broadcast %c14_i32 : i32 to vector<256x1xi32>
      %86 = arith.cmpi sle, %82, %85 : vector<256x1xi32>
      %cst_68 = arith.constant 0.000000e+00 : f32
      %87 = vector.broadcast %cst_68 : f32 to vector<256x32xf32>
      %c7 = arith.constant 7 : index
      %c0_69 = arith.constant 0 : index
      %88 = vector.load %arg17[%c7, %c0_69] : memref<304x4xf32, #tpu.memory_space<vmem>>, vector<256x4xf32>
      %cst_70 = arith.constant 0.000000e+00 : f32
      %89 = vector.shape_cast %84 : vector<256x1xi1> to vector<256x1xi1>
      %90 = vector.broadcast %89 : vector<256x1xi1> to vector<256x4xi1>
      %91 = vector.broadcast %cst_70 : f32 to vector<256x4xf32>
      %92 = arith.select %90, %88, %91 : vector<256x4xi1>, vector<256x4xf32>
      %93 = arith.truncf %92 : vector<256x4xf32> to vector<256x4xbf16>
      %c0_71 = arith.constant 0 : index
      %c0_72 = arith.constant 0 : index
      %c0_73 = arith.constant 0 : index
      %94 = vector.load %arg2[%c0_71, %c0_72, %c0_73] : memref<9x4x32xbf16, #tpu.memory_space<vmem>>, vector<1x4x32xbf16>
      %95 = vector.shape_cast %94 : vector<1x4x32xbf16> to vector<4x32xbf16>
      %cst_74 = arith.constant dense<0.000000e+00> : vector<256x32xf32>
      %96 = tpu.matmul %93, %95, %cst_74 {dimension_numbers = #tpu.dot_dimension_numbers<[1], [0], [0], [1], [0, 0, 1, 1], [], []>} : vector<256x4xbf16>, vector<4x32xbf16>, vector<256x32xf32> -> vector<256x32xf32>
      %97 = arith.addf %87, %96 : vector<256x32xf32>
      %c8 = arith.constant 8 : index
      %c0_75 = arith.constant 0 : index
      %98 = vector.load %arg17[%c8, %c0_75] : memref<304x4xf32, #tpu.memory_space<vmem>>, vector<256x4xf32>
      %99 = arith.truncf %98 : vector<256x4xf32> to vector<256x4xbf16>
      %c1_76 = arith.constant 1 : index
      %c0_77 = arith.constant 0 : index
      %c0_78 = arith.constant 0 : index
      %100 = vector.load %arg2[%c1_76, %c0_77, %c0_78] : memref<9x4x32xbf16, #tpu.memory_space<vmem>>, vector<1x4x32xbf16>
      %101 = vector.shape_cast %100 : vector<1x4x32xbf16> to vector<4x32xbf16>
      %cst_79 = arith.constant dense<0.000000e+00> : vector<256x32xf32>
      %102 = tpu.matmul %99, %101, %cst_79 {dimension_numbers = #tpu.dot_dimension_numbers<[1], [0], [0], [1], [0, 0, 1, 1], [], []>} : vector<256x4xbf16>, vector<4x32xbf16>, vector<256x32xf32> -> vector<256x32xf32>
      %103 = arith.addf %97, %102 : vector<256x32xf32>
      %c9 = arith.constant 9 : index
      %c0_80 = arith.constant 0 : index
      %104 = vector.load %arg17[%c9, %c0_80] : memref<304x4xf32, #tpu.memory_space<vmem>>, vector<256x4xf32>
      %cst_81 = arith.constant 0.000000e+00 : f32
      %105 = vector.shape_cast %86 : vector<256x1xi1> to vector<256x1xi1>
      %106 = vector.broadcast %105 : vector<256x1xi1> to vector<256x4xi1>
      %107 = vector.broadcast %cst_81 : f32 to vector<256x4xf32>
      %108 = arith.select %106, %104, %107 : vector<256x4xi1>, vector<256x4xf32>
      %109 = arith.truncf %108 : vector<256x4xf32> to vector<256x4xbf16>
      %c2_82 = arith.constant 2 : index
      %c0_83 = arith.constant 0 : index
      %c0_84 = arith.constant 0 : index
      %110 = vector.load %arg2[%c2_82, %c0_83, %c0_84] : memref<9x4x32xbf16, #tpu.memory_space<vmem>>, vector<1x4x32xbf16>
      %111 = vector.shape_cast %110 : vector<1x4x32xbf16> to vector<4x32xbf16>
      %cst_85 = arith.constant dense<0.000000e+00> : vector<256x32xf32>
      %112 = tpu.matmul %109, %111, %cst_85 {dimension_numbers = #tpu.dot_dimension_numbers<[1], [0], [0], [1], [0, 0, 1, 1], [], []>} : vector<256x4xbf16>, vector<4x32xbf16>, vector<256x32xf32> -> vector<256x32xf32>
      %113 = arith.addf %103, %112 : vector<256x32xf32>
      %c23 = arith.constant 23 : index
      %c0_86 = arith.constant 0 : index
      %114 = vector.load %arg17[%c23, %c0_86] : memref<304x4xf32, #tpu.memory_space<vmem>>, vector<256x4xf32>
      %cst_87 = arith.constant 0.000000e+00 : f32
      %115 = vector.shape_cast %84 : vector<256x1xi1> to vector<256x1xi1>
      %116 = vector.broadcast %115 : vector<256x1xi1> to vector<256x4xi1>
      %117 = vector.broadcast %cst_87 : f32 to vector<256x4xf32>
      %118 = arith.select %116, %114, %117 : vector<256x4xi1>, vector<256x4xf32>
      %119 = arith.truncf %118 : vector<256x4xf32> to vector<256x4xbf16>
      %c3_88 = arith.constant 3 : index
      %c0_89 = arith.constant 0 : index
      %c0_90 = arith.constant 0 : index
      %120 = vector.load %arg2[%c3_88, %c0_89, %c0_90] : memref<9x4x32xbf16, #tpu.memory_space<vmem>>, vector<1x4x32xbf16>
      %121 = vector.shape_cast %120 : vector<1x4x32xbf16> to vector<4x32xbf16>
      %cst_91 = arith.constant dense<0.000000e+00> : vector<256x32xf32>
      %122 = tpu.matmul %119, %121, %cst_91 {dimension_numbers = #tpu.dot_dimension_numbers<[1], [0], [0], [1], [0, 0, 1, 1], [], []>} : vector<256x4xbf16>, vector<4x32xbf16>, vector<256x32xf32> -> vector<256x32xf32>
      %123 = arith.addf %113, %122 : vector<256x32xf32>
      %c24_92 = arith.constant 24 : index
      %c0_93 = arith.constant 0 : index
      %124 = vector.load %arg17[%c24_92, %c0_93] : memref<304x4xf32, #tpu.memory_space<vmem>>, vector<256x4xf32>
      %125 = arith.truncf %124 : vector<256x4xf32> to vector<256x4xbf16>
      %c4 = arith.constant 4 : index
      %c0_94 = arith.constant 0 : index
      %c0_95 = arith.constant 0 : index
      %126 = vector.load %arg2[%c4, %c0_94, %c0_95] : memref<9x4x32xbf16, #tpu.memory_space<vmem>>, vector<1x4x32xbf16>
      %127 = vector.shape_cast %126 : vector<1x4x32xbf16> to vector<4x32xbf16>
      %cst_96 = arith.constant dense<0.000000e+00> : vector<256x32xf32>
      %128 = tpu.matmul %125, %127, %cst_96 {dimension_numbers = #tpu.dot_dimension_numbers<[1], [0], [0], [1], [0, 0, 1, 1], [], []>} : vector<256x4xbf16>, vector<4x32xbf16>, vector<256x32xf32> -> vector<256x32xf32>
      %129 = arith.addf %123, %128 : vector<256x32xf32>
      %c25 = arith.constant 25 : index
      %c0_97 = arith.constant 0 : index
      %130 = vector.load %arg17[%c25, %c0_97] : memref<304x4xf32, #tpu.memory_space<vmem>>, vector<256x4xf32>
      %cst_98 = arith.constant 0.000000e+00 : f32
      %131 = vector.shape_cast %86 : vector<256x1xi1> to vector<256x1xi1>
      %132 = vector.broadcast %131 : vector<256x1xi1> to vector<256x4xi1>
      %133 = vector.broadcast %cst_98 : f32 to vector<256x4xf32>
      %134 = arith.select %132, %130, %133 : vector<256x4xi1>, vector<256x4xf32>
      %135 = arith.truncf %134 : vector<256x4xf32> to vector<256x4xbf16>
      %c5 = arith.constant 5 : index
      %c0_99 = arith.constant 0 : index
      %c0_100 = arith.constant 0 : index
      %136 = vector.load %arg2[%c5, %c0_99, %c0_100] : memref<9x4x32xbf16, #tpu.memory_space<vmem>>, vector<1x4x32xbf16>
      %137 = vector.shape_cast %136 : vector<1x4x32xbf16> to vector<4x32xbf16>
      %cst_101 = arith.constant dense<0.000000e+00> : vector<256x32xf32>
      %138 = tpu.matmul %135, %137, %cst_101 {dimension_numbers = #tpu.dot_dimension_numbers<[1], [0], [0], [1], [0, 0, 1, 1], [], []>} : vector<256x4xbf16>, vector<4x32xbf16>, vector<256x32xf32> -> vector<256x32xf32>
      %139 = arith.addf %129, %138 : vector<256x32xf32>
      %c39 = arith.constant 39 : index
      %c0_102 = arith.constant 0 : index
      %140 = vector.load %arg17[%c39, %c0_102] : memref<304x4xf32, #tpu.memory_space<vmem>>, vector<256x4xf32>
      %cst_103 = arith.constant 0.000000e+00 : f32
      %141 = vector.shape_cast %84 : vector<256x1xi1> to vector<256x1xi1>
      %142 = vector.broadcast %141 : vector<256x1xi1> to vector<256x4xi1>
      %143 = vector.broadcast %cst_103 : f32 to vector<256x4xf32>
      %144 = arith.select %142, %140, %143 : vector<256x4xi1>, vector<256x4xf32>
      %145 = arith.truncf %144 : vector<256x4xf32> to vector<256x4xbf16>
      %c6 = arith.constant 6 : index
      %c0_104 = arith.constant 0 : index
      %c0_105 = arith.constant 0 : index
      %146 = vector.load %arg2[%c6, %c0_104, %c0_105] : memref<9x4x32xbf16, #tpu.memory_space<vmem>>, vector<1x4x32xbf16>
      %147 = vector.shape_cast %146 : vector<1x4x32xbf16> to vector<4x32xbf16>
      %cst_106 = arith.constant dense<0.000000e+00> : vector<256x32xf32>
      %148 = tpu.matmul %145, %147, %cst_106 {dimension_numbers = #tpu.dot_dimension_numbers<[1], [0], [0], [1], [0, 0, 1, 1], [], []>} : vector<256x4xbf16>, vector<4x32xbf16>, vector<256x32xf32> -> vector<256x32xf32>
      %149 = arith.addf %139, %148 : vector<256x32xf32>
      %c40 = arith.constant 40 : index
      %c0_107 = arith.constant 0 : index
      %150 = vector.load %arg17[%c40, %c0_107] : memref<304x4xf32, #tpu.memory_space<vmem>>, vector<256x4xf32>
      %151 = arith.truncf %150 : vector<256x4xf32> to vector<256x4xbf16>
      %c7_108 = arith.constant 7 : index
      %c0_109 = arith.constant 0 : index
      %c0_110 = arith.constant 0 : index
      %152 = vector.load %arg2[%c7_108, %c0_109, %c0_110] : memref<9x4x32xbf16, #tpu.memory_space<vmem>>, vector<1x4x32xbf16>
      %153 = vector.shape_cast %152 : vector<1x4x32xbf16> to vector<4x32xbf16>
      %cst_111 = arith.constant dense<0.000000e+00> : vector<256x32xf32>
      %154 = tpu.matmul %151, %153, %cst_111 {dimension_numbers = #tpu.dot_dimension_numbers<[1], [0], [0], [1], [0, 0, 1, 1], [], []>} : vector<256x4xbf16>, vector<4x32xbf16>, vector<256x32xf32> -> vector<256x32xf32>
      %155 = arith.addf %149, %154 : vector<256x32xf32>
      %c41 = arith.constant 41 : index
      %c0_112 = arith.constant 0 : index
      %156 = vector.load %arg17[%c41, %c0_112] : memref<304x4xf32, #tpu.memory_space<vmem>>, vector<256x4xf32>
      %cst_113 = arith.constant 0.000000e+00 : f32
      %157 = vector.shape_cast %86 : vector<256x1xi1> to vector<256x1xi1>
      %158 = vector.broadcast %157 : vector<256x1xi1> to vector<256x4xi1>
      %159 = vector.broadcast %cst_113 : f32 to vector<256x4xf32>
      %160 = arith.select %158, %156, %159 : vector<256x4xi1>, vector<256x4xf32>
      %161 = arith.truncf %160 : vector<256x4xf32> to vector<256x4xbf16>
      %c8_114 = arith.constant 8 : index
      %c0_115 = arith.constant 0 : index
      %c0_116 = arith.constant 0 : index
      %162 = vector.load %arg2[%c8_114, %c0_115, %c0_116] : memref<9x4x32xbf16, #tpu.memory_space<vmem>>, vector<1x4x32xbf16>
      %163 = vector.shape_cast %162 : vector<1x4x32xbf16> to vector<4x32xbf16>
      %cst_117 = arith.constant dense<0.000000e+00> : vector<256x32xf32>
      %164 = tpu.matmul %161, %163, %cst_117 {dimension_numbers = #tpu.dot_dimension_numbers<[1], [0], [0], [1], [0, 0, 1, 1], [], []>} : vector<256x4xbf16>, vector<4x32xbf16>, vector<256x32xf32> -> vector<256x32xf32>
      %165 = arith.addf %155, %164 : vector<256x32xf32>
      %c0_118 = arith.constant 0 : index
      %c0_119 = arith.constant 0 : index
      %166 = vector.load %arg3[%c0_118, %c0_119] : memref<1x32xf32, #tpu.memory_space<vmem>>, vector<1x32xf32>
      %167 = vector.broadcast %166 : vector<1x32xf32> to vector<256x32xf32>
      %168 = arith.addf %165, %167 : vector<256x32xf32>
      %cst_120 = arith.constant 0.000000e+00 : f32
      %169 = vector.broadcast %cst_120 : f32 to vector<256x32xf32>
      %170 = arith.maximumf %168, %169 : vector<256x32xf32>
      %c24_121 = arith.constant 24 : index
      %c0_122 = arith.constant 0 : index
      %171 = vector.load %arg18[%c24_121, %c0_122] : memref<304x32xf32, #tpu.memory_space<vmem>>, vector<256x32xf32>
      tpu.vector_store %arg18[%c24_121, %c0_122], %170 {strides = array<i32>} : memref<304x32xf32, #tpu.memory_space<vmem>>, vector<256x32xf32>,
      %172 = tpu.iota {dimensions = array<i32: 0>} : vector<256x1xi32>
      %c16_i32_123 = arith.constant 16 : i32
      %c0_i32_124 = arith.constant 0 : i32
      %173 = arith.cmpi eq, %c16_i32_123, %c0_i32_124 : i32
      %c1_i32_125 = arith.constant 1 : i32
      %174 = arith.select %173, %c1_i32_125, %c16_i32_123 : i32
      %175 = vector.broadcast %174 : i32 to vector<256x1xi32>
      %176 = arith.remsi %172, %175 : vector<256x1xi32>
      %c0_i32_126 = arith.constant 0 : i32
      %177 = vector.broadcast %c0_i32_126 : i32 to vector<256x1xi32>
      %178 = arith.cmpi ne, %176, %177 : vector<256x1xi32>
      %c0_i32_127 = arith.constant 0 : i32
      %179 = vector.broadcast %c0_i32_127 : i32 to vector<256x1xi32>
      %180 = arith.cmpi slt, %176, %179 : vector<256x1xi32>
      %c0_i32_128 = arith.constant 0 : i32
      %181 = arith.cmpi slt, %174, %c0_i32_128 : i32
      %182 = vector.broadcast %181 : i1 to vector<256x1xi1>
      %183 = vector.broadcast %182 : vector<256x1xi1> to vector<256x1xi1>
      %184 = arith.xori %180, %183 : vector<256x1xi1>
      %185 = arith.andi %184, %178 : vector<256x1xi1>
      %186 = vector.broadcast %174 : i32 to vector<256x1xi32>
      %187 = arith.addi %176, %186 : vector<256x1xi32>
      %188 = arith.select %185, %187, %176 : vector<256x1xi1>, vector<256x1xi32>
      %c1_i32_129 = arith.constant 1 : i32
      %189 = vector.broadcast %c1_i32_129 : i32 to vector<256x1xi32>
      %190 = arith.cmpi sge, %188, %189 : vector<256x1xi32>
      %c14_i32_130 = arith.constant 14 : i32
      %191 = vector.broadcast %c14_i32_130 : i32 to vector<256x1xi32>
      %192 = arith.cmpi sle, %188, %191 : vector<256x1xi32>
      %cst_131 = arith.constant 0.000000e+00 : f32
      %193 = vector.broadcast %cst_131 : f32 to vector<256x64xf32>
      %c7_132 = arith.constant 7 : index
      %c0_133 = arith.constant 0 : index
      %194 = vector.load %arg18[%c7_132, %c0_133] : memref<304x32xf32, #tpu.memory_space<vmem>>, vector<256x32xf32>
      %cst_134 = arith.constant 0.000000e+00 : f32
      %195 = vector.shape_cast %190 : vector<256x1xi1> to vector<256x1xi1>
      %196 = vector.broadcast %195 : vector<256x1xi1> to vector<256x32xi1>
      %197 = vector.broadcast %cst_134 : f32 to vector<256x32xf32>
      %198 = arith.select %196, %194, %197 : vector<256x32xi1>, vector<256x32xf32>
      %199 = arith.truncf %198 : vector<256x32xf32> to vector<256x32xbf16>
      %c0_135 = arith.constant 0 : index
      %c0_136 = arith.constant 0 : index
      %c0_137 = arith.constant 0 : index
      %200 = vector.load %arg4[%c0_135, %c0_136, %c0_137] : memref<9x32x64xbf16, #tpu.memory_space<vmem>>, vector<1x32x64xbf16>
      %201 = vector.shape_cast %200 : vector<1x32x64xbf16> to vector<32x64xbf16>
      %cst_138 = arith.constant dense<0.000000e+00> : vector<256x64xf32>
      %202 = tpu.matmul %199, %201, %cst_138 {dimension_numbers = #tpu.dot_dimension_numbers<[1], [0], [0], [1], [0, 0, 1, 1], [], []>} : vector<256x32xbf16>, vector<32x64xbf16>, vector<256x64xf32> -> vector<256x64xf32>
      %203 = arith.addf %193, %202 : vector<256x64xf32>
      %c8_139 = arith.constant 8 : index
      %c0_140 = arith.constant 0 : index
      %204 = vector.load %arg18[%c8_139, %c0_140] : memref<304x32xf32, #tpu.memory_space<vmem>>, vector<256x32xf32>
      %205 = arith.truncf %204 : vector<256x32xf32> to vector<256x32xbf16>
      %c1_141 = arith.constant 1 : index
      %c0_142 = arith.constant 0 : index
      %c0_143 = arith.constant 0 : index
      %206 = vector.load %arg4[%c1_141, %c0_142, %c0_143] : memref<9x32x64xbf16, #tpu.memory_space<vmem>>, vector<1x32x64xbf16>
      %207 = vector.shape_cast %206 : vector<1x32x64xbf16> to vector<32x64xbf16>
      %cst_144 = arith.constant dense<0.000000e+00> : vector<256x64xf32>
      %208 = tpu.matmul %205, %207, %cst_144 {dimension_numbers = #tpu.dot_dimension_numbers<[1], [0], [0], [1], [0, 0, 1, 1], [], []>} : vector<256x32xbf16>, vector<32x64xbf16>, vector<256x64xf32> -> vector<256x64xf32>
      %209 = arith.addf %203, %208 : vector<256x64xf32>
      %c9_145 = arith.constant 9 : index
      %c0_146 = arith.constant 0 : index
      %210 = vector.load %arg18[%c9_145, %c0_146] : memref<304x32xf32, #tpu.memory_space<vmem>>, vector<256x32xf32>
      %cst_147 = arith.constant 0.000000e+00 : f32
      %211 = vector.shape_cast %192 : vector<256x1xi1> to vector<256x1xi1>
      %212 = vector.broadcast %211 : vector<256x1xi1> to vector<256x32xi1>
      %213 = vector.broadcast %cst_147 : f32 to vector<256x32xf32>
      %214 = arith.select %212, %210, %213 : vector<256x32xi1>, vector<256x32xf32>
      %215 = arith.truncf %214 : vector<256x32xf32> to vector<256x32xbf16>
      %c2_148 = arith.constant 2 : index
      %c0_149 = arith.constant 0 : index
      %c0_150 = arith.constant 0 : index
      %216 = vector.load %arg4[%c2_148, %c0_149, %c0_150] : memref<9x32x64xbf16, #tpu.memory_space<vmem>>, vector<1x32x64xbf16>
      %217 = vector.shape_cast %216 : vector<1x32x64xbf16> to vector<32x64xbf16>
      %cst_151 = arith.constant dense<0.000000e+00> : vector<256x64xf32>
      %218 = tpu.matmul %215, %217, %cst_151 {dimension_numbers = #tpu.dot_dimension_numbers<[1], [0], [0], [1], [0, 0, 1, 1], [], []>} : vector<256x32xbf16>, vector<32x64xbf16>, vector<256x64xf32> -> vector<256x64xf32>
      %219 = arith.addf %209, %218 : vector<256x64xf32>
      %c23_152 = arith.constant 23 : index
      %c0_153 = arith.constant 0 : index
      %220 = vector.load %arg18[%c23_152, %c0_153] : memref<304x32xf32, #tpu.memory_space<vmem>>, vector<256x32xf32>
      %cst_154 = arith.constant 0.000000e+00 : f32
      %221 = vector.shape_cast %190 : vector<256x1xi1> to vector<256x1xi1>
      %222 = vector.broadcast %221 : vector<256x1xi1> to vector<256x32xi1>
      %223 = vector.broadcast %cst_154 : f32 to vector<256x32xf32>
      %224 = arith.select %222, %220, %223 : vector<256x32xi1>, vector<256x32xf32>
      %225 = arith.truncf %224 : vector<256x32xf32> to vector<256x32xbf16>
      %c3_155 = arith.constant 3 : index
      %c0_156 = arith.constant 0 : index
      %c0_157 = arith.constant 0 : index
      %226 = vector.load %arg4[%c3_155, %c0_156, %c0_157] : memref<9x32x64xbf16, #tpu.memory_space<vmem>>, vector<1x32x64xbf16>
      %227 = vector.shape_cast %226 : vector<1x32x64xbf16> to vector<32x64xbf16>
      %cst_158 = arith.constant dense<0.000000e+00> : vector<256x64xf32>
      %228 = tpu.matmul %225, %227, %cst_158 {dimension_numbers = #tpu.dot_dimension_numbers<[1], [0], [0], [1], [0, 0, 1, 1], [], []>} : vector<256x32xbf16>, vector<32x64xbf16>, vector<256x64xf32> -> vector<256x64xf32>
      %229 = arith.addf %219, %228 : vector<256x64xf32>
      %c24_159 = arith.constant 24 : index
      %c0_160 = arith.constant 0 : index
      %230 = vector.load %arg18[%c24_159, %c0_160] : memref<304x32xf32, #tpu.memory_space<vmem>>, vector<256x32xf32>
      %231 = arith.truncf %230 : vector<256x32xf32> to vector<256x32xbf16>
      %c4_161 = arith.constant 4 : index
      %c0_162 = arith.constant 0 : index
      %c0_163 = arith.constant 0 : index
      %232 = vector.load %arg4[%c4_161, %c0_162, %c0_163] : memref<9x32x64xbf16, #tpu.memory_space<vmem>>, vector<1x32x64xbf16>
      %233 = vector.shape_cast %232 : vector<1x32x64xbf16> to vector<32x64xbf16>
      %cst_164 = arith.constant dense<0.000000e+00> : vector<256x64xf32>
      %234 = tpu.matmul %231, %233, %cst_164 {dimension_numbers = #tpu.dot_dimension_numbers<[1], [0], [0], [1], [0, 0, 1, 1], [], []>} : vector<256x32xbf16>, vector<32x64xbf16>, vector<256x64xf32> -> vector<256x64xf32>
      %235 = arith.addf %229, %234 : vector<256x64xf32>
      %c25_165 = arith.constant 25 : index
      %c0_166 = arith.constant 0 : index
      %236 = vector.load %arg18[%c25_165, %c0_166] : memref<304x32xf32, #tpu.memory_space<vmem>>, vector<256x32xf32>
      %cst_167 = arith.constant 0.000000e+00 : f32
      %237 = vector.shape_cast %192 : vector<256x1xi1> to vector<256x1xi1>
      %238 = vector.broadcast %237 : vector<256x1xi1> to vector<256x32xi1>
      %239 = vector.broadcast %cst_167 : f32 to vector<256x32xf32>
      %240 = arith.select %238, %236, %239 : vector<256x32xi1>, vector<256x32xf32>
      %241 = arith.truncf %240 : vector<256x32xf32> to vector<256x32xbf16>
      %c5_168 = arith.constant 5 : index
      %c0_169 = arith.constant 0 : index
      %c0_170 = arith.constant 0 : index
      %242 = vector.load %arg4[%c5_168, %c0_169, %c0_170] : memref<9x32x64xbf16, #tpu.memory_space<vmem>>, vector<1x32x64xbf16>
      %243 = vector.shape_cast %242 : vector<1x32x64xbf16> to vector<32x64xbf16>
      %cst_171 = arith.constant dense<0.000000e+00> : vector<256x64xf32>
      %244 = tpu.matmul %241, %243, %cst_171 {dimension_numbers = #tpu.dot_dimension_numbers<[1], [0], [0], [1], [0, 0, 1, 1], [], []>} : vector<256x32xbf16>, vector<32x64xbf16>, vector<256x64xf32> -> vector<256x64xf32>
      %245 = arith.addf %235, %244 : vector<256x64xf32>
      %c39_172 = arith.constant 39 : index
      %c0_173 = arith.constant 0 : index
      %246 = vector.load %arg18[%c39_172, %c0_173] : memref<304x32xf32, #tpu.memory_space<vmem>>, vector<256x32xf32>
      %cst_174 = arith.constant 0.000000e+00 : f32
      %247 = vector.shape_cast %190 : vector<256x1xi1> to vector<256x1xi1>
      %248 = vector.broadcast %247 : vector<256x1xi1> to vector<256x32xi1>
      %249 = vector.broadcast %cst_174 : f32 to vector<256x32xf32>
      %250 = arith.select %248, %246, %249 : vector<256x32xi1>, vector<256x32xf32>
      %251 = arith.truncf %250 : vector<256x32xf32> to vector<256x32xbf16>
      %c6_175 = arith.constant 6 : index
      %c0_176 = arith.constant 0 : index
      %c0_177 = arith.constant 0 : index
      %252 = vector.load %arg4[%c6_175, %c0_176, %c0_177] : memref<9x32x64xbf16, #tpu.memory_space<vmem>>, vector<1x32x64xbf16>
      %253 = vector.shape_cast %252 : vector<1x32x64xbf16> to vector<32x64xbf16>
      %cst_178 = arith.constant dense<0.000000e+00> : vector<256x64xf32>
      %254 = tpu.matmul %251, %253, %cst_178 {dimension_numbers = #tpu.dot_dimension_numbers<[1], [0], [0], [1], [0, 0, 1, 1], [], []>} : vector<256x32xbf16>, vector<32x64xbf16>, vector<256x64xf32> -> vector<256x64xf32>
      %255 = arith.addf %245, %254 : vector<256x64xf32>
      %c40_179 = arith.constant 40 : index
      %c0_180 = arith.constant 0 : index
      %256 = vector.load %arg18[%c40_179, %c0_180] : memref<304x32xf32, #tpu.memory_space<vmem>>, vector<256x32xf32>
      %257 = arith.truncf %256 : vector<256x32xf32> to vector<256x32xbf16>
      %c7_181 = arith.constant 7 : index
      %c0_182 = arith.constant 0 : index
      %c0_183 = arith.constant 0 : index
      %258 = vector.load %arg4[%c7_181, %c0_182, %c0_183] : memref<9x32x64xbf16, #tpu.memory_space<vmem>>, vector<1x32x64xbf16>
      %259 = vector.shape_cast %258 : vector<1x32x64xbf16> to vector<32x64xbf16>
      %cst_184 = arith.constant dense<0.000000e+00> : vector<256x64xf32>
      %260 = tpu.matmul %257, %259, %cst_184 {dimension_numbers = #tpu.dot_dimension_numbers<[1], [0], [0], [1], [0, 0, 1, 1], [], []>} : vector<256x32xbf16>, vector<32x64xbf16>, vector<256x64xf32> -> vector<256x64xf32>
      %261 = arith.addf %255, %260 : vector<256x64xf32>
      %c41_185 = arith.constant 41 : index
      %c0_186 = arith.constant 0 : index
      %262 = vector.load %arg18[%c41_185, %c0_186] : memref<304x32xf32, #tpu.memory_space<vmem>>, vector<256x32xf32>
      %cst_187 = arith.constant 0.000000e+00 : f32
      %263 = vector.shape_cast %192 : vector<256x1xi1> to vector<256x1xi1>
      %264 = vector.broadcast %263 : vector<256x1xi1> to vector<256x32xi1>
      %265 = vector.broadcast %cst_187 : f32 to vector<256x32xf32>
      %266 = arith.select %264, %262, %265 : vector<256x32xi1>, vector<256x32xf32>
      %267 = arith.truncf %266 : vector<256x32xf32> to vector<256x32xbf16>
      %c8_188 = arith.constant 8 : index
      %c0_189 = arith.constant 0 : index
      %c0_190 = arith.constant 0 : index
      %268 = vector.load %arg4[%c8_188, %c0_189, %c0_190] : memref<9x32x64xbf16, #tpu.memory_space<vmem>>, vector<1x32x64xbf16>
      %269 = vector.shape_cast %268 : vector<1x32x64xbf16> to vector<32x64xbf16>
      %cst_191 = arith.constant dense<0.000000e+00> : vector<256x64xf32>
      %270 = tpu.matmul %267, %269, %cst_191 {dimension_numbers = #tpu.dot_dimension_numbers<[1], [0], [0], [1], [0, 0, 1, 1], [], []>} : vector<256x32xbf16>, vector<32x64xbf16>, vector<256x64xf32> -> vector<256x64xf32>
      %271 = arith.addf %261, %270 : vector<256x64xf32>
      %c0_192 = arith.constant 0 : index
      %c0_193 = arith.constant 0 : index
      %272 = vector.load %arg5[%c0_192, %c0_193] : memref<1x64xf32, #tpu.memory_space<vmem>>, vector<1x64xf32>
      %273 = vector.broadcast %272 : vector<1x64xf32> to vector<256x64xf32>
      %274 = arith.addf %271, %273 : vector<256x64xf32>
      %cst_194 = arith.constant 0.000000e+00 : f32
      %275 = vector.broadcast %cst_194 : f32 to vector<256x64xf32>
      %276 = arith.maximumf %274, %275 : vector<256x64xf32>
      %277 = vector.extract_strided_slice %276 {offsets = [0, 0], sizes = [16, 64], strides = [1, 1]} : vector<256x64xf32> to vector<16x64xf32>
      %278 = vector.extract_strided_slice %276 {offsets = [16, 0], sizes = [16, 64], strides = [1, 1]} : vector<256x64xf32> to vector<16x64xf32>
      %279 = arith.maximumf %277, %278 : vector<16x64xf32>
      %c0_195 = arith.constant 0 : index
      %c0_196 = arith.constant 0 : index
      %280 = vector.load %arg21[%c0_195, %c0_196] : memref<128x64xf32, #tpu.memory_space<vmem>>, vector<16x64xf32>
      tpu.vector_store %arg21[%c0_195, %c0_196], %279 {strides = array<i32>} : memref<128x64xf32, #tpu.memory_space<vmem>>, vector<16x64xf32>,
      %281 = vector.extract_strided_slice %276 {offsets = [32, 0], sizes = [16, 64], strides = [1, 1]} : vector<256x64xf32> to vector<16x64xf32>
      %282 = vector.extract_strided_slice %276 {offsets = [48, 0], sizes = [16, 64], strides = [1, 1]} : vector<256x64xf32> to vector<16x64xf32>
      %283 = arith.maximumf %281, %282 : vector<16x64xf32>
      %c16 = arith.constant 16 : index
      %c0_197 = arith.constant 0 : index
      %284 = vector.load %arg21[%c16, %c0_197] : memref<128x64xf32, #tpu.memory_space<vmem>>, vector<16x64xf32>
      tpu.vector_store %arg21[%c16, %c0_197], %283 {strides = array<i32>} : memref<128x64xf32, #tpu.memory_space<vmem>>, vector<16x64xf32>,
      %285 = vector.extract_strided_slice %276 {offsets = [64, 0], sizes = [16, 64], strides = [1, 1]} : vector<256x64xf32> to vector<16x64xf32>
      %286 = vector.extract_strided_slice %276 {offsets = [80, 0], sizes = [16, 64], strides = [1, 1]} : vector<256x64xf32> to vector<16x64xf32>
      %287 = arith.maximumf %285, %286 : vector<16x64xf32>
      %c32 = arith.constant 32 : index
      %c0_198 = arith.constant 0 : index
      %288 = vector.load %arg21[%c32, %c0_198] : memref<128x64xf32, #tpu.memory_space<vmem>>, vector<16x64xf32>
      tpu.vector_store %arg21[%c32, %c0_198], %287 {strides = array<i32>} : memref<128x64xf32, #tpu.memory_space<vmem>>, vector<16x64xf32>,
      %289 = vector.extract_strided_slice %276 {offsets = [96, 0], sizes = [16, 64], strides = [1, 1]} : vector<256x64xf32> to vector<16x64xf32>
      %290 = vector.extract_strided_slice %276 {offsets = [112, 0], sizes = [16, 64], strides = [1, 1]} : vector<256x64xf32> to vector<16x64xf32>
      %291 = arith.maximumf %289, %290 : vector<16x64xf32>
      %c48 = arith.constant 48 : index
      %c0_199 = arith.constant 0 : index
      %292 = vector.load %arg21[%c48, %c0_199] : memref<128x64xf32, #tpu.memory_space<vmem>>, vector<16x64xf32>
      tpu.vector_store %arg21[%c48, %c0_199], %291 {strides = array<i32>} : memref<128x64xf32, #tpu.memory_space<vmem>>, vector<16x64xf32>,
      %293 = vector.extract_strided_slice %276 {offsets = [128, 0], sizes = [16, 64], strides = [1, 1]} : vector<256x64xf32> to vector<16x64xf32>
      %294 = vector.extract_strided_slice %276 {offsets = [144, 0], sizes = [16, 64], strides = [1, 1]} : vector<256x64xf32> to vector<16x64xf32>
      %295 = arith.maximumf %293, %294 : vector<16x64xf32>
      %c64 = arith.constant 64 : index
      %c0_200 = arith.constant 0 : index
      %296 = vector.load %arg21[%c64, %c0_200] : memref<128x64xf32, #tpu.memory_space<vmem>>, vector<16x64xf32>
      tpu.vector_store %arg21[%c64, %c0_200], %295 {strides = array<i32>} : memref<128x64xf32, #tpu.memory_space<vmem>>, vector<16x64xf32>,
      %297 = vector.extract_strided_slice %276 {offsets = [160, 0], sizes = [16, 64], strides = [1, 1]} : vector<256x64xf32> to vector<16x64xf32>
      %298 = vector.extract_strided_slice %276 {offsets = [176, 0], sizes = [16, 64], strides = [1, 1]} : vector<256x64xf32> to vector<16x64xf32>
      %299 = arith.maximumf %297, %298 : vector<16x64xf32>
      %c80_201 = arith.constant 80 : index
      %c0_202 = arith.constant 0 : index
      %300 = vector.load %arg21[%c80_201, %c0_202] : memref<128x64xf32, #tpu.memory_space<vmem>>, vector<16x64xf32>
      tpu.vector_store %arg21[%c80_201, %c0_202], %299 {strides = array<i32>} : memref<128x64xf32, #tpu.memory_space<vmem>>, vector<16x64xf32>,
      %301 = vector.extract_strided_slice %276 {offsets = [192, 0], sizes = [16, 64], strides = [1, 1]} : vector<256x64xf32> to vector<16x64xf32>
      %302 = vector.extract_strided_slice %276 {offsets = [208, 0], sizes = [16, 64], strides = [1, 1]} : vector<256x64xf32> to vector<16x64xf32>
      %303 = arith.maximumf %301, %302 : vector<16x64xf32>
      %c96 = arith.constant 96 : index
      %c0_203 = arith.constant 0 : index
      %304 = vector.load %arg21[%c96, %c0_203] : memref<128x64xf32, #tpu.memory_space<vmem>>, vector<16x64xf32>
      tpu.vector_store %arg21[%c96, %c0_203], %303 {strides = array<i32>} : memref<128x64xf32, #tpu.memory_space<vmem>>, vector<16x64xf32>,
      %305 = vector.extract_strided_slice %276 {offsets = [224, 0], sizes = [16, 64], strides = [1, 1]} : vector<256x64xf32> to vector<16x64xf32>
      %306 = vector.extract_strided_slice %276 {offsets = [240, 0], sizes = [16, 64], strides = [1, 1]} : vector<256x64xf32> to vector<16x64xf32>
      %307 = arith.maximumf %305, %306 : vector<16x64xf32>
      %c112 = arith.constant 112 : index
      %c0_204 = arith.constant 0 : index
      %308 = vector.load %arg21[%c112, %c0_204] : memref<128x64xf32, #tpu.memory_space<vmem>>, vector<16x64xf32>
      tpu.vector_store %arg21[%c112, %c0_204], %307 {strides = array<i32>} : memref<128x64xf32, #tpu.memory_space<vmem>>, vector<16x64xf32>,
      %c0_205 = arith.constant 0 : index
      %c0_206 = arith.constant 0 : index
      %309 = tpu.strided_load %arg21[%c0_205, %c0_206] {strides = array<i32: 2, 1>} : memref<128x64xf32, #tpu.memory_space<vmem>>, vector<64x64xf32>
      %c1_207 = arith.constant 1 : index
      %c0_208 = arith.constant 0 : index
      %310 = tpu.strided_load %arg21[%c1_207, %c0_208] {strides = array<i32: 2, 1>} : memref<128x64xf32, #tpu.memory_space<vmem>>, vector<64x64xf32>
      %311 = arith.maximumf %309, %310 : vector<64x64xf32>
      %c16_209 = arith.constant 16 : index
      %c0_210 = arith.constant 0 : index
      %312 = vector.load %arg19[%c16_209, %c0_210] : memref<96x64xf32, #tpu.memory_space<vmem>>, vector<64x64xf32>
      tpu.vector_store %arg19[%c16_209, %c0_210], %311 {strides = array<i32>} : memref<96x64xf32, #tpu.memory_space<vmem>>, vector<64x64xf32>,
      %313 = tpu.iota {dimensions = array<i32: 0>} : vector<64x1xi32>
      %c8_i32 = arith.constant 8 : i32
      %c0_i32_211 = arith.constant 0 : i32
      %314 = arith.cmpi eq, %c8_i32, %c0_i32_211 : i32
      %c1_i32_212 = arith.constant 1 : i32
      %315 = arith.select %314, %c1_i32_212, %c8_i32 : i32
      %316 = vector.broadcast %315 : i32 to vector<64x1xi32>
      %317 = arith.remsi %313, %316 : vector<64x1xi32>
      %c0_i32_213 = arith.constant 0 : i32
      %318 = vector.broadcast %c0_i32_213 : i32 to vector<64x1xi32>
      %319 = arith.cmpi ne, %317, %318 : vector<64x1xi32>
      %c0_i32_214 = arith.constant 0 : i32
      %320 = vector.broadcast %c0_i32_214 : i32 to vector<64x1xi32>
      %321 = arith.cmpi slt, %317, %320 : vector<64x1xi32>
      %c0_i32_215 = arith.constant 0 : i32
      %322 = arith.cmpi slt, %315, %c0_i32_215 : i32
      %323 = vector.broadcast %322 : i1 to vector<64x1xi1>
      %324 = vector.broadcast %323 : vector<64x1xi1> to vector<64x1xi1>
      %325 = arith.xori %321, %324 : vector<64x1xi1>
      %326 = arith.andi %325, %319 : vector<64x1xi1>
      %327 = vector.broadcast %315 : i32 to vector<64x1xi32>
      %328 = arith.addi %317, %327 : vector<64x1xi32>
      %329 = arith.select %326, %328, %317 : vector<64x1xi1>, vector<64x1xi32>
      %c1_i32_216 = arith.constant 1 : i32
      %330 = vector.broadcast %c1_i32_216 : i32 to vector<64x1xi32>
      %331 = arith.cmpi sge, %329, %330 : vector<64x1xi32>
      %c6_i32 = arith.constant 6 : i32
      %332 = vector.broadcast %c6_i32 : i32 to vector<64x1xi32>
      %333 = arith.cmpi sle, %329, %332 : vector<64x1xi32>
      %cst_217 = arith.constant 0.000000e+00 : f32
      %334 = vector.broadcast %cst_217 : f32 to vector<64x64xf32>
      %c7_218 = arith.constant 7 : index
      %c0_219 = arith.constant 0 : index
      %335 = vector.load %arg19[%c7_218, %c0_219] : memref<96x64xf32, #tpu.memory_space<vmem>>, vector<64x64xf32>
      %cst_220 = arith.constant 0.000000e+00 : f32
      %336 = vector.shape_cast %331 : vector<64x1xi1> to vector<64x1xi1>
      %337 = vector.broadcast %336 : vector<64x1xi1> to vector<64x64xi1>
      %338 = vector.broadcast %cst_220 : f32 to vector<64x64xf32>
      %339 = arith.select %337, %335, %338 : vector<64x64xi1>, vector<64x64xf32>
      %340 = arith.truncf %339 : vector<64x64xf32> to vector<64x64xbf16>
      %c0_221 = arith.constant 0 : index
      %c0_222 = arith.constant 0 : index
      %c0_223 = arith.constant 0 : index
      %341 = vector.load %arg6[%c0_221, %c0_222, %c0_223] : memref<9x64x64xbf16, #tpu.memory_space<vmem>>, vector<1x64x64xbf16>
      %342 = vector.shape_cast %341 : vector<1x64x64xbf16> to vector<64x64xbf16>
      %cst_224 = arith.constant dense<0.000000e+00> : vector<64x64xf32>
      %343 = tpu.matmul %340, %342, %cst_224 {dimension_numbers = #tpu.dot_dimension_numbers<[1], [0], [0], [1], [0, 0, 1, 1], [], []>} : vector<64x64xbf16>, vector<64x64xbf16>, vector<64x64xf32> -> vector<64x64xf32>
      %344 = arith.addf %334, %343 : vector<64x64xf32>
      %c8_225 = arith.constant 8 : index
      %c0_226 = arith.constant 0 : index
      %345 = vector.load %arg19[%c8_225, %c0_226] : memref<96x64xf32, #tpu.memory_space<vmem>>, vector<64x64xf32>
      %346 = arith.truncf %345 : vector<64x64xf32> to vector<64x64xbf16>
      %c1_227 = arith.constant 1 : index
      %c0_228 = arith.constant 0 : index
      %c0_229 = arith.constant 0 : index
      %347 = vector.load %arg6[%c1_227, %c0_228, %c0_229] : memref<9x64x64xbf16, #tpu.memory_space<vmem>>, vector<1x64x64xbf16>
      %348 = vector.shape_cast %347 : vector<1x64x64xbf16> to vector<64x64xbf16>
      %cst_230 = arith.constant dense<0.000000e+00> : vector<64x64xf32>
      %349 = tpu.matmul %346, %348, %cst_230 {dimension_numbers = #tpu.dot_dimension_numbers<[1], [0], [0], [1], [0, 0, 1, 1], [], []>} : vector<64x64xbf16>, vector<64x64xbf16>, vector<64x64xf32> -> vector<64x64xf32>
      %350 = arith.addf %344, %349 : vector<64x64xf32>
      %c9_231 = arith.constant 9 : index
      %c0_232 = arith.constant 0 : index
      %351 = vector.load %arg19[%c9_231, %c0_232] : memref<96x64xf32, #tpu.memory_space<vmem>>, vector<64x64xf32>
      %cst_233 = arith.constant 0.000000e+00 : f32
      %352 = vector.shape_cast %333 : vector<64x1xi1> to vector<64x1xi1>
      %353 = vector.broadcast %352 : vector<64x1xi1> to vector<64x64xi1>
      %354 = vector.broadcast %cst_233 : f32 to vector<64x64xf32>
      %355 = arith.select %353, %351, %354 : vector<64x64xi1>, vector<64x64xf32>
      %356 = arith.truncf %355 : vector<64x64xf32> to vector<64x64xbf16>
      %c2_234 = arith.constant 2 : index
      %c0_235 = arith.constant 0 : index
      %c0_236 = arith.constant 0 : index
      %357 = vector.load %arg6[%c2_234, %c0_235, %c0_236] : memref<9x64x64xbf16, #tpu.memory_space<vmem>>, vector<1x64x64xbf16>
      %358 = vector.shape_cast %357 : vector<1x64x64xbf16> to vector<64x64xbf16>
      %cst_237 = arith.constant dense<0.000000e+00> : vector<64x64xf32>
      %359 = tpu.matmul %356, %358, %cst_237 {dimension_numbers = #tpu.dot_dimension_numbers<[1], [0], [0], [1], [0, 0, 1, 1], [], []>} : vector<64x64xbf16>, vector<64x64xbf16>, vector<64x64xf32> -> vector<64x64xf32>
      %360 = arith.addf %350, %359 : vector<64x64xf32>
      %c15 = arith.constant 15 : index
      %c0_238 = arith.constant 0 : index
      %361 = vector.load %arg19[%c15, %c0_238] : memref<96x64xf32, #tpu.memory_space<vmem>>, vector<64x64xf32>
      %cst_239 = arith.constant 0.000000e+00 : f32
      %362 = vector.shape_cast %331 : vector<64x1xi1> to vector<64x1xi1>
      %363 = vector.broadcast %362 : vector<64x1xi1> to vector<64x64xi1>
      %364 = vector.broadcast %cst_239 : f32 to vector<64x64xf32>
      %365 = arith.select %363, %361, %364 : vector<64x64xi1>, vector<64x64xf32>
      %366 = arith.truncf %365 : vector<64x64xf32> to vector<64x64xbf16>
      %c3_240 = arith.constant 3 : index
      %c0_241 = arith.constant 0 : index
      %c0_242 = arith.constant 0 : index
      %367 = vector.load %arg6[%c3_240, %c0_241, %c0_242] : memref<9x64x64xbf16, #tpu.memory_space<vmem>>, vector<1x64x64xbf16>
      %368 = vector.shape_cast %367 : vector<1x64x64xbf16> to vector<64x64xbf16>
      %cst_243 = arith.constant dense<0.000000e+00> : vector<64x64xf32>
      %369 = tpu.matmul %366, %368, %cst_243 {dimension_numbers = #tpu.dot_dimension_numbers<[1], [0], [0], [1], [0, 0, 1, 1], [], []>} : vector<64x64xbf16>, vector<64x64xbf16>, vector<64x64xf32> -> vector<64x64xf32>
      %370 = arith.addf %360, %369 : vector<64x64xf32>
      %c16_244 = arith.constant 16 : index
      %c0_245 = arith.constant 0 : index
      %371 = vector.load %arg19[%c16_244, %c0_245] : memref<96x64xf32, #tpu.memory_space<vmem>>, vector<64x64xf32>
      %372 = arith.truncf %371 : vector<64x64xf32> to vector<64x64xbf16>
      %c4_246 = arith.constant 4 : index
      %c0_247 = arith.constant 0 : index
      %c0_248 = arith.constant 0 : index
      %373 = vector.load %arg6[%c4_246, %c0_247, %c0_248] : memref<9x64x64xbf16, #tpu.memory_space<vmem>>, vector<1x64x64xbf16>
      %374 = vector.shape_cast %373 : vector<1x64x64xbf16> to vector<64x64xbf16>
      %cst_249 = arith.constant dense<0.000000e+00> : vector<64x64xf32>
      %375 = tpu.matmul %372, %374, %cst_249 {dimension_numbers = #tpu.dot_dimension_numbers<[1], [0], [0], [1], [0, 0, 1, 1], [], []>} : vector<64x64xbf16>, vector<64x64xbf16>, vector<64x64xf32> -> vector<64x64xf32>
      %376 = arith.addf %370, %375 : vector<64x64xf32>
      %c17 = arith.constant 17 : index
      %c0_250 = arith.constant 0 : index
      %377 = vector.load %arg19[%c17, %c0_250] : memref<96x64xf32, #tpu.memory_space<vmem>>, vector<64x64xf32>
      %cst_251 = arith.constant 0.000000e+00 : f32
      %378 = vector.shape_cast %333 : vector<64x1xi1> to vector<64x1xi1>
      %379 = vector.broadcast %378 : vector<64x1xi1> to vector<64x64xi1>
      %380 = vector.broadcast %cst_251 : f32 to vector<64x64xf32>
      %381 = arith.select %379, %377, %380 : vector<64x64xi1>, vector<64x64xf32>
      %382 = arith.truncf %381 : vector<64x64xf32> to vector<64x64xbf16>
      %c5_252 = arith.constant 5 : index
      %c0_253 = arith.constant 0 : index
      %c0_254 = arith.constant 0 : index
      %383 = vector.load %arg6[%c5_252, %c0_253, %c0_254] : memref<9x64x64xbf16, #tpu.memory_space<vmem>>, vector<1x64x64xbf16>
      %384 = vector.shape_cast %383 : vector<1x64x64xbf16> to vector<64x64xbf16>
      %cst_255 = arith.constant dense<0.000000e+00> : vector<64x64xf32>
      %385 = tpu.matmul %382, %384, %cst_255 {dimension_numbers = #tpu.dot_dimension_numbers<[1], [0], [0], [1], [0, 0, 1, 1], [], []>} : vector<64x64xbf16>, vector<64x64xbf16>, vector<64x64xf32> -> vector<64x64xf32>
      %386 = arith.addf %376, %385 : vector<64x64xf32>
      %c23_256 = arith.constant 23 : index
      %c0_257 = arith.constant 0 : index
      %387 = vector.load %arg19[%c23_256, %c0_257] : memref<96x64xf32, #tpu.memory_space<vmem>>, vector<64x64xf32>
      %cst_258 = arith.constant 0.000000e+00 : f32
      %388 = vector.shape_cast %331 : vector<64x1xi1> to vector<64x1xi1>
      %389 = vector.broadcast %388 : vector<64x1xi1> to vector<64x64xi1>
      %390 = vector.broadcast %cst_258 : f32 to vector<64x64xf32>
      %391 = arith.select %389, %387, %390 : vector<64x64xi1>, vector<64x64xf32>
      %392 = arith.truncf %391 : vector<64x64xf32> to vector<64x64xbf16>
      %c6_259 = arith.constant 6 : index
      %c0_260 = arith.constant 0 : index
      %c0_261 = arith.constant 0 : index
      %393 = vector.load %arg6[%c6_259, %c0_260, %c0_261] : memref<9x64x64xbf16, #tpu.memory_space<vmem>>, vector<1x64x64xbf16>
      %394 = vector.shape_cast %393 : vector<1x64x64xbf16> to vector<64x64xbf16>
      %cst_262 = arith.constant dense<0.000000e+00> : vector<64x64xf32>
      %395 = tpu.matmul %392, %394, %cst_262 {dimension_numbers = #tpu.dot_dimension_numbers<[1], [0], [0], [1], [0, 0, 1, 1], [], []>} : vector<64x64xbf16>, vector<64x64xbf16>, vector<64x64xf32> -> vector<64x64xf32>
      %396 = arith.addf %386, %395 : vector<64x64xf32>
      %c24_263 = arith.constant 24 : index
      %c0_264 = arith.constant 0 : index
      %397 = vector.load %arg19[%c24_263, %c0_264] : memref<96x64xf32, #tpu.memory_space<vmem>>, vector<64x64xf32>
      %398 = arith.truncf %397 : vector<64x64xf32> to vector<64x64xbf16>
      %c7_265 = arith.constant 7 : index
      %c0_266 = arith.constant 0 : index
      %c0_267 = arith.constant 0 : index
      %399 = vector.load %arg6[%c7_265, %c0_266, %c0_267] : memref<9x64x64xbf16, #tpu.memory_space<vmem>>, vector<1x64x64xbf16>
      %400 = vector.shape_cast %399 : vector<1x64x64xbf16> to vector<64x64xbf16>
      %cst_268 = arith.constant dense<0.000000e+00> : vector<64x64xf32>
      %401 = tpu.matmul %398, %400, %cst_268 {dimension_numbers = #tpu.dot_dimension_numbers<[1], [0], [0], [1], [0, 0, 1, 1], [], []>} : vector<64x64xbf16>, vector<64x64xbf16>, vector<64x64xf32> -> vector<64x64xf32>
      %402 = arith.addf %396, %401 : vector<64x64xf32>
      %c25_269 = arith.constant 25 : index
      %c0_270 = arith.constant 0 : index
      %403 = vector.load %arg19[%c25_269, %c0_270] : memref<96x64xf32, #tpu.memory_space<vmem>>, vector<64x64xf32>
      %cst_271 = arith.constant 0.000000e+00 : f32
      %404 = vector.shape_cast %333 : vector<64x1xi1> to vector<64x1xi1>
      %405 = vector.broadcast %404 : vector<64x1xi1> to vector<64x64xi1>
      %406 = vector.broadcast %cst_271 : f32 to vector<64x64xf32>
      %407 = arith.select %405, %403, %406 : vector<64x64xi1>, vector<64x64xf32>
      %408 = arith.truncf %407 : vector<64x64xf32> to vector<64x64xbf16>
      %c8_272 = arith.constant 8 : index
      %c0_273 = arith.constant 0 : index
      %c0_274 = arith.constant 0 : index
      %409 = vector.load %arg6[%c8_272, %c0_273, %c0_274] : memref<9x64x64xbf16, #tpu.memory_space<vmem>>, vector<1x64x64xbf16>
      %410 = vector.shape_cast %409 : vector<1x64x64xbf16> to vector<64x64xbf16>
      %cst_275 = arith.constant dense<0.000000e+00> : vector<64x64xf32>
      %411 = tpu.matmul %408, %410, %cst_275 {dimension_numbers = #tpu.dot_dimension_numbers<[1], [0], [0], [1], [0, 0, 1, 1], [], []>} : vector<64x64xbf16>, vector<64x64xbf16>, vector<64x64xf32> -> vector<64x64xf32>
      %412 = arith.addf %402, %411 : vector<64x64xf32>
      %c0_276 = arith.constant 0 : index
      %c0_277 = arith.constant 0 : index
      %413 = vector.load %arg7[%c0_276, %c0_277] : memref<1x64xf32, #tpu.memory_space<vmem>>, vector<1x64xf32>
      %414 = vector.broadcast %413 : vector<1x64xf32> to vector<64x64xf32>
      %415 = arith.addf %412, %414 : vector<64x64xf32>
      %cst_278 = arith.constant 0.000000e+00 : f32
      %416 = vector.broadcast %cst_278 : f32 to vector<64x64xf32>
      %417 = arith.maximumf %415, %416 : vector<64x64xf32>
      %418 = vector.extract_strided_slice %417 {offsets = [0, 0], sizes = [8, 64], strides = [1, 1]} : vector<64x64xf32> to vector<8x64xf32>
      %419 = vector.extract_strided_slice %417 {offsets = [8, 0], sizes = [8, 64], strides = [1, 1]} : vector<64x64xf32> to vector<8x64xf32>
      %420 = arith.maximumf %418, %419 : vector<8x64xf32>
      %c0_279 = arith.constant 0 : index
      %c0_280 = arith.constant 0 : index
      %421 = vector.load %arg22[%c0_279, %c0_280] : memref<32x64xf32, #tpu.memory_space<vmem>>, vector<8x64xf32>
      tpu.vector_store %arg22[%c0_279, %c0_280], %420 {strides = array<i32>} : memref<32x64xf32, #tpu.memory_space<vmem>>, vector<8x64xf32>,
      %422 = vector.extract_strided_slice %417 {offsets = [16, 0], sizes = [8, 64], strides = [1, 1]} : vector<64x64xf32> to vector<8x64xf32>
      %423 = vector.extract_strided_slice %417 {offsets = [24, 0], sizes = [8, 64], strides = [1, 1]} : vector<64x64xf32> to vector<8x64xf32>
      %424 = arith.maximumf %422, %423 : vector<8x64xf32>
      %c8_281 = arith.constant 8 : index
      %c0_282 = arith.constant 0 : index
      %425 = vector.load %arg22[%c8_281, %c0_282] : memref<32x64xf32, #tpu.memory_space<vmem>>, vector<8x64xf32>
      tpu.vector_store %arg22[%c8_281, %c0_282], %424 {strides = array<i32>} : memref<32x64xf32, #tpu.memory_space<vmem>>, vector<8x64xf32>,
      %426 = vector.extract_strided_slice %417 {offsets = [32, 0], sizes = [8, 64], strides = [1, 1]} : vector<64x64xf32> to vector<8x64xf32>
      %427 = vector.extract_strided_slice %417 {offsets = [40, 0], sizes = [8, 64], strides = [1, 1]} : vector<64x64xf32> to vector<8x64xf32>
      %428 = arith.maximumf %426, %427 : vector<8x64xf32>
      %c16_283 = arith.constant 16 : index
      %c0_284 = arith.constant 0 : index
      %429 = vector.load %arg22[%c16_283, %c0_284] : memref<32x64xf32, #tpu.memory_space<vmem>>, vector<8x64xf32>
      tpu.vector_store %arg22[%c16_283, %c0_284], %428 {strides = array<i32>} : memref<32x64xf32, #tpu.memory_space<vmem>>, vector<8x64xf32>,
      %430 = vector.extract_strided_slice %417 {offsets = [48, 0], sizes = [8, 64], strides = [1, 1]} : vector<64x64xf32> to vector<8x64xf32>
      %431 = vector.extract_strided_slice %417 {offsets = [56, 0], sizes = [8, 64], strides = [1, 1]} : vector<64x64xf32> to vector<8x64xf32>
      %432 = arith.maximumf %430, %431 : vector<8x64xf32>
      %c24_285 = arith.constant 24 : index
      %c0_286 = arith.constant 0 : index
      %433 = vector.load %arg22[%c24_285, %c0_286] : memref<32x64xf32, #tpu.memory_space<vmem>>, vector<8x64xf32>
      tpu.vector_store %arg22[%c24_285, %c0_286], %432 {strides = array<i32>} : memref<32x64xf32, #tpu.memory_space<vmem>>, vector<8x64xf32>,
      %c0_287 = arith.constant 0 : index
      %c0_288 = arith.constant 0 : index
      %434 = tpu.strided_load %arg22[%c0_287, %c0_288] {strides = array<i32: 2, 1>} : memref<32x64xf32, #tpu.memory_space<vmem>>, vector<16x64xf32>
      %c1_289 = arith.constant 1 : index
      %c0_290 = arith.constant 0 : index
      %435 = tpu.strided_load %arg22[%c1_289, %c0_290] {strides = array<i32: 2, 1>} : memref<32x64xf32, #tpu.memory_space<vmem>>, vector<16x64xf32>
      %436 = arith.maximumf %434, %435 : vector<16x64xf32>
      %c8_291 = arith.constant 8 : index
      %c0_292 = arith.constant 0 : index
      %437 = vector.load %arg20[%c8_291, %c0_292] : memref<32x64xf32, #tpu.memory_space<vmem>>, vector<16x64xf32>
      tpu.vector_store %arg20[%c8_291, %c0_292], %436 {strides = array<i32>} : memref<32x64xf32, #tpu.memory_space<vmem>>, vector<16x64xf32>,
      %438 = tpu.iota {dimensions = array<i32: 0>} : vector<16x1xi32>
      %c4_i32 = arith.constant 4 : i32
      %c0_i32_293 = arith.constant 0 : i32
      %439 = arith.cmpi eq, %c4_i32, %c0_i32_293 : i32
      %c1_i32_294 = arith.constant 1 : i32
      %440 = arith.select %439, %c1_i32_294, %c4_i32 : i32
      %441 = vector.broadcast %440 : i32 to vector<16x1xi32>
      %442 = arith.remsi %438, %441 : vector<16x1xi32>
      %c0_i32_295 = arith.constant 0 : i32
      %443 = vector.broadcast %c0_i32_295 : i32 to vector<16x1xi32>
      %444 = arith.cmpi ne, %442, %443 : vector<16x1xi32>
      %c0_i32_296 = arith.constant 0 : i32
      %445 = vector.broadcast %c0_i32_296 : i32 to vector<16x1xi32>
      %446 = arith.cmpi slt, %442, %445 : vector<16x1xi32>
      %c0_i32_297 = arith.constant 0 : i32
      %447 = arith.cmpi slt, %440, %c0_i32_297 : i32
      %448 = vector.broadcast %447 : i1 to vector<16x1xi1>
      %449 = vector.broadcast %448 : vector<16x1xi1> to vector<16x1xi1>
      %450 = arith.xori %446, %449 : vector<16x1xi1>
      %451 = arith.andi %450, %444 : vector<16x1xi1>
      %452 = vector.broadcast %440 : i32 to vector<16x1xi32>
      %453 = arith.addi %442, %452 : vector<16x1xi32>
      %454 = arith.select %451, %453, %442 : vector<16x1xi1>, vector<16x1xi32>
      %c1_i32_298 = arith.constant 1 : i32
      %455 = vector.broadcast %c1_i32_298 : i32 to vector<16x1xi32>
      %456 = arith.cmpi sge, %454, %455 : vector<16x1xi32>
      %c2_i32_299 = arith.constant 2 : i32
      %457 = vector.broadcast %c2_i32_299 : i32 to vector<16x1xi32>
      %458 = arith.cmpi sle, %454, %457 : vector<16x1xi32>
      %cst_300 = arith.constant 0.000000e+00 : f32
      %459 = vector.broadcast %cst_300 : f32 to vector<16x32xf32>
      %c3_301 = arith.constant 3 : index
      %c0_302 = arith.constant 0 : index
      %460 = vector.load %arg20[%c3_301, %c0_302] : memref<32x64xf32, #tpu.memory_space<vmem>>, vector<16x64xf32>
      %cst_303 = arith.constant 0.000000e+00 : f32
      %461 = vector.shape_cast %456 : vector<16x1xi1> to vector<16x1xi1>
      %462 = vector.broadcast %461 : vector<16x1xi1> to vector<16x64xi1>
      %463 = vector.broadcast %cst_303 : f32 to vector<16x64xf32>
      %464 = arith.select %462, %460, %463 : vector<16x64xi1>, vector<16x64xf32>
      %465 = arith.truncf %464 : vector<16x64xf32> to vector<16x64xbf16>
      %c0_304 = arith.constant 0 : index
      %c0_305 = arith.constant 0 : index
      %c0_306 = arith.constant 0 : index
      %466 = vector.load %arg8[%c0_304, %c0_305, %c0_306] : memref<9x64x32xbf16, #tpu.memory_space<vmem>>, vector<1x64x32xbf16>
      %467 = vector.shape_cast %466 : vector<1x64x32xbf16> to vector<64x32xbf16>
      %cst_307 = arith.constant dense<0.000000e+00> : vector<16x32xf32>
      %468 = tpu.matmul %465, %467, %cst_307 {dimension_numbers = #tpu.dot_dimension_numbers<[1], [0], [0], [1], [0, 0, 1, 1], [], []>} : vector<16x64xbf16>, vector<64x32xbf16>, vector<16x32xf32> -> vector<16x32xf32>
      %469 = arith.addf %459, %468 : vector<16x32xf32>
      %c4_308 = arith.constant 4 : index
      %c0_309 = arith.constant 0 : index
      %470 = vector.load %arg20[%c4_308, %c0_309] : memref<32x64xf32, #tpu.memory_space<vmem>>, vector<16x64xf32>
      %471 = arith.truncf %470 : vector<16x64xf32> to vector<16x64xbf16>
      %c1_310 = arith.constant 1 : index
      %c0_311 = arith.constant 0 : index
      %c0_312 = arith.constant 0 : index
      %472 = vector.load %arg8[%c1_310, %c0_311, %c0_312] : memref<9x64x32xbf16, #tpu.memory_space<vmem>>, vector<1x64x32xbf16>
      %473 = vector.shape_cast %472 : vector<1x64x32xbf16> to vector<64x32xbf16>
      %cst_313 = arith.constant dense<0.000000e+00> : vector<16x32xf32>
      %474 = tpu.matmul %471, %473, %cst_313 {dimension_numbers = #tpu.dot_dimension_numbers<[1], [0], [0], [1], [0, 0, 1, 1], [], []>} : vector<16x64xbf16>, vector<64x32xbf16>, vector<16x32xf32> -> vector<16x32xf32>
      %475 = arith.addf %469, %474 : vector<16x32xf32>
      %c5_314 = arith.constant 5 : index
      %c0_315 = arith.constant 0 : index
      %476 = vector.load %arg20[%c5_314, %c0_315] : memref<32x64xf32, #tpu.memory_space<vmem>>, vector<16x64xf32>
      %cst_316 = arith.constant 0.000000e+00 : f32
      %477 = vector.shape_cast %458 : vector<16x1xi1> to vector<16x1xi1>
      %478 = vector.broadcast %477 : vector<16x1xi1> to vector<16x64xi1>
      %479 = vector.broadcast %cst_316 : f32 to vector<16x64xf32>
      %480 = arith.select %478, %476, %479 : vector<16x64xi1>, vector<16x64xf32>
      %481 = arith.truncf %480 : vector<16x64xf32> to vector<16x64xbf16>
      %c2_317 = arith.constant 2 : index
      %c0_318 = arith.constant 0 : index
      %c0_319 = arith.constant 0 : index
      %482 = vector.load %arg8[%c2_317, %c0_318, %c0_319] : memref<9x64x32xbf16, #tpu.memory_space<vmem>>, vector<1x64x32xbf16>
      %483 = vector.shape_cast %482 : vector<1x64x32xbf16> to vector<64x32xbf16>
      %cst_320 = arith.constant dense<0.000000e+00> : vector<16x32xf32>
      %484 = tpu.matmul %481, %483, %cst_320 {dimension_numbers = #tpu.dot_dimension_numbers<[1], [0], [0], [1], [0, 0, 1, 1], [], []>} : vector<16x64xbf16>, vector<64x32xbf16>, vector<16x32xf32> -> vector<16x32xf32>
      %485 = arith.addf %475, %484 : vector<16x32xf32>
      %c7_321 = arith.constant 7 : index
      %c0_322 = arith.constant 0 : index
      %486 = vector.load %arg20[%c7_321, %c0_322] : memref<32x64xf32, #tpu.memory_space<vmem>>, vector<16x64xf32>
      %cst_323 = arith.constant 0.000000e+00 : f32
      %487 = vector.shape_cast %456 : vector<16x1xi1> to vector<16x1xi1>
      %488 = vector.broadcast %487 : vector<16x1xi1> to vector<16x64xi1>
      %489 = vector.broadcast %cst_323 : f32 to vector<16x64xf32>
      %490 = arith.select %488, %486, %489 : vector<16x64xi1>, vector<16x64xf32>
      %491 = arith.truncf %490 : vector<16x64xf32> to vector<16x64xbf16>
      %c3_324 = arith.constant 3 : index
      %c0_325 = arith.constant 0 : index
      %c0_326 = arith.constant 0 : index
      %492 = vector.load %arg8[%c3_324, %c0_325, %c0_326] : memref<9x64x32xbf16, #tpu.memory_space<vmem>>, vector<1x64x32xbf16>
      %493 = vector.shape_cast %492 : vector<1x64x32xbf16> to vector<64x32xbf16>
      %cst_327 = arith.constant dense<0.000000e+00> : vector<16x32xf32>
      %494 = tpu.matmul %491, %493, %cst_327 {dimension_numbers = #tpu.dot_dimension_numbers<[1], [0], [0], [1], [0, 0, 1, 1], [], []>} : vector<16x64xbf16>, vector<64x32xbf16>, vector<16x32xf32> -> vector<16x32xf32>
      %495 = arith.addf %485, %494 : vector<16x32xf32>
      %c8_328 = arith.constant 8 : index
      %c0_329 = arith.constant 0 : index
      %496 = vector.load %arg20[%c8_328, %c0_329] : memref<32x64xf32, #tpu.memory_space<vmem>>, vector<16x64xf32>
      %497 = arith.truncf %496 : vector<16x64xf32> to vector<16x64xbf16>
      %c4_330 = arith.constant 4 : index
      %c0_331 = arith.constant 0 : index
      %c0_332 = arith.constant 0 : index
      %498 = vector.load %arg8[%c4_330, %c0_331, %c0_332] : memref<9x64x32xbf16, #tpu.memory_space<vmem>>, vector<1x64x32xbf16>
      %499 = vector.shape_cast %498 : vector<1x64x32xbf16> to vector<64x32xbf16>
      %cst_333 = arith.constant dense<0.000000e+00> : vector<16x32xf32>
      %500 = tpu.matmul %497, %499, %cst_333 {dimension_numbers = #tpu.dot_dimension_numbers<[1], [0], [0], [1], [0, 0, 1, 1], [], []>} : vector<16x64xbf16>, vector<64x32xbf16>, vector<16x32xf32> -> vector<16x32xf32>
      %501 = arith.addf %495, %500 : vector<16x32xf32>
      %c9_334 = arith.constant 9 : index
      %c0_335 = arith.constant 0 : index
      %502 = vector.load %arg20[%c9_334, %c0_335] : memref<32x64xf32, #tpu.memory_space<vmem>>, vector<16x64xf32>
      %cst_336 = arith.constant 0.000000e+00 : f32
      %503 = vector.shape_cast %458 : vector<16x1xi1> to vector<16x1xi1>
      %504 = vector.broadcast %503 : vector<16x1xi1> to vector<16x64xi1>
      %505 = vector.broadcast %cst_336 : f32 to vector<16x64xf32>
      %506 = arith.select %504, %502, %505 : vector<16x64xi1>, vector<16x64xf32>
      %507 = arith.truncf %506 : vector<16x64xf32> to vector<16x64xbf16>
      %c5_337 = arith.constant 5 : index
      %c0_338 = arith.constant 0 : index
      %c0_339 = arith.constant 0 : index
      %508 = vector.load %arg8[%c5_337, %c0_338, %c0_339] : memref<9x64x32xbf16, #tpu.memory_space<vmem>>, vector<1x64x32xbf16>
      %509 = vector.shape_cast %508 : vector<1x64x32xbf16> to vector<64x32xbf16>
      %cst_340 = arith.constant dense<0.000000e+00> : vector<16x32xf32>
      %510 = tpu.matmul %507, %509, %cst_340 {dimension_numbers = #tpu.dot_dimension_numbers<[1], [0], [0], [1], [0, 0, 1, 1], [], []>} : vector<16x64xbf16>, vector<64x32xbf16>, vector<16x32xf32> -> vector<16x32xf32>
      %511 = arith.addf %501, %510 : vector<16x32xf32>
      %c11 = arith.constant 11 : index
      %c0_341 = arith.constant 0 : index
      %512 = vector.load %arg20[%c11, %c0_341] : memref<32x64xf32, #tpu.memory_space<vmem>>, vector<16x64xf32>
      %cst_342 = arith.constant 0.000000e+00 : f32
      %513 = vector.shape_cast %456 : vector<16x1xi1> to vector<16x1xi1>
      %514 = vector.broadcast %513 : vector<16x1xi1> to vector<16x64xi1>
      %515 = vector.broadcast %cst_342 : f32 to vector<16x64xf32>
      %516 = arith.select %514, %512, %515 : vector<16x64xi1>, vector<16x64xf32>
      %517 = arith.truncf %516 : vector<16x64xf32> to vector<16x64xbf16>
      %c6_343 = arith.constant 6 : index
      %c0_344 = arith.constant 0 : index
      %c0_345 = arith.constant 0 : index
      %518 = vector.load %arg8[%c6_343, %c0_344, %c0_345] : memref<9x64x32xbf16, #tpu.memory_space<vmem>>, vector<1x64x32xbf16>
      %519 = vector.shape_cast %518 : vector<1x64x32xbf16> to vector<64x32xbf16>
      %cst_346 = arith.constant dense<0.000000e+00> : vector<16x32xf32>
      %520 = tpu.matmul %517, %519, %cst_346 {dimension_numbers = #tpu.dot_dimension_numbers<[1], [0], [0], [1], [0, 0, 1, 1], [], []>} : vector<16x64xbf16>, vector<64x32xbf16>, vector<16x32xf32> -> vector<16x32xf32>
      %521 = arith.addf %511, %520 : vector<16x32xf32>
      %c12 = arith.constant 12 : index
      %c0_347 = arith.constant 0 : index
      %522 = vector.load %arg20[%c12, %c0_347] : memref<32x64xf32, #tpu.memory_space<vmem>>, vector<16x64xf32>
      %523 = arith.truncf %522 : vector<16x64xf32> to vector<16x64xbf16>
      %c7_348 = arith.constant 7 : index
      %c0_349 = arith.constant 0 : index
      %c0_350 = arith.constant 0 : index
      %524 = vector.load %arg8[%c7_348, %c0_349, %c0_350] : memref<9x64x32xbf16, #tpu.memory_space<vmem>>, vector<1x64x32xbf16>
      %525 = vector.shape_cast %524 : vector<1x64x32xbf16> to vector<64x32xbf16>
      %cst_351 = arith.constant dense<0.000000e+00> : vector<16x32xf32>
      %526 = tpu.matmul %523, %525, %cst_351 {dimension_numbers = #tpu.dot_dimension_numbers<[1], [0], [0], [1], [0, 0, 1, 1], [], []>} : vector<16x64xbf16>, vector<64x32xbf16>, vector<16x32xf32> -> vector<16x32xf32>
      %527 = arith.addf %521, %526 : vector<16x32xf32>
      %c13 = arith.constant 13 : index
      %c0_352 = arith.constant 0 : index
      %528 = vector.load %arg20[%c13, %c0_352] : memref<32x64xf32, #tpu.memory_space<vmem>>, vector<16x64xf32>
      %cst_353 = arith.constant 0.000000e+00 : f32
      %529 = vector.shape_cast %458 : vector<16x1xi1> to vector<16x1xi1>
      %530 = vector.broadcast %529 : vector<16x1xi1> to vector<16x64xi1>
      %531 = vector.broadcast %cst_353 : f32 to vector<16x64xf32>
      %532 = arith.select %530, %528, %531 : vector<16x64xi1>, vector<16x64xf32>
      %533 = arith.truncf %532 : vector<16x64xf32> to vector<16x64xbf16>
      %c8_354 = arith.constant 8 : index
      %c0_355 = arith.constant 0 : index
      %c0_356 = arith.constant 0 : index
      %534 = vector.load %arg8[%c8_354, %c0_355, %c0_356] : memref<9x64x32xbf16, #tpu.memory_space<vmem>>, vector<1x64x32xbf16>
      %535 = vector.shape_cast %534 : vector<1x64x32xbf16> to vector<64x32xbf16>
      %cst_357 = arith.constant dense<0.000000e+00> : vector<16x32xf32>
      %536 = tpu.matmul %533, %535, %cst_357 {dimension_numbers = #tpu.dot_dimension_numbers<[1], [0], [0], [1], [0, 0, 1, 1], [], []>} : vector<16x64xbf16>, vector<64x32xbf16>, vector<16x32xf32> -> vector<16x32xf32>
      %537 = arith.addf %527, %536 : vector<16x32xf32>
      %c0_358 = arith.constant 0 : index
      %c0_359 = arith.constant 0 : index
      %538 = vector.load %arg9[%c0_358, %c0_359] : memref<1x32xf32, #tpu.memory_space<vmem>>, vector<1x32xf32>
      %539 = vector.broadcast %538 : vector<1x32xf32> to vector<16x32xf32>
      %540 = arith.addf %537, %539 : vector<16x32xf32>
      %cst_360 = arith.constant 0.000000e+00 : f32
      %541 = vector.broadcast %cst_360 : f32 to vector<16x32xf32>
      %542 = arith.maximumf %540, %541 : vector<16x32xf32>
      %c4_i32_361 = arith.constant 4 : i32
      %543 = arith.muli %arg25, %c4_i32_361 : i32
      %c0_i32_362 = arith.constant 0 : i32
      %544 = arith.addi %543, %c0_i32_362 : i32
      %545 = vector.extract_strided_slice %542 {offsets = [0, 0], sizes = [4, 32], strides = [1, 1]} : vector<16x32xf32> to vector<4x32xf32>
      %546 = vector.extract_strided_slice %542 {offsets = [4, 0], sizes = [4, 32], strides = [1, 1]} : vector<16x32xf32> to vector<4x32xf32>
      %547 = arith.maximumf %545, %546 : vector<4x32xf32>
      %c0_363 = arith.constant 0 : index
      %c0_364 = arith.constant 0 : index
      %548 = vector.load %arg23[%c0_363, %c0_364] : memref<8x32xf32, #tpu.memory_space<vmem>>, vector<4x32xf32>
      tpu.vector_store %arg23[%c0_363, %c0_364], %547 {strides = array<i32>} : memref<8x32xf32, #tpu.memory_space<vmem>>, vector<4x32xf32>,
      %549 = vector.extract_strided_slice %542 {offsets = [8, 0], sizes = [4, 32], strides = [1, 1]} : vector<16x32xf32> to vector<4x32xf32>
      %550 = vector.extract_strided_slice %542 {offsets = [12, 0], sizes = [4, 32], strides = [1, 1]} : vector<16x32xf32> to vector<4x32xf32>
      %551 = arith.maximumf %549, %550 : vector<4x32xf32>
      %c4_365 = arith.constant 4 : index
      %c0_366 = arith.constant 0 : index
      %552 = vector.load %arg23[%c4_365, %c0_366] : memref<8x32xf32, #tpu.memory_space<vmem>>, vector<4x32xf32>
      tpu.vector_store %arg23[%c4_365, %c0_366], %551 {strides = array<i32>} : memref<8x32xf32, #tpu.memory_space<vmem>>, vector<4x32xf32>,
      %c0_367 = arith.constant 0 : index
      %c0_368 = arith.constant 0 : index
      %553 = tpu.strided_load %arg23[%c0_367, %c0_368] {strides = array<i32: 2, 1>} : memref<8x32xf32, #tpu.memory_space<vmem>>, vector<4x32xf32>
      %c1_369 = arith.constant 1 : index
      %c0_370 = arith.constant 0 : index
      %554 = tpu.strided_load %arg23[%c1_369, %c0_370] {strides = array<i32: 2, 1>} : memref<8x32xf32, #tpu.memory_space<vmem>>, vector<4x32xf32>
      %555 = arith.maximumf %553, %554 : vector<4x32xf32>
      %556 = arith.index_cast %544 : i32 to index
      %c0_371 = arith.constant 0 : index
      %557 = vector.load %arg24[%556, %c0_371] : memref<8x32xf32, #tpu.memory_space<vmem>>, vector<4x32xf32>
      tpu.vector_store %arg24[%556, %c0_371], %555 {strides = array<i32>} : memref<8x32xf32, #tpu.memory_space<vmem>>, vector<4x32xf32>,
    }
    %c2_i32_19 = arith.constant 2 : i32
    %cst_20 = arith.constant 0.000000e+00 : f32
    %17 = vector.broadcast %cst_20 : f32 to vector<2x512xf32>
    %c0_21 = arith.constant 0 : index
    %c0_22 = arith.constant 0 : index
    %18 = tpu.strided_load %arg24[%c0_21, %c0_22] {strides = array<i32: 4, 1>} : memref<8x32xf32, #tpu.memory_space<vmem>>, vector<2x32xf32>
    %19 = arith.truncf %18 : vector<2x32xf32> to vector<2x32xbf16>
    %c0_23 = arith.constant 0 : index
    %c0_24 = arith.constant 0 : index
    %c0_25 = arith.constant 0 : index
    %20 = vector.load %arg10[%c0_23, %c0_24, %c0_25] : memref<4x32x512xbf16, #tpu.memory_space<vmem>>, vector<1x32x512xbf16>
    %21 = vector.shape_cast %20 : vector<1x32x512xbf16> to vector<32x512xbf16>
    %cst_26 = arith.constant dense<0.000000e+00> : vector<2x512xf32>
    %22 = tpu.matmul %19, %21, %cst_26 {dimension_numbers = #tpu.dot_dimension_numbers<[1], [0], [0], [1], [0, 0, 1, 1], [], []>} : vector<2x32xbf16>, vector<32x512xbf16>, vector<2x512xf32> -> vector<2x512xf32>
    %23 = arith.addf %17, %22 : vector<2x512xf32>
    %c1 = arith.constant 1 : index
    %c0_27 = arith.constant 0 : index
    %24 = tpu.strided_load %arg24[%c1, %c0_27] {strides = array<i32: 4, 1>} : memref<8x32xf32, #tpu.memory_space<vmem>>, vector<2x32xf32>
    %25 = arith.truncf %24 : vector<2x32xf32> to vector<2x32xbf16>
    %c1_28 = arith.constant 1 : index
    %c0_29 = arith.constant 0 : index
    %c0_30 = arith.constant 0 : index
    %26 = vector.load %arg10[%c1_28, %c0_29, %c0_30] : memref<4x32x512xbf16, #tpu.memory_space<vmem>>, vector<1x32x512xbf16>
    %27 = vector.shape_cast %26 : vector<1x32x512xbf16> to vector<32x512xbf16>
    %cst_31 = arith.constant dense<0.000000e+00> : vector<2x512xf32>
    %28 = tpu.matmul %25, %27, %cst_31 {dimension_numbers = #tpu.dot_dimension_numbers<[1], [0], [0], [1], [0, 0, 1, 1], [], []>} : vector<2x32xbf16>, vector<32x512xbf16>, vector<2x512xf32> -> vector<2x512xf32>
    %29 = arith.addf %23, %28 : vector<2x512xf32>
    %c2 = arith.constant 2 : index
    %c0_32 = arith.constant 0 : index
    %30 = tpu.strided_load %arg24[%c2, %c0_32] {strides = array<i32: 4, 1>} : memref<8x32xf32, #tpu.memory_space<vmem>>, vector<2x32xf32>
    %31 = arith.truncf %30 : vector<2x32xf32> to vector<2x32xbf16>
    %c2_33 = arith.constant 2 : index
    %c0_34 = arith.constant 0 : index
    %c0_35 = arith.constant 0 : index
    %32 = vector.load %arg10[%c2_33, %c0_34, %c0_35] : memref<4x32x512xbf16, #tpu.memory_space<vmem>>, vector<1x32x512xbf16>
    %33 = vector.shape_cast %32 : vector<1x32x512xbf16> to vector<32x512xbf16>
    %cst_36 = arith.constant dense<0.000000e+00> : vector<2x512xf32>
    %34 = tpu.matmul %31, %33, %cst_36 {dimension_numbers = #tpu.dot_dimension_numbers<[1], [0], [0], [1], [0, 0, 1, 1], [], []>} : vector<2x32xbf16>, vector<32x512xbf16>, vector<2x512xf32> -> vector<2x512xf32>
    %35 = arith.addf %29, %34 : vector<2x512xf32>
    %c3 = arith.constant 3 : index
    %c0_37 = arith.constant 0 : index
    %36 = tpu.strided_load %arg24[%c3, %c0_37] {strides = array<i32: 4, 1>} : memref<8x32xf32, #tpu.memory_space<vmem>>, vector<2x32xf32>
    %37 = arith.truncf %36 : vector<2x32xf32> to vector<2x32xbf16>
    %c3_38 = arith.constant 3 : index
    %c0_39 = arith.constant 0 : index
    %c0_40 = arith.constant 0 : index
    %38 = vector.load %arg10[%c3_38, %c0_39, %c0_40] : memref<4x32x512xbf16, #tpu.memory_space<vmem>>, vector<1x32x512xbf16>
    %39 = vector.shape_cast %38 : vector<1x32x512xbf16> to vector<32x512xbf16>
    %cst_41 = arith.constant dense<0.000000e+00> : vector<2x512xf32>
    %40 = tpu.matmul %37, %39, %cst_41 {dimension_numbers = #tpu.dot_dimension_numbers<[1], [0], [0], [1], [0, 0, 1, 1], [], []>} : vector<2x32xbf16>, vector<32x512xbf16>, vector<2x512xf32> -> vector<2x512xf32>
    %41 = arith.addf %35, %40 : vector<2x512xf32>
    %c0_42 = arith.constant 0 : index
    %c0_43 = arith.constant 0 : index
    %42 = vector.load %arg11[%c0_42, %c0_43] : memref<1x512xf32, #tpu.memory_space<vmem>>, vector<1x512xf32>
    %43 = vector.broadcast %42 : vector<1x512xf32> to vector<2x512xf32>
    %44 = arith.addf %41, %43 : vector<2x512xf32>
    %cst_44 = arith.constant 0.000000e+00 : f32
    %45 = vector.broadcast %cst_44 : f32 to vector<2x512xf32>
    %46 = arith.maximumf %44, %45 : vector<2x512xf32>
    %47 = arith.truncf %46 : vector<2x512xf32> to vector<2x512xbf16>
    %c0_45 = arith.constant 0 : index
    %c0_46 = arith.constant 0 : index
    %48 = vector.load %arg12[%c0_45, %c0_46] : memref<512x256xbf16, #tpu.memory_space<vmem>>, vector<512x256xbf16>
    %cst_47 = arith.constant dense<0.000000e+00> : vector<2x256xf32>
    %49 = tpu.matmul %47, %48, %cst_47 {dimension_numbers = #tpu.dot_dimension_numbers<[1], [0], [0], [1], [0, 0, 1, 1], [], []>} : vector<2x512xbf16>, vector<512x256xbf16>, vector<2x256xf32> -> vector<2x256xf32>
    %c0_48 = arith.constant 0 : index
    %c0_49 = arith.constant 0 : index
    %50 = vector.load %arg13[%c0_48, %c0_49] : memref<1x256xf32, #tpu.memory_space<vmem>>, vector<1x256xf32>
    %51 = vector.broadcast %50 : vector<1x256xf32> to vector<2x256xf32>
    %52 = arith.addf %49, %51 : vector<2x256xf32>
    %cst_50 = arith.constant 0.000000e+00 : f32
    %53 = vector.broadcast %cst_50 : f32 to vector<2x256xf32>
    %54 = arith.maximumf %52, %53 : vector<2x256xf32>
    %55 = arith.truncf %54 : vector<2x256xf32> to vector<2x256xbf16>
    %c0_51 = arith.constant 0 : index
    %c0_52 = arith.constant 0 : index
    %56 = vector.load %arg14[%c0_51, %c0_52] : memref<256x128xbf16, #tpu.memory_space<vmem>>, vector<256x128xbf16>
    %cst_53 = arith.constant dense<0.000000e+00> : vector<2x128xf32>
    %57 = tpu.matmul %55, %56, %cst_53 {dimension_numbers = #tpu.dot_dimension_numbers<[1], [0], [0], [1], [0, 0, 1, 1], [], []>} : vector<2x256xbf16>, vector<256x128xbf16>, vector<2x128xf32> -> vector<2x128xf32>
    %c0_54 = arith.constant 0 : index
    %c0_55 = arith.constant 0 : index
    %58 = vector.load %arg15[%c0_54, %c0_55] : memref<1x128xf32, #tpu.memory_space<vmem>>, vector<1x128xf32>
    %59 = vector.broadcast %58 : vector<1x128xf32> to vector<2x128xf32>
    %60 = arith.addf %57, %59 : vector<2x128xf32>
    %c0_56 = arith.constant 0 : index
    %c0_57 = arith.constant 0 : index
    %61 = vector.load %arg16[%c0_56, %c0_57] : memref<2x128xf32, #tpu.memory_space<vmem>>, vector<2x128xf32>
    tpu.vector_store %arg16[%c0_56, %c0_57], %60 {strides = array<i32>} : memref<2x128xf32, #tpu.memory_space<vmem>>, vector<2x128xf32>,
    return
  }
  func.func @transform_0(%arg0: i32) -> (i32, i32, i32) {
    %c0_i32 = arith.constant 0 : i32
    %c0_i32_0 = arith.constant 0 : i32
    %c0_i32_1 = arith.constant 0 : i32
    return %arg0, %c0_i32, %c0_i32_0 : i32, i32, i32
  }
  func.func @transform_1(%arg0: i32) -> (i32, i32, i32) {
    %c0_i32 = arith.constant 0 : i32
    %c0_i32_0 = arith.constant 0 : i32
    %c0_i32_1 = arith.constant 0 : i32
    %c0_i32_2 = arith.constant 0 : i32
    return %c0_i32, %c0_i32_0, %c0_i32_1 : i32, i32, i32
  }
  func.func @transform_2(%arg0: i32) -> (i32, i32) {
    %c0_i32 = arith.constant 0 : i32
    %c0_i32_0 = arith.constant 0 : i32
    %c0_i32_1 = arith.constant 0 : i32
    return %c0_i32, %c0_i32_0 : i32, i32
  }
  func.func @transform_3(%arg0: i32) -> (i32, i32, i32) {
    %c0_i32 = arith.constant 0 : i32
    %c0_i32_0 = arith.constant 0 : i32
    %c0_i32_1 = arith.constant 0 : i32
    %c0_i32_2 = arith.constant 0 : i32
    return %c0_i32, %c0_i32_0, %c0_i32_1 : i32, i32, i32
  }
  func.func @transform_4(%arg0: i32) -> (i32, i32) {
    %c0_i32 = arith.constant 0 : i32
    %c0_i32_0 = arith.constant 0 : i32
    %c0_i32_1 = arith.constant 0 : i32
    return %c0_i32, %c0_i32_0 : i32, i32
  }
  func.func @transform_5(%arg0: i32) -> (i32, i32, i32) {
    %c0_i32 = arith.constant 0 : i32
    %c0_i32_0 = arith.constant 0 : i32
    %c0_i32_1 = arith.constant 0 : i32
    %c0_i32_2 = arith.constant 0 : i32
    return %c0_i32, %c0_i32_0, %c0_i32_1 : i32, i32, i32
  }
  func.func @transform_6(%arg0: i32) -> (i32, i32) {
    %c0_i32 = arith.constant 0 : i32
    %c0_i32_0 = arith.constant 0 : i32
    %c0_i32_1 = arith.constant 0 : i32
    return %c0_i32, %c0_i32_0 : i32, i32
  }
  func.func @transform_7(%arg0: i32) -> (i32, i32, i32) {
    %c0_i32 = arith.constant 0 : i32
    %c0_i32_0 = arith.constant 0 : i32
    %c0_i32_1 = arith.constant 0 : i32
    %c0_i32_2 = arith.constant 0 : i32
    return %c0_i32, %c0_i32_0, %c0_i32_1 : i32, i32, i32
  }
  func.func @transform_8(%arg0: i32) -> (i32, i32) {
    %c0_i32 = arith.constant 0 : i32
    %c0_i32_0 = arith.constant 0 : i32
    %c0_i32_1 = arith.constant 0 : i32
    return %c0_i32, %c0_i32_0 : i32, i32
  }
  func.func @transform_9(%arg0: i32) -> (i32, i32, i32) {
    %c0_i32 = arith.constant 0 : i32
    %c0_i32_0 = arith.constant 0 : i32
    %c0_i32_1 = arith.constant 0 : i32
    %c0_i32_2 = arith.constant 0 : i32
    return %c0_i32, %c0_i32_0, %c0_i32_1 : i32, i32, i32
  }
  func.func @transform_10(%arg0: i32) -> (i32, i32) {
    %c0_i32 = arith.constant 0 : i32
    %c0_i32_0 = arith.constant 0 : i32
    %c0_i32_1 = arith.constant 0 : i32
    return %c0_i32, %c0_i32_0 : i32, i32
  }
  func.func @transform_11(%arg0: i32) -> (i32, i32) {
    %c0_i32 = arith.constant 0 : i32
    %c0_i32_0 = arith.constant 0 : i32
    %c0_i32_1 = arith.constant 0 : i32
    return %c0_i32, %c0_i32_0 : i32, i32
  }
  func.func @transform_12(%arg0: i32) -> (i32, i32) {
    %c0_i32 = arith.constant 0 : i32
    %c0_i32_0 = arith.constant 0 : i32
    %c0_i32_1 = arith.constant 0 : i32
    return %c0_i32, %c0_i32_0 : i32, i32
  }
  func.func @transform_13(%arg0: i32) -> (i32, i32) {
    %c0_i32 = arith.constant 0 : i32
    %c0_i32_0 = arith.constant 0 : i32
    %c0_i32_1 = arith.constant 0 : i32
    return %c0_i32, %c0_i32_0 : i32, i32
  }
  func.func @transform_14(%arg0: i32) -> (i32, i32) {
    %c0_i32 = arith.constant 0 : i32
    %c0_i32_0 = arith.constant 0 : i32
    %c0_i32_1 = arith.constant 0 : i32
    return %c0_i32, %c0_i32_0 : i32, i32
  }
  func.func @transform_15(%arg0: i32) -> (i32, i32) {
    %c0_i32 = arith.constant 0 : i32
    %c0_i32_0 = arith.constant 0 : i32
    return %arg0, %c0_i32 : i32, i32
  }
}

</mosaic_0001>

<bundles_post_ra>
// kernel: cnn500k_forward.1
= control target key start
LH: loop header
LB: loop body
LE: loop exit
PB: predicated region body
PF: predicated region fallthrough
CT: control target
= control target key end

     0   :  { %20 = vsyncpa [#allocation11], 0  ;;  %s16466_s0 = inlined_call_operand.vmem [shape: f32[2,256,4], index: 0, kind: input, shape index: {}]   ;;  %s16467_s1 = inlined_call_operand.hbm [shape: bf16[9,4,32], index: 1, kind: input, shape index: {}]   ;;  %s16468_s2 = inlined_call_operand.hbm [shape: f32[1,32], index: 2, kind: input, shape index: {}]   ;;  %s16469_s3 = inlined_call_operand.vmem [shape: bf16[9,32,64], index: 3, kind: input, shape index: {}]   ;;  %s16470_s4 = inlined_call_operand.vmem [shape: f32[1,64], index: 4, kind: input, shape index: {}]   ;;  %s16471_s5 = inlined_call_operand.vmem [shape: bf16[9,64,64], index: 5, kind: input, shape index: {}]   ;;  %s16472_s6 = inlined_call_operand.vmem [shape: f32[1,64], index: 6, kind: input, shape index: {}]   ;;  %s16473_s7 = inlined_call_operand.vmem [shape: bf16[9,64,32], index: 7, kind: input, shape index: {}]   ;;  %s16474_s8 = inlined_call_operand.vmem [shape: f32[1,32], index: 8, kind: input, shape index: {}]   ;;  %s16475_s9 = inlined_call_operand.vmem [shape: bf16[4,32,512], index: 9, kind: input, shape index: {}]   ;;  %s16476_s10 = inlined_call_operand.vmem [shape: f32[1,512], index: 10, kind: input, shape index: {}]   ;;  %s16477_s11 = inlined_call_operand.vmem [shape: bf16[512,256], index: 11, kind: input, shape index: {}]   ;;  %s16478_s12 = inlined_call_operand.vmem [shape: f32[1,256], index: 12, kind: input, shape index: {}]   ;;  %s16479_s13 = inlined_call_operand.vmem [shape: bf16[256,128], index: 13, kind: input, shape index: {}]   ;;  %s16480_s14 = inlined_call_operand.vmem [shape: f32[1,128], index: 14, kind: input, shape index: {}]   ;;  %s16481_s15 = inlined_call_operand.hbm [shape: f32[2,128], index: 15, kind: output, shape index: {}]  }
   0x1   :  { %21 = vsyncpa [#allocation14], 0 }
   0x2   :  { %22 = vsyncpa [#allocation12], 0  ;;  %s13162_s18 = smov [#allocation10]   ;;  %s13082_s22 = scalar_lea.hbm %s16467_s1, 288 }
   0x3   :  { %s30_s19 = sshll.u32 %s13162_s18, 4  ;;  %p13083_p0 = scmp.ne.s32.totalorder %s16467_s1, %s13082_s22  ;;  %s31_s19 = int_to_ptr.vmem [resolvable:$true] %s30_s19 }
   0x4   :  { %p13086_p1 = scmp.lt.u32.totalorder %s13082_s22, %s16467_s1 }
   0x6   :  { %p13088_p2 = pnand %p13086_p1, %p13083_p0 }
   0x8   :  { %13091 = shalt.err (!%p13088_p2)
}
   0x9   :  { %s13092_s27 = scalar_lea.vmem %s31_s19, 288  ;;  %p13097_p4 = scmp.lt.s32.totalorder %s31_s19, %s31_s19 }
   0xa   :  { %p13093_p3 = scmp.ne.s32.totalorder %s31_s19, %s13092_s27  ;;  %p13098_p5 = scmp.lt.s32.totalorder %s13092_s27, %s13092_s27 }
   0xc   :  { %p13099_p6 = por %p13098_p5, %p13097_p4 }
   0xe   :  { %p13100_p7 = pnand %p13099_p6, %p13093_p3 }
  0x10   :  { %13103 = shalt.err (!%p13100_p7)
}
  0x11   :  { %s13163_s28 = smov 32   ;;  %s13164_s29 = smov 2  }
  0x12   :  { %36 = dma.hbm_to_vmem [thread:$0]  %s16467_s1, 288, %s31_s19, [#allocation11], %s13163_s28, %s13163_s28, %s13164_s29  }
  0x13   :  { %s13165_s17 = smov [#allocation13]   ;;  %s13104_s22 = scalar_lea.hbm %s16468_s2, 16 }
  0x14   :  { %s43_s18 = sshll.u32 %s13165_s17, 4  ;;  %p13105_p8 = scmp.ne.s32.totalorder %s16468_s2, %s13104_s22  ;;  %s44_s18 = int_to_ptr.vmem [resolvable:$true] %s43_s18 }
  0x15   :  { %p13108_p9 = scmp.lt.u32.totalorder %s13104_s22, %s16468_s2 }
  0x17   :  { %p13110_p10 = pnand %p13108_p9, %p13105_p8 }
  0x19   :  { %13113 = shalt.err (!%p13110_p10)
}
  0x1a   :  { %s13114_s27 = scalar_lea.vmem %s44_s18, 16  ;;  %s13118_s1 = scalar_lea.vmem %s44_s18, 32 }
  0x1b   :  { %p13115_p11 = scmp.ne.s32.totalorder %s44_s18, %s13114_s27  ;;  %p13119_p12 = scmp.lt.s32.totalorder %s44_s18, %s44_s18 }
  0x1c   :  { %p13120_p13 = scmp.lt.s32.totalorder %s13118_s1, %s13114_s27 }
  0x1e   :  { %p13121_p0 = por %p13120_p13, %p13119_p12 }
  0x20   :  { %p13122_p1 = pnand %p13121_p0, %p13115_p11 }
  0x22   :  { %13125 = shalt.err (!%p13122_p1)
}
  0x23   :  { %46 = dma.hbm_to_vmem [thread:$0]  %s16468_s2, 16, %s44_s18, [#allocation14]  }
  0x24   :  { %13152 = dma.done.wait [#allocation11], 288  }
  0x25   :  { %13153 = vsyncadd [#allocation11], 4294967008 }
  0x26   :  { %13154 = dma.done.wait [#allocation14], 16  }
  0x27   :  { %13155 = vsyncadd [#allocation14], 4294967280  ;;  %vm16493_vm0 = vcmask 31744   ;;  %vm16483_vm1 = vcmask 261120   ;;  %vm16482_vm2 = vcmask 523264   ;;  %v13166_v0 = vmov 0.0  }
  0x28   :  { %79 = vst.msk [vmem:[#allocation2] sm:$0xff] %vm16493_vm0, %v13166_v0  ;;  %80 = vst.msk [vmem:[#allocation2 + $0x8] sm:$0xff] %vm16493_vm0, %v13166_v0  ;;  %s13293_s2 = smov 0  }
  0x29   :  { %81 = vst.msk [vmem:[#allocation2 + $0x10] sm:$0xff] %vm16493_vm0, %v13166_v0  ;;  %82 = vst.msk [vmem:[#allocation2 + $0x118] sm:$0xff] %vm16493_vm0, %v13166_v0 }
  0x2a   :  { %83 = vst.msk [vmem:[#allocation2 + $0x120] sm:$0xff] %vm16493_vm0, %v13166_v0  ;;  %84 = vst.msk [vmem:[#allocation2 + $0x128] sm:$0xff] %vm16493_vm0, %v13166_v0 }
  0x2b   :  { %86 = vst.msk [vmem:[#allocation3] sm:$0xff] %vm16483_vm1, %v13166_v0  ;;  %87 = vst.msk [vmem:[#allocation3 + $0x8] sm:$0xff] %vm16483_vm1, %v13166_v0 }
  0x2c   :  { %88 = vst.msk [vmem:[#allocation3 + $0x10] sm:$0xff] %vm16483_vm1, %v13166_v0  ;;  %89 = vst.msk [vmem:[#allocation3 + $0x118] sm:$0xff] %vm16483_vm1, %v13166_v0 }
  0x2d   :  { %90 = vst.msk [vmem:[#allocation3 + $0x120] sm:$0xff] %vm16483_vm1, %v13166_v0  ;;  %91 = vst.msk [vmem:[#allocation3 + $0x128] sm:$0xff] %vm16483_vm1, %v13166_v0 }
  0x2e   :  { %93 = vst.msk [vmem:[#allocation4] sm:$0xff] %vm16482_vm2, %v13166_v0  ;;  %94 = vst.msk [vmem:[#allocation4 + $0x8] sm:$0xff] %vm16482_vm2, %v13166_v0 }
  0x2f   :  { %95 = vst.msk [vmem:[#allocation4 + $0x50] sm:$0xff] %vm16482_vm2, %v13166_v0  ;;  %96 = vst.msk [vmem:[#allocation4 + $0x58] sm:$0xff] %vm16482_vm2, %v13166_v0 }
  0x30   :  { %97 = vst.msk [vmem:[#allocation5] sm:$0xff] %vm16482_vm2, %v13166_v0  ;;  %98 = vst.msk [vmem:[#allocation5 + $0x18] sm:$0xff] %vm16482_vm2, %v13166_v0 }
  0x31 LB: > { %v846_v1 = vld [vmem:[#allocation10 + $0x2] sm:$0x3]  ;;  %vm16487_vm3 = vcmask 1041408   ;;  %v797_v2 = vld [vmem:[#allocation2 + $0x8] sm:$0xff]  ;;  %v796_v6 = vld [vmem:[#allocation10] sm:$0x3]  ;;  %s13160_s2 = sphi %s13293_s2, %s104_s2  }
  0x32   : > { %v798_v3 = vld [vmem:[#allocation2 + $0x10] sm:$0xff]  ;;  %12806 = vmatprep.subr.msk.bf16.mxu0 %vm16487_vm3, %v846_v1  ;;  %v897_v4 = vsel %vm16487_vm3, %v846_v1, 0  ;;  %s10156_s29 = sshll.u32 %s13160_s2, 8  ;;  %vm16726_vm0 = vcmask 31744   ;;  %v1109_v35 = vsel %vm16487_vm3, %v796_v6, 0  ;;  %s10744_s19 = sshll.u32 %s13160_s2, 2 }
  0x33   : > { %v829_v5 = vpack.c.bf16 %v798_v3, %v797_v2  ;;  %11345 = vmatpush3.bf16.msra.mxu0 %v897_v4  ;;  %s13306_s17 = scalar_lea.vmem %s16466_s0, %s10156_s29  ;;  %v13361_v38 = vld [vmem:[#allocation10 + $0x4] sm:$0x3]  ;;  %v171_v4 = vlaneseq  ;;  %s8883_s28 = scalar_lea.vmem [#allocation9], %s10744_s19 }
  0x34   : > { %12807 = vmatprep.subr.msk.bf16.mxu0 %vm16487_vm3, %v796_v6  ;;  %v107_v7 = vld [vmem:[%s13306_s17] sm:$0xff]  ;;  %v108_v8 = vld [vmem:[%s13306_s17 + $0x8] sm:$0xff]  ;;  %v109_v9 = vld [vmem:[%s13306_s17 + $0x10] sm:$0xff]  ;;  %s104_s2 = sadd.s32 1, %s13160_s2  }
  0x35   : > { %11346 = vmatprep.mubr.msk.bf16.mxu0 %vm16726_vm0, %v829_v5  ;;  %139 = vst.msk [vmem:[#allocation2 + $0x18] sm:$0xff] %vm16726_vm0, %v107_v7  ;;  %140 = vst.msk [vmem:[#allocation2 + $0x20] sm:$0xff] %vm16726_vm0, %v108_v8  ;;  %v110_v10 = vld [vmem:[%s13306_s17 + $0x18] sm:$0xff]  ;;  %v111_v11 = vld [vmem:[%s13306_s17 + $0x20] sm:$0xff]  ;;  %v13411_v7 = vshrl.u32 %v171_v4, 7  ;;  %p101_p2 = scmp.ge.s32.totalorder %s104_s2, 2  }
  0x36   : > { %141 = vst.msk [vmem:[#allocation2 + $0x28] sm:$0xff] %vm16726_vm0, %v109_v9  ;;  %v112_v12 = vld [vmem:[%s13306_s17 + $0x28] sm:$0xff]  ;;  %142 = vst.msk [vmem:[#allocation2 + $0x30] sm:$0xff] %vm16726_vm0, %v110_v10  ;;  %v113_v13 = vld [vmem:[%s13306_s17 + $0x30] sm:$0xff]  ;;  %s13170_s16 = smov (%p101_p2), [#allocation15]  }
  0x37   : > { %143 = vst.msk [vmem:[#allocation2 + $0x38] sm:$0xff] %vm16726_vm0, %v111_v11  ;;  %144 = vst.msk [vmem:[#allocation2 + $0x40] sm:$0xff] %vm16726_vm0, %v112_v12  ;;  %v114_v14 = vld [vmem:[%s13306_s17 + $0x38] sm:$0xff]  ;;  %v115_v15 = vld [vmem:[%s13306_s17 + $0x40] sm:$0xff]  ;;  %v208_v12 = vand.u32 15, %v13411_v7 }
  0x38   : > { %145 = vst.msk [vmem:[#allocation2 + $0x48] sm:$0xff] %vm16726_vm0, %v113_v13  ;;  %146 = vst.msk [vmem:[#allocation2 + $0x50] sm:$0xff] %vm16726_vm0, %v114_v14  ;;  %v116_v16 = vld [vmem:[%s13306_s17 + $0x48] sm:$0xff]  ;;  %v117_v17 = vld [vmem:[%s13306_s17 + $0x50] sm:$0xff]  ;;  %v13421_v14 = vadd.s32 16, %v13411_v7 }
  0x39   : > { %147 = vst.msk [vmem:[#allocation2 + $0x58] sm:$0xff] %vm16726_vm0, %v115_v15  ;;  %v118_v18 = vld [vmem:[%s13306_s17 + $0x58] sm:$0xff]  ;;  %148 = vst.msk [vmem:[#allocation2 + $0x60] sm:$0xff] %vm16726_vm0, %v116_v16  ;;  %v119_v19 = vld [vmem:[%s13306_s17 + $0x60] sm:$0xff]  ;;  %v13424_v15 = vadd.s32 32, %v13411_v7  ;;  %vm13431_vm4 = vcmp.ge.s32.totalorder %v208_v12, 1 }
  0x3a   : > { %149 = vst.msk [vmem:[#allocation2 + $0x68] sm:$0xff] %vm16726_vm0, %v117_v17  ;;  %150 = vst.msk [vmem:[#allocation2 + $0x70] sm:$0xff] %vm16726_vm0, %v118_v18  ;;  %v120_v20 = vld [vmem:[%s13306_s17 + $0x68] sm:$0xff]  ;;  %v121_v21 = vld [vmem:[%s13306_s17 + $0x70] sm:$0xff]  ;;  %v13427_v17 = vadd.s32 48, %v13411_v7 }
  0x3b   : > { %151 = vst.msk [vmem:[#allocation2 + $0x78] sm:$0xff] %vm16726_vm0, %v119_v19  ;;  %152 = vst.msk [vmem:[#allocation2 + $0x80] sm:$0xff] %vm16726_vm0, %v120_v20  ;;  %v122_v22 = vld [vmem:[%s13306_s17 + $0x78] sm:$0xff]  ;;  %v123_v23 = vld [vmem:[%s13306_s17 + $0x80] sm:$0xff]  ;;  %v16741_v19 = vmov 0  ;;  %v180_v20 = vadd.s32 64, %v13411_v7 }
  0x3c   : > { %153 = vst.msk [vmem:[#allocation2 + $0x88] sm:$0xff] %vm16726_vm0, %v121_v21  ;;  %v124_v24 = vld [vmem:[%s13306_s17 + $0x88] sm:$0xff]  ;;  %154 = vst.msk [vmem:[#allocation2 + $0x90] sm:$0xff] %vm16726_vm0, %v122_v22  ;;  %v125_v25 = vld [vmem:[%s13306_s17 + $0x90] sm:$0xff]  ;;  %v16742_v19 = vsel %vm13431_vm4, 4294967295, %v16741_v19  ;;  %v182_v21 = vadd.s32 80, %v13411_v7 }
  0x3d   : > { %155 = vst.msk [vmem:[#allocation2 + $0x98] sm:$0xff] %vm16726_vm0, %v123_v23  ;;  %156 = vst.msk [vmem:[#allocation2 + $0xa0] sm:$0xff] %vm16726_vm0, %v124_v24  ;;  %v126_v26 = vld [vmem:[%s13306_s17 + $0x98] sm:$0xff]  ;;  %v127_v27 = vld [vmem:[%s13306_s17 + $0xa0] sm:$0xff]  ;;  %v222_v24 = vand.u32 15, %v13421_v14 }
  0x3e   : > { %157 = vst.msk [vmem:[#allocation2 + $0xa8] sm:$0xff] %vm16726_vm0, %v125_v25  ;;  %158 = vst.msk [vmem:[#allocation2 + $0xb0] sm:$0xff] %vm16726_vm0, %v126_v26  ;;  %v128_v28 = vld [vmem:[%s13306_s17 + $0xa8] sm:$0xff]  ;;  %v129_v29 = vld [vmem:[%s13306_s17 + $0xb0] sm:$0xff]  ;;  %v1467_v25 = vsel %vm16487_vm3, %v13361_v38, 0 }
  0x3f   : > { %159 = vst.msk [vmem:[#allocation2 + $0xb8] sm:$0xff] %vm16726_vm0, %v127_v27  ;;  %v130_v30 = vld [vmem:[%s13306_s17 + $0xb8] sm:$0xff]  ;;  %v800_v32 = vld [vmem:[#allocation2 + $0x20] sm:$0xff]  ;;  %v801_v33 = vld [vmem:[#allocation2 + $0x28] sm:$0xff]  ;;  %v236_v27 = vand.u32 15, %v13424_v15  ;;  %vm13455_vm5 = vcmp.ge.s32.totalorder %v222_v24, 1 }
  0x40   : > { %v799_v31 = vld [vmem:[#allocation2 + $0x18] sm:$0xff]  ;;  %160 = vst.msk [vmem:[#allocation2 + $0xc0] sm:$0xff] %vm16726_vm0, %v128_v28  ;;  %161 = vst.msk [vmem:[#allocation2 + $0xc8] sm:$0xff] %vm16726_vm0, %v129_v29  ;;  %v802_v36 = vld [vmem:[#allocation2 + $0x30] sm:$0xff]  ;;  %v250_v29 = vand.u32 15, %v13427_v17 }
  0x41   : > { %162 = vst.msk [vmem:[#allocation2 + $0xd0] sm:$0xff] %vm16726_vm0, %v130_v30  ;;  %v13356_v34 = vpack.c.bf16 %v800_v32, %v799_v31  ;;  %v13359_v37 = vpack.c.bf16 %v802_v36, %v801_v33  ;;  %v803_v39 = vld [vmem:[#allocation2 + $0x38] sm:$0xff]  ;;  %v804_v40 = vld [vmem:[#allocation2 + $0x40] sm:$0xff]  ;;  %v805_v41 = vld [vmem:[#allocation2 + $0x48] sm:$0xff]  ;;  %v264_v31 = vand.u32 15, %v180_v20  ;;  %v278_v32 = vand.u32 15, %v182_v21 }
  0x42   : > { %v806_v42 = vld [vmem:[#allocation2 + $0x50] sm:$0xff]  ;;  %v13369_v43 = vpack.c.bf16 %v804_v40, %v803_v39  ;;  %v131_v45 = vld [vmem:[%s13306_s17 + $0xc0] sm:$0xff]  ;;  %v132_v46 = vld [vmem:[%s13306_s17 + $0xc8] sm:$0xff]  ;;  %16735 = vst [vmem:[#allocation27_spill] sm:$0xff] %v13411_v7  ;;  %v184_v33 = vadd.s32 96, %v13411_v7  ;;  %v186_v39 = vadd.s32 112, %v13411_v7 }
  0x43   : > { %11347 = vmatmul.mubr.msk.bf16.vlgmr.msra.gmra.mrb[0].mxu0 %vm16726_vm0, %v13356_v34  ;;  %v13371_v44 = vpack.c.bf16 %v806_v42, %v805_v41  ;;  %v133_v47 = vld [vmem:[%s13306_s17 + $0xd0] sm:$0xff]  ;;  %163 = vst.msk [vmem:[#allocation2 + $0xd8] sm:$0xff] %vm16726_vm0, %v131_v45  ;;  %164 = vst.msk [vmem:[#allocation2 + $0xe0] sm:$0xff] %vm16726_vm0, %v132_v46  ;;  %v134_v48 = vld [vmem:[%s13306_s17 + $0xd8] sm:$0xff]  ;;  %vm13459_vm6 = vcmp.ge.s32.totalorder %v236_v27, 1  ;;  %v13464_v42 = vadd.s32 144, %v13411_v7 }
  0x44   : > { %11379 = vmatpush3.bf16.msra.mxu0 %v1109_v35  ;;  %11350 = vmatprep.mubr.msk.bf16.mxu0 %vm16726_vm0, %v13359_v37  ;;  %16727 = vst [vmem:[#allocation19_spill] sm:$0xff] %v13369_v43  ;;  %165 = vst.msk [vmem:[#allocation2 + $0xe8] sm:$0xff] %vm16726_vm0, %v133_v47  ;;  %v135_v49 = vld [vmem:[%s13306_s17 + $0xe0] sm:$0xff]  ;;  %v136_v50 = vld [vmem:[%s13306_s17 + $0xe8] sm:$0xff]  ;;  %v13467_v45 = vadd.s32 160, %v13411_v7  ;;  %vm13493_vm7 = vcmp.ge.s32.totalorder %v250_v29, 1 }
  0x45   : > { %12808 = vmatprep.subr.msk.bf16.mxu0 %vm16487_vm3, %v13361_v38  ;;  %16728 = vst [vmem:[#allocation20_spill] sm:$0xff] %v13371_v44  ;;  %166 = vst.msk [vmem:[#allocation2 + $0xf0] sm:$0xff] %vm16726_vm0, %v134_v48  ;;  %v807_v51 = vld [vmem:[#allocation2 + $0x58] sm:$0xff]  ;;  %v808_v52 = vld [vmem:[#allocation2 + $0x60] sm:$0xff]  ;;  %v188_v38 = vadd.s32 128, %v13411_v7  ;;  %v292_v48 = vand.u32 15, %v184_v33 }
  0x46   : > { %167 = vst.msk [vmem:[#allocation2 + $0xf8] sm:$0xff] %vm16726_vm0, %v135_v49  ;;  %168 = vst.msk [vmem:[#allocation2 + $0x100] sm:$0xff] %vm16726_vm0, %v136_v50  ;;  %v809_v53 = vld [vmem:[#allocation2 + $0x68] sm:$0xff]  ;;  %v810_v54 = vld [vmem:[#allocation2 + $0x70] sm:$0xff]  ;;  %v13389_v55 = vpack.c.bf16 %v808_v52, %v807_v51  ;;  %v13472_v49 = vadd.s32 176, %v13411_v7  ;;  %v13475_v50 = vadd.s32 192, %v13411_v7 }
  0x47   : > { %v13391_v56 = vpack.c.bf16 %v810_v54, %v809_v53  ;;  %v811_v57 = vld [vmem:[#allocation2 + $0x78] sm:$0xff]  ;;  %v812_v58 = vld [vmem:[#allocation2 + $0x80] sm:$0xff]  ;;  %v813_v59 = vld [vmem:[#allocation2 + $0x88] sm:$0xff]  ;;  %16738 = vst [vmem:[#allocation30_spill] sm:$0xff] %v13421_v14  ;;  %v13480_v52 = vadd.s32 208, %v13411_v7  ;;  %v306_v53 = vand.u32 15, %v186_v39 }
  0x48   : > { %16729 = vst [vmem:[#allocation21_spill] sm:$0xff] %v13389_v55  ;;  %v814_v60 = vld [vmem:[#allocation2 + $0x90] sm:$0xff]  ;;  %v13397_v61 = vpack.c.bf16 %v812_v58, %v811_v57  ;;  %v815_v63 = vld [vmem:[#allocation2 + $0x98] sm:$0xff]  ;;  %v816_v0 = vld [vmem:[#allocation2 + $0xa0] sm:$0xff]  ;;  %v320_v54 = vand.u32 15, %v188_v38  ;;  %v334_v57 = vand.u32 15, %v13464_v42 }
  0x49   : > { %16730 = vst [vmem:[#allocation22_spill] sm:$0xff] %v13391_v56  ;;  %v13399_v62 = vpack.c.bf16 %v814_v60, %v813_v59  ;;  %v817_v1 = vld [vmem:[#allocation2 + $0xa8] sm:$0xff]  ;;  %v818_v2 = vld [vmem:[#allocation2 + $0xb0] sm:$0xff]  ;;  %v13405_v3 = vpack.c.bf16 %v816_v0, %v815_v63  ;;  %v819_v6 = vld [vmem:[#allocation2 + $0xb8] sm:$0xff]  ;;  %v348_v58 = vand.u32 15, %v13467_v45  ;;  %v362_v63 = vand.u32 15, %v13472_v49 }
  0x4a   : > { %16731 = vst [vmem:[#allocation23_spill] sm:$0xff] %v13397_v61  ;;  %v13407_v5 = vpack.c.bf16 %v818_v2, %v817_v1  ;;  %v820_v8 = vld [vmem:[#allocation2 + $0xc0] sm:$0xff]  ;;  %v821_v9 = vld [vmem:[#allocation2 + $0xc8] sm:$0xff]  ;;  %v822_v10 = vld [vmem:[#allocation2 + $0xd0] sm:$0xff]  ;;  %v376_v0 = vand.u32 15, %v13475_v50  ;;  %v13489_v1 = vadd.s32 224, %v13411_v7 }
  0x4b   : > { %11351 = vmatmul.mubr.msk.bf16.gmra.mrb[4].mxu0 %vm16726_vm0, %v13369_v43  ;;  %16732 = vst [vmem:[#allocation24_spill] sm:$0xff] %v13399_v62  ;;  %16733 = vst [vmem:[#allocation25_spill] sm:$0xff] %v13405_v3  ;;  %v13415_v11 = vpack.c.bf16 %v820_v8, %v819_v6  ;;  %v13418_v13 = vpack.c.bf16 %v822_v10, %v821_v9  ;;  %v652_v16 = vld [vmem:[#allocation2 + $0x7] sm:$0xff]  ;;  %v823_v18 = vld [vmem:[#allocation2 + $0xd8] sm:$0xff]  ;;  %v16751_v6 = vmov 0  ;;  %vm13498_vm8 = vcmp.ge.s32.totalorder %v264_v31, 1 }
  0x4c   : > { %11354 = vmatprep.mubr.msk.bf16.mxu0 %vm16726_vm0, %v13371_v44  ;;  %16734 = vst [vmem:[#allocation26_spill] sm:$0xff] %v13407_v5  ;;  %16739 = vst [vmem:[#allocation31_spill] sm:$0xff] %v13424_v15  ;;  %v824_v22 = vld [vmem:[#allocation2 + $0xe0] sm:$0xff]  ;;  %v825_v23 = vld [vmem:[#allocation2 + $0xe8] sm:$0xff]  ;;  %v748_v28 = vsel %vm13431_vm4, %v652_v16, 0.0  ;;  %v16752_v6 = vsel %vm13493_vm7, 4294967295, %v16751_v6 }
  0x4d   : > { %16736 = vst [vmem:[#allocation28_spill] sm:$0xff] %v13415_v11  ;;  %16737 = vst [vmem:[#allocation29_spill] sm:$0xff] %v13418_v13  ;;  %v826_v26 = vld [vmem:[#allocation2 + $0xf0] sm:$0xff]  ;;  %v13446_v30 = vpack.c.bf16 %v824_v22, %v823_v18  ;;  %v827_v46 = vld [vmem:[#allocation2 + $0xf8] sm:$0xff]  ;;  %v16754_v9 = vmov 0  ;;  %vm13522_vm9 = vcmp.ge.s32.totalorder %v278_v32, 1 }
  0x4e   : > { %16740 = vst [vmem:[#allocation32_spill] sm:$0xff] %v13427_v17  ;;  %16743 = vst [vmem:[#allocation33_spill] sm:$0xff] %v16742_v19  ;;  %v137_v35 = vld [vmem:[%s13306_s17 + $0xf0] sm:$0xff]  ;;  %v13450_v36 = vpack.c.bf16 %v826_v26, %v825_v23  ;;  %v828_v51 = vld [vmem:[#allocation2 + $0x100] sm:$0xff]  ;;  %v16755_v9 = vsel %vm13498_vm8, 4294967295, %v16754_v9  ;;  %vm13528_vm10 = vcmp.ge.s32.totalorder %v292_v48, 1 }
  0x4f   : > { %16744 = vst [vmem:[#allocation34_spill] sm:$0xff] %v13446_v30  ;;  %169 = vst.msk [vmem:[#allocation2 + $0x108] sm:$0xff] %vm16726_vm0, %v137_v35  ;;  %v653_v47 = vld [vmem:[#allocation2 + $0xf] sm:$0xff]  ;;  %v13484_v59 = vpack.c.bf16 %v828_v51, %v827_v46  ;;  %v654_v60 = vld [vmem:[#allocation2 + $0x17] sm:$0xff]  ;;  %v16760_v31 = vmov 0  ;;  %vm13552_vm11 = vcmp.ge.s32.totalorder %v306_v53, 1 }
  0x50   : > { %16745 = vst [vmem:[#allocation35_spill] sm:$0xff] %v13450_v36  ;;  %v780_v2 = vpack.c.bf16 %v653_v47, %v748_v28  ;;  %v13491_v4 = vld [vmem:[#allocation2 + $0x27] sm:$0xff]  ;;  %16753 = vst [vmem:[#allocation37_spill] sm:$0xff] %v16752_v6  ;;  %v655_v10 = vld [vmem:[#allocation2 + $0x1f] sm:$0xff]  ;;  %v1694_v12 = vsel %vm13431_vm4, %v654_v60, 0.0  ;;  %v750_v16 = vsel %vm13455_vm5, %v654_v60, 0.0 }
  0x51   : > { %16750 = vst [vmem:[#allocation36_spill] sm:$0xff] %v13484_v59  ;;  %16756 = vst [vmem:[#allocation38_spill] sm:$0xff] %v16755_v9  ;;  %v13509_v18 = vld [vmem:[#allocation2 + $0x2f] sm:$0xff]  ;;  %v752_v20 = vsel %vm13459_vm6, %v13491_v4, 0.0  ;;  %v13515_v22 = vpack.c.bf16 %v655_v10, %v1694_v12  ;;  %v13517_v23 = vld [vmem:[#allocation2 + $0x37] sm:$0xff]  ;;  %v781_v24 = vpack.c.bf16 %v655_v10, %v750_v16  ;;  %v16757_v28 = vmov 0 }
  0x52   : > { %v13519_v26 = vld [vmem:[#allocation2 + $0x47] sm:$0xff]  ;;  %v782_v27 = vpack.c.bf16 %v13509_v18, %v752_v20  ;;  %v16758_v28 = vsel %vm13522_vm9, 4294967295, %v16757_v28  ;;  %v13526_v29 = vld [vmem:[#allocation10 + $0x6] sm:$0x3]  ;;  %v16761_v31 = vsel %vm13528_vm10, 4294967295, %v16760_v31  ;;  %v13533_v33 = vld [vmem:[#allocation2 + $0x3f] sm:$0xff] }
  0x53   : > { %11355 = vmatmul.mubr.msk.bf16.gmra.mrb[8].mxu0 %vm16726_vm0, %v13389_v55  ;;  %16759 = vst [vmem:[#allocation39_spill] sm:$0xff] %v16758_v28  ;;  %16762 = vst [vmem:[#allocation40_spill] sm:$0xff] %v16761_v31  ;;  %v754_v35 = vsel %vm13493_vm7, %v13517_v23, 0.0  ;;  %v13539_v32 = vld [vmem:[#allocation2 + $0x4f] sm:$0xff]  ;;  %v756_v39 = vsel %vm13498_vm8, %v13519_v26, 0.0  ;;  %v13546_v38 = vld [vmem:[#allocation2 + $0x57] sm:$0xff] }
  0x54   : > { %11358 = vmatprep.mubr.msk.bf16.mxu0 %vm16726_vm0, %v13391_v56  ;;  %v783_v42 = vpack.c.bf16 %v13533_v33, %v754_v35  ;;  %v13549_v45 = vld [vmem:[#allocation2 + $0x67] sm:$0xff]  ;;  %v784_v46 = vpack.c.bf16 %v13539_v32, %v756_v39  ;;  %vm13556_vm12 = vcmp.ge.s32.totalorder %v320_v54, 1  ;;  %v16766_v47 = vmov 0  ;;  %v13561_v48 = vld [vmem:[#allocation2 + $0x5f] sm:$0xff]  ;;  %v13567_v50 = vld [vmem:[#allocation2 + $0x6f] sm:$0xff] }
  0x55   : > { %v16767_v47 = vsel %vm13556_vm12, 4294967295, %v16766_v47  ;;  %v758_v49 = vsel %vm13522_vm9, %v13546_v38, 0.0  ;;  %v760_v51 = vsel %vm13528_vm10, %v13549_v45, 0.0  ;;  %v13572_v53 = vld [vmem:[#allocation2 + $0x77] sm:$0xff]  ;;  %v13575_v60 = vld [vmem:[#allocation2 + $0x87] sm:$0xff]  ;;  %vm13578_vm13 = vcmp.ge.s32.totalorder %v334_v57, 1 }
  0x56   : > { %16768 = vst [vmem:[#allocation42_spill] sm:$0xff] %v16767_v47  ;;  %v785_v54 = vpack.c.bf16 %v13561_v48, %v758_v49  ;;  %v16769_v10 = vmov 0  ;;  %vm13582_vm14 = vcmp.ge.s32.totalorder %v348_v58, 1  ;;  %v16772_v12 = vmov 0  ;;  %v13587_v16 = vld [vmem:[#allocation2 + $0x7f] sm:$0xff]  ;;  %v13598_v58 = vld [vmem:[#allocation2 + $0x97] sm:$0xff] }
  0x57   : > { %v16770_v10 = vsel %vm13578_vm13, 4294967295, %v16769_v10  ;;  %v16773_v12 = vsel %vm13582_vm14, 4294967295, %v16772_v12  ;;  %v762_v20 = vsel %vm13552_vm11, %v13572_v53, 0.0  ;;  %v764_v57 = vsel %vm13556_vm12, %v13575_v60, 0.0  ;;  %v13601_v35 = vld [vmem:[#allocation2 + $0xa7] sm:$0xff]  ;;  %v13613_v49 = vld [vmem:[#allocation2 + $0x9f] sm:$0xff] }
  0x58   : > { %16771 = vst [vmem:[#allocation43_spill] sm:$0xff] %v16770_v10  ;;  %16774 = vst [vmem:[#allocation44_spill] sm:$0xff] %v16773_v12  ;;  %vm13604_vm15 = vcmp.ge.s32.totalorder %v362_v63, 1  ;;  %vm13608_vm2 = vcmp.ge.s32.totalorder %v376_v0, 1  ;;  %v768_v63 = vsel %vm13582_vm14, %v13601_v35, 0.0  ;;  %v13624_v0 = vld [vmem:[#allocation2 + $0xb7] sm:$0xff] }
  0x59   : > { %v13637_v21 = vld [vmem:[#allocation2 + $0xcf] sm:$0xff]  ;;  %v16781_v17 = vmov 0  ;;  %v13650_v15 = vld [vmem:[#allocation2 + $0xd7] sm:$0xff]  ;;  %v16784_v14 = vand.u32 15, %v13489_v1  ;;  %v16785_v19 = vmov 0  ;;  %vm16794_vm4 = vcmask 31744  }
  0x5a   : > { %v13671_v1 = vld [vmem:[#allocation2 + $0xef] sm:$0xff]  ;;  %v13716_v55 = vadd.s32 56, %v13411_v7  ;;  %v16807_v44 = vmov 0  ;;  %v16815_v43 = vmov 0 }
  0x5b   : > { %11359 = vmatmul.mubr.msk.bf16.gmra.mrb[12].mxu0 %vm16726_vm0, %v13397_v61 }
  0x5c   : > { %11362 = vmatprep.mubr.msk.bf16.mxu0 %vm16726_vm0, %v13399_v62  ;;  %16806 = vst [vmem:[#allocation57_spill] sm:$0xff] %v13716_v55 }
  0x63   : > { %11363 = vmatmul.mubr.msk.bf16.gmra.mrb[16].mxu0 %vm16726_vm0, %v13405_v3  ;;  %v1272_v3 = vld [vmem:[#allocation2 + $0x9] sm:$0xff] }
  0x64   : > { %11366 = vmatprep.mubr.msk.bf16.mxu0 %vm16726_vm0, %v13407_v5  ;;  %v13687_v5 = vadd.s32 24, %v13411_v7 }
  0x66   : > { %16793 = vst [vmem:[#allocation51_spill] sm:$0xff] %v13687_v5 }
  0x6b   : > { %11367 = vmatmul.mubr.msk.bf16.gmra.mrb[20].mxu0 %vm16726_vm0, %v13415_v11  ;;  %v13684_v11 = vld [vmem:[#allocation2 + $0xf7] sm:$0xff] }
  0x6c   : > { %11370 = vmatprep.mubr.msk.bf16.mxu0 %vm16726_vm0, %v13418_v13  ;;  %v16789_v13 = vmov 0  ;;  %16792 = vst [vmem:[#allocation50_spill] sm:$0xff] %v13684_v11 }
  0x73   : > { %11371 = vmatmul.mubr.msk.bf16.gmra.mrb[24].mxu0 %vm16726_vm0, %v13446_v30 }
  0x74   : > { %11374 = vmatprep.mubr.msk.bf16.mxu0 %vm16726_vm0, %v13450_v36 }
  0x7b   : > { %11375 = vmatmul.mubr.msk.bf16.gmra.mrb[28].mxu0 %vm16726_vm0, %v13484_v59 }
  0x7c   : > { %11380 = vmatprep.mubr.msk.bf16.mxu0 %vm16726_vm0, %v780_v2  ;;  %v786_v2 = vpack.c.bf16 %v13567_v50, %v760_v51  ;;  %v766_v51 = vsel %vm13578_vm13, %v13598_v58, 0.0 }
  0x83   : > { %11381 = vmatmul.mubr.msk.bf16.vlgmr.msra.gmra.mrb[0].mxu0 %vm16726_vm0, %v781_v24  ;;  %v13593_v24 = vld [vmem:[#allocation2 + $0x8f] sm:$0xff] }
  0x84   : > { %11413 = vmatpush3.bf16.msra.mxu0 %v1467_v25  ;;  %11384 = vmatprep.mubr.msk.bf16.mxu0 %vm16726_vm0, %v782_v27  ;;  %v16763_v25 = vmov 0  ;;  %v787_v27 = vpack.c.bf16 %v13587_v16, %v762_v20  ;;  %v788_v39 = vpack.c.bf16 %v13593_v24, %v764_v57  ;;  %v13627_v20 = vld [vmem:[#allocation2 + $0xc7] sm:$0xff] }
  0x85   : > { %12809 = vmatprep.subr.msk.bf16.mxu0 %vm16487_vm3, %v13526_v29  ;;  %v16764_v25 = vsel %vm13552_vm11, 4294967295, %v16763_v25  ;;  %vm13655_vm3 = vcmp.ge.s32.totalorder %v16784_v14, 1 }
  0x86   : > { %16765 = vst [vmem:[#allocation41_spill] sm:$0xff] %v16764_v25  ;;  %v16786_v19 = vsel %vm13655_vm3, 4294967295, %v16785_v19 }
  0x87   : > { %16787 = vst [vmem:[#allocation47_spill] sm:$0xff] %v16786_v19 }
  0x8b   : > { %11385 = vmatmul.mubr.msk.bf16.gmra.mrb[4].mxu0 %vm16726_vm0, %v783_v42  ;;  %v16775_v42 = vmov 0 }
  0x8c   : > { %11388 = vmatprep.mubr.msk.bf16.mxu0 %vm16726_vm0, %v784_v46  ;;  %v16776_v42 = vsel %vm13604_vm15, 4294967295, %v16775_v42  ;;  %v16777_v46 = vmov 0 }
  0x8d   : > { %v16778_v46 = vsel %vm13608_vm2, 4294967295, %v16777_v46 }
  0x8e   : > { %16779 = vst [vmem:[#allocation45_spill] sm:$0xff] %v16778_v46 }
  0x93   : > { %11389 = vmatmul.mubr.msk.bf16.gmra.mrb[8].mxu0 %vm16726_vm0, %v785_v54  ;;  %v13619_v54 = vld [vmem:[#allocation2 + $0xaf] sm:$0xff] }
  0x94   : > { %11392 = vmatprep.mubr.msk.bf16.mxu0 %vm16726_vm0, %v786_v2  ;;  %v789_v2 = vpack.c.bf16 %v13613_v49, %v766_v51  ;;  %v790_v57 = vpack.c.bf16 %v13619_v54, %v768_v63  ;;  %v772_v51 = vsel %vm13608_vm2, %v13627_v20, 0.0 }
  0x95   : > { %v792_v63 = vpack.c.bf16 %v13637_v21, %v772_v51  ;;  %v13662_v51 = vadd.s32 8, %v13411_v7 }
  0x97   : > { %16788 = vst [vmem:[#allocation48_spill] sm:$0xff] %v13662_v51  ;;  %v215_v36 = vand.u32 15, %v13662_v51  ;;  %v1273_v51 = vld [vmem:[#allocation2 + $0x11] sm:$0xff] }
  0x9b   : > { %11393 = vmatmul.mubr.msk.bf16.gmra.mrb[12].mxu0 %vm16726_vm0, %v787_v27  ;;  %v13631_v27 = vld [vmem:[#allocation2 + $0xbf] sm:$0xff] }
  0x9c   : > { %11396 = vmatprep.mubr.msk.bf16.mxu0 %vm16726_vm0, %v788_v39  ;;  %v770_v39 = vsel %vm13604_vm15, %v13624_v0, 0.0 }
  0x9d   : > { %v791_v8 = vpack.c.bf16 %v13631_v27, %v770_v39  ;;  %v13659_v39 = vld [vmem:[#allocation2 + $0xe7] sm:$0xff] }
  0x9e   : > { %v776_v14 = vsel %vm13655_vm3, %v13659_v39, 0.0  ;;  %vm13690_vm3 = vcmp.le.s32.totalorder %v215_v36, 14 }
  0x9f   : > { %v1369_v36 = vsel %vm13690_vm3, %v1273_v51, 0.0  ;;  %v13722_v51 = vld [vmem:[#allocation2 + $0x31] sm:$0xff] }
  0xa0   : > { %v1400_v56 = vpack.c.bf16 %v1369_v36, %v1272_v3  ;;  %16810 = vst [vmem:[#allocation59_spill] sm:$0xff] %v13722_v51  ;;  %v13727_v3 = vld [vmem:[#allocation2 + $0x19] sm:$0xff]  ;;  %v13732_v36 = vld [vmem:[#allocation2 + $0x29] sm:$0xff] }
  0xa1   : > { %16812 = vst [vmem:[#allocation60_spill] sm:$0xff] %v13727_v3  ;;  %16813 = vst [vmem:[#allocation61_spill] sm:$0xff] %v13732_v36 }
  0xa3   : > { %11397 = vmatmul.mubr.msk.bf16.gmra.mrb[16].mxu0 %vm16726_vm0, %v789_v2  ;;  %v16780_v2 = vand.u32 15, %v13480_v52  ;;  %v13666_v52 = vld [vmem:[#allocation2 + $0xdf] sm:$0xff] }
  0xa4   : > { %11400 = vmatprep.mubr.msk.bf16.mxu0 %vm16726_vm0, %v790_v57  ;;  %v202_v57 = vadd.s32 240, %v13411_v7 }
  0xa5   : > { %vm13646_vm1 = vcmp.ge.s32.totalorder %v16780_v2, 1 }
  0xa6   : > { %v16782_v17 = vsel %vm13646_vm1, 4294967295, %v16781_v17  ;;  %v774_v2 = vsel %vm13646_vm1, %v13650_v15, 0.0  ;;  %v418_v59 = vand.u32 15, %v202_v57  ;;  %v16795_v57 = vmov 0  ;;  %vm16799_vm1 = vmmov %vm16794_vm4 }
  0xa7   : > { %16783 = vst [vmem:[#allocation46_spill] sm:$0xff] %v16782_v17  ;;  %v793_v30 = vpack.c.bf16 %v13666_v52, %v774_v2  ;;  %v16796_v57 = vsel %vm13690_vm3, 4294967295, %v16795_v57  ;;  %v13695_v2 = vadd.s32 40, %v13411_v7  ;;  %vm16800_vm2 = vmmov %vm16799_vm1 }
  0xa8   : > { %16797 = vst [vmem:[#allocation52_spill] sm:$0xff] %v16796_v57  ;;  %vm16811_vm3 = vmmov %vm16794_vm4 }
  0xa9   : > { %16798 = vst [vmem:[#allocation53_spill] sm:$0xff] %v13695_v2  ;;  %v243_v62 = vand.u32 15, %v13695_v2  ;;  %v181_v2 = vadd.s32 72, %v13411_v7 }
  0xab   : > { %11401 = vmatmul.mubr.msk.bf16.gmra.mrb[20].mxu0 %vm16726_vm0, %v791_v8  ;;  %v794_v8 = vpack.c.bf16 %v13671_v1, %v776_v14 }
  0xac   : > { %11404 = vmatprep.mubr.msk.bf16.mxu0 %vm16726_vm0, %v792_v63  ;;  %v138_v63 = vld [vmem:[%s13306_s17 + $0xf8] sm:$0xff]  ;;  %vm13680_vm0 = vcmp.ge.s32.totalorder %v418_v59, 1  ;;  %s10137_s17 = sshll.u32 (%p101_p2), %s13170_s16, 4  ;;  %s10138_s17 = int_to_ptr.vmem [resolvable:$true] %s10137_s17 }
  0xad   : > { %v16790_v13 = vsel %vm13680_vm0, 4294967295, %v16789_v13  ;;  %170 = vst.msk [vmem:[#allocation2 + $0x110] sm:$0xff] %vm16794_vm4, %v138_v63  ;;  %v13699_v59 = vld [vmem:[#allocation2 + $0xff] sm:$0xff]  ;;  %v778_v14 = vsel %vm13680_vm0, %v13684_v11, 0.0  ;;  %v229_v63 = vand.u32 15, %v13687_v5  ;;  %v271_v5 = vand.u32 15, %v181_v2  ;;  %p13131_p4 = scmp.lt.s32.totalorder (%p101_p2), %s10138_s17, %s10138_s17 }
  0xae   : > { %16791 = vst [vmem:[#allocation49_spill] sm:$0xff] %v16790_v13  ;;  %16801 = vst [vmem:[#allocation54_spill] sm:$0xff] %v13699_v59  ;;  %v795_v61 = vpack.c.bf16 %v13699_v59, %v778_v14  ;;  %v13753_v2 = vld [vmem:[#allocation2 + $0x51] sm:$0xff]  ;;  %vm16827_vm0 = vcmask 1041408   ;;  %s13126_s18 = scalar_lea.vmem (%p101_p2), %s10138_s17, 32 }
  0xaf   : > { %16822 = vst [vmem:[#allocation65_spill] sm:$0xff] %v13753_v2  ;;  %p13127_p3 = scmp.ne.s32.totalorder (%p101_p2), %s10138_s17, %s13126_s18  ;;  %p13132_p5 = scmp.lt.s32.totalorder (%p101_p2), %s13126_s18, %s13126_s18 }
  0xb1   :  { %p13133_p6 = por (%p101_p2), %p13132_p5, %p13131_p4 }
  0xb3   : > { %11405 = vmatmul.mubr.msk.bf16.gmra.mrb[24].mxu0 %vm16799_vm1, %v793_v30  ;;  %vm13709_vm1 = vcmp.le.s32.totalorder %v229_v63, 14  ;;  %v16802_v30 = vmov 0  ;;  %v257_v63 = vand.u32 15, %v13716_v55  ;;  %p13134_p7 = pnand (%p101_p2), %p13133_p6, %p13127_p3 }
  0xb4   : > { %11408 = vmatprep.mubr.msk.bf16.mxu0 %vm16800_vm2, %v794_v8  ;;  %v16803_v30 = vsel %vm13709_vm1, 4294967295, %v16802_v30  ;;  %v13713_v8 = vld [vmem:[#allocation2 + $0x21] sm:$0xff]  ;;  %vm13718_vm2 = vcmp.le.s32.totalorder %v243_v62, 14 }
  0xb5   : > { %16804 = vst [vmem:[#allocation55_spill] sm:$0xff] %v16803_v30  ;;  %16805 = vst [vmem:[#allocation56_spill] sm:$0xff] %v13713_v8  ;;  %v16808_v44 = vsel %vm13718_vm2, 4294967295, %v16807_v44  ;;  %v1371_v14 = vsel %vm13709_vm1, %v13713_v8, 0.0  ;;  %v1373_v62 = vsel %vm13718_vm2, %v13722_v51, 0.0  ;;  %v13746_v30 = vld [vmem:[#allocation2 + $0x41] sm:$0xff] }
  0xb6   : > { %16809 = vst [vmem:[#allocation58_spill] sm:$0xff] %v16808_v44  ;;  %v1401_v57 = vpack.c.bf16 %v1371_v14, %v13727_v3  ;;  %16818 = vst [vmem:[#allocation63_spill] sm:$0xff] %v13746_v30  ;;  %v183_v8 = vadd.s32 88, %v13411_v7  ;;  %vm13749_vm1 = vcmp.le.s32.totalorder %v271_v5, 14  ;;  %v16819_v44 = vmov 0  ;;  %v13806_v3 = vld [vmem:[#allocation2 + $0x81] sm:$0xff] }
  0xb7   : > { %v16820_v44 = vsel %vm13749_vm1, 4294967295, %v16819_v44  ;;  %v185_v14 = vadd.s32 104, %v13411_v7  ;;  %vm16823_vm2 = vcmask 31744   ;;  %v1377_v55 = vsel %vm13749_vm1, %v13753_v2, 0.0  ;;  %16843 = vst [vmem:[#allocation75_spill] sm:$0xff] %v13806_v3 }
  0xb8   : > { %16821 = vst [vmem:[#allocation64_spill] sm:$0xff] %v16820_v44  ;;  %v16828_v51 = vmov 0  ;;  %v16832_v44 = vmov 0 }
  0xbb   : > { %11409 = vmatmul.mubr.msk.bf16.gmra.mrb[28].mxu0 %vm16794_vm4, %v795_v61  ;;  %v1402_v61 = vpack.c.bf16 %v1373_v62, %v13732_v36  ;;  %vm13742_vm4 = vcmp.le.s32.totalorder %v257_v63, 14  ;;  %v13756_v62 = vld [vmem:[#allocation10 + $0x8] sm:$0x3]  ;;  %v13765_v63 = vld [vmem:[#allocation2 + $0x49] sm:$0xff]  ;;  %v285_v36 = vand.u32 15, %v183_v8 }
  0xbc   : > { %11414 = vmatprep.mubr.msk.bf16.mxu0 %vm16811_vm3, %v1400_v56  ;;  %vm16814_vm3 = vcmask 1041408   ;;  %v16816_v43 = vsel %vm13742_vm4, 4294967295, %v16815_v43  ;;  %v1375_v5 = vsel %vm13742_vm4, %v13746_v30, 0.0  ;;  %16826 = vst [vmem:[#allocation67_spill] sm:$0xff] %v13765_v63  ;;  %v187_v30 = vadd.s32 120, %v13411_v7  ;;  %v13785_v8 = vld [vmem:[#allocation2 + $0x71] sm:$0xff] }
  0xbd   : > { %v1793_v56 = vsel %vm16814_vm3, %v13526_v29, 0  ;;  %16817 = vst [vmem:[#allocation62_spill] sm:$0xff] %v16816_v43  ;;  %vm16824_vm3 = vmmov %vm16823_vm2  ;;  %v13760_v29 = vld [vmem:[#allocation2 + $0x39] sm:$0xff]  ;;  %v13778_v43 = vld [vmem:[#allocation2 + $0x61] sm:$0xff] }
  0xbe   : > { %16825 = vst [vmem:[#allocation66_spill] sm:$0xff] %v13760_v29  ;;  %16831 = vst [vmem:[#allocation69_spill] sm:$0xff] %v13778_v43 }
  0xbf   : > { %16835 = vst [vmem:[#allocation71_spill] sm:$0xff] %v13785_v8 }
  0xc3   : > { %11415 = vmatmul.mubr.msk.bf16.vlgmr.msra.gmra.mrb[0].mxu0 %vm16823_vm2, %v1401_v57  ;;  %v299_v57 = vand.u32 15, %v185_v14  ;;  %vm13774_vm2 = vcmp.le.s32.totalorder %v285_v36, 14  ;;  %v189_v14 = vadd.s32 136, %v13411_v7 }
  0xc4   : > { %11447 = vmatpush3.bf16.msra.mxu0 %v1793_v56  ;;  %11418 = vmatprep.mubr.msk.bf16.mxu0 %vm16824_vm3, %v1402_v61  ;;  %v1403_v56 = vpack.c.bf16 %v1375_v5, %v13760_v29  ;;  %v1404_v61 = vpack.c.bf16 %v1377_v55, %v13765_v63  ;;  %v16829_v51 = vsel %vm13774_vm2, 4294967295, %v16828_v51  ;;  %v13790_v55 = vld [vmem:[#allocation2 + $0x59] sm:$0xff]  ;;  %v1379_v36 = vsel %vm13774_vm2, %v13778_v43, 0.0  ;;  %v13795_v5 = vld [vmem:[#allocation2 + $0x69] sm:$0xff] }
  0xc5   : > { %12810 = vmatprep.subr.msk.bf16.mxu0 %vm16827_vm0, %v13756_v62  ;;  %16830 = vst [vmem:[#allocation68_spill] sm:$0xff] %v16829_v51  ;;  %vm13781_vm3 = vcmp.le.s32.totalorder %v299_v57, 14  ;;  %vm16836_vm0 = vcmask 31744   ;;  %16838 = vst [vmem:[#allocation72_spill] sm:$0xff] %v13790_v55  ;;  %v313_v63 = vand.u32 15, %v187_v30  ;;  %v327_v2 = vand.u32 15, %v189_v14 }
  0xc6   : > { %v16833_v44 = vsel %vm13781_vm3, 4294967295, %v16832_v44  ;;  %vm16837_vm1 = vmmov %vm16836_vm0  ;;  %16839 = vst [vmem:[#allocation73_spill] sm:$0xff] %v13795_v5  ;;  %v1381_v57 = vsel %vm13781_vm3, %v13785_v8, 0.0  ;;  %v1405_v29 = vpack.c.bf16 %v1379_v36, %v13790_v55  ;;  %v191_v51 = vadd.s32 152, %v13411_v7  ;;  %v13823_v36 = vld [vmem:[#allocation2 + $0x89] sm:$0xff]  ;;  %v13834_v55 = vld [vmem:[#allocation2 + $0xa1] sm:$0xff] }
  0xc7   : > { %16834 = vst [vmem:[#allocation70_spill] sm:$0xff] %v16833_v44  ;;  %v16844_v43 = vmov 0  ;;  %v13813_v44 = vld [vmem:[#allocation2 + $0x91] sm:$0xff]  ;;  %v193_v30 = vadd.s32 168, %v13411_v7  ;;  %vm16848_vm3 = vcmask 31744   ;;  %16851 = vst [vmem:[#allocation79_spill] sm:$0xff] %v13823_v36 }
  0xc8   : > { %16847 = vst [vmem:[#allocation77_spill] sm:$0xff] %v13813_v44  ;;  %vm16849_vm2 = vmmov %vm16848_vm3 }
  0xc9   : > { %16855 = vst [vmem:[#allocation81_spill] sm:$0xff] %v13834_v55 }
  0xcb   : > { %11419 = vmatmul.mubr.msk.bf16.gmra.mrb[4].mxu0 %vm16836_vm0, %v1403_v56  ;;  %v1406_v56 = vpack.c.bf16 %v1381_v57, %v13795_v5  ;;  %vm13802_vm0 = vcmp.le.s32.totalorder %v313_v63, 14  ;;  %v13818_v63 = vld [vmem:[#allocation2 + $0x79] sm:$0xff]  ;;  %v341_v57 = vand.u32 15, %v191_v51  ;;  %v355_v5 = vand.u32 15, %v193_v30 }
  0xcc   : > { %11422 = vmatprep.mubr.msk.bf16.mxu0 %vm16837_vm1, %v1404_v61  ;;  %v16840_v61 = vmov 0  ;;  %vm13809_vm1 = vcmp.le.s32.totalorder %v327_v2, 14  ;;  %16850 = vst [vmem:[#allocation78_spill] sm:$0xff] %v13818_v63  ;;  %v1383_v14 = vsel %vm13802_vm0, %v13806_v3, 0.0  ;;  %v16856_v3 = vmov 0  ;;  %v13846_v30 = vld [vmem:[#allocation2 + $0x99] sm:$0xff] }
  0xcd   : > { %v16841_v61 = vsel %vm13802_vm0, 4294967295, %v16840_v61  ;;  %v16845_v43 = vsel %vm13809_vm1, 4294967295, %v16844_v43  ;;  %v1385_v2 = vsel %vm13809_vm1, %v13813_v44, 0.0  ;;  %v1407_v8 = vpack.c.bf16 %v1383_v14, %v13818_v63  ;;  %16862 = vst [vmem:[#allocation84_spill] sm:$0xff] %v13846_v30  ;;  %v13862_v63 = vld [vmem:[#allocation2 + $0xc1] sm:$0xff] }
  0xce   : > { %16842 = vst [vmem:[#allocation74_spill] sm:$0xff] %v16841_v61  ;;  %16846 = vst [vmem:[#allocation76_spill] sm:$0xff] %v16845_v43  ;;  %v195_v61 = vadd.s32 184, %v13411_v7  ;;  %v13841_v43 = vld [vmem:[#allocation2 + $0xb1] sm:$0xff]  ;;  %v197_v51 = vadd.s32 200, %v13411_v7  ;;  %vm16860_vm1 = vcmask 31744  }
  0xcf   : > { %16859 = vst [vmem:[#allocation83_spill] sm:$0xff] %v13841_v43  ;;  %vm16861_vm0 = vmmov %vm16860_vm1 }
  0xd0   : > { %16867 = vst [vmem:[#allocation87_spill] sm:$0xff] %v13862_v63 }
  0xd3   : > { %11423 = vmatmul.mubr.msk.bf16.gmra.mrb[8].mxu0 %vm16848_vm3, %v1405_v29  ;;  %v1408_v29 = vpack.c.bf16 %v1385_v2, %v13823_v36  ;;  %vm13830_vm3 = vcmp.le.s32.totalorder %v341_v57, 14  ;;  %v13851_v2 = vld [vmem:[#allocation2 + $0xa9] sm:$0xff]  ;;  %v369_v57 = vand.u32 15, %v195_v61  ;;  %v383_v36 = vand.u32 15, %v197_v51  ;;  %v13874_v51 = vld [vmem:[#allocation2 + $0xb9] sm:$0xff] }
  0xd4   : > { %11426 = vmatprep.mubr.msk.bf16.mxu0 %vm16849_vm2, %v1406_v56  ;;  %v16852_v56 = vmov 0  ;;  %vm13837_vm2 = vcmp.le.s32.totalorder %v355_v5, 14  ;;  %v1387_v14 = vsel %vm13830_vm3, %v13834_v55, 0.0  ;;  %16863 = vst [vmem:[#allocation85_spill] sm:$0xff] %v13851_v2  ;;  %v16868_v55 = vmov 0 }
  0xd5   : > { %v16853_v56 = vsel %vm13830_vm3, 4294967295, %v16852_v56  ;;  %v16857_v3 = vsel %vm13837_vm2, 4294967295, %v16856_v3  ;;  %v1389_v5 = vsel %vm13837_vm2, %v13841_v43, 0.0  ;;  %v1409_v44 = vpack.c.bf16 %v1387_v14, %v13846_v30  ;;  %v13890_v30 = vld [vmem:[#allocation2 + $0xe1] sm:$0xff] }
  0xd6   : > { %16854 = vst [vmem:[#allocation80_spill] sm:$0xff] %v16853_v56  ;;  %16858 = vst [vmem:[#allocation82_spill] sm:$0xff] %v16857_v3  ;;  %v199_v56 = vadd.s32 216, %v13411_v7  ;;  %v13869_v3 = vld [vmem:[#allocation2 + $0xd1] sm:$0xff]  ;;  %v201_v61 = vadd.s32 232, %v13411_v7  ;;  %vm16871_vm2 = vcmask 31744  }
  0xd7   : > { %vm16872_vm3 = vmmov %vm16871_vm2 }
  0xdb   : > { %11427 = vmatmul.mubr.msk.bf16.gmra.mrb[12].mxu0 %vm16860_vm1, %v1407_v8  ;;  %v1410_v8 = vpack.c.bf16 %v1389_v5, %v13851_v2  ;;  %vm13858_vm1 = vcmp.le.s32.totalorder %v369_v57, 14  ;;  %v13879_v5 = vld [vmem:[#allocation2 + $0xc9] sm:$0xff]  ;;  %v397_v57 = vand.u32 15, %v199_v56  ;;  %v411_v2 = vand.u32 15, %v201_v61  ;;  %v13901_v56 = vld [vmem:[#allocation2 + $0xd9] sm:$0xff] }
  0xdc   : > { %11430 = vmatprep.mubr.msk.bf16.mxu0 %vm16861_vm0, %v1408_v29  ;;  %v16864_v29 = vmov 0  ;;  %vm13865_vm0 = vcmp.le.s32.totalorder %v383_v36, 14  ;;  %v1391_v14 = vsel %vm13858_vm1, %v13862_v63, 0.0  ;;  %v16876_v63 = vmov 0 }
  0xdd   : > { %v16865_v29 = vsel %vm13858_vm1, 4294967295, %v16864_v29  ;;  %v16869_v55 = vsel %vm13865_vm0, 4294967295, %v16868_v55  ;;  %v1393_v36 = vsel %vm13865_vm0, %v13869_v3, 0.0  ;;  %v1411_v43 = vpack.c.bf16 %v1391_v14, %v13874_v51  ;;  %v13906_v14 = vld [vmem:[#allocation2 + $0xe9] sm:$0xff] }
  0xde   : > { %16866 = vst [vmem:[#allocation86_spill] sm:$0xff] %v16865_v29  ;;  %16870 = vst [vmem:[#allocation88_spill] sm:$0xff] %v16869_v55  ;;  %v203_v29 = vadd.s32 248, %v13411_v7  ;;  %v13897_v55 = vld [vmem:[#allocation2 + $0xf1] sm:$0xff]  ;;  %vm16879_vm0 = vcmask 31744  }
  0xdf   : > { %vm16880_vm1 = vmmov %vm16879_vm0 }
  0xe0   : > { %vm16886_vm4 = vmmov %vm16880_vm1 }
  0xe3   : > { %11431 = vmatmul.mubr.msk.bf16.gmra.mrb[16].mxu0 %vm16871_vm2, %v1409_v44  ;;  %v1412_v44 = vpack.c.bf16 %v1393_v36, %v13879_v5  ;;  %vm13886_vm2 = vcmp.le.s32.totalorder %v397_v57, 14  ;;  %v425_v36 = vand.u32 15, %v203_v29 }
  0xe4   : > { %11434 = vmatprep.mubr.msk.bf16.mxu0 %vm16872_vm3, %v1410_v8  ;;  %v16873_v8 = vmov 0  ;;  %vm13893_vm3 = vcmp.le.s32.totalorder %v411_v2, 14  ;;  %v1395_v61 = vsel %vm13886_vm2, %v13890_v30, 0.0 }
  0xe5   : > { %v16874_v8 = vsel %vm13886_vm2, 4294967295, %v16873_v8  ;;  %v16877_v63 = vsel %vm13893_vm3, 4294967295, %v16876_v63  ;;  %v1397_v2 = vsel %vm13893_vm3, %v13897_v55, 0.0  ;;  %v1413_v57 = vpack.c.bf16 %v1395_v61, %v13901_v56  ;;  %vm16884_vm2 = vmmov %vm16880_vm1 }
  0xe6   : > { %16875 = vst [vmem:[#allocation89_spill] sm:$0xff] %v16874_v8  ;;  %16878 = vst [vmem:[#allocation90_spill] sm:$0xff] %v16877_v63  ;;  %v1414_v7 = vpack.c.bf16 %v1397_v2, %v13906_v14  ;;  %v13921_v8 = vld [vmem:[#allocation2 + $0xf9] sm:$0xff]  ;;  %v1696_v2 = vsel %vm13455_vm5, %v13491_v4, 0.0 }
  0xe7   : > { %vm16885_vm3 = vmmov %vm16880_vm1 }
  0xeb   : > { %11435 = vmatmul.mubr.msk.bf16.gmra.mrb[20].mxu0 %vm16879_vm0, %v1411_v43  ;;  %vm13913_vm0 = vcmp.le.s32.totalorder %v425_v36, 14  ;;  %v16881_v43 = vmov 0  ;;  %v1727_v36 = vpack.c.bf16 %v13509_v18, %v1696_v2 }
  0xec   : > { %11438 = vmatprep.mubr.msk.bf16.mxu0 %vm16880_vm1, %v1412_v44  ;;  %v16882_v43 = vsel %vm13913_vm0, 4294967295, %v16881_v43  ;;  %v13917_v44 = vld [vmem:[#allocation2 + $0x101] sm:$0xff] }
  0xed   : > { %16883 = vst [vmem:[#allocation91_spill] sm:$0xff] %v16882_v43  ;;  %v1399_v29 = vsel %vm13913_vm0, %v13917_v44, 0.0  ;;  %v2363_v43 = vld [vmem:[#allocation10 + $0xa] sm:$0x3] }
  0xee   : > { %v1415_v61 = vpack.c.bf16 %v1399_v29, %v13921_v8 }
  0xf3   : > { %11439 = vmatmul.mubr.msk.bf16.gmra.mrb[24].mxu0 %vm16880_vm1, %v1413_v57 }
  0xf4   : > { %11442 = vmatprep.mubr.msk.bf16.mxu0 %vm16884_vm2, %v1414_v7  ;;  %v1698_v7 = vsel %vm13459_vm6, %v13517_v23, 0.0  ;;  %vm16887_vm2 = vcmask 1041408  }
  0xf5   : > { %v1728_v57 = vpack.c.bf16 %v13533_v33, %v1698_v7  ;;  %v2087_v29 = vsel %vm16887_vm2, %v13756_v62, 0  ;;  %v1704_v7 = vsel %vm13522_vm9, %v13549_v45, 0.0 }
  0xfb   : > { %11443 = vmatmul.mubr.msk.bf16.gmra.mrb[28].mxu0 %vm16885_vm3, %v1415_v61  ;;  %vm16888_vm3 = vmmov %vm16880_vm1  ;;  %v1702_v61 = vsel %vm13498_vm8, %v13546_v38, 0.0 }
  0xfc   : > { %11448 = vmatprep.mubr.msk.bf16.mxu0 %vm16886_vm4, %v13515_v22  ;;  %vm16889_vm4 = vmmov %vm16880_vm1  ;;  %v1700_v22 = vsel %vm13493_vm7, %v13519_v26, 0.0  ;;  %v1730_v62 = vpack.c.bf16 %v13561_v48, %v1702_v61  ;;  %v1710_v61 = vsel %vm13556_vm12, %v13598_v58, 0.0 }
  0xfd   : > { %vm16890_vm1 = vmmov %vm16887_vm2  ;;  %v1729_v2 = vpack.c.bf16 %v13539_v32, %v1700_v22  ;;  %v1708_v22 = vsel %vm13552_vm11, %v13575_v60, 0.0 }
  0xfe   : > { %vm16891_vm2 = vmmov %vm16888_vm3 }
 0x103   : > { %11449 = vmatmul.mubr.msk.bf16.vlgmr.msra.gmra.mrb[0].mxu0 %vm16888_vm3, %v1727_v36  ;;  %vm16892_vm3 = vmmov %vm16891_vm2  ;;  %v1706_v36 = vsel %vm13528_vm10, %v13572_v53, 0.0 }
 0x104   : > { %11481 = vmatpush3.bf16.msra.mxu0 %v2087_v29  ;;  %11452 = vmatprep.mubr.msk.bf16.mxu0 %vm16889_vm4, %v1728_v57  ;;  %v1731_v57 = vpack.c.bf16 %v13567_v50, %v1704_v7  ;;  %v1732_v29 = vpack.c.bf16 %v13587_v16, %v1706_v36  ;;  %vm16893_vm4 = vmmov %vm16891_vm2  ;;  %v1712_v7 = vsel %vm13578_vm13, %v13601_v35, 0.0  ;;  %v1714_v36 = vsel %vm13582_vm14, %v13624_v0, 0.0 }
 0x105   : > { %12811 = vmatprep.subr.msk.bf16.mxu0 %vm16890_vm1, %v2363_v43  ;;  %vm16894_vm1 = vmmov %vm16891_vm2 }
 0x106   : > { %vm16900_vm14 = vmmov %vm16894_vm1 }
 0x10b   : > { %11453 = vmatmul.mubr.msk.bf16.gmra.mrb[4].mxu0 %vm16891_vm2, %v1729_v2  ;;  %v1733_v2 = vpack.c.bf16 %v13593_v24, %v1708_v22  ;;  %vm16895_vm2 = vmmov %vm16894_vm1  ;;  %v1716_v22 = vsel %vm13604_vm15, %v13627_v20, 0.0 }
 0x10c   : > { %11456 = vmatprep.mubr.msk.bf16.mxu0 %vm16892_vm3, %v1730_v62  ;;  %v1734_v62 = vpack.c.bf16 %v13613_v49, %v1710_v61  ;;  %vm16896_vm3 = vmmov %vm16894_vm1 }
 0x113   : > { %11457 = vmatmul.mubr.msk.bf16.gmra.mrb[8].mxu0 %vm16893_vm4, %v1731_v57  ;;  %v1735_v57 = vpack.c.bf16 %v13619_v54, %v1712_v7  ;;  %vm16897_vm4 = vmmov %vm16894_vm1 }
 0x114   : > { %11460 = vmatprep.mubr.msk.bf16.mxu0 %vm16894_vm1, %v1732_v29  ;;  %v1736_v29 = vpack.c.bf16 %v13631_v27, %v1714_v36 }
 0x11b   : > { %11461 = vmatmul.mubr.msk.bf16.gmra.mrb[12].mxu0 %vm16895_vm2, %v1733_v2  ;;  %vm16898_vm2 = vnez %v16778_v46  ;;  %v1737_v2 = vpack.c.bf16 %v13637_v21, %v1716_v22  ;;  %v14001_v46 = vld [vmem:[#allocation2 + $0x107] sm:$0xff]  ;;  %v14005_v22 = vld [vmem:[#allocation2 + $0x10f] sm:$0xff] }
 0x11c   : > { %11464 = vmatprep.mubr.msk.bf16.mxu0 %vm16896_vm3, %v1734_v62  ;;  %v1718_v61 = vsel %vm16898_vm2, %v13650_v15, 0.0  ;;  %vm16899_vm3 = vmmov %vm16894_vm1  ;;  %16903 = vst [vmem:[#allocation92_spill] sm:$0xff] %v14001_v46 }
 0x11d   : > { %v1738_v62 = vpack.c.bf16 %v13666_v52, %v1718_v61  ;;  %vm16904_vm2 = vmmov %vm16899_vm3  ;;  %16906 = vst [vmem:[#allocation93_spill] sm:$0xff] %v14005_v22 }
 0x11e   : > { %vm16905_vm15 = vmmov %vm16904_vm2 }
 0x123   : > { %11465 = vmatmul.mubr.msk.bf16.gmra.mrb[16].mxu0 %vm16897_vm4, %v1735_v57  ;;  %vm16901_vm4 = vnez %v16782_v17  ;;  %v16950_v17 = vld [vmem:[#allocation61_spill] sm:$0xff] }
 0x124   : > { %11468 = vmatprep.mubr.msk.bf16.mxu0 %vm16894_vm1, %v1736_v29  ;;  %v1720_v7 = vsel %vm16901_vm4, %v13659_v39, 0.0  ;;  %vm16902_vm1 = vnez %v16786_v19  ;;  %vm16910_vm4 = vcmask 1041408   ;;  %v16948_v19 = vld [vmem:[#allocation58_spill] sm:$0xff] }
 0x125   : > { %v1722_v36 = vsel %vm16902_vm1, %v13684_v11, 0.0  ;;  %v1739_v57 = vpack.c.bf16 %v13671_v1, %v1720_v7  ;;  %vm16909_vm1 = vmmov %vm16904_vm2  ;;  %v2689_v7 = vld [vmem:[#allocation10 + $0xc] sm:$0x3] }
 0x126   : > { %v1740_v29 = vpack.c.bf16 %v13699_v59, %v1722_v36  ;;  %v16912_v36 = vld [vmem:[#allocation19_spill] sm:$0xff]  ;;  %vm16914_vm13 = vmmov %vm16910_vm4 }
 0x127   : > { %vm16925_vm12 = vmmov %vm16909_vm1 }
 0x12b   : > { %11469 = vmatmul.mubr.msk.bf16.gmra.mrb[20].mxu0 %vm16899_vm3, %v1737_v2  ;;  %vm16908_vm3 = vmmov %vm16904_vm2 }
 0x12c   : > { %11472 = vmatprep.mubr.msk.bf16.mxu0 %vm16900_vm14, %v1738_v62  ;;  %vm16907_vm14 = vnez %v16790_v13  ;;  %v2413_v62 = vsel %vm16910_vm4, %v2363_v43, 0  ;;  %vm16921_vm4 = vmmov %vm16909_vm1  ;;  %v16922_v43 = vld [vmem:[#allocation24_spill] sm:$0xff]  ;;  %v16938_v13 = vld [vmem:[#allocation52_spill] sm:$0xff] }
 0x12d   : > { %v1724_v61 = vsel %vm16907_vm14, %v14001_v46, 0.0  ;;  %vm16916_vm14 = vmmov %vm16909_vm1 }
 0x12e   : > { %v1741_v2 = vpack.c.bf16 %v14005_v22, %v1724_v61  ;;  %v16919_v61 = vld [vmem:[#allocation22_spill] sm:$0xff] }
 0x133   : > { %11473 = vmatmul.mubr.msk.bf16.gmra.mrb[24].mxu0 %vm16904_vm2, %v1739_v57  ;;  %vm16911_vm2 = vmmov %vm16909_vm1  ;;  %v16915_v57 = vld [vmem:[#allocation20_spill] sm:$0xff] }
 0x134   : > { %11476 = vmatprep.mubr.msk.bf16.mxu0 %vm16905_vm15, %v1740_v29  ;;  %vm16913_vm15 = vmmov %vm16909_vm1  ;;  %v16917_v29 = vld [vmem:[#allocation21_spill] sm:$0xff] }
 0x13b   : > { %11477 = vmatmul.mubr.msk.bf16.gmra.mrb[28].mxu0 %vm16908_vm3, %v1741_v2  ;;  %vm16918_vm3 = vmmov %vm16909_vm1  ;;  %v16926_v2 = vld [vmem:[#allocation26_spill] sm:$0xff] }
 0x13c   : > { %11482 = vmatprep.mubr.msk.bf16.mxu0 %vm16909_vm1, %v13356_v34  ;;  %v16920_v34 = vld [vmem:[#allocation23_spill] sm:$0xff] }
 0x143   : > { %11483 = vmatmul.mubr.msk.bf16.vlgmr.msra.gmra.mrb[0].mxu0 %vm16911_vm2, %v13359_v37  ;;  %vm16923_vm2 = vmmov %vm16909_vm1  ;;  %v16924_v37 = vld [vmem:[#allocation25_spill] sm:$0xff] }
 0x144   : > { %11515 = vmatpush3.bf16.msra.mxu0 %v2413_v62  ;;  %11486 = vmatprep.mubr.msk.bf16.mxu0 %vm16913_vm15, %v16912_v36  ;;  %v16928_v62 = vld [vmem:[#allocation28_spill] sm:$0xff]  ;;  %v16930_v36 = vld [vmem:[#allocation29_spill] sm:$0xff]  ;;  %vm16931_vm15 = vmmov %vm16909_vm1 }
 0x145   : > { %12812 = vmatprep.subr.msk.bf16.mxu0 %vm16914_vm13, %v2689_v7  ;;  %vm16927_vm13 = vmmov %vm16909_vm1 }
 0x14b   : > { %11487 = vmatmul.mubr.msk.bf16.gmra.mrb[4].mxu0 %vm16916_vm14, %v16915_v57  ;;  %vm16929_vm14 = vmmov %vm16909_vm1  ;;  %v16932_v57 = vld [vmem:[#allocation34_spill] sm:$0xff] }
 0x14c   : > { %11490 = vmatprep.mubr.msk.bf16.mxu0 %vm16918_vm3, %v16917_v29  ;;  %vm16933_vm3 = vmmov %vm16909_vm1  ;;  %v16934_v29 = vld [vmem:[#allocation35_spill] sm:$0xff] }
 0x153   : > { %11491 = vmatmul.mubr.msk.bf16.gmra.mrb[8].mxu0 %vm16909_vm1, %v16919_v61  ;;  %v16935_v61 = vld [vmem:[#allocation36_spill] sm:$0xff] }
 0x154   : > { %11494 = vmatprep.mubr.msk.bf16.mxu0 %vm16921_vm4, %v16920_v34  ;;  %vm16936_vm4 = vmmov %vm16909_vm1  ;;  %v2018_v34 = vld [vmem:[#allocation2 + $0x108] sm:$0xff] }
 0x15b   : > { %11495 = vmatmul.mubr.msk.bf16.gmra.mrb[12].mxu0 %vm16923_vm2, %v16922_v43  ;;  %v2019_v43 = vld [vmem:[#allocation2 + $0x110] sm:$0xff]  ;;  %vm16942_vm2 = vmmov %vm16909_vm1 }
 0x15c   : > { %11498 = vmatprep.mubr.msk.bf16.mxu0 %vm16925_vm12, %v16924_v37  ;;  %v16937_v37 = vld [vmem:[#allocation56_spill] sm:$0xff]  ;;  %vm16939_vm12 = vnez %v16938_v13  ;;  %v14047_v22 = vpack.c.bf16 %v2019_v43, %v2018_v34 }
 0x15e   : > { %16940 = vst [vmem:[#allocation19_spill] sm:$0xff] %v14047_v22 }
 0x163   : > { %11499 = vmatmul.mubr.msk.bf16.gmra.mrb[16].mxu0 %vm16927_vm13, %v16926_v2  ;;  %v2315_v2 = vsel %vm16939_vm12, %v16937_v37, 0.0  ;;  %vm16943_vm13 = vmmov %vm16909_vm1  ;;  %v16951_v37 = vld [vmem:[#allocation66_spill] sm:$0xff] }
 0x164   : > { %11502 = vmatprep.mubr.msk.bf16.mxu0 %vm16929_vm14, %v16928_v62  ;;  %v16941_v62 = vld [vmem:[#allocation60_spill] sm:$0xff] }
 0x165   : > { %v2346_v59 = vpack.c.bf16 %v2315_v2, %v16941_v62  ;;  %v2983_v2 = vld [vmem:[#allocation10 + $0xe] sm:$0x3] }
 0x166   : > { %v16955_v62 = vld [vmem:[#allocation62_spill] sm:$0xff] }
 0x16b   : > { %11503 = vmatmul.mubr.msk.bf16.gmra.mrb[20].mxu0 %vm16931_vm15, %v16930_v36  ;;  %v16944_v36 = vld [vmem:[#allocation59_spill] sm:$0xff]  ;;  %vm16949_vm15 = vnez %v16948_v19 }
 0x16c   : > { %11506 = vmatprep.mubr.msk.bf16.mxu0 %vm16933_vm3, %v16932_v57  ;;  %v16945_v57 = vld [vmem:[#allocation55_spill] sm:$0xff]  ;;  %vm16952_vm3 = vcmask 1041408  }
 0x16d   : > { %vm16946_vm14 = vnez %v16945_v57  ;;  %v2739_v43 = vsel %vm16952_vm3, %v2689_v7, 0 }
 0x173   : > { %11507 = vmatmul.mubr.msk.bf16.gmra.mrb[24].mxu0 %vm16909_vm1, %v16934_v29  ;;  %v2317_v29 = vsel %vm16946_vm14, %v16944_v36, 0.0  ;;  %v16957_v36 = vld [vmem:[#allocation69_spill] sm:$0xff] }
 0x174   : > { %11510 = vmatprep.mubr.msk.bf16.mxu0 %vm16936_vm4, %v16935_v61  ;;  %v16947_v61 = vld [vmem:[#allocation63_spill] sm:$0xff]  ;;  %v2347_v13 = vpack.c.bf16 %v2317_v29, %v16950_v17  ;;  %vm16953_vm4 = vmmov %vm16909_vm1  ;;  %v16971_v17 = vld [vmem:[#allocation78_spill] sm:$0xff] }
 0x175   : > { %v2319_v46 = vsel %vm16949_vm15, %v16947_v61, 0.0  ;;  %vm16960_vm15 = vmmov %vm16952_vm3  ;;  %v16961_v29 = vld [vmem:[#allocation67_spill] sm:$0xff] }
 0x176   : > { %v2348_v34 = vpack.c.bf16 %v2319_v46, %v16951_v37  ;;  %v16962_v37 = vld [vmem:[#allocation72_spill] sm:$0xff]  ;;  %vm16963_vm3 = vmmov %vm16909_vm1 }
 0x17b   : > { %11511 = vmatmul.mubr.msk.bf16.gmra.mrb[28].mxu0 %vm16942_vm2, %v14047_v22  ;;  %vm16956_vm2 = vnez %v16955_v62  ;;  %v16958_v22 = vld [vmem:[#allocation64_spill] sm:$0xff]  ;;  %v16967_v62 = vld [vmem:[#allocation75_spill] sm:$0xff] }
 0x17c   : > { %11516 = vmatprep.mubr.msk.bf16.mxu0 %vm16943_vm13, %v2346_v59  ;;  %v16954_v59 = vld [vmem:[#allocation65_spill] sm:$0xff]  ;;  %vm16959_vm13 = vnez %v16958_v22 }
 0x17d   : > { %v2321_v57 = vsel %vm16956_vm2, %v16954_v59, 0.0  ;;  %v2323_v19 = vsel %vm16959_vm13, %v16957_v36, 0.0  ;;  %v16968_v59 = vld [vmem:[#allocation70_spill] sm:$0xff]  ;;  %v16970_v22 = vld [vmem:[#allocation73_spill] sm:$0xff]  ;;  %vm16973_vm13 = vmmov %vm16909_vm1 }
 0x17e   : > { %v2349_v46 = vpack.c.bf16 %v2321_v57, %v16961_v29  ;;  %v2350_v7 = vpack.c.bf16 %v2323_v19, %v16962_v37  ;;  %vm16969_vm2 = vnez %v16968_v59  ;;  %v16974_v19 = vld [vmem:[#allocation77_spill] sm:$0xff]  ;;  %v16975_v57 = vld [vmem:[#allocation74_spill] sm:$0xff]  ;;  %v16978_v37 = vld [vmem:[#allocation76_spill] sm:$0xff] }
 0x17f   : > { %v2327_v61 = vsel %vm16969_vm2, %v16967_v62, 0.0  ;;  %v16981_v59 = vld [vmem:[#allocation84_spill] sm:$0xff]  ;;  %vm16982_vm2 = vmmov %vm16973_vm13 }
 0x180   : > { %v2352_v11 = vpack.c.bf16 %v2327_v61, %v16971_v17  ;;  %v16984_v61 = vld [vmem:[#allocation83_spill] sm:$0xff]  ;;  %v16988_v17 = vld [vmem:[#allocation82_spill] sm:$0xff] }
 0x183   : > { %11517 = vmatmul.mubr.msk.bf16.vlgmr.msra.gmra.mrb[0].mxu0 %vm16909_vm1, %v2347_v13  ;;  %v16964_v13 = vld [vmem:[#allocation71_spill] sm:$0xff] }
 0x184   : > { %11549 = vmatpush3.bf16.msra.mxu0 %v2739_v43  ;;  %11520 = vmatprep.mubr.msk.bf16.mxu0 %vm16953_vm4, %v2348_v34  ;;  %v16965_v34 = vld [vmem:[#allocation68_spill] sm:$0xff] }
 0x185   : > { %12813 = vmatprep.subr.msk.bf16.mxu0 %vm16960_vm15, %v2983_v2  ;;  %vm16966_vm4 = vnez %v16965_v34  ;;  %vm16972_vm15 = vmmov %vm16909_vm1 }
 0x186   : > { %v2325_v43 = vsel %vm16966_vm4, %v16964_v13, 0.0  ;;  %v16980_v13 = vld [vmem:[#allocation79_spill] sm:$0xff]  ;;  %vm16983_vm4 = vmmov %vm16982_vm2 }
 0x187   : > { %v2351_v36 = vpack.c.bf16 %v2325_v43, %v16970_v22  ;;  %v16987_v43 = vld [vmem:[#allocation87_spill] sm:$0xff] }
 0x18b   : > { %11521 = vmatmul.mubr.msk.bf16.gmra.mrb[4].mxu0 %vm16963_vm3, %v2349_v46  ;;  %vm16976_vm3 = vnez %v16975_v57 }
 0x18c   : > { %11524 = vmatprep.mubr.msk.bf16.mxu0 %vm16909_vm1, %v2350_v7  ;;  %v2329_v46 = vsel %vm16976_vm3, %v16974_v19, 0.0  ;;  %v16977_v7 = vld [vmem:[#allocation81_spill] sm:$0xff]  ;;  %vm16979_vm1 = vnez %v16978_v37 }
 0x18d   : > { %v2331_v34 = vsel %vm16979_vm1, %v16977_v7, 0.0  ;;  %v2353_v29 = vpack.c.bf16 %v2329_v46, %v16980_v13  ;;  %v16990_v19 = vld [vmem:[#allocation85_spill] sm:$0xff]  ;;  %vm16991_vm1 = vmmov %vm16982_vm2 }
 0x18e   : > { %v2354_v62 = vpack.c.bf16 %v2331_v34, %v16981_v59  ;;  %vm16992_vm3 = vmmov %vm16991_vm1  ;;  %v16995_v34 = vld [vmem:[#allocation88_spill] sm:$0xff] }
 0x193   : > { %11525 = vmatmul.mubr.msk.bf16.gmra.mrb[8].mxu0 %vm16972_vm15, %v2351_v36  ;;  %v16985_v36 = vld [vmem:[#allocation80_spill] sm:$0xff] }
 0x194   : > { %11528 = vmatprep.mubr.msk.bf16.mxu0 %vm16973_vm13, %v2352_v11  ;;  %vm16986_vm15 = vnez %v16985_v36  ;;  %vm16989_vm13 = vnez %v16988_v17 }
 0x195   : > { %v2333_v11 = vsel %vm16986_vm15, %v16984_v61, 0.0  ;;  %v2335_v57 = vsel %vm16989_vm13, %v16987_v43, 0.0  ;;  %vm16997_vm13 = vmmov %vm16991_vm1 }
 0x196   : > { %v2355_v22 = vpack.c.bf16 %v2333_v11, %v16990_v19  ;;  %v2356_v37 = vpack.c.bf16 %v2335_v57, %v13874_v51  ;;  %vm16998_vm15 = vmmov %vm16991_vm1 }
 0x19b   : > { %11529 = vmatmul.mubr.msk.bf16.gmra.mrb[12].mxu0 %vm16982_vm2, %v2353_v29  ;;  %v16993_v29 = vld [vmem:[#allocation86_spill] sm:$0xff] }
 0x19c   : > { %11532 = vmatprep.mubr.msk.bf16.mxu0 %vm16983_vm4, %v2354_v62  ;;  %vm16994_vm2 = vnez %v16993_v29  ;;  %vm16996_vm4 = vnez %v16995_v34  ;;  %v14123_v29 = vld [vmem:[#allocation2 + $0x111] sm:$0xff] }
 0x19d   : > { %v2337_v62 = vsel %vm16994_vm2, %v13869_v3, 0.0  ;;  %v2339_v46 = vsel %vm16996_vm4, %v13890_v30, 0.0  ;;  %vm17002_vm4 = vmmov %vm16997_vm13 }
 0x19e   : > { %v2357_v36 = vpack.c.bf16 %v2337_v62, %v13879_v5  ;;  %v2358_v17 = vpack.c.bf16 %v2339_v46, %v13901_v56  ;;  %vm17003_vm2 = vmmov %vm17002_vm4  ;;  %v2345_v62 = vsel %vm13913_vm0, %v14123_v29, 0.0  ;;  %v17005_v46 = vld [vmem:[#allocation33_spill] sm:$0xff] }
 0x1a3   : > { %11533 = vmatmul.mubr.msk.bf16.gmra.mrb[16].mxu0 %vm16991_vm1, %v2355_v22  ;;  %v16999_v22 = vld [vmem:[#allocation89_spill] sm:$0xff] }
 0x1a4   : > { %11536 = vmatprep.mubr.msk.bf16.mxu0 %vm16992_vm3, %v2356_v37  ;;  %vm17000_vm1 = vnez %v16999_v22  ;;  %vm17001_vm3 = vnez %v16877_v63 }
 0x1a5   : > { %v2341_v37 = vsel %vm17000_vm1, %v13897_v55, 0.0  ;;  %v2343_v57 = vsel %vm17001_vm3, %v13917_v44, 0.0  ;;  %vm17008_vm3 = vmmov %vm17003_vm2 }
 0x1a6   : > { %v2359_v11 = vpack.c.bf16 %v2341_v37, %v13906_v14  ;;  %v2360_v34 = vpack.c.bf16 %v2343_v57, %v13921_v8 }
 0x1ab   : > { %11537 = vmatmul.mubr.msk.bf16.gmra.mrb[20].mxu0 %vm16997_vm13, %v2357_v36  ;;  %v14127_v36 = vld [vmem:[#allocation2 + $0x109] sm:$0xff]  ;;  %vm17007_vm13 = vmmov %vm17003_vm2 }
 0x1ac   : > { %11540 = vmatprep.mubr.msk.bf16.mxu0 %vm16998_vm15, %v2358_v17  ;;  %vm17006_vm15 = vnez %v17005_v46  ;;  %v2361_v37 = vpack.c.bf16 %v2345_v62, %v14127_v36  ;;  %v3309_v46 = vld [vmem:[#allocation10 + $0x10] sm:$0x3] }
 0x1ad   : > { %v2640_v63 = vsel %vm17006_vm15, %v13491_v4, 0.0 }
 0x1ae   : > { %v2672_v57 = vpack.c.bf16 %v13509_v18, %v2640_v63  ;;  %v2646_v18 = vsel %vm13493_vm7, %v13546_v38, 0.0  ;;  %v2652_v38 = vsel %vm13528_vm10, %v13575_v60, 0.0 }
 0x1af   : > { %v2678_v63 = vpack.c.bf16 %v13593_v24, %v2652_v38  ;;  %v2936_v38 = vld [vmem:[#allocation2 + $0x38] sm:$0xff] }
 0x1b3   : > { %11541 = vmatmul.mubr.msk.bf16.gmra.mrb[24].mxu0 %vm17002_vm4, %v2359_v11  ;;  %v2644_v11 = vsel %vm13459_vm6, %v13519_v26, 0.0  ;;  %vm17010_vm4 = vmmov %vm17008_vm3  ;;  %v2675_v26 = vpack.c.bf16 %v13561_v48, %v2646_v18  ;;  %v2654_v48 = vsel %vm13552_vm11, %v13598_v58, 0.0 }
 0x1b4   : > { %11544 = vmatprep.mubr.msk.bf16.mxu0 %vm17003_vm2, %v2360_v34  ;;  %v2642_v34 = vsel %vm13455_vm5, %v13517_v23, 0.0  ;;  %v2674_v4 = vpack.c.bf16 %v13539_v32, %v2644_v11  ;;  %vm17009_vm2 = vcmask 1041408   ;;  %v2648_v23 = vsel %vm13498_vm8, %v13549_v45, 0.0 }
 0x1b5   : > { %v2673_v17 = vpack.c.bf16 %v13533_v33, %v2642_v34  ;;  %v3033_v62 = vsel %vm17009_vm2, %v2983_v2, 0  ;;  %v2676_v33 = vpack.c.bf16 %v13567_v50, %v2648_v23  ;;  %v2650_v32 = vsel %vm13522_vm9, %v13572_v53, 0.0  ;;  %v17035_v34 = vld [vmem:[#allocation54_spill] sm:$0xff]  ;;  %v2934_v23 = vld [vmem:[#allocation2 + $0x28] sm:$0xff] }
 0x1b6   : > { %v2677_v45 = vpack.c.bf16 %v13587_v16, %v2650_v32  ;;  %v2679_v53 = vpack.c.bf16 %v13613_v49, %v2654_v48  ;;  %v2939_v48 = vld [vmem:[#allocation2 + $0x50] sm:$0xff] }
 0x1bb   : > { %11545 = vmatmul.mubr.msk.bf16.gmra.mrb[28].mxu0 %vm17007_vm13, %v2361_v37  ;;  %vm17011_vm13 = vmmov %vm17008_vm3  ;;  %v17032_v37 = vld [vmem:[#allocation92_spill] sm:$0xff] }
 0x1bc   : > { %11550 = vmatprep.mubr.msk.bf16.mxu0 %vm17008_vm3, %v2672_v57  ;;  %vm17012_vm3 = vmmov %vm17009_vm2  ;;  %v17033_v57 = vld [vmem:[#allocation47_spill] sm:$0xff] }
 0x1bd   : > { %vm17013_vm2 = vmmov %vm17010_vm4 }
 0x1c3   : > { %11551 = vmatmul.mubr.msk.bf16.vlgmr.msra.gmra.mrb[0].mxu0 %vm17010_vm4, %v2673_v17  ;;  %vm17014_vm4 = vmmov %vm17013_vm2 }
 0x1c4   : > { %11583 = vmatpush3.bf16.msra.mxu0 %v3033_v62  ;;  %11554 = vmatprep.mubr.msk.bf16.mxu0 %vm17011_vm13, %v2674_v4  ;;  %vm17015_vm13 = vmmov %vm17013_vm2  ;;  %v17036_v4 = vld [vmem:[#allocation93_spill] sm:$0xff] }
 0x1c5   : > { %12814 = vmatprep.subr.msk.bf16.mxu0 %vm17012_vm3, %v3309_v46  ;;  %vm17016_vm3 = vmmov %vm17013_vm2  ;;  %v2638_v62 = vld [vmem:[#allocation2 + $0x117] sm:$0xff] }
 0x1c6   : > { %vm17019_vm10 = vmmov %vm17016_vm3 }
 0x1cb   : > { %11555 = vmatmul.mubr.msk.bf16.gmra.mrb[4].mxu0 %vm17013_vm2, %v2675_v26  ;;  %vm17017_vm2 = vnez %v16767_v47  ;;  %v2935_v26 = vld [vmem:[#allocation2 + $0x30] sm:$0xff] }
 0x1cc   : > { %11558 = vmatprep.mubr.msk.bf16.mxu0 %vm17014_vm4, %v2676_v33  ;;  %v2656_v50 = vsel %vm17017_vm2, %v13601_v35, 0.0  ;;  %vm17018_vm4 = vmmov %vm17016_vm3  ;;  %v2966_v32 = vpack.c.bf16 %v2935_v26, %v2934_v23  ;;  %v2954_v23 = vld [vmem:[#allocation2 + $0xc8] sm:$0xff]  ;;  %v2955_v26 = vld [vmem:[#allocation2 + $0xd0] sm:$0xff] }
 0x1cd   : > { %v2680_v60 = vpack.c.bf16 %v13619_v54, %v2656_v50  ;;  %vm17022_vm2 = vmmov %vm17018_vm4  ;;  %v17025_v54 = vld [vmem:[#allocation45_spill] sm:$0xff] }
 0x1ce   : > { %vm17023_vm11 = vmmov %vm17022_vm2 }
 0x1d3   : > { %11559 = vmatmul.mubr.msk.bf16.gmra.mrb[8].mxu0 %vm17015_vm13, %v2677_v45  ;;  %vm17020_vm13 = vnez %v16770_v10  ;;  %v2937_v45 = vld [vmem:[#allocation2 + $0x40] sm:$0xff] }
 0x1d4   : > { %11562 = vmatprep.mubr.msk.bf16.mxu0 %vm17016_vm3, %v2678_v63  ;;  %v2658_v16 = vsel %vm17020_vm13, %v13624_v0, 0.0  ;;  %vm17021_vm3 = vnez %v16773_v12  ;;  %vm17028_vm13 = vmmov %vm17022_vm2  ;;  %v2938_v63 = vld [vmem:[#allocation2 + $0x48] sm:$0xff]  ;;  %v2967_v50 = vpack.c.bf16 %v2937_v45, %v2936_v38  ;;  %v2956_v38 = vld [vmem:[#allocation2 + $0xd8] sm:$0xff] }
 0x1d5   : > { %v2660_v24 = vsel %vm17021_vm3, %v13627_v20, 0.0  ;;  %v2681_v58 = vpack.c.bf16 %v13631_v27, %v2658_v16  ;;  %vm17027_vm3 = vmmov %vm17022_vm2  ;;  %v17030_v27 = vld [vmem:[#allocation46_spill] sm:$0xff] }
 0x1d6   : > { %v2682_v35 = vpack.c.bf16 %v13637_v21, %v2660_v24  ;;  %v17029_v21 = vld [vmem:[#allocation50_spill] sm:$0xff] }
 0x1d7   : > { %v2940_v16 = vld [vmem:[#allocation2 + $0x58] sm:$0xff]  ;;  %v2941_v24 = vld [vmem:[#allocation2 + $0x60] sm:$0xff] }
 0x1d8   : > { %v2957_v45 = vld [vmem:[#allocation2 + $0xe0] sm:$0xff] }
 0x1db   : > { %11563 = vmatmul.mubr.msk.bf16.gmra.mrb[12].mxu0 %vm17018_vm4, %v2679_v53  ;;  %vm17024_vm4 = vnez %v16776_v42  ;;  %v2968_v53 = vpack.c.bf16 %v2939_v48, %v2938_v63  ;;  %v2958_v63 = vld [vmem:[#allocation2 + $0xe8] sm:$0xff]  ;;  %v2959_v48 = vld [vmem:[#allocation2 + $0xf0] sm:$0xff] }
 0x1dc   : > { %11566 = vmatprep.mubr.msk.bf16.mxu0 %vm17019_vm10, %v2680_v60  ;;  %v2662_v49 = vsel %vm17024_vm4, %v13650_v15, 0.0  ;;  %vm17026_vm10 = vnez %v17025_v54  ;;  %vm17038_vm4 = vmmov %vm17027_vm3 }
 0x1dd   : > { %v2664_v0 = vsel %vm17026_vm10, %v13659_v39, 0.0  ;;  %v2683_v2 = vpack.c.bf16 %v13666_v52, %v2662_v49  ;;  %vm17037_vm10 = vmmov %vm17027_vm3  ;;  %v2639_v52 = vld [vmem:[#allocation2 + $0x11f] sm:$0xff]  ;;  %v2969_v49 = vpack.c.bf16 %v2941_v24, %v2940_v16 }
 0x1de   : > { %v2684_v20 = vpack.c.bf16 %v13671_v1, %v2664_v0  ;;  %v17039_v1 = vld [vmem:[#allocation49_spill] sm:$0xff]  ;;  %v2961_v16 = vld [vmem:[#allocation2 + $0x100] sm:$0xff] }
 0x1e3   : > { %11567 = vmatmul.mubr.msk.bf16.gmra.mrb[16].mxu0 %vm17022_vm2, %v2681_v58  ;;  %vm17031_vm2 = vnez %v17030_v27  ;;  %v2942_v58 = vld [vmem:[#allocation2 + $0x68] sm:$0xff] }
 0x1e4   : > { %11570 = vmatprep.mubr.msk.bf16.mxu0 %vm17023_vm11, %v2682_v35  ;;  %v2666_v17 = vsel %vm17031_vm2, %v17029_v21, 0.0  ;;  %vm17034_vm11 = vnez %v17033_v57  ;;  %v2943_v35 = vld [vmem:[#allocation2 + $0x70] sm:$0xff]  ;;  %v2946_v21 = vld [vmem:[#allocation2 + $0x88] sm:$0xff]  ;;  %vm17055_vm2 = vmmov %vm17027_vm3 }
 0x1e5   : > { %v2668_v15 = vsel %vm17034_vm11, %v17032_v37, 0.0  ;;  %v2685_v11 = vpack.c.bf16 %v17035_v34, %v2666_v17  ;;  %vm17041_vm11 = vmmov %vm17027_vm3  ;;  %v2970_v0 = vpack.c.bf16 %v2943_v35, %v2942_v58  ;;  %v2947_v17 = vld [vmem:[#allocation2 + $0x90] sm:$0xff]  ;;  %v2949_v34 = vld [vmem:[#allocation2 + $0xa0] sm:$0xff] }
 0x1e6   : > { %v2686_v39 = vpack.c.bf16 %v17036_v4, %v2668_v15  ;;  %v2972_v37 = vpack.c.bf16 %v2947_v17, %v2946_v21  ;;  %v2948_v15 = vld [vmem:[#allocation2 + $0x98] sm:$0xff]  ;;  %v2951_v4 = vld [vmem:[#allocation2 + $0xb0] sm:$0xff] }
 0x1e7   : > { %v17054_v58 = vld [vmem:[#allocation19_spill] sm:$0xff]  ;;  %v2964_v35 = vld [vmem:[#allocation2 + $0x118] sm:$0xff] }
 0x1e8   : > { %v17058_v17 = vld [vmem:[#allocation61_spill] sm:$0xff] }
 0x1eb   : > { %11571 = vmatmul.mubr.msk.bf16.gmra.mrb[20].mxu0 %vm17027_vm3, %v2683_v2  ;;  %v2944_v2 = vld [vmem:[#allocation2 + $0x78] sm:$0xff] }
 0x1ec   : > { %11574 = vmatprep.mubr.msk.bf16.mxu0 %vm17028_vm13, %v2684_v20  ;;  %vm17040_vm13 = vnez %v17039_v1  ;;  %v2945_v20 = vld [vmem:[#allocation2 + $0x80] sm:$0xff] }
 0x1ed   : > { %v2670_v18 = vsel %vm17040_vm13, %v2638_v62, 0.0  ;;  %vm17044_vm13 = vmmov %vm17027_vm3 }
 0x1ee   : > { %v2687_v33 = vpack.c.bf16 %v2639_v52, %v2670_v18  ;;  %v2952_v52 = vld [vmem:[#allocation2 + $0xb8] sm:$0xff]  ;;  %v2953_v18 = vld [vmem:[#allocation2 + $0xc0] sm:$0xff] }
 0x1f3   : > { %11575 = vmatmul.mubr.msk.bf16.gmra.mrb[24].mxu0 %vm17037_vm10, %v2685_v11  ;;  %vm17042_vm10 = vcmask 1041408   ;;  %v2950_v11 = vld [vmem:[#allocation2 + $0xa8] sm:$0xff] }
 0x1f4   : > { %11578 = vmatprep.mubr.msk.bf16.mxu0 %vm17038_vm4, %v2686_v39  ;;  %v3359_v60 = vsel %vm17042_vm10, %v3309_v46, 0  ;;  %vm17043_vm4 = vmmov %vm17027_vm3  ;;  %v2971_v46 = vpack.c.bf16 %v2945_v20, %v2944_v2  ;;  %v2973_v39 = vpack.c.bf16 %v2949_v34, %v2948_v15  ;;  %v2974_v62 = vpack.c.bf16 %v2951_v4, %v2950_v11  ;;  %v17063_v11 = vld [vmem:[#allocation65_spill] sm:$0xff]  ;;  %v17064_v4 = vld [vmem:[#allocation58_spill] sm:$0xff] }
 0x1f5   : > { %vm17046_vm10 = vmmov %vm17027_vm3  ;;  %v12839_v2 = vld [vmem:[%s16469_s3 + $0x38] sm:$0xff]   ;;  %v12840_v15 = vld [vmem:[%s16469_s3 + $0x40] sm:$0xff]  }
 0x1fb   : > { %11579 = vmatmul.mubr.msk.bf16.gmra.mrb[28].mxu0 %vm17027_vm3, %v2687_v33  ;;  %v2975_v33 = vpack.c.bf16 %v2953_v18, %v2952_v52  ;;  %v17067_v18 = vld [vmem:[#allocation67_spill] sm:$0xff] }
 0x1fc   : > { %11584 = vmatprep.mubr.msk.bf16.mxu0 %vm17041_vm11, %v2966_v32  ;;  %vm17045_vm11 = vmmov %vm17027_vm3  ;;  %v2976_v32 = vpack.c.bf16 %v2955_v26, %v2954_v23  ;;  %v17070_v26 = vld [vmem:[#allocation69_spill] sm:$0xff] }
 0x203   : > { %11585 = vmatmul.mubr.msk.bf16.vlgmr.msra.gmra.mrb[0].mxu0 %vm17043_vm4, %v2967_v50  ;;  %vm17047_vm4 = vmmov %vm17027_vm3  ;;  %v2977_v50 = vpack.c.bf16 %v2957_v45, %v2956_v38  ;;  %v17073_v38 = vld [vmem:[#allocation71_spill] sm:$0xff]  ;;  %v17074_v45 = vld [vmem:[#allocation64_spill] sm:$0xff] }
 0x204   : > { %11617 = vmatpush3.bf16.msra.mxu0 %v3359_v60  ;;  %11588 = vmatprep.mubr.msk.bf16.mxu0 %vm17044_vm13, %v2968_v53  ;;  %vm17048_vm13 = vmmov %vm17027_vm3  ;;  %v2978_v53 = vpack.c.bf16 %v2959_v48, %v2958_v63  ;;  %v2960_v60 = vld [vmem:[#allocation2 + $0xf8] sm:$0xff]  ;;  %v17076_v48 = vld [vmem:[#allocation72_spill] sm:$0xff] }
 0x205   : > { %v2979_v24 = vpack.c.bf16 %v2961_v16, %v2960_v60  ;;  %v17080_v16 = vld [vmem:[#allocation75_spill] sm:$0xff] }
 0x20b   : > { %11589 = vmatmul.mubr.msk.bf16.gmra.mrb[4].mxu0 %vm17045_vm11, %v2969_v49  ;;  %vm17049_vm11 = vmmov %vm17027_vm3  ;;  %v2965_v49 = vld [vmem:[#allocation2 + $0x120] sm:$0xff] }
 0x20c   : > { %11592 = vmatprep.mubr.msk.bf16.mxu0 %vm17027_vm3, %v2970_v0  ;;  %v17056_v0 = vld [vmem:[#allocation59_spill] sm:$0xff]  ;;  %v2981_v21 = vpack.c.bf16 %v2965_v49, %v2964_v35  ;;  %v17083_v35 = vld [vmem:[#allocation77_spill] sm:$0xff]  ;;  %v17084_v49 = vld [vmem:[#allocation70_spill] sm:$0xff] }
 0x20d   : > { %v3261_v20 = vsel %vm16939_vm12, %v17056_v0, 0.0 }
 0x213   : > { %11593 = vmatmul.mubr.msk.bf16.gmra.mrb[8].mxu0 %vm17046_vm10, %v2971_v46  ;;  %vm17050_vm10 = vmmov %vm17027_vm3  ;;  %v3292_v46 = vpack.c.bf16 %v3261_v20, %v17058_v17  ;;  %v17086_v20 = vld [vmem:[#allocation78_spill] sm:$0xff] }
 0x214   : > { %11596 = vmatprep.mubr.msk.bf16.mxu0 %vm17047_vm4, %v2972_v37  ;;  %vm17051_vm4 = vmmov %vm17027_vm3  ;;  %v17061_v37 = vld [vmem:[#allocation63_spill] sm:$0xff] }
 0x215   : > { %v3263_v34 = vsel %vm16946_vm14, %v17061_v37, 0.0 }
 0x21b   : > { %11597 = vmatmul.mubr.msk.bf16.gmra.mrb[12].mxu0 %vm17048_vm13, %v2973_v39  ;;  %vm17052_vm13 = vmmov %vm17027_vm3 }
 0x21c   : > { %11600 = vmatprep.mubr.msk.bf16.mxu0 %vm17049_vm11, %v2974_v62  ;;  %vm17053_vm11 = vmmov %vm17027_vm3  ;;  %v17066_v62 = vld [vmem:[#allocation66_spill] sm:$0xff] }
 0x21d   : > { %v3293_v52 = vpack.c.bf16 %v3263_v34, %v17066_v62  ;;  %v17091_v34 = vld [vmem:[#allocation76_spill] sm:$0xff] }
 0x223   : > { %11601 = vmatmul.mubr.msk.bf16.gmra.mrb[16].mxu0 %vm17027_vm3, %v2975_v33  ;;  %vm17059_vm3 = vmmov %vm17055_vm2  ;;  %v17071_v33 = vld [vmem:[#allocation62_spill] sm:$0xff] }
 0x224   : > { %11604 = vmatprep.mubr.msk.bf16.mxu0 %vm17050_vm10, %v2976_v32  ;;  %vm17060_vm10 = vmmov %vm17055_vm2 }
 0x22b   : > { %11605 = vmatmul.mubr.msk.bf16.gmra.mrb[20].mxu0 %vm17051_vm4, %v2977_v50  ;;  %vm17068_vm4 = vmmov %vm17059_vm3 }
 0x22c   : > { %11608 = vmatprep.mubr.msk.bf16.mxu0 %vm17052_vm13, %v2978_v53  ;;  %vm17069_vm13 = vmmov %vm17059_vm3  ;;  %v17077_v53 = vld [vmem:[#allocation73_spill] sm:$0xff] }
 0x22d   : > { %vm17079_vm9 = vmmov %vm17068_vm4 }
 0x233   : > { %11609 = vmatmul.mubr.msk.bf16.gmra.mrb[24].mxu0 %vm17053_vm11, %v2979_v24  ;;  %vm17072_vm11 = vnez %v17071_v33  ;;  %v17081_v24 = vld [vmem:[#allocation68_spill] sm:$0xff] }
 0x234   : > { %11612 = vmatprep.mubr.msk.bf16.mxu0 %vm17055_vm2, %v17054_v58  ;;  %vm17065_vm2 = vnez %v17064_v4  ;;  %v3267_v32 = vsel %vm17072_vm11, %v17070_v26, 0.0  ;;  %v17103_v26 = vld [vmem:[#allocation88_spill] sm:$0xff] }
 0x235   : > { %v3265_v39 = vsel %vm17065_vm2, %v17063_v11, 0.0  ;;  %v3295_v50 = vpack.c.bf16 %v3267_v32, %v17076_v48 }
 0x236   : > { %v3294_v23 = vpack.c.bf16 %v3265_v39, %v17067_v18  ;;  %v17097_v18 = vld [vmem:[#allocation82_spill] sm:$0xff] }
 0x23b   : > { %11613 = vmatmul.mubr.msk.bf16.gmra.mrb[28].mxu0 %vm17059_vm3, %v2981_v21  ;;  %vm17075_vm3 = vnez %v17074_v45 }
 0x23c   : > { %11618 = vmatprep.mubr.msk.bf16.mxu0 %vm17060_vm10, %v3292_v46  ;;  %v3269_v63 = vsel %vm17075_vm3, %v17073_v38, 0.0  ;;  %vm17078_vm10 = vmmov %vm17068_vm4  ;;  %v17089_v46 = vld [vmem:[#allocation74_spill] sm:$0xff] }
 0x23d   : > { %v3296_v60 = vpack.c.bf16 %v3269_v63, %v17077_v53  ;;  %vm17087_vm3 = vmmov %vm17079_vm9  ;;  %v3259_v63 = vld [vmem:[#allocation2 + $0x121] sm:$0xff] }
 0x23e   : > { %vm17088_vm11 = vmmov %vm17087_vm3  ;;  %v3291_v48 = vsel %vm13913_vm0, %v3259_v63, 0.0  ;;  %vm17168_vm0 = vnez %v17074_v45 }
 0x243   : > { %11619 = vmatmul.mubr.msk.bf16.vlgmr.msra.gmra.mrb[0].mxu0 %vm17068_vm4, %v3293_v52  ;;  %vm17082_vm4 = vnez %v17081_v24 }
 0x244   : > { %11622 = vmatprep.mubr.msk.bf16.mxu0 %vm17069_vm13, %v3294_v23  ;;  %v3271_v58 = vsel %vm17082_vm4, %v17080_v16, 0.0  ;;  %vm17085_vm13 = vnez %v17084_v49  ;;  %vm17094_vm4 = vmmov %vm17087_vm3  ;;  %v14320_v16 = vld [vmem:[#allocation13] ss:$0 sm:$0xff] }
 0x245   : > { %v3273_v0 = vsel %vm17085_vm13, %v17083_v35, 0.0  ;;  %v3297_v21 = vpack.c.bf16 %v3271_v58, %v17086_v20  ;;  %vm17093_vm13 = vmmov %vm17087_vm3 }
 0x246   : > { %v3298_v17 = vpack.c.bf16 %v3273_v0, %v16980_v13  ;;  %v17095_v13 = vld [vmem:[#allocation80_spill] sm:$0xff] }
 0x24b   : > { %11623 = vmatmul.mubr.msk.bf16.gmra.mrb[4].mxu0 %vm17078_vm10, %v3295_v50  ;;  %vm17090_vm10 = vnez %v17089_v46 }
 0x24c   : > { %11626 = vmatprep.mubr.msk.bf16.mxu0 %vm17079_vm9, %v3296_v60  ;;  %v3275_v37 = vsel %vm17090_vm10, %v16977_v7, 0.0  ;;  %vm17092_vm9 = vnez %v17091_v34  ;;  %vm17100_vm10 = vmmov %vm17094_vm4  ;;  %v12834_v60 = vld [vmem:[%s16469_s3] sm:$0xff]  }
 0x24d   : > { %v3277_v11 = vsel %vm17092_vm9, %v16984_v61, 0.0  ;;  %v3299_v39 = vpack.c.bf16 %v3275_v37, %v16981_v59  ;;  %vm17099_vm9 = vmmov %vm17094_vm4  ;;  %v17101_v59 = vld [vmem:[#allocation86_spill] sm:$0xff] }
 0x24e   : > { %v3300_v62 = vpack.c.bf16 %v3277_v11, %v16990_v19 }
 0x253   : > { %11627 = vmatmul.mubr.msk.bf16.gmra.mrb[8].mxu0 %vm17087_vm3, %v3297_v21  ;;  %vm17096_vm3 = vnez %v17095_v13 }
 0x254   : > { %11630 = vmatprep.mubr.msk.bf16.mxu0 %vm17088_vm11, %v3298_v17  ;;  %v3279_v52 = vsel %vm17096_vm3, %v16987_v43, 0.0  ;;  %vm17098_vm11 = vnez %v17097_v18  ;;  %vm17106_vm3 = vmmov %vm17099_vm9 }
 0x255   : > { %v3281_v7 = vsel %vm17098_vm11, %v13869_v3, 0.0  ;;  %v3301_v23 = vpack.c.bf16 %v3279_v52, %v13874_v51  ;;  %vm17105_vm11 = vmmov %vm17099_vm9  ;;  %v3287_v51 = vsel %vm17000_vm1, %v13917_v44, 0.0  ;;  %v12832_v44 = vld [vmem:[%s16469_s3 + $0x10] sm:$0xff]  }
 0x256   : > { %v3302_v61 = vpack.c.bf16 %v3281_v7, %v13879_v5  ;;  %v17107_v5 = vld [vmem:[#allocation90_spill] sm:$0xff]  ;;  %v3305_v38 = vpack.c.bf16 %v3287_v51, %v13921_v8  ;;  %11650 = vmatprep.subr.bf16.mxu1 %v12832_v44 }
 0x257   : > { %11651 = vmatpush3.bf16.msra.mxu1 %v12832_v44  ;;  %v12833_v8 = vld [vmem:[%s16469_s3 + $0x18] sm:$0xff]  }
 0x258   : > { %11652 = vmatprep.subr.bf16.mxu1 %v12833_v8 }
 0x25b   : > { %11631 = vmatmul.mubr.msk.bf16.gmra.mrb[12].mxu0 %vm17093_vm13, %v3299_v39  ;;  %vm17102_vm13 = vnez %v17101_v59  ;;  %11653 = vmatpush3.bf16.msra.mxu1 %v12833_v8  ;;  %v12835_v8 = vld [vmem:[%s16469_s3 + $0x8] sm:$0xff]  }
 0x25c   : > { %11634 = vmatprep.mubr.msk.bf16.mxu0 %vm17094_vm4, %v3300_v62  ;;  %v3283_v19 = vsel %vm17102_vm13, %v13890_v30, 0.0  ;;  %vm17104_vm4 = vnez %v17103_v26  ;;  %11686 = vmatprep.subr.bf16.mxu1 %v12834_v60 }
 0x25d   : > { %v3285_v43 = vsel %vm17104_vm4, %v13897_v55, 0.0  ;;  %v3303_v32 = vpack.c.bf16 %v3283_v19, %v13901_v56  ;;  %vm17110_vm4 = vmmov %vm17106_vm3  ;;  %v3258_v56 = vld [vmem:[#allocation2 + $0x119] sm:$0xff] }
 0x25e   : > { %v3304_v3 = vpack.c.bf16 %v3285_v43, %v13906_v14  ;;  %v3307_v50 = vpack.c.bf16 %v3291_v48, %v3258_v56 }
 0x263   : > { %11635 = vmatmul.mubr.msk.bf16.gmra.mrb[16].mxu0 %vm17099_vm9, %v3301_v23  ;;  %vm17109_vm9 = vmmov %vm17106_vm3 }
 0x264   : > { %11638 = vmatprep.mubr.msk.bf16.mxu0 %vm17100_vm10, %v3302_v61  ;;  %vm17108_vm10 = vnez %v17107_v5 }
 0x265   : > { %v3289_v30 = vsel %vm17108_vm10, %v14123_v29, 0.0  ;;  %v3741_v29 = vld [vmem:[#allocation3 + $0x8] sm:$0xff] }
 0x266   : > { %v3306_v55 = vpack.c.bf16 %v3289_v30, %v14127_v36  ;;  %v3742_v36 = vld [vmem:[#allocation3 + $0x10] sm:$0xff] }
 0x267   : > { %v3773_v53 = vpack.c.bf16 %v3742_v36, %v3741_v29 }
 0x26b   : > { %11639 = vmatmul.mubr.msk.bf16.gmra.mrb[20].mxu0 %vm17105_vm11, %v3303_v32  ;;  %vm17112_vm11 = vcmask 261120  }
 0x26c   : > { %11642 = vmatprep.mubr.msk.bf16.mxu0 %vm17106_vm3, %v3304_v3  ;;  %11654 = vmatprep.mubr.msk.bf16.mxu1 %vm17112_vm11, %v3773_v53 }
 0x273   : > { %11643 = vmatmul.mubr.msk.bf16.gmra.mrb[24].mxu0 %vm17109_vm9, %v3305_v38 }
 0x274   : > { %11646 = vmatprep.mubr.msk.bf16.mxu0 %vm17110_vm4, %v3306_v55  ;;  %vm17113_vm4 = vmmov %vm17112_vm11 }
 0x275   : > { %vm17114_vm9 = vmmov %vm17113_vm4 }
 0x27b   : > { %11647 = vmatmul.mubr.msk.bf16.gmra.mrb[28].mxu0 %vm17106_vm3, %v3307_v50  ;;  %vm17115_vm3 = vmmov %vm17113_vm4 }
 0x27c   : > { %vm17116_vm11 = vmmov %vm17115_vm3 }
 0x316   : > { %v11620_v58 = vpop.f32.mrb[0].mxu0 }
 0x317   : > { %v3563_v35 = vadd.f32 %v11620_v58, %v14320_v16  ;;  %v3395_v0 = vpop.f32.mrb[1].mxu0 }
 0x318   : > { %v3561_v20 = vadd.f32 %v14320_v16, %v3395_v0  ;;  %v11621_v21 = vpop.f32.mrb[2].mxu0 }
 0x319   : > { %v3595_v17 = vmax.f32 %v3563_v35, 0.0  ;;  %v3564_v37 = vadd.f32 %v11621_v21, %v14320_v16  ;;  %v3398_v11 = vpop.f32.mrb[3].mxu0 }
 0x31a   : > { %v3593_v39 = vmax.f32 %v3561_v20, 0.0  ;;  %v3562_v62 = vadd.f32 %v14320_v16, %v3398_v11 }
 0x31b   : > { %3627 = vst.msk [vmem:[#allocation3 + $0x28] sm:$0xff] %vm17113_vm4, %v3595_v17  ;;  %v3596_v52 = vmax.f32 %v3564_v37, 0.0  ;;  %vm17117_vm4 = vmmov %vm17115_vm3 }
 0x31c   : > { %3625 = vst.msk [vmem:[#allocation3 + $0x18] sm:$0xff] %vm17114_vm9, %v3593_v39  ;;  %v3594_v7 = vmax.f32 %v3562_v62, 0.0  ;;  %vm17118_vm9 = vmmov %vm17115_vm3 }
 0x31d   : > { %3628 = vst.msk [vmem:[#allocation3 + $0x30] sm:$0xff] %vm17115_vm3, %v3596_v52 }
 0x31e   : > { %3626 = vst.msk [vmem:[#allocation3 + $0x20] sm:$0xff] %vm17116_vm11, %v3594_v7  ;;  %v11624_v23 = vpop.f32.mrb[4].mxu0  ;;  %vm17120_vm11 = vmmov %vm17115_vm3 }
 0x31f   : > { %v3567_v61 = vadd.f32 %v11624_v23, %v14320_v16  ;;  %v3411_v19 = vpop.f32.mrb[5].mxu0 }
 0x320   : > { %v3565_v43 = vadd.f32 %v14320_v16, %v3411_v19  ;;  %v11625_v32 = vpop.f32.mrb[6].mxu0 }
 0x321   : > { %v3599_v3 = vmax.f32 %v3567_v61, 0.0  ;;  %v3568_v51 = vadd.f32 %v11625_v32, %v14320_v16  ;;  %v3414_v30 = vpop.f32.mrb[7].mxu0 }
 0x322   : > { %v3597_v38 = vmax.f32 %v3565_v43, 0.0  ;;  %v3566_v55 = vadd.f32 %v14320_v16, %v3414_v30  ;;  %v3745_v21 = vld [vmem:[#allocation3 + $0x28] sm:$0xff] }
 0x323   : > { %3631 = vst.msk [vmem:[#allocation3 + $0x48] sm:$0xff] %vm17117_vm4, %v3599_v3  ;;  %v3600_v63 = vmax.f32 %v3568_v51, 0.0  ;;  %v14335_v56 = vld [vmem:[#allocation3 + $0x17] sm:$0xff]  ;;  %vm17127_vm4 = vmmov %vm17115_vm3 }
 0x324   : > { %3629 = vst.msk [vmem:[#allocation3 + $0x38] sm:$0xff] %vm17118_vm9, %v3597_v38  ;;  %v3598_v48 = vmax.f32 %v3566_v55, 0.0  ;;  %v3743_v50 = vld [vmem:[#allocation3 + $0x18] sm:$0xff]  ;;  %v3746_v44 = vld [vmem:[#allocation3 + $0x30] sm:$0xff]  ;;  %v4606_v35 = vsel %vm17006_vm15, %v14335_v56, 0.0  ;;  %vm17129_vm9 = vmmov %vm17115_vm3 }
 0x325   : > { %3632 = vst.msk [vmem:[#allocation3 + $0x50] sm:$0xff] %vm17115_vm3, %v3600_v63  ;;  %v3744_v29 = vld [vmem:[#allocation3 + $0x20] sm:$0xff]  ;;  %v14360_v52 = vpack.c.bf16 %v3746_v44, %v3745_v21  ;;  %v14362_v7 = vld [vmem:[#allocation3 + $0x2f] sm:$0xff] }
 0x326   : > { %v14342_v36 = vld [vmem:[#allocation3 + $0x1f] sm:$0xff]  ;;  %v14344_v53 = vld [vmem:[#allocation3 + $0x27] sm:$0xff]  ;;  %3630 = vst.msk [vmem:[#allocation3 + $0x40] sm:$0xff] %vm17120_vm11, %v3598_v48  ;;  %v11628_v0 = vpop.f32.mrb[8].mxu0  ;;  %v14350_v20 = vpack.c.bf16 %v3744_v29, %v3743_v50  ;;  %17126 = vst [vmem:[#allocation25_spill] sm:$0xff] %v14362_v7 }
 0x327   : > { %v14352_v17 = vld [vmem:[#allocation3 + $0x19] sm:$0xff]  ;;  %v14354_v37 = vld [vmem:[#allocation3 + $0x21] sm:$0xff]  ;;  %v14357_v11 = vpack.c.bf16 %v14342_v36, %v4606_v35  ;;  %v3571_v39 = vadd.f32 %v11628_v0, %v14320_v16  ;;  %v3427_v62 = vpop.f32.mrb[9].mxu0  ;;  %17125 = vst [vmem:[#allocation24_spill] sm:$0xff] %v14360_v52  ;;  %v4608_v23 = vsel %vm13455_vm5, %v14344_v53, 0.0  ;;  %v5588_v55 = vsel %vm17006_vm15, %v14344_v53, 0.0  ;;  %vm17135_vm11 = vmmov %vm17115_vm3 }
 0x328   : > { %17121 = vst [vmem:[#allocation20_spill] sm:$0xff] %v14350_v20  ;;  %17122 = vst [vmem:[#allocation21_spill] sm:$0xff] %v14352_v17  ;;  %v3569_v61 = vadd.f32 %v14320_v16, %v3427_v62  ;;  %v11629_v19 = vpop.f32.mrb[10].mxu0  ;;  %11655 = vmatmul.mubr.msk.bf16.vlgmr.msra.gmra.mrb[0].mxu1 %vm17127_vm4, %v14350_v20  ;;  %v14371_v43 = vpack.c.bf16 %v14362_v7, %v4608_v23  ;;  %v5251_v32 = vsel %vm16939_vm12, %v14354_v37, 0.0  ;;  %v14389_v50 = vld [vmem:[%s16469_s3 + $0x20] sm:$0xff]  }
 0x329   : > { %17123 = vst [vmem:[#allocation22_spill] sm:$0xff] %v14354_v37  ;;  %17124 = vst [vmem:[#allocation23_spill] sm:$0xff] %v14357_v11  ;;  %v3603_v3 = vmax.f32 %v3571_v39, 0.0  ;;  %v3572_v51 = vadd.f32 %v11629_v19, %v14320_v16  ;;  %11687 = vmatpush3.bf16.msra.mxu1 %v12834_v60  ;;  %v3430_v30 = vpop.f32.mrb[11].mxu0  ;;  %11658 = vmatprep.mubr.msk.bf16.mxu1 %vm17129_vm9, %v14360_v52  ;;  %v14380_v38 = vpack.c.bf16 %v5251_v32, %v14352_v17 }
 0x32a   : > { %17128 = vst [vmem:[#allocation26_spill] sm:$0xff] %v14371_v43  ;;  %v3601_v63 = vmax.f32 %v3569_v61, 0.0  ;;  %v3570_v48 = vadd.f32 %v14320_v16, %v3430_v30  ;;  %11688 = vmatprep.subr.bf16.mxu1 %v12835_v8  ;;  %17131 = vst [vmem:[#allocation29_spill] sm:$0xff] %v14389_v50  ;;  %v14392_v60 = vpack.c.bf16 %v14362_v7, %v5588_v55  ;;  %v3749_v30 = vld [vmem:[#allocation3 + $0x48] sm:$0xff] }
 0x32b   : > { %17130 = vst [vmem:[#allocation28_spill] sm:$0xff] %v14380_v38  ;;  %3635 = vst.msk [vmem:[#allocation3 + $0x68] sm:$0xff] %vm17115_vm3, %v3603_v3  ;;  %v3604_v44 = vmax.f32 %v3572_v51, 0.0  ;;  %v14395_v29 = vld [vmem:[#allocation3 + $0x37] sm:$0xff]  ;;  %v14425_v38 = vld [vmem:[#allocation3 + $0x29] sm:$0xff] }
 0x32c   : > { %17132 = vst [vmem:[#allocation34_spill] sm:$0xff] %v14392_v60  ;;  %17133 = vst [vmem:[#allocation35_spill] sm:$0xff] %v14395_v29  ;;  %v14397_v35 = vld [vmem:[#allocation3 + $0x31] sm:$0xff]  ;;  %v3602_v0 = vmax.f32 %v3570_v48, 0.0  ;;  %v4610_v19 = vsel %vm13459_vm6, %v14395_v29, 0.0  ;;  %v14493_v1 = vld [vmem:[#allocation3 + $0x49] sm:$0xff] }
 0x32d   : > { %17134 = vst [vmem:[#allocation36_spill] sm:$0xff] %v14397_v35  ;;  %3633 = vst.msk [vmem:[#allocation3 + $0x58] sm:$0xff] %vm17135_vm11, %v3601_v63  ;;  %v3747_v21 = vld [vmem:[#allocation3 + $0x38] sm:$0xff]  ;;  %v3750_v39 = vld [vmem:[#allocation3 + $0x50] sm:$0xff]  ;;  %11689 = vmatpush3.bf16.msra.mxu1 %v12835_v8  ;;  %v5253_v32 = vsel %vm16946_vm14, %v14397_v35, 0.0 }
 0x32e   : > { %vm17136_vm4 = vmmov %vm17115_vm3  ;;  %v3748_v62 = vld [vmem:[#allocation3 + $0x40] sm:$0xff]  ;;  %v11632_v3 = vpop.f32.mrb[12].mxu0  ;;  %11722 = vmatprep.subr.bf16.mxu1 %v14389_v50  ;;  %v14423_v60 = vld [vmem:[#allocation3 + $0x4f] sm:$0xff]  ;;  %17145 = vst [vmem:[#allocation85_spill] sm:$0xff] %v14425_v38 }
 0x32f   : > { %3636 = vst.msk [vmem:[#allocation3 + $0x70] sm:$0xff] %vm17136_vm4, %v3604_v44  ;;  %v14401_v23 = vld [vmem:[#allocation3 + $0x3f] sm:$0xff]  ;;  %v14403_v61 = vld [vmem:[#allocation3 + $0x47] sm:$0xff]  ;;  %vm17139_vm9 = vmmov %vm17115_vm3  ;;  %v14412_v51 = vpack.c.bf16 %v3748_v62, %v3747_v21  ;;  %v3575_v63 = vadd.f32 %v11632_v3, %v14320_v16  ;;  %v3443_v48 = vpop.f32.mrb[13].mxu0  ;;  %v14421_v44 = vpack.c.bf16 %v3750_v39, %v3749_v30  ;;  %v14439_v39 = vpack.c.bf16 %v5253_v32, %v14425_v38 }
 0x330   : > { %17137 = vst [vmem:[#allocation56_spill] sm:$0xff] %v14401_v23  ;;  %17138 = vst [vmem:[#allocation60_spill] sm:$0xff] %v14403_v61  ;;  %v14415_v8 = vld [vmem:[#allocation3 + $0x41] sm:$0xff]  ;;  %v14418_v55 = vpack.c.bf16 %v14401_v23, %v4610_v19  ;;  %v4612_v21 = vsel %vm13493_vm7, %v14403_v61, 0.0  ;;  %v3573_v62 = vadd.f32 %v14320_v16, %v3443_v48  ;;  %v11633_v52 = vpop.f32.mrb[14].mxu0 }
 0x331   : > { %3634 = vst.msk [vmem:[#allocation3 + $0x60] sm:$0xff] %vm17139_vm9, %v3602_v0  ;;  %17140 = vst [vmem:[#allocation81_spill] sm:$0xff] %v14412_v51  ;;  %v14427_v0 = vld [vmem:[#allocation3 + $0x39] sm:$0xff]  ;;  %11659 = vmatmul.mubr.msk.bf16.gmra.mrb[4].mxu1 %vm17115_vm3, %v14412_v51  ;;  %v14436_v19 = vpack.c.bf16 %v14423_v60, %v4612_v21  ;;  %v3607_v3 = vmax.f32 %v3575_v63, 0.0  ;;  %v3576_v30 = vadd.f32 %v11633_v52, %v14320_v16  ;;  %v3446_v20 = vpop.f32.mrb[15].mxu0  ;;  %v5255_v48 = vsel %vm17065_vm2, %v14415_v8, 0.0 }
 0x332   : > { %17141 = vst [vmem:[#allocation79_spill] sm:$0xff] %v14415_v8  ;;  %17142 = vst [vmem:[#allocation84_spill] sm:$0xff] %v14418_v55  ;;  %v5590_v51 = vsel %vm13455_vm5, %v14395_v29, 0.0  ;;  %v3605_v21 = vmax.f32 %v3573_v62, 0.0  ;;  %v14452_v32 = vpack.c.bf16 %v5255_v48, %v14427_v0  ;;  %v5592_v55 = vsel %vm13459_vm6, %v14403_v61, 0.0 }
 0x333   : > { %17143 = vst [vmem:[#allocation83_spill] sm:$0xff] %v14421_v44  ;;  %17144 = vst [vmem:[#allocation87_spill] sm:$0xff] %v14423_v60  ;;  %v14455_v52 = vpack.c.bf16 %v14401_v23, %v5590_v51  ;;  %v3608_v63 = vmax.f32 %v3576_v30, 0.0 }
 0x334   : > { %17146 = vst [vmem:[#allocation89_spill] sm:$0xff] %v14427_v0  ;;  %17147 = vst [vmem:[#allocation45_spill] sm:$0xff] %v14436_v19  ;;  %v3574_v19 = vadd.f32 %v14320_v16, %v3446_v20  ;;  %v3751_v62 = vld [vmem:[#allocation3 + $0x58] sm:$0xff] }
 0x335   : > { %17148 = vst [vmem:[#allocation50_spill] sm:$0xff] %v14439_v39  ;;  %vm17149_vm11 = vmmov %vm17115_vm3  ;;  %v14458_v39 = vld [vmem:[#allocation3 + $0x57] sm:$0xff] }
 0x336   : > { %11662 = vmatprep.mubr.msk.bf16.mxu1 %vm17149_vm11, %v14421_v44  ;;  %17150 = vst [vmem:[#allocation46_spill] sm:$0xff] %v14452_v32  ;;  %17151 = vst [vmem:[#allocation92_spill] sm:$0xff] %v14455_v52  ;;  %v14460_v44 = vld [vmem:[#allocation3 + $0x51] sm:$0xff]  ;;  %v3606_v20 = vmax.f32 %v3574_v19, 0.0  ;;  %v14467_v32 = vpack.c.bf16 %v14423_v60, %v5592_v55  ;;  %v4614_v52 = vsel %vm13498_vm8, %v14458_v39, 0.0  ;;  %vm17158_vm11 = vnez %v17071_v33  ;;  %v14561_v61 = vld [vmem:[#allocation3 + $0x69] sm:$0xff] }
 0x337   : > { %vm17152_vm4 = vmmov %vm17115_vm3  ;;  %17153 = vst [vmem:[#allocation47_spill] sm:$0xff] %v14458_v39  ;;  %v3754_v48 = vld [vmem:[#allocation3 + $0x70] sm:$0xff]  ;;  %v5257_v19 = vsel %vm17158_vm11, %v14460_v44, 0.0  ;;  %v6237_v40 = vsel %vm17065_vm2, %v14460_v44, 0.0 }
 0x338   : > { %3639 = vst.msk [vmem:[#allocation3 + $0x88] sm:$0xff] %vm17152_vm4, %v3607_v3  ;;  %vm17154_vm9 = vmmov %vm17115_vm3  ;;  %v3752_v51 = vld [vmem:[#allocation3 + $0x60] sm:$0xff]  ;;  %v14491_v37 = vld [vmem:[#allocation3 + $0x6f] sm:$0xff] }
 0x339   : > { %3637 = vst.msk [vmem:[#allocation3 + $0x78] sm:$0xff] %vm17154_vm9, %v3605_v21  ;;  %17155 = vst [vmem:[#allocation54_spill] sm:$0xff] %v14467_v32  ;;  %v14470_v3 = vld [vmem:[#allocation3 + $0x5f] sm:$0xff]  ;;  %v14472_v30 = vld [vmem:[#allocation3 + $0x67] sm:$0xff]  ;;  %v11636_v21 = vpop.f32.mrb[16].mxu0  ;;  %v14481_v55 = vpack.c.bf16 %v3752_v51, %v3751_v62  ;;  %vm17164_vm9 = vnez %v16758_v28 }
 0x33a   : > { %3640 = vst.msk [vmem:[#allocation3 + $0x90] sm:$0xff] %vm17115_vm3, %v3608_v63  ;;  %17156 = vst [vmem:[#allocation93_spill] sm:$0xff] %v14470_v3  ;;  %v3753_v32 = vld [vmem:[#allocation3 + $0x68] sm:$0xff]  ;;  %v14486_v43 = vpack.c.bf16 %v14470_v3, %v4614_v52  ;;  %v3579_v11 = vadd.f32 %v11636_v21, %v14320_v16  ;;  %v3459_v14 = vpop.f32.mrb[17].mxu0  ;;  %v14495_v60 = vld [vmem:[#allocation3 + $0x59] sm:$0xff] }
 0x33b   : > { %17157 = vst [vmem:[#allocation19_spill] sm:$0xff] %v14472_v30  ;;  %vm17159_vm4 = vmmov %vm17115_vm3  ;;  %v14483_v63 = vld [vmem:[#allocation3 + $0x61] sm:$0xff]  ;;  %v14489_v17 = vpack.c.bf16 %v3754_v48, %v3753_v32  ;;  %v3577_v62 = vadd.f32 %v14320_v16, %v3459_v14  ;;  %v11637_v51 = vpop.f32.mrb[18].mxu0  ;;  %11663 = vmatmul.mubr.msk.bf16.gmra.mrb[8].mxu1 %vm17115_vm3, %v14481_v55  ;;  %v14507_v32 = vpack.c.bf16 %v5257_v19, %v14493_v1  ;;  %v17344_v4 = vld [vmem:[#allocation79_spill] sm:$0xff] }
 0x33c   : > { %3638 = vst.msk [vmem:[#allocation3 + $0x80] sm:$0xff] %vm17159_vm4, %v3606_v20  ;;  %17160 = vst [vmem:[#allocation59_spill] sm:$0xff] %v14481_v55  ;;  %v4616_v20 = vsel %vm17164_vm9, %v14472_v30, 0.0  ;;  %v3611_v48 = vmax.f32 %v3579_v11, 0.0  ;;  %v3580_v21 = vadd.f32 %v11637_v51, %v14320_v16  ;;  %v5259_v14 = vsel %vm17168_vm0, %v14483_v63, 0.0 }
 0x33d   : > { %17161 = vst [vmem:[#allocation52_spill] sm:$0xff] %v14486_v43  ;;  %17162 = vst [vmem:[#allocation61_spill] sm:$0xff] %v14489_v17  ;;  %v14504_v52 = vpack.c.bf16 %v14491_v37, %v4616_v20  ;;  %v3462_v43 = vpop.f32.mrb[19].mxu0  ;;  %v5594_v55 = vsel %vm13493_vm7, %v14458_v39, 0.0  ;;  %v3609_v20 = vmax.f32 %v3577_v62, 0.0  ;;  %v14520_v19 = vpack.c.bf16 %v5259_v14, %v14495_v60 }
 0x33e   : > { %17163 = vst [vmem:[#allocation63_spill] sm:$0xff] %v14491_v37  ;;  %17166 = vst [vmem:[#allocation65_spill] sm:$0xff] %v14507_v32  ;;  %v14523_v11 = vpack.c.bf16 %v14470_v3, %v5594_v55  ;;  %v3612_v51 = vmax.f32 %v3580_v21, 0.0  ;;  %v5596_v39 = vsel %vm13498_vm8, %v14472_v30, 0.0  ;;  %vm17188_vm0 = vnez %v17084_v49 }
 0x33f   : > { %17165 = vst [vmem:[#allocation55_spill] sm:$0xff] %v14504_v52  ;;  %vm17167_vm4 = vmmov %vm17115_vm3  ;;  %v3578_v52 = vadd.f32 %v14320_v16, %v3462_v43 }
 0x340   : > { %11666 = vmatprep.mubr.msk.bf16.mxu1 %vm17167_vm4, %v14489_v17  ;;  %17169 = vst [vmem:[#allocation58_spill] sm:$0xff] %v14520_v19  ;;  %17170 = vst [vmem:[#allocation66_spill] sm:$0xff] %v14523_v11  ;;  %v14526_v32 = vld [vmem:[#allocation3 + $0x77] sm:$0xff]  ;;  %v14535_v19 = vpack.c.bf16 %v14491_v37, %v5596_v39 }
 0x341   : > { %3643 = vst.msk [vmem:[#allocation3 + $0xa8] sm:$0xff] %vm17115_vm3, %v3611_v48  ;;  %17171 = vst [vmem:[#allocation67_spill] sm:$0xff] %v14526_v32  ;;  %v14528_v17 = vld [vmem:[#allocation3 + $0x71] sm:$0xff]  ;;  %v3610_v43 = vmax.f32 %v3578_v52, 0.0  ;;  %v14629_v29 = vld [vmem:[#allocation3 + $0x89] sm:$0xff] }
 0x342   : > { %vm17172_vm4 = vmmov %vm17115_vm3  ;;  %v3755_v62 = vld [vmem:[#allocation3 + $0x78] sm:$0xff]  ;;  %v3758_v14 = vld [vmem:[#allocation3 + $0x90] sm:$0xff]  ;;  %17173 = vst [vmem:[#allocation69_spill] sm:$0xff] %v14535_v19 }
 0x343   : > { %3641 = vst.msk [vmem:[#allocation3 + $0x98] sm:$0xff] %vm17172_vm4, %v3609_v20  ;;  %vm17174_vm7 = vmmov %vm17115_vm3  ;;  %v3756_v55 = vld [vmem:[#allocation3 + $0x80] sm:$0xff]  ;;  %vm17177_vm3 = vnez %v16761_v31  ;;  %vm17178_vm4 = vnez %v17081_v24  ;;  %v11640_v20 = vpop.f32.mrb[20].mxu0  ;;  %v3757_v19 = vld [vmem:[#allocation3 + $0x88] sm:$0xff] }
 0x344   : > { %3644 = vst.msk [vmem:[#allocation3 + $0xb0] sm:$0xff] %vm17174_vm7, %v3612_v51  ;;  %v14538_v48 = vld [vmem:[#allocation3 + $0x7f] sm:$0xff]  ;;  %v14540_v21 = vld [vmem:[#allocation3 + $0x87] sm:$0xff]  ;;  %v4618_v11 = vsel %vm17177_vm3, %v14526_v32, 0.0  ;;  %v5261_v52 = vsel %vm17178_vm4, %v14528_v17, 0.0  ;;  %vm17179_vm8 = vmmov %vm17174_vm7  ;;  %v14549_v39 = vpack.c.bf16 %v3756_v55, %v3755_v62  ;;  %v3583_v3 = vadd.f32 %v11640_v20, %v14320_v16  ;;  %v3475_v30 = vpop.f32.mrb[21].mxu0 }
 0x345   : > { %17175 = vst [vmem:[#allocation62_spill] sm:$0xff] %v14538_v48  ;;  %17176 = vst [vmem:[#allocation71_spill] sm:$0xff] %v14540_v21  ;;  %v14551_v51 = vld [vmem:[#allocation3 + $0x81] sm:$0xff]  ;;  %v14554_v37 = vpack.c.bf16 %v14538_v48, %v4618_v11  ;;  %v14557_v23 = vpack.c.bf16 %v3758_v14, %v3757_v19  ;;  %v14559_v9 = vld [vmem:[#allocation3 + $0x8f] sm:$0xff]  ;;  %vm17184_vm7 = vnez %v16764_v25  ;;  %v3581_v62 = vadd.f32 %v14320_v16, %v3475_v30  ;;  %v11641_v55 = vpop.f32.mrb[22].mxu0 }
 0x346   : > { %3642 = vst.msk [vmem:[#allocation3 + $0xa0] sm:$0xff] %vm17179_vm8, %v3610_v43  ;;  %17180 = vst [vmem:[#allocation64_spill] sm:$0xff] %v14549_v39  ;;  %v14563_v6 = vld [vmem:[#allocation3 + $0x79] sm:$0xff]  ;;  %v4620_v43 = vsel %vm17184_vm7, %v14540_v21, 0.0  ;;  %11667 = vmatmul.mubr.msk.bf16.gmra.mrb[12].mxu1 %vm17179_vm8, %v14549_v39  ;;  %v14575_v19 = vpack.c.bf16 %v5261_v52, %v14561_v61  ;;  %v3615_v14 = vmax.f32 %v3583_v3, 0.0  ;;  %v3584_v20 = vadd.f32 %v11641_v55, %v14320_v16 }
 0x347   : > { %17181 = vst [vmem:[#allocation72_spill] sm:$0xff] %v14554_v37  ;;  %17182 = vst [vmem:[#allocation73_spill] sm:$0xff] %v14557_v23  ;;  %v14572_v11 = vpack.c.bf16 %v14559_v9, %v4620_v43  ;;  %v3478_v37 = vpop.f32.mrb[23].mxu0  ;;  %v5263_v30 = vsel %vm17188_vm0, %v14551_v51, 0.0  ;;  %v5598_v39 = vsel %vm17164_vm9, %v14526_v32, 0.0  ;;  %v3613_v43 = vmax.f32 %v3581_v62, 0.0 }
 0x348   : > { %17183 = vst [vmem:[#allocation75_spill] sm:$0xff] %v14559_v9  ;;  %17186 = vst [vmem:[#allocation77_spill] sm:$0xff] %v14575_v19  ;;  %v14588_v52 = vpack.c.bf16 %v5263_v30, %v14563_v6  ;;  %v14591_v3 = vpack.c.bf16 %v14538_v48, %v5598_v39  ;;  %v3616_v55 = vmax.f32 %v3584_v20, 0.0  ;;  %v5600_v32 = vsel %vm17177_vm3, %v14540_v21, 0.0 }
 0x349   : > { %17185 = vst [vmem:[#allocation68_spill] sm:$0xff] %v14572_v11  ;;  %vm17187_vm4 = vmmov %vm17179_vm8  ;;  %v3582_v11 = vadd.f32 %v14320_v16, %v3478_v37  ;;  %vm17208_vm0 = vnez %v17091_v34 }
 0x34a   : > { %11670 = vmatprep.mubr.msk.bf16.mxu1 %vm17187_vm4, %v14557_v23  ;;  %17189 = vst [vmem:[#allocation70_spill] sm:$0xff] %v14588_v52  ;;  %17190 = vst [vmem:[#allocation78_spill] sm:$0xff] %v14591_v3  ;;  %v14594_v19 = vld [vmem:[#allocation3 + $0x97] sm:$0xff]  ;;  %v14603_v52 = vpack.c.bf16 %v14559_v9, %v5600_v32 }
 0x34b   : > { %vm17191_vm8 = vmmov %vm17187_vm4  ;;  %17192 = vst [vmem:[#allocation74_spill] sm:$0xff] %v14594_v19  ;;  %v14596_v23 = vld [vmem:[#allocation3 + $0x91] sm:$0xff]  ;;  %v3614_v37 = vmax.f32 %v3582_v11, 0.0  ;;  %v14697_v7 = vld [vmem:[#allocation3 + $0xa9] sm:$0xff] }
 0x34c   : > { %3647 = vst.msk [vmem:[#allocation3 + $0xc8] sm:$0xff] %vm17191_vm8, %v3615_v14  ;;  %v3759_v62 = vld [vmem:[#allocation3 + $0x98] sm:$0xff]  ;;  %v3762_v30 = vld [vmem:[#allocation3 + $0xb0] sm:$0xff]  ;;  %17193 = vst [vmem:[#allocation76_spill] sm:$0xff] %v14603_v52  ;;  %vm17197_vm8 = vnez %v16767_v47 }
 0x34d   : > { %3645 = vst.msk [vmem:[#allocation3 + $0xb8] sm:$0xff] %vm17187_vm4, %v3613_v43  ;;  %vm17194_vm9 = vmmov %vm17187_vm4  ;;  %v3760_v39 = vld [vmem:[#allocation3 + $0xa0] sm:$0xff]  ;;  %v4622_v3 = vsel %vm17197_vm8, %v14594_v19, 0.0  ;;  %vm17198_vm4 = vnez %v17089_v46  ;;  %v11644_v43 = vpop.f32.mrb[24].mxu0  ;;  %v3761_v52 = vld [vmem:[#allocation3 + $0xa8] sm:$0xff] }
 0x34e   : > { %3648 = vst.msk [vmem:[#allocation3 + $0xd0] sm:$0xff] %vm17194_vm9, %v3616_v55  ;;  %v14606_v14 = vld [vmem:[#allocation3 + $0x9f] sm:$0xff]  ;;  %v14608_v20 = vld [vmem:[#allocation3 + $0xa7] sm:$0xff]  ;;  %v5265_v11 = vsel %vm17198_vm4, %v14596_v23, 0.0  ;;  %vm17199_vm3 = vmmov %vm17194_vm9  ;;  %v14617_v32 = vpack.c.bf16 %v3760_v39, %v3759_v62  ;;  %v3587_v48 = vadd.f32 %v11644_v43, %v14320_v16  ;;  %v3491_v21 = vpop.f32.mrb[25].mxu0  ;;  %v14625_v31 = vpack.c.bf16 %v3762_v30, %v3761_v52 }
 0x34f   : > { %17195 = vst [vmem:[#allocation82_spill] sm:$0xff] %v14606_v14  ;;  %17196 = vst [vmem:[#allocation86_spill] sm:$0xff] %v14608_v20  ;;  %v14619_v55 = vld [vmem:[#allocation3 + $0xa1] sm:$0xff]  ;;  %v14622_v9 = vpack.c.bf16 %v14606_v14, %v4622_v3  ;;  %v14627_v28 = vld [vmem:[#allocation3 + $0xaf] sm:$0xff]  ;;  %vm17204_vm9 = vnez %v16770_v10  ;;  %v3585_v62 = vadd.f32 %v14320_v16, %v3491_v21  ;;  %v11645_v39 = vpop.f32.mrb[26].mxu0  ;;  %v14643_v52 = vpack.c.bf16 %v5265_v11, %v14629_v29 }
 0x350   : > { %3646 = vst.msk [vmem:[#allocation3 + $0xc0] sm:$0xff] %vm17199_vm3, %v3614_v37  ;;  %17200 = vst [vmem:[#allocation88_spill] sm:$0xff] %v14617_v32  ;;  %v14631_v50 = vld [vmem:[#allocation3 + $0x99] sm:$0xff]  ;;  %v4624_v37 = vsel %vm17204_vm9, %v14608_v20, 0.0  ;;  %11671 = vmatmul.mubr.msk.bf16.gmra.mrb[16].mxu1 %vm17199_vm3, %v14617_v32  ;;  %v3619_v30 = vmax.f32 %v3587_v48, 0.0  ;;  %v3588_v43 = vadd.f32 %v11645_v39, %v14320_v16  ;;  %v5267_v21 = vsel %vm17208_vm0, %v14619_v55, 0.0 }
 0x351   : > { %17201 = vst [vmem:[#allocation90_spill] sm:$0xff] %v14622_v9  ;;  %17202 = vst [vmem:[#allocation33_spill] sm:$0xff] %v14625_v31  ;;  %v14640_v3 = vpack.c.bf16 %v14627_v28, %v4624_v37  ;;  %v3494_v9 = vpop.f32.mrb[27].mxu0  ;;  %v5602_v32 = vsel %vm17184_vm7, %v14594_v19, 0.0  ;;  %v3617_v37 = vmax.f32 %v3585_v62, 0.0  ;;  %v14656_v11 = vpack.c.bf16 %v5267_v21, %v14631_v50 }
 0x352   : > { %17203 = vst [vmem:[#allocation94_spill] sm:$0xff] %v14627_v28  ;;  %17206 = vst [vmem:[#allocation96_spill] sm:$0xff] %v14643_v52  ;;  %v14659_v48 = vpack.c.bf16 %v14606_v14, %v5602_v32  ;;  %v3620_v39 = vmax.f32 %v3588_v43, 0.0  ;;  %v5604_v19 = vsel %vm17197_vm8, %v14608_v20, 0.0  ;;  %vm17228_vm0 = vnez %v17097_v18 }
 0x353   : > { %17205 = vst [vmem:[#allocation95_spill] sm:$0xff] %v14640_v3  ;;  %vm17207_vm4 = vmmov %vm17199_vm3  ;;  %v3586_v3 = vadd.f32 %v14320_v16, %v3494_v9 }
 0x354   : > { %11674 = vmatprep.mubr.msk.bf16.mxu1 %vm17207_vm4, %v14625_v31  ;;  %17209 = vst [vmem:[#allocation97_spill] sm:$0xff] %v14656_v11  ;;  %17210 = vst [vmem:[#allocation98_spill] sm:$0xff] %v14659_v48  ;;  %v14662_v52 = vld [vmem:[#allocation3 + $0xb7] sm:$0xff]  ;;  %v14671_v11 = vpack.c.bf16 %v14627_v28, %v5604_v19 }
 0x355   : > { %3651 = vst.msk [vmem:[#allocation3 + $0xe8] sm:$0xff] %vm17199_vm3, %v3619_v30  ;;  %17211 = vst [vmem:[#allocation99_spill] sm:$0xff] %v14662_v52  ;;  %v14664_v31 = vld [vmem:[#allocation3 + $0xb1] sm:$0xff]  ;;  %v3618_v9 = vmax.f32 %v3586_v3, 0.0 }
 0x356   : > { %vm17212_vm4 = vmmov %vm17199_vm3  ;;  %v3763_v62 = vld [vmem:[#allocation3 + $0xb8] sm:$0xff]  ;;  %v3766_v21 = vld [vmem:[#allocation3 + $0xd0] sm:$0xff]  ;;  %17213 = vst [vmem:[#allocation100_spill] sm:$0xff] %v14671_v11 }
 0x357   : > { %3649 = vst.msk [vmem:[#allocation3 + $0xd8] sm:$0xff] %vm17212_vm4, %v3617_v37  ;;  %vm17214_vm7 = vmmov %vm17199_vm3  ;;  %v3764_v32 = vld [vmem:[#allocation3 + $0xc0] sm:$0xff]  ;;  %vm17217_vm3 = vnez %v16773_v12  ;;  %vm17218_vm4 = vnez %v17095_v13  ;;  %v11648_v37 = vpop.f32.mrb[28].mxu0  ;;  %v3765_v11 = vld [vmem:[#allocation3 + $0xc8] sm:$0xff] }
 0x358   : > { %3652 = vst.msk [vmem:[#allocation3 + $0xf0] sm:$0xff] %vm17214_vm7, %v3620_v39  ;;  %v14674_v30 = vld [vmem:[#allocation3 + $0xbf] sm:$0xff]  ;;  %v14676_v43 = vld [vmem:[#allocation3 + $0xc7] sm:$0xff]  ;;  %v4626_v48 = vsel %vm17217_vm3, %v14662_v52, 0.0  ;;  %v5269_v3 = vsel %vm17218_vm4, %v14664_v31, 0.0  ;;  %vm17219_vm8 = vmmov %vm17214_vm7  ;;  %v14685_v19 = vpack.c.bf16 %v3764_v32, %v3763_v62  ;;  %v3591_v14 = vadd.f32 %v11648_v37, %v14320_v16  ;;  %v3507_v20 = vpop.f32.mrb[29].mxu0 }
 0x359   : > { %17215 = vst [vmem:[#allocation101_spill] sm:$0xff] %v14674_v30  ;;  %17216 = vst [vmem:[#allocation102_spill] sm:$0xff] %v14676_v43  ;;  %v14687_v39 = vld [vmem:[#allocation3 + $0xc1] sm:$0xff]  ;;  %v14690_v28 = vpack.c.bf16 %v14674_v30, %v4626_v48  ;;  %v14693_v47 = vpack.c.bf16 %v3766_v21, %v3765_v11  ;;  %v14695_v25 = vld [vmem:[#allocation3 + $0xcf] sm:$0xff]  ;;  %vm17224_vm7 = vnez %v16776_v42  ;;  %v3589_v62 = vadd.f32 %v14320_v16, %v3507_v20  ;;  %v11649_v32 = vpop.f32.mrb[30].mxu0 }
 0x35a   : > { %3650 = vst.msk [vmem:[#allocation3 + $0xe0] sm:$0xff] %vm17219_vm8, %v3618_v9  ;;  %17220 = vst [vmem:[#allocation103_spill] sm:$0xff] %v14685_v19  ;;  %v14699_v13 = vld [vmem:[#allocation3 + $0xb9] sm:$0xff]  ;;  %v4628_v9 = vsel %vm17224_vm7, %v14676_v43, 0.0  ;;  %11675 = vmatmul.mubr.msk.bf16.gmra.mrb[20].mxu1 %vm17219_vm8, %v14685_v19  ;;  %v14711_v11 = vpack.c.bf16 %v5269_v3, %v14697_v7  ;;  %v3623_v21 = vmax.f32 %v3591_v14, 0.0  ;;  %v3592_v37 = vadd.f32 %v11649_v32, %v14320_v16 }
 0x35b   : > { %17221 = vst [vmem:[#allocation104_spill] sm:$0xff] %v14690_v28  ;;  %17222 = vst [vmem:[#allocation105_spill] sm:$0xff] %v14693_v47  ;;  %v14708_v48 = vpack.c.bf16 %v14695_v25, %v4628_v9  ;;  %v3510_v28 = vpop.f32.mrb[31].mxu0  ;;  %v5271_v20 = vsel %vm17228_vm0, %v14687_v39, 0.0  ;;  %v5606_v19 = vsel %vm17204_vm9, %v14662_v52, 0.0  ;;  %v3621_v9 = vmax.f32 %v3589_v62, 0.0 }
 0x35c   : > { %17223 = vst [vmem:[#allocation106_spill] sm:$0xff] %v14695_v25  ;;  %17226 = vst [vmem:[#allocation108_spill] sm:$0xff] %v14711_v11  ;;  %v14724_v3 = vpack.c.bf16 %v5271_v20, %v14699_v13  ;;  %v14727_v14 = vpack.c.bf16 %v14674_v30, %v5606_v19  ;;  %v3624_v32 = vmax.f32 %v3592_v37, 0.0  ;;  %v5608_v52 = vsel %vm17217_vm3, %v14676_v43, 0.0  ;;  %v14738_v20 = vld [vmem:[#allocation3 + $0xc9] sm:$0xff] }
 0x35d   : > { %17225 = vst [vmem:[#allocation107_spill] sm:$0xff] %v14708_v48  ;;  %vm17227_vm4 = vmmov %vm17219_vm8  ;;  %v3590_v48 = vadd.f32 %v14320_v16, %v3510_v28  ;;  %v14741_v19 = vpack.c.bf16 %v14695_v25, %v5608_v52  ;;  %vm17234_vm3 = vnez %v17025_v54  ;;  %v3769_v52 = vld [vmem:[#allocation3 + $0xe8] sm:$0xff]  ;;  %vm17241_vm9 = vnez %v17103_v26 }
 0x35e   : > { %11678 = vmatprep.mubr.msk.bf16.mxu1 %vm17227_vm4, %v14693_v47  ;;  %17229 = vst [vmem:[#allocation109_spill] sm:$0xff] %v14724_v3  ;;  %17230 = vst [vmem:[#allocation110_spill] sm:$0xff] %v14727_v14  ;;  %v14730_v11 = vld [vmem:[#allocation3 + $0xd7] sm:$0xff]  ;;  %v3657_v43 = vld [vmem:[#allocation3 + $0x7] sm:$0xff] }
 0x35f   : > { %vm17231_vm8 = vmmov %vm17227_vm4  ;;  %v14732_v47 = vld [vmem:[#allocation3 + $0xd1] sm:$0xff]  ;;  %3653 = vst.msk [vmem:[#allocation3 + $0xf8] sm:$0xff] %vm17227_vm4, %v3621_v9  ;;  %v3622_v28 = vmax.f32 %v3590_v48, 0.0  ;;  %v4630_v3 = vsel %vm17234_vm3, %v14730_v11, 0.0 }
 0x360   : > { %3655 = vst.msk [vmem:[#allocation3 + $0x108] sm:$0xff] %vm17231_vm8, %v3623_v21  ;;  %v3767_v16 = vld [vmem:[#allocation3 + $0xd8] sm:$0xff]  ;;  %v3770_v62 = vld [vmem:[#allocation3 + $0xf0] sm:$0xff]  ;;  %17232 = vst [vmem:[#allocation111_spill] sm:$0xff] %v14741_v19  ;;  %v5273_v48 = vsel %vm17102_vm13, %v14732_v47, 0.0 }
 0x361   : > { %vm17233_vm8 = vmmov %vm17227_vm4  ;;  %v3768_v21 = vld [vmem:[#allocation3 + $0xe0] sm:$0xff]  ;;  %3654 = vst.msk [vmem:[#allocation3 + $0x100] sm:$0xff] %vm17227_vm4, %v3622_v28  ;;  %v14764_v30 = vpack.c.bf16 %v3770_v62, %v3769_v52  ;;  %v14766_v12 = vld [vmem:[#allocation3 + $0xef] sm:$0xff]  ;;  %v14772_v28 = vpack.c.bf16 %v5273_v48, %v14738_v20  ;;  %v5610_v62 = vsel %vm17224_vm7, %v14730_v11, 0.0 }
 0x362   : > { %3656 = vst.msk [vmem:[#allocation3 + $0x110] sm:$0xff] %vm17233_vm8, %v3624_v32  ;;  %v14744_v37 = vld [vmem:[#allocation3 + $0xdf] sm:$0xff]  ;;  %v14746_v14 = vld [vmem:[#allocation3 + $0xe7] sm:$0xff]  ;;  %v14755_v9 = vpack.c.bf16 %v3768_v21, %v3767_v16  ;;  %vm17238_vm8 = vnez %v17030_v27  ;;  %vm17242_vm13 = vmmov %vm17227_vm4 }
 0x363   : > { %v14757_v19 = vld [vmem:[#allocation3 + $0xd9] sm:$0xff]  ;;  %v14759_v32 = vld [vmem:[#allocation3 + $0xe1] sm:$0xff]  ;;  %v14762_v25 = vpack.c.bf16 %v14744_v37, %v4630_v3  ;;  %17237 = vst [vmem:[#allocation114_spill] sm:$0xff] %v14764_v30  ;;  %v4632_v10 = vsel %vm17238_vm8, %v14746_v14, 0.0  ;;  %17239 = vst [vmem:[#allocation115_spill] sm:$0xff] %v14772_v28  ;;  %v14791_v48 = vpack.c.bf16 %v14744_v37, %v5610_v62  ;;  %v3689_v28 = vsel %vm17006_vm15, %v3657_v43, 0.0 }
 0x364   : > { %17235 = vst [vmem:[#allocation112_spill] sm:$0xff] %v14755_v9  ;;  %11679 = vmatmul.mubr.msk.bf16.gmra.mrb[24].mxu1 %vm17227_vm4, %v14755_v9  ;;  %v14777_v16 = vpack.c.bf16 %v14766_v12, %v4632_v10  ;;  %v5275_v3 = vsel %vm17241_vm9, %v14759_v32, 0.0  ;;  %v5612_v10 = vsel %vm17234_vm3, %v14746_v14, 0.0  ;;  %v3658_v52 = vld [vmem:[#allocation3 + $0xf] sm:$0xff]  ;;  %vm17248_vm15 = vnez %v17033_v57 }
 0x365   : > { %17236 = vst [vmem:[#allocation113_spill] sm:$0xff] %v14762_v25  ;;  %11682 = vmatprep.mubr.msk.bf16.mxu1 %vm17242_vm13, %v14764_v30  ;;  %v14788_v21 = vpack.c.bf16 %v5275_v3, %v14757_v19  ;;  %17244 = vst [vmem:[#allocation118_spill] sm:$0xff] %v14791_v48  ;;  %v14799_v9 = vpack.c.bf16 %v14766_v12, %v5612_v10  ;;  %v6233_v30 = vsel %vm16939_vm12, %v14397_v35, 0.0  ;;  %v6235_v3 = vsel %vm16946_vm14, %v14415_v8, 0.0  ;;  %v14817_v10 = vld [vmem:[#allocation3 + $0xe9] sm:$0xff] }
 0x366   : > { %17240 = vst [vmem:[#allocation116_spill] sm:$0xff] %v14777_v16  ;;  %v14807_v62 = vld [vmem:[#allocation3 + $0xf7] sm:$0xff]  ;;  %v14815_v58 = vpack.c.bf16 %v6235_v3, %v14427_v0  ;;  %v3721_v8 = vpack.c.bf16 %v3658_v52, %v3689_v28  ;;  %v3691_v0 = vsel %vm13455_vm5, %v14335_v56, 0.0  ;;  %v6239_v56 = vsel %vm17158_vm11, %v14483_v63, 0.0  ;;  %vm17256_vm5 = vmmov %vm17227_vm4 }
 0x367   : > { %17243 = vst [vmem:[#allocation117_spill] sm:$0xff] %v14788_v21  ;;  %17245 = vst [vmem:[#allocation119_spill] sm:$0xff] %v14799_v9  ;;  %v14809_v48 = vld [vmem:[#allocation3 + $0xf1] sm:$0xff]  ;;  %v14812_v21 = vpack.c.bf16 %v6233_v30, %v14425_v38  ;;  %v4634_v9 = vsel %vm17248_vm15, %v14807_v62, 0.0  ;;  %v3717_v42 = vsel %vm17248_vm15, %v14746_v14, 0.0 }
 0x368   : > { %17247 = vst [vmem:[#allocation121_spill] sm:$0xff] %v14815_v58  ;;  %v3771_v43 = vld [vmem:[#allocation3 + $0xf8] sm:$0xff]  ;;  %v5277_v16 = vsel %vm17000_vm1, %v14809_v48, 0.0  ;;  %v3772_v25 = vld [vmem:[#allocation3 + $0x100] sm:$0xff]  ;;  %v5614_v58 = vsel %vm17238_vm8, %v14807_v62, 0.0  ;;  %vm17259_vm13 = vmmov %vm17227_vm4  ;;  %vm17263_vm4 = vnez %v17074_v45  ;;  %v3735_v54 = vpack.c.bf16 %v14766_v12, %v3717_v42 }
 0x369   : > { %17246 = vst [vmem:[#allocation120_spill] sm:$0xff] %v14812_v21  ;;  %v14825_v35 = vld [vmem:[#allocation3 + $0xff] sm:$0xff]  ;;  %v14830_v3 = vpack.c.bf16 %v5277_v16, %v14817_v10  ;;  %v14835_v21 = vpack.c.bf16 %v3772_v25, %v3771_v43  ;;  %v14845_v52 = vld [vmem:[#allocation3 + $0x107] sm:$0xff]  ;;  %v3722_v43 = vpack.c.bf16 %v14342_v36, %v3691_v0  ;;  %v14898_v0 = vld [vmem:[#allocation3 + $0x111] sm:$0xff] }
 0x36a   : > { %v14827_v30 = vld [vmem:[#allocation3 + $0xf9] sm:$0xff]  ;;  %v14840_v38 = vld [vmem:[#allocation3 + $0x101] sm:$0xff]  ;;  %v14843_v28 = vpack.c.bf16 %v14825_v35, %v4634_v9  ;;  %17254 = vst [vmem:[#allocation127_spill] sm:$0xff] %v14845_v52  ;;  %v14848_v16 = vpack.c.bf16 %v14825_v35, %v5614_v58  ;;  %v5616_v25 = vsel %vm17248_vm15, %v14845_v52, 0.0  ;;  %v14864_v9 = vld [vmem:[#allocation3 + $0x10f] sm:$0xff]  ;;  %v3693_v52 = vsel %vm13459_vm6, %v14344_v53, 0.0 }
 0x36b   : > { %17249 = vst [vmem:[#allocation122_spill] sm:$0xff] %v14827_v30  ;;  %17250 = vst [vmem:[#allocation123_spill] sm:$0xff] %v14830_v3  ;;  %v5279_v3 = vsel %vm17108_vm10, %v14840_v38, 0.0  ;;  %vm17266_vm6 = vnez %v17084_v49  ;;  %v17338_v12 = vld [vmem:[#allocation22_spill] sm:$0xff] }
 0x36c   : > { %17251 = vst [vmem:[#allocation124_spill] sm:$0xff] %v14835_v21  ;;  %17252 = vst [vmem:[#allocation125_spill] sm:$0xff] %v14840_v38  ;;  %11683 = vmatmul.mubr.msk.bf16.gmra.mrb[28].mxu1 %vm17256_vm5, %v14835_v21  ;;  %v14867_v58 = vpack.c.bf16 %v5279_v3, %v14827_v30  ;;  %v14881_v21 = vpack.c.bf16 %v6239_v56, %v14495_v60  ;;  %v6241_v3 = vsel %vm17263_vm4, %v14528_v17, 0.0  ;;  %vm17265_vm5 = vnez %v17081_v24  ;;  %v17393_v42 = vld [vmem:[#allocation107_spill] sm:$0xff] }
 0x36d   : > { %17253 = vst [vmem:[#allocation126_spill] sm:$0xff] %v14843_v28  ;;  %17255 = vst [vmem:[#allocation128_spill] sm:$0xff] %v14848_v16  ;;  %11690 = vmatprep.mubr.msk.bf16.mxu1 %vm17259_vm13, %v3721_v8  ;;  %v14872_v16 = vpack.c.bf16 %v14864_v9, %v5616_v25  ;;  %v14878_v28 = vpack.c.bf16 %v6237_v40, %v14493_v1  ;;  %v14887_v8 = vpack.c.bf16 %v6241_v3, %v14561_v61 }
 0x36e   : > { %17257 = vst [vmem:[#allocation129_spill] sm:$0xff] %v14864_v9  ;;  %17258 = vst [vmem:[#allocation130_spill] sm:$0xff] %v14867_v58  ;;  %v6243_v36 = vsel %vm17265_vm5, %v14551_v51, 0.0  ;;  %v6245_v41 = vsel %vm17266_vm6, %v14596_v23, 0.0  ;;  %vm17267_vm13 = vnez %v17089_v46  ;;  %vm17272_vm5 = vnez %v17091_v34 }
 0x36f   : > { %17260 = vst [vmem:[#allocation131_spill] sm:$0xff] %v14872_v16  ;;  %17261 = vst [vmem:[#allocation132_spill] sm:$0xff] %v14878_v28  ;;  %v6247_v53 = vsel %vm17267_vm13, %v14619_v55, 0.0  ;;  %v14901_v25 = vpack.c.bf16 %v6243_v36, %v14563_v6  ;;  %v14904_v40 = vpack.c.bf16 %v6245_v41, %v14629_v29  ;;  %v6249_v3 = vsel %vm17272_vm5, %v14664_v31, 0.0  ;;  %v17275_v28 = vld [vmem:[#allocation80_spill] sm:$0xff]  ;;  %v17281_v16 = vld [vmem:[#allocation25_spill] sm:$0xff] }
 0x370   : > { %17262 = vst [vmem:[#allocation133_spill] sm:$0xff] %v14881_v21  ;;  %17264 = vst [vmem:[#allocation134_spill] sm:$0xff] %v14887_v8  ;;  %v14907_v56 = vpack.c.bf16 %v6247_v53, %v14631_v50  ;;  %v14912_v8 = vld [vmem:[#allocation3 + $0x109] sm:$0xff]  ;;  %v14915_v21 = vpack.c.bf16 %v6249_v3, %v14697_v7  ;;  %vm17276_vm13 = vnez %v17275_v28  ;;  %v6253_v41 = vsel %vm17228_vm0, %v14732_v47, 0.0 }
 0x371   : > { %17268 = vst [vmem:[#allocation135_spill] sm:$0xff] %v14898_v0  ;;  %17269 = vst [vmem:[#allocation136_spill] sm:$0xff] %v14901_v25  ;;  %v6251_v36 = vsel %vm17276_vm13, %v14687_v39, 0.0  ;;  %vm17277_vm6 = vnez %v17101_v59  ;;  %v14933_v3 = vpack.c.bf16 %v6253_v41, %v14738_v20  ;;  %v6257_v25 = vsel %vm17241_vm9, %v14809_v48, 0.0 }
 0x372   : > { %17270 = vst [vmem:[#allocation137_spill] sm:$0xff] %v14904_v40  ;;  %17271 = vst [vmem:[#allocation138_spill] sm:$0xff] %v14907_v56  ;;  %v6255_v53 = vsel %vm17277_vm6, %v14759_v32, 0.0  ;;  %v12837_v56 = vld [vmem:[%s16469_s3 + $0x28] sm:$0xff]   ;;  %v14930_v40 = vpack.c.bf16 %v6251_v36, %v14699_v13  ;;  %v3723_v58 = vpack.c.bf16 %v17281_v16, %v3693_v52  ;;  %v14943_v9 = vpack.c.bf16 %v6257_v25, %v14817_v10  ;;  %v17286_v52 = vld [vmem:[#allocation29_spill] sm:$0xff] }
 0x373   : > { %17273 = vst [vmem:[#allocation139_spill] sm:$0xff] %v14912_v8  ;;  %17274 = vst [vmem:[#allocation140_spill] sm:$0xff] %v14915_v21  ;;  %v14936_v21 = vpack.c.bf16 %v6255_v53, %v14757_v19  ;;  %v6259_v36 = vsel %vm17000_vm1, %v14840_v38, 0.0  ;;  %v6261_v41 = vsel %vm17108_vm10, %v14898_v0, 0.0  ;;  %vm17283_vm6 = vcmask 261120   ;;  %v12838_v16 = vld [vmem:[%s16469_s3 + $0x30] sm:$0xff]  }
 0x374   : > { %17278 = vst [vmem:[#allocation80_spill] sm:$0xff] %v14930_v40  ;;  %17279 = vst [vmem:[#allocation141_spill] sm:$0xff] %v14933_v3  ;;  %11691 = vmatmul.mubr.msk.bf16.vlgmr.msra.gmra.mrb[0].mxu1 %vm17283_vm6, %v3722_v43  ;;  %v14953_v53 = vpack.c.bf16 %v6259_v36, %v14827_v30  ;;  %v17288_v25 = vld [vmem:[#allocation35_spill] sm:$0xff]  ;;  %v17291_v43 = vld [vmem:[#allocation60_spill] sm:$0xff]  ;;  %v4271_v14 = vsel %vm16946_vm14, %v17338_v12, 0.0 }
 0x375   : > { %17280 = vst [vmem:[#allocation142_spill] sm:$0xff] %v14936_v21  ;;  %17282 = vst [vmem:[#allocation25_spill] sm:$0xff] %v14943_v9  ;;  %v14956_v21 = vpack.c.bf16 %v6261_v41, %v14912_v8  ;;  %11723 = vmatpush3.bf16.msra.mxu1 %v17286_v52  ;;  %v17289_v9 = vld [vmem:[#allocation37_spill] sm:$0xff]  ;;  %v17292_v40 = vld [vmem:[#allocation38_spill] sm:$0xff] }
 0x376   : > { %17284 = vst [vmem:[#allocation143_spill] sm:$0xff] %v14953_v53  ;;  %vm17287_vm9 = vmmov %vm17283_vm6  ;;  %11724 = vmatprep.subr.bf16.mxu1 %v12837_v56  ;;  %vm17290_vm10 = vnez %v17289_v9  ;;  %vm17293_vm6 = vnez %v17292_v40  ;;  %v17294_v41 = vld [vmem:[#allocation56_spill] sm:$0xff]  ;;  %v17295_v52 = vld [vmem:[#allocation87_spill] sm:$0xff] }
 0x377   : > { %17285 = vst [vmem:[#allocation144_spill] sm:$0xff] %v14956_v21  ;;  %11694 = vmatprep.mubr.msk.bf16.mxu1 %vm17287_vm9, %v3723_v58  ;;  %v3695_v3 = vsel %vm17290_vm10, %v17288_v25, 0.0  ;;  %v3697_v36 = vsel %vm17293_vm6, %v17291_v43, 0.0  ;;  %vm17296_vm1 = vmmov %vm17287_vm9  ;;  %v17297_v58 = vld [vmem:[#allocation47_spill] sm:$0xff]  ;;  %v17300_v9 = vld [vmem:[#allocation19_spill] sm:$0xff] }
 0x378   : > { %v3724_v21 = vpack.c.bf16 %v17294_v41, %v3695_v3  ;;  %v3725_v53 = vpack.c.bf16 %v17295_v52, %v3697_v36  ;;  %v17298_v8 = vld [vmem:[#allocation39_spill] sm:$0xff]  ;;  %v17301_v25 = vld [vmem:[#allocation40_spill] sm:$0xff]  ;;  %v17303_v40 = vld [vmem:[#allocation93_spill] sm:$0xff] }
 0x379   : > { %11725 = vmatpush3.bf16.msra.mxu1 %v12837_v56  ;;  %vm17299_vm0 = vnez %v17298_v8  ;;  %vm17302_vm10 = vnez %v17301_v25  ;;  %v17304_v56 = vld [vmem:[#allocation63_spill] sm:$0xff]  ;;  %vm17305_vm6 = vmmov %vm17296_vm1  ;;  %v17311_v41 = vld [vmem:[#allocation42_spill] sm:$0xff] }
 0x37a   : > { %11758 = vmatprep.subr.bf16.mxu1 %v12838_v16  ;;  %v3699_v0 = vsel %vm17299_vm0, %v17297_v58, 0.0  ;;  %v3701_v30 = vsel %vm17302_vm10, %v17300_v9, 0.0  ;;  %vm17306_vm13 = vmmov %vm17296_vm1  ;;  %v17307_v3 = vld [vmem:[#allocation67_spill] sm:$0xff]  ;;  %v17313_v52 = vld [vmem:[#allocation62_spill] sm:$0xff] }
 0x37b   : > { %v3726_v43 = vpack.c.bf16 %v17303_v40, %v3699_v0  ;;  %v3727_v38 = vpack.c.bf16 %v17304_v56, %v3701_v30  ;;  %v17310_v36 = vld [vmem:[#allocation71_spill] sm:$0xff]  ;;  %vm17315_vm0 = vmmov %vm17305_vm6  ;;  %v17317_v30 = vld [vmem:[#allocation74_spill] sm:$0xff] }
 0x37c   : > { %11695 = vmatmul.mubr.msk.bf16.gmra.mrb[4].mxu1 %vm17287_vm9, %v3724_v21  ;;  %v17308_v21 = vld [vmem:[#allocation41_spill] sm:$0xff]  ;;  %v17314_v25 = vld [vmem:[#allocation75_spill] sm:$0xff]  ;;  %vm17316_vm10 = vmmov %vm17315_vm0 }
 0x37d   : > { %11698 = vmatprep.mubr.msk.bf16.mxu1 %vm17296_vm1, %v3725_v53  ;;  %vm17309_vm9 = vnez %v17308_v21  ;;  %vm17312_vm1 = vnez %v17311_v41  ;;  %v17318_v0 = vld [vmem:[#allocation43_spill] sm:$0xff]  ;;  %v17320_v40 = vld [vmem:[#allocation86_spill] sm:$0xff]  ;;  %vm17337_vm15 = vmmov %vm17315_vm0 }
 0x37e   : > { %v3703_v53 = vsel %vm17309_vm9, %v17307_v3, 0.0  ;;  %v3705_v8 = vsel %vm17312_vm1, %v17310_v36, 0.0  ;;  %v17323_v3 = vld [vmem:[#allocation82_spill] sm:$0xff]  ;;  %vm17325_vm9 = vmmov %vm17315_vm0 }
 0x37f   : > { %v3728_v58 = vpack.c.bf16 %v17313_v52, %v3703_v53  ;;  %v3729_v9 = vpack.c.bf16 %v17314_v25, %v3705_v8  ;;  %v17324_v41 = vld [vmem:[#allocation94_spill] sm:$0xff]  ;;  %vm17326_vm1 = vmmov %vm17315_vm0  ;;  %v17327_v53 = vld [vmem:[#allocation99_spill] sm:$0xff] }
 0x380   : > { %v3711_v8 = vsel %vm17224_vm7, %v17327_v53, 0.0  ;;  %v17328_v52 = vld [vmem:[#allocation102_spill] sm:$0xff]  ;;  %v17329_v25 = vld [vmem:[#allocation101_spill] sm:$0xff]  ;;  %vm17333_vm7 = vmmov %vm17315_vm0 }
 0x381   : > { %vm17346_vm14 = vmmov %vm17315_vm0  ;;  %v12843_v12 = vld [vmem:[%s16469_s3 + $0x58] sm:$0xff]  }
 0x384   : > { %11699 = vmatmul.mubr.msk.bf16.gmra.mrb[8].mxu1 %vm17305_vm6, %v3726_v43  ;;  %vm17319_vm6 = vnez %v17318_v0  ;;  %v17321_v43 = vld [vmem:[#allocation44_spill] sm:$0xff] }
 0x385   : > { %11702 = vmatprep.mubr.msk.bf16.mxu1 %vm17306_vm13, %v3727_v38  ;;  %v3707_v38 = vsel %vm17319_vm6, %v17317_v30, 0.0  ;;  %vm17322_vm13 = vnez %v17321_v43  ;;  %v17330_v30 = vld [vmem:[#allocation106_spill] sm:$0xff] }
 0x386   : > { %v3709_v56 = vsel %vm17322_vm13, %v17320_v40, 0.0  ;;  %v3730_v21 = vpack.c.bf16 %v17323_v3, %v3707_v38  ;;  %v3715_v38 = vsel %vm17238_vm8, %v14730_v11, 0.0  ;;  %v4237_v43 = vld [vmem:[#allocation3 + $0x11] sm:$0xff]  ;;  %vm17336_vm8 = vmmov %vm17315_vm0 }
 0x387   : > { %v3731_v36 = vpack.c.bf16 %v17324_v41, %v3709_v56  ;;  %v3734_v40 = vpack.c.bf16 %v14744_v37, %v3715_v38  ;;  %v17334_v56 = vld [vmem:[#allocation49_spill] sm:$0xff]  ;;  %v4269_v27 = vsel %vm16939_vm12, %v4237_v43, 0.0  ;;  %v17339_v37 = vld [vmem:[#allocation36_spill] sm:$0xff]  ;;  %vm17342_vm12 = vmmov %vm17315_vm0 }
 0x388   : > { %vm17335_vm6 = vnez %v17334_v56  ;;  %v4273_v41 = vsel %vm17065_vm2, %v17339_v37, 0.0  ;;  %vm17343_vm13 = vmmov %vm17315_vm0  ;;  %v17391_v38 = vld [vmem:[#allocation104_spill] sm:$0xff]  ;;  %v17398_v43 = vld [vmem:[#allocation126_spill] sm:$0xff] }
 0x389   : > { %v3719_v3 = vsel %vm17335_vm6, %v14807_v62, 0.0  ;;  %v17340_v62 = vld [vmem:[#allocation21_spill] sm:$0xff]  ;;  %vm17347_vm2 = vmmov %vm17315_vm0  ;;  %v17407_v37 = vld [vmem:[#allocation81_spill] sm:$0xff] }
 0x38a   : > { %v3736_v57 = vpack.c.bf16 %v14825_v35, %v3719_v3  ;;  %v17341_v35 = vld [vmem:[#allocation85_spill] sm:$0xff]  ;;  %v17400_v3 = vld [vmem:[#allocation127_spill] sm:$0xff] }
 0x38b   : > { %v4302_v53 = vpack.c.bf16 %v4273_v41, %v17341_v35  ;;  %v12844_v41 = vld [vmem:[%s16469_s3 + $0x60] sm:$0xff]   ;;  %v17415_v35 = vld [vmem:[#allocation64_spill] sm:$0xff] }
 0x38c   : > { %11703 = vmatmul.mubr.msk.bf16.gmra.mrb[12].mxu1 %vm17315_vm0, %v3728_v58  ;;  %v3713_v58 = vsel %vm17234_vm3, %v17328_v52, 0.0  ;;  %vm17332_vm3 = vmmov %vm17315_vm0  ;;  %v4277_v52 = vsel %vm17263_vm4, %v14460_v44, 0.0  ;;  %v5901_v56 = vld [vmem:[#allocation3 + $0x60] sm:$0xff] }
 0x38d   : > { %11706 = vmatprep.mubr.msk.bf16.mxu1 %vm17316_vm10, %v3729_v9  ;;  %v3732_v9 = vpack.c.bf16 %v17329_v25, %v3711_v8  ;;  %v3733_v0 = vpack.c.bf16 %v17330_v30, %v3713_v58  ;;  %vm17331_vm10 = vmmov %vm17315_vm0  ;;  %v4275_v8 = vsel %vm17158_vm11, %v17344_v4, 0.0  ;;  %v17345_v58 = vld [vmem:[#allocation89_spill] sm:$0xff]  ;;  %vm17349_vm11 = vnez %v17084_v49  ;;  %v17387_v30 = vld [vmem:[#allocation90_spill] sm:$0xff] }
 0x38e   : > { %v4303_v25 = vpack.c.bf16 %v4275_v8, %v17345_v58  ;;  %v4281_v33 = vsel %vm17349_vm11, %v14528_v17, 0.0  ;;  %vm17350_vm4 = vmmov %vm17315_vm0  ;;  %vm17364_vm11 = vnez %v17107_v5  ;;  %v12841_v5 = vld [vmem:[%s16469_s3 + $0x48] sm:$0xff]   ;;  %v17421_v4 = vld [vmem:[#allocation33_spill] sm:$0xff] }
 0x38f   : > { %v4306_v44 = vpack.c.bf16 %v4281_v33, %v14561_v61  ;;  %v17369_v61 = vld [vmem:[#allocation122_spill] sm:$0xff]  ;;  %v17423_v8 = vld [vmem:[#allocation103_spill] sm:$0xff]  ;;  %v17426_v58 = vld [vmem:[#allocation112_spill] sm:$0xff] }
 0x390   : > { %v4942_v33 = vld [vmem:[#allocation3 + $0x108] sm:$0xff] }
 0x394   : > { %11707 = vmatmul.mubr.msk.bf16.gmra.mrb[16].mxu1 %vm17325_vm9, %v3730_v21  ;;  %v4236_v21 = vld [vmem:[#allocation3 + $0x9] sm:$0xff]  ;;  %vm17348_vm9 = vnez %v17081_v24  ;;  %v4285_v24 = vsel %vm17272_vm5, %v14596_v23, 0.0 }
 0x395   : > { %11710 = vmatprep.mubr.msk.bf16.mxu1 %vm17326_vm1, %v3731_v36  ;;  %v4300_v11 = vpack.c.bf16 %v4269_v27, %v4236_v21  ;;  %v4301_v36 = vpack.c.bf16 %v4271_v14, %v17340_v62  ;;  %vm17351_vm1 = vmmov %vm17315_vm0  ;;  %v4308_v49 = vpack.c.bf16 %v4285_v24, %v14629_v29  ;;  %v4636_v21 = vsel %vm17335_vm6, %v17400_v3, 0.0  ;;  %v17401_v27 = vld [vmem:[#allocation129_spill] sm:$0xff]  ;;  %v17409_v62 = vld [vmem:[#allocation83_spill] sm:$0xff] }
 0x396   : > { %vm17357_vm5 = vmmov %vm17351_vm1  ;;  %v17405_v14 = vld [vmem:[#allocation24_spill] sm:$0xff]  ;;  %v17435_v24 = vld [vmem:[#allocation50_spill] sm:$0xff] }
 0x397   : > { %v17492_v3 = vld [vmem:[#allocation131_spill] sm:$0xff] }
 0x39c   : > { %11711 = vmatmul.mubr.msk.bf16.gmra.mrb[20].mxu1 %vm17315_vm0, %v3732_v9  ;;  %v4279_v9 = vsel %vm17348_vm9, %v14483_v63, 0.0  ;;  %vm17352_vm0 = vnez %v17089_v46  ;;  %vm17363_vm9 = vnez %v16999_v22  ;;  %v17371_v22 = vld [vmem:[#allocation23_spill] sm:$0xff] }
 0x39d   : > { %11714 = vmatprep.mubr.msk.bf16.mxu1 %vm17331_vm10, %v3733_v0  ;;  %v4305_v45 = vpack.c.bf16 %v4279_v9, %v14495_v60  ;;  %vm17353_vm10 = vmmov %vm17351_vm1  ;;  %v17389_v0 = vld [vmem:[#allocation95_spill] sm:$0xff] }
 0x39e   : > { %v4943_v9 = vld [vmem:[#allocation3 + $0x110] sm:$0xff] }
 0x3a4   : > { %11715 = vmatmul.mubr.msk.bf16.gmra.mrb[24].mxu1 %vm17332_vm3, %v3734_v40  ;;  %vm17354_vm3 = vmmov %vm17351_vm1  ;;  %v17395_v40 = vld [vmem:[#allocation113_spill] sm:$0xff] }
 0x3a5   : > { %11718 = vmatprep.mubr.msk.bf16.mxu1 %vm17333_vm7, %v3735_v54  ;;  %vm17355_vm7 = vnez %v17275_v28  ;;  %v17385_v28 = vld [vmem:[#allocation68_spill] sm:$0xff] }
 0x3a6   : > { %v4287_v17 = vsel %vm17355_vm7, %v14619_v55, 0.0  ;;  %v17373_v55 = vld [vmem:[#allocation26_spill] sm:$0xff]  ;;  %vm17374_vm7 = vmmov %vm17351_vm1  ;;  %v17396_v54 = vld [vmem:[#allocation116_spill] sm:$0xff] }
 0x3a7   : > { %v4309_v60 = vpack.c.bf16 %v4287_v17, %v14631_v50  ;;  %v17439_v17 = vld [vmem:[#allocation65_spill] sm:$0xff] }
 0x3ac   : > { %11719 = vmatmul.mubr.msk.bf16.gmra.mrb[28].mxu1 %vm17336_vm8, %v3736_v57  ;;  %vm17356_vm8 = vnez %v17097_v18  ;;  %v4295_v18 = vsel %vm17363_vm9, %v14759_v32, 0.0  ;;  %v17379_v32 = vld [vmem:[#allocation52_spill] sm:$0xff]  ;;  %vm17390_vm9 = vmmov %vm17351_vm1  ;;  %v4653_v57 = vpack.c.bf16 %v17401_v27, %v4636_v21 }
 0x3ad   : > { %11726 = vmatprep.mubr.msk.bf16.mxu1 %vm17337_vm15, %v4300_v11  ;;  %v4289_v46 = vsel %vm17356_vm8, %v14664_v31, 0.0  ;;  %vm17358_vm15 = vmmov %vm17351_vm1  ;;  %v17403_v11 = vld [vmem:[#allocation20_spill] sm:$0xff] }
 0x3ae   : > { %v4310_v34 = vpack.c.bf16 %v4289_v46, %v14697_v7  ;;  %v4313_v7 = vpack.c.bf16 %v4295_v18, %v14757_v19  ;;  %vm17376_vm8 = vmmov %vm17351_vm1  ;;  %v17377_v19 = vld [vmem:[#allocation45_spill] sm:$0xff]  ;;  %v17441_v46 = vld [vmem:[#allocation58_spill] sm:$0xff] }
 0x3af   : > { %v17454_v18 = vld [vmem:[#allocation115_spill] sm:$0xff]  ;;  %v5587_v21 = vld [vmem:[#allocation3 + $0x11f] sm:$0xff] }
 0x3b4   : > { %11727 = vmatmul.mubr.msk.bf16.vlgmr.msra.gmra.mrb[0].mxu1 %vm17342_vm12, %v4301_v36  ;;  %vm17359_vm12 = vnez %v17101_v59  ;;  %v4297_v59 = vsel %vm17364_vm11, %v14809_v48, 0.0  ;;  %v17381_v48 = vld [vmem:[#allocation55_spill] sm:$0xff]  ;;  %vm17392_vm11 = vmmov %vm17351_vm1 }
 0x3b5   : > { %11759 = vmatpush3.bf16.msra.mxu1 %v12838_v16  ;;  %11730 = vmatprep.mubr.msk.bf16.mxu1 %vm17343_vm13, %v4302_v53  ;;  %v4304_v16 = vpack.c.bf16 %v4277_v52, %v14493_v1  ;;  %v4283_v1 = vsel %vm17352_vm0, %v14551_v51, 0.0  ;;  %vm17360_vm13 = vnez %v17103_v26  ;;  %v17367_v26 = vld [vmem:[#allocation91_spill] sm:$0xff]  ;;  %v17417_v53 = vld [vmem:[#allocation73_spill] sm:$0xff] }
 0x3b6   : > { %11760 = vmatprep.subr.bf16.mxu1 %v12839_v2  ;;  %v4307_v63 = vpack.c.bf16 %v4283_v1, %v14563_v6  ;;  %v4291_v6 = vsel %vm17359_vm12, %v14687_v39, 0.0  ;;  %v4293_v29 = vsel %vm17360_vm13, %v14732_v47, 0.0  ;;  %v4314_v47 = vpack.c.bf16 %v4297_v59, %v14817_v10  ;;  %v17375_v39 = vld [vmem:[#allocation84_spill] sm:$0xff]  ;;  %vm17382_vm12 = vmmov %vm17351_vm1  ;;  %v17411_v36 = vld [vmem:[#allocation59_spill] sm:$0xff] }
 0x3b7   : > { %v4311_v23 = vpack.c.bf16 %v4291_v6, %v14699_v13  ;;  %v4312_v31 = vpack.c.bf16 %v4293_v29, %v14738_v20  ;;  %v17366_v13 = vld [vmem:[#allocation125_spill] sm:$0xff]  ;;  %vm17368_vm0 = vnez %v17367_v26  ;;  %v17383_v10 = vld [vmem:[#allocation72_spill] sm:$0xff]  ;;  %vm17384_vm13 = vmmov %vm17351_vm1 }
 0x3b8   : > { %v4299_v50 = vsel %vm17368_vm0, %v17366_v13, 0.0  ;;  %v12842_v20 = vld [vmem:[%s16469_s3 + $0x50] sm:$0xff]   ;;  %v12845_v1 = vld [vmem:[%s16469_s3 + $0x68] sm:$0xff]  }
 0x3b9   : > { %11761 = vmatpush3.bf16.msra.mxu1 %v12839_v2  ;;  %v4315_v51 = vpack.c.bf16 %v4299_v50, %v17369_v61  ;;  %v17413_v2 = vld [vmem:[#allocation61_spill] sm:$0xff]  ;;  %v17447_v6 = vld [vmem:[#allocation96_spill] sm:$0xff]  ;;  %v17462_v13 = vld [vmem:[#allocation135_spill] sm:$0xff] }
 0x3ba   : > { %11794 = vmatprep.subr.bf16.mxu1 %v12840_v15  ;;  %v17424_v52 = vld [vmem:[#allocation105_spill] sm:$0xff]  ;;  %v5281_v50 = vsel %vm17368_vm0, %v17462_v13, 0.0  ;;  %v17463_v61 = vld [vmem:[#allocation139_spill] sm:$0xff] }
 0x3bb   : > { %v17449_v29 = vld [vmem:[#allocation97_spill] sm:$0xff] }
 0x3bc   : > { %11731 = vmatmul.mubr.msk.bf16.gmra.mrb[4].mxu1 %vm17346_vm14, %v4303_v25  ;;  %vm17361_vm14 = vmmov %vm17351_vm1  ;;  %v17428_v25 = vld [vmem:[#allocation114_spill] sm:$0xff]  ;;  %v17456_v59 = vld [vmem:[#allocation117_spill] sm:$0xff] }
 0x3bd   : > { %11734 = vmatprep.mubr.msk.bf16.mxu1 %vm17347_vm2, %v4304_v16  ;;  %vm17362_vm2 = vmmov %vm17351_vm1  ;;  %v17430_v16 = vld [vmem:[#allocation124_spill] sm:$0xff] }
 0x3be   : > { %v12852_v26 = vld [vmem:[%s16471_s5 + $0x30] sm:$0xff]  }
 0x3c4   : > { %11735 = vmatmul.mubr.msk.bf16.gmra.mrb[8].mxu1 %vm17350_vm4, %v4305_v45  ;;  %vm17365_vm4 = vmmov %vm17351_vm1  ;;  %v15189_v45 = vpack.c.bf16 %v4943_v9, %v4942_v33  ;;  %v5904_v9 = vld [vmem:[#allocation3 + $0x78] sm:$0xff] }
 0x3c5   : > { %11738 = vmatprep.mubr.msk.bf16.mxu1 %vm17351_vm1, %v4306_v44  ;;  %v17433_v44 = vld [vmem:[#allocation28_spill] sm:$0xff] }
 0x3cc   : > { %11739 = vmatmul.mubr.msk.bf16.gmra.mrb[12].mxu1 %vm17353_vm10, %v4307_v63  ;;  %vm17370_vm10 = vmmov %vm17351_vm1  ;;  %v17437_v63 = vld [vmem:[#allocation46_spill] sm:$0xff] }
 0x3cd   : > { %11742 = vmatprep.mubr.msk.bf16.mxu1 %vm17354_vm3, %v4308_v49  ;;  %vm17372_vm3 = vmmov %vm17351_vm1  ;;  %v12846_v49 = vld [vmem:[%s16469_s3 + $0x70] sm:$0xff]  }
 0x3d4   : > { %11743 = vmatmul.mubr.msk.bf16.gmra.mrb[16].mxu1 %vm17357_vm5, %v4309_v60  ;;  %vm17378_vm5 = vmmov %vm17351_vm1  ;;  %v17443_v60 = vld [vmem:[#allocation77_spill] sm:$0xff] }
 0x3d5   : > { %11746 = vmatprep.mubr.msk.bf16.mxu1 %vm17358_vm15, %v4310_v34  ;;  %vm17380_vm15 = vmmov %vm17351_vm1  ;;  %v17445_v34 = vld [vmem:[#allocation70_spill] sm:$0xff] }
 0x3dc   : > { %11747 = vmatmul.mubr.msk.bf16.gmra.mrb[20].mxu1 %vm17361_vm14, %v4311_v23  ;;  %vm17386_vm14 = vmmov %vm17351_vm1  ;;  %v17450_v23 = vld [vmem:[#allocation108_spill] sm:$0xff] }
 0x3dd   : > { %11750 = vmatprep.mubr.msk.bf16.mxu1 %vm17362_vm2, %v4312_v31  ;;  %vm17388_vm2 = vmmov %vm17351_vm1  ;;  %v17452_v31 = vld [vmem:[#allocation109_spill] sm:$0xff] }
 0x3e4   : > { %11751 = vmatmul.mubr.msk.bf16.gmra.mrb[24].mxu1 %vm17365_vm4, %v4313_v7  ;;  %vm17394_vm4 = vmmov %vm17351_vm1  ;;  %v17458_v7 = vld [vmem:[#allocation123_spill] sm:$0xff] }
 0x3e5   : > { %11754 = vmatprep.mubr.msk.bf16.mxu1 %vm17351_vm1, %v4314_v47  ;;  %v17460_v47 = vld [vmem:[#allocation130_spill] sm:$0xff] }
 0x3ec   : > { %11755 = vmatmul.mubr.msk.bf16.gmra.mrb[28].mxu1 %vm17370_vm10, %v4315_v51  ;;  %vm17397_vm10 = vmmov %vm17351_vm1  ;;  %v5297_v51 = vpack.c.bf16 %v5281_v50, %v17463_v61  ;;  %v5918_v50 = vld [vmem:[#allocation3 + $0xe8] sm:$0xff] }
 0x3ed   : > { %11762 = vmatprep.mubr.msk.bf16.mxu1 %vm17372_vm3, %v17371_v22  ;;  %vm17399_vm3 = vmmov %vm17351_vm1  ;;  %v17465_v22 = vld [vmem:[#allocation34_spill] sm:$0xff] }
 0x3f4   : > { %11763 = vmatmul.mubr.msk.bf16.vlgmr.msra.gmra.mrb[0].mxu1 %vm17374_vm7, %v17373_v55  ;;  %vm17402_vm7 = vmmov %vm17351_vm1  ;;  %v17467_v55 = vld [vmem:[#allocation92_spill] sm:$0xff] }
 0x3f5   : > { %11795 = vmatpush3.bf16.msra.mxu1 %v12840_v15  ;;  %11766 = vmatprep.mubr.msk.bf16.mxu1 %vm17376_vm8, %v17375_v39  ;;  %vm17404_vm8 = vmmov %vm17351_vm1  ;;  %v17419_v15 = vld [vmem:[#allocation88_spill] sm:$0xff]  ;;  %v17469_v39 = vld [vmem:[#allocation54_spill] sm:$0xff] }
 0x3f6   : > { %11796 = vmatprep.subr.bf16.mxu1 %v12841_v5 }
 0x3f9   : > { %11797 = vmatpush3.bf16.msra.mxu1 %v12841_v5  ;;  %v12847_v5 = vld [vmem:[%s16469_s3 + $0x78] sm:$0xff]  }
 0x3fa   : > { %11830 = vmatprep.subr.bf16.mxu1 %v12842_v20 }
 0x3fc   : > { %11767 = vmatmul.mubr.msk.bf16.gmra.mrb[4].mxu1 %vm17378_vm5, %v17377_v19  ;;  %vm17406_vm5 = vmmov %vm17351_vm1  ;;  %v17471_v19 = vld [vmem:[#allocation66_spill] sm:$0xff] }
 0x3fd   : > { %11770 = vmatprep.mubr.msk.bf16.mxu1 %vm17380_vm15, %v17379_v32  ;;  %vm17408_vm15 = vmmov %vm17351_vm1  ;;  %v17473_v32 = vld [vmem:[#allocation69_spill] sm:$0xff] }
 0x404   : > { %11771 = vmatmul.mubr.msk.bf16.gmra.mrb[8].mxu1 %vm17382_vm12, %v17381_v48  ;;  %vm17410_vm12 = vmmov %vm17351_vm1  ;;  %v17475_v48 = vld [vmem:[#allocation78_spill] sm:$0xff] }
 0x405   : > { %11774 = vmatprep.mubr.msk.bf16.mxu1 %vm17384_vm13, %v17383_v10  ;;  %vm17412_vm13 = vmmov %vm17351_vm1  ;;  %v17477_v10 = vld [vmem:[#allocation76_spill] sm:$0xff] }
 0x40c   : > { %11775 = vmatmul.mubr.msk.bf16.gmra.mrb[12].mxu1 %vm17386_vm14, %v17385_v28  ;;  %vm17414_vm14 = vmmov %vm17351_vm1  ;;  %v17478_v28 = vld [vmem:[#allocation98_spill] sm:$0xff] }
 0x40d   : > { %11778 = vmatprep.mubr.msk.bf16.mxu1 %vm17388_vm2, %v17387_v30  ;;  %vm17416_vm2 = vmmov %vm17351_vm1  ;;  %v17480_v30 = vld [vmem:[#allocation100_spill] sm:$0xff] }
 0x414   : > { %11779 = vmatmul.mubr.msk.bf16.gmra.mrb[16].mxu1 %vm17390_vm9, %v17389_v0  ;;  %vm17418_vm9 = vmmov %vm17351_vm1  ;;  %v17482_v0 = vld [vmem:[#allocation110_spill] sm:$0xff] }
 0x415   : > { %11782 = vmatprep.mubr.msk.bf16.mxu1 %vm17392_vm11, %v17391_v38  ;;  %vm17420_vm11 = vmmov %vm17351_vm1  ;;  %v17484_v38 = vld [vmem:[#allocation111_spill] sm:$0xff] }
 0x41c   : > { %11783 = vmatmul.mubr.msk.bf16.gmra.mrb[20].mxu1 %vm17394_vm4, %v17393_v42  ;;  %vm17422_vm4 = vmmov %vm17351_vm1  ;;  %v17486_v42 = vld [vmem:[#allocation118_spill] sm:$0xff] }
 0x41d   : > { %11786 = vmatprep.mubr.msk.bf16.mxu1 %vm17351_vm1, %v17395_v40  ;;  %v17488_v40 = vld [vmem:[#allocation119_spill] sm:$0xff] }
 0x424   : > { %11787 = vmatmul.mubr.msk.bf16.gmra.mrb[24].mxu1 %vm17397_vm10, %v17396_v54  ;;  %vm17425_vm10 = vmmov %vm17351_vm1  ;;  %v17490_v54 = vld [vmem:[#allocation128_spill] sm:$0xff] }
 0x425   : > { %11790 = vmatprep.mubr.msk.bf16.mxu1 %vm17399_vm3, %v17398_v43  ;;  %vm17427_vm3 = vmmov %vm17351_vm1  ;;  %v5586_v43 = vld [vmem:[#allocation3 + $0x117] sm:$0xff] }
 0x426   : > { %v5618_v27 = vsel %vm17335_vm6, %v5586_v43, 0.0  ;;  %vm17497_vm6 = vmmov %vm17351_vm1  ;;  %v17533_v43 = vld [vmem:[#allocation25_spill] sm:$0xff] }
 0x42c   : > { %11791 = vmatmul.mubr.msk.bf16.gmra.mrb[28].mxu1 %vm17402_vm7, %v4653_v57  ;;  %vm17429_vm7 = vmmov %vm17351_vm1  ;;  %v5895_v57 = vld [vmem:[#allocation3 + $0x30] sm:$0xff] }
 0x42d   : > { %11798 = vmatprep.mubr.msk.bf16.mxu1 %vm17404_vm8, %v17403_v11  ;;  %vm17431_vm8 = vmmov %vm17351_vm1  ;;  %v5635_v11 = vpack.c.bf16 %v5587_v21, %v5618_v27  ;;  %v17535_v21 = vld [vmem:[#allocation143_spill] sm:$0xff]  ;;  %v17537_v27 = vld [vmem:[#allocation144_spill] sm:$0xff] }
 0x434   : > { %11799 = vmatmul.mubr.msk.bf16.vlgmr.msra.gmra.mrb[0].mxu1 %vm17406_vm5, %v17405_v14  ;;  %vm17432_vm5 = vmmov %vm17351_vm1 }
 0x435   : > { %11831 = vmatpush3.bf16.msra.mxu1 %v12842_v20  ;;  %11802 = vmatprep.mubr.msk.bf16.mxu1 %vm17408_vm15, %v17407_v37  ;;  %vm17434_vm15 = vmmov %vm17351_vm1  ;;  %v12848_v20 = vld [vmem:[%s16469_s3 + $0x80] sm:$0xff]   ;;  %v5897_v37 = vld [vmem:[#allocation3 + $0x40] sm:$0xff] }
 0x436   : > { %11832 = vmatprep.subr.bf16.mxu1 %v12843_v12 }
 0x439   : > { %11833 = vmatpush3.bf16.msra.mxu1 %v12843_v12  ;;  %v5894_v12 = vld [vmem:[#allocation3 + $0x28] sm:$0xff] }
 0x43a   : > { %11866 = vmatprep.subr.bf16.mxu1 %v12844_v41  ;;  %v5926_v14 = vpack.c.bf16 %v5895_v57, %v5894_v12  ;;  %v6230_v57 = vld [vmem:[#allocation3 + $0x119] sm:$0xff] }
 0x43c   : > { %11803 = vmatmul.mubr.msk.bf16.gmra.mrb[4].mxu1 %vm17410_vm12, %v17409_v62  ;;  %vm17436_vm12 = vmmov %vm17351_vm1  ;;  %v5896_v62 = vld [vmem:[#allocation3 + $0x38] sm:$0xff] }
 0x43d   : > { %11806 = vmatprep.mubr.msk.bf16.mxu1 %vm17412_vm13, %v17411_v36  ;;  %vm17438_vm13 = vmmov %vm17351_vm1  ;;  %v5927_v36 = vpack.c.bf16 %v5897_v37, %v5896_v62  ;;  %v12851_v37 = vld [vmem:[%s16471_s5 + $0x28] sm:$0xff]   ;;  %v15341_v62 = vld [vmem:[%s16471_s5] sm:$0xff]  }
 0x444   : > { %11807 = vmatmul.mubr.msk.bf16.gmra.mrb[8].mxu1 %vm17414_vm14, %v17413_v2  ;;  %vm17440_vm14 = vmmov %vm17351_vm1  ;;  %v5898_v2 = vld [vmem:[#allocation3 + $0x48] sm:$0xff] }
 0x445   : > { %11810 = vmatprep.mubr.msk.bf16.mxu1 %vm17416_vm2, %v17415_v35  ;;  %vm17442_vm2 = vmmov %vm17351_vm1  ;;  %v12849_v35 = vld [vmem:[%s16469_s3 + $0x88] sm:$0xff]  }
 0x44c   : > { %11811 = vmatmul.mubr.msk.bf16.gmra.mrb[12].mxu1 %vm17418_vm9, %v17417_v53  ;;  %vm17444_vm9 = vmmov %vm17351_vm1 }
 0x44d   : > { %11814 = vmatprep.mubr.msk.bf16.mxu1 %vm17420_vm11, %v17419_v15  ;;  %vm17446_vm11 = vmmov %vm17351_vm1  ;;  %v5903_v15 = vld [vmem:[#allocation3 + $0x70] sm:$0xff] }
 0x454   : > { %11815 = vmatmul.mubr.msk.bf16.gmra.mrb[16].mxu1 %vm17422_vm4, %v17421_v4  ;;  %vm17448_vm4 = vmmov %vm17351_vm1  ;;  %v5900_v4 = vld [vmem:[#allocation3 + $0x58] sm:$0xff] }
 0x455   : > { %11818 = vmatprep.mubr.msk.bf16.mxu1 %vm17351_vm1, %v17423_v8  ;;  %v5929_v8 = vpack.c.bf16 %v5901_v56, %v5900_v4 }
 0x45c   : > { %11819 = vmatmul.mubr.msk.bf16.gmra.mrb[20].mxu1 %vm17425_vm10, %v17424_v52  ;;  %vm17451_vm10 = vmmov %vm17351_vm1  ;;  %v5902_v52 = vld [vmem:[#allocation3 + $0x68] sm:$0xff] }
 0x45d   : > { %11822 = vmatprep.mubr.msk.bf16.mxu1 %vm17427_vm3, %v17426_v58  ;;  %vm17453_vm3 = vmmov %vm17351_vm1  ;;  %v5930_v58 = vpack.c.bf16 %v5903_v15, %v5902_v52 }
 0x464   : > { %11823 = vmatmul.mubr.msk.bf16.gmra.mrb[24].mxu1 %vm17429_vm7, %v17428_v25  ;;  %vm17455_vm7 = vmmov %vm17351_vm1  ;;  %v5905_v25 = vld [vmem:[#allocation3 + $0x80] sm:$0xff] }
 0x465   : > { %11826 = vmatprep.mubr.msk.bf16.mxu1 %vm17431_vm8, %v17430_v16  ;;  %vm17457_vm8 = vmmov %vm17351_vm1  ;;  %v5907_v16 = vld [vmem:[#allocation3 + $0x90] sm:$0xff]  ;;  %v5931_v33 = vpack.c.bf16 %v5905_v25, %v5904_v9 }
 0x46c   : > { %11827 = vmatmul.mubr.msk.bf16.gmra.mrb[28].mxu1 %vm17432_vm5, %v15189_v45  ;;  %vm17459_vm5 = vmmov %vm17351_vm1 }
 0x46d   : > { %11834 = vmatprep.mubr.msk.bf16.mxu1 %vm17434_vm15, %v17433_v44  ;;  %vm17461_vm15 = vmmov %vm17351_vm1  ;;  %v5906_v44 = vld [vmem:[#allocation3 + $0x88] sm:$0xff] }
 0x474   : > { %11835 = vmatmul.mubr.msk.bf16.vlgmr.msra.gmra.mrb[0].mxu1 %vm17436_vm12, %v17435_v24  ;;  %vm17464_vm12 = vmmov %vm17351_vm1  ;;  %v5909_v24 = vld [vmem:[#allocation3 + $0xa0] sm:$0xff] }
 0x475   : > { %11867 = vmatpush3.bf16.msra.mxu1 %v12844_v41  ;;  %11838 = vmatprep.mubr.msk.bf16.mxu1 %vm17438_vm13, %v17437_v63  ;;  %vm17466_vm13 = vmmov %vm17351_vm1  ;;  %v5899_v41 = vld [vmem:[#allocation3 + $0x50] sm:$0xff] }
 0x476   : > { %11868 = vmatprep.subr.bf16.mxu1 %v12845_v1  ;;  %v5928_v53 = vpack.c.bf16 %v5899_v41, %v5898_v2  ;;  %v5911_v63 = vld [vmem:[#allocation3 + $0xb0] sm:$0xff]  ;;  %v12853_v41 = vld [vmem:[%s16471_s5 + $0x38] sm:$0xff]  }
 0x479   : > { %11869 = vmatpush3.bf16.msra.mxu1 %v12845_v1  ;;  %v5932_v1 = vpack.c.bf16 %v5907_v16, %v5906_v44 }
 0x47a   : > { %11902 = vmatprep.subr.bf16.mxu1 %v12846_v49 }
 0x47c   : > { %11839 = vmatmul.mubr.msk.bf16.gmra.mrb[4].mxu1 %vm17440_vm14, %v17439_v17  ;;  %vm17468_vm14 = vmmov %vm17351_vm1 }
 0x47d   : > { %11842 = vmatprep.mubr.msk.bf16.mxu1 %vm17442_vm2, %v17441_v46  ;;  %vm17470_vm2 = vmmov %vm17351_vm1  ;;  %v5910_v46 = vld [vmem:[#allocation3 + $0xa8] sm:$0xff] }
 0x484   : > { %11843 = vmatmul.mubr.msk.bf16.gmra.mrb[8].mxu1 %vm17444_vm9, %v17443_v60  ;;  %vm17472_vm9 = vmmov %vm17351_vm1  ;;  %v5934_v60 = vpack.c.bf16 %v5911_v63, %v5910_v46 }
 0x485   : > { %11846 = vmatprep.mubr.msk.bf16.mxu1 %vm17446_vm11, %v17445_v34  ;;  %vm17474_vm11 = vmmov %vm17351_vm1  ;;  %v5913_v34 = vld [vmem:[#allocation3 + $0xc0] sm:$0xff] }
 0x48c   : > { %11847 = vmatmul.mubr.msk.bf16.gmra.mrb[12].mxu1 %vm17448_vm4, %v17447_v6  ;;  %vm17476_vm4 = vmmov %vm17351_vm1  ;;  %v5915_v6 = vld [vmem:[#allocation3 + $0xd0] sm:$0xff] }
 0x48d   : > { %11850 = vmatprep.mubr.msk.bf16.mxu1 %vm17351_vm1, %v17449_v29  ;;  %v5912_v29 = vld [vmem:[#allocation3 + $0xb8] sm:$0xff] }
 0x494   : > { %11851 = vmatmul.mubr.msk.bf16.gmra.mrb[16].mxu1 %vm17451_vm10, %v17450_v23  ;;  %vm17479_vm10 = vmmov %vm17351_vm1  ;;  %v5935_v23 = vpack.c.bf16 %v5913_v34, %v5912_v29 }
 0x495   : > { %11854 = vmatprep.mubr.msk.bf16.mxu1 %vm17453_vm3, %v17452_v31  ;;  %vm17481_vm3 = vmmov %vm17351_vm1  ;;  %v5914_v31 = vld [vmem:[#allocation3 + $0xc8] sm:$0xff] }
 0x49c   : > { %11855 = vmatmul.mubr.msk.bf16.gmra.mrb[20].mxu1 %vm17455_vm7, %v17454_v18  ;;  %vm17483_vm7 = vmmov %vm17351_vm1  ;;  %v5936_v18 = vpack.c.bf16 %v5915_v6, %v5914_v31 }
 0x49d   : > { %11858 = vmatprep.mubr.msk.bf16.mxu1 %vm17457_vm8, %v17456_v59  ;;  %vm17485_vm8 = vmmov %vm17351_vm1  ;;  %v5917_v59 = vld [vmem:[#allocation3 + $0xe0] sm:$0xff] }
 0x4a4   : > { %11859 = vmatmul.mubr.msk.bf16.gmra.mrb[24].mxu1 %vm17459_vm5, %v17458_v7  ;;  %vm17487_vm5 = vmmov %vm17351_vm1  ;;  %v5919_v7 = vld [vmem:[#allocation3 + $0xf0] sm:$0xff] }
 0x4a5   : > { %11862 = vmatprep.mubr.msk.bf16.mxu1 %vm17461_vm15, %v17460_v47  ;;  %vm17489_vm15 = vmmov %vm17351_vm1  ;;  %v5916_v47 = vld [vmem:[#allocation3 + $0xd8] sm:$0xff]  ;;  %v5938_v61 = vpack.c.bf16 %v5919_v7, %v5918_v50 }
 0x4a6   : > { %v5937_v13 = vpack.c.bf16 %v5917_v59, %v5916_v47 }
 0x4ac   : > { %11863 = vmatmul.mubr.msk.bf16.gmra.mrb[28].mxu1 %vm17464_vm12, %v5297_v51  ;;  %vm17491_vm12 = vmmov %vm17351_vm1  ;;  %v5921_v51 = vld [vmem:[#allocation3 + $0x100] sm:$0xff] }
 0x4ad   : > { %11870 = vmatprep.mubr.msk.bf16.mxu1 %vm17466_vm13, %v17465_v22  ;;  %vm17493_vm13 = vmmov %vm17351_vm1  ;;  %v5920_v22 = vld [vmem:[#allocation3 + $0xf8] sm:$0xff] }
 0x4b4   : > { %11871 = vmatmul.mubr.msk.bf16.vlgmr.msra.gmra.mrb[0].mxu1 %vm17468_vm14, %v17467_v55  ;;  %vm17494_vm14 = vmmov %vm17351_vm1  ;;  %v5924_v55 = vld [vmem:[#allocation3 + $0x118] sm:$0xff] }
 0x4b5   : > { %11903 = vmatpush3.bf16.msra.mxu1 %v12846_v49  ;;  %11874 = vmatprep.mubr.msk.bf16.mxu1 %vm17470_vm2, %v17469_v39  ;;  %vm17495_vm2 = vmmov %vm17351_vm1  ;;  %v5908_v49 = vld [vmem:[#allocation3 + $0x98] sm:$0xff]  ;;  %v5925_v39 = vld [vmem:[#allocation3 + $0x120] sm:$0xff] }
 0x4b6   : > { %11904 = vmatprep.subr.bf16.mxu1 %v12847_v5  ;;  %v5933_v17 = vpack.c.bf16 %v5909_v24, %v5908_v49 }
 0x4b9   : > { %11905 = vmatpush3.bf16.msra.mxu1 %v12847_v5  ;;  %v5939_v5 = vpack.c.bf16 %v5921_v51, %v5920_v22 }
 0x4ba   : > { %11938 = vmatprep.subr.bf16.mxu1 %v12848_v20 }
 0x4bc   : > { %11875 = vmatmul.mubr.msk.bf16.gmra.mrb[4].mxu1 %vm17472_vm9, %v17471_v19  ;;  %vm17496_vm9 = vmmov %vm17351_vm1  ;;  %v17510_v19 = vld [vmem:[#allocation120_spill] sm:$0xff] }
 0x4bd   : > { %11878 = vmatprep.mubr.msk.bf16.mxu1 %vm17474_vm11, %v17473_v32  ;;  %vm17498_vm11 = vmmov %vm17351_vm1  ;;  %v17512_v32 = vld [vmem:[#allocation121_spill] sm:$0xff] }
 0x4c4   : > { %11879 = vmatmul.mubr.msk.bf16.gmra.mrb[8].mxu1 %vm17476_vm4, %v17475_v48  ;;  %vm17499_vm4 = vmmov %vm17351_vm1  ;;  %v17514_v48 = vld [vmem:[#allocation132_spill] sm:$0xff] }
 0x4c5   : > { %11882 = vmatprep.mubr.msk.bf16.mxu1 %vm17351_vm1, %v17477_v10  ;;  %v17516_v10 = vld [vmem:[#allocation133_spill] sm:$0xff] }
 0x4cc   : > { %11883 = vmatmul.mubr.msk.bf16.gmra.mrb[12].mxu1 %vm17479_vm10, %v17478_v28  ;;  %vm17500_vm10 = vmmov %vm17351_vm1  ;;  %v17518_v28 = vld [vmem:[#allocation134_spill] sm:$0xff] }
 0x4cd   : > { %11886 = vmatprep.mubr.msk.bf16.mxu1 %vm17481_vm3, %v17480_v30  ;;  %vm17501_vm3 = vmmov %vm17351_vm1  ;;  %v17521_v30 = vld [vmem:[#allocation137_spill] sm:$0xff] }
 0x4d4   : > { %11887 = vmatmul.mubr.msk.bf16.gmra.mrb[16].mxu1 %vm17483_vm7, %v17482_v0  ;;  %vm17502_vm7 = vmmov %vm17351_vm1  ;;  %v17523_v0 = vld [vmem:[#allocation138_spill] sm:$0xff] }
 0x4d5   : > { %11890 = vmatprep.mubr.msk.bf16.mxu1 %vm17485_vm8, %v17484_v38  ;;  %vm17503_vm8 = vmmov %vm17351_vm1  ;;  %v17525_v38 = vld [vmem:[#allocation140_spill] sm:$0xff] }
 0x4dc   : > { %11891 = vmatmul.mubr.msk.bf16.gmra.mrb[20].mxu1 %vm17487_vm5, %v17486_v42  ;;  %vm17504_vm5 = vmmov %vm17351_vm1  ;;  %v17527_v42 = vld [vmem:[#allocation80_spill] sm:$0xff] }
 0x4dd   : > { %11894 = vmatprep.mubr.msk.bf16.mxu1 %vm17489_vm15, %v17488_v40  ;;  %vm17505_vm15 = vmmov %vm17351_vm1  ;;  %v17529_v40 = vld [vmem:[#allocation141_spill] sm:$0xff] }
 0x4e4   : > { %11895 = vmatmul.mubr.msk.bf16.gmra.mrb[24].mxu1 %vm17491_vm12, %v17490_v54  ;;  %vm17506_vm12 = vmmov %vm17351_vm1  ;;  %v17531_v54 = vld [vmem:[#allocation142_spill] sm:$0xff] }
 0x4e5   : > { %11898 = vmatprep.mubr.msk.bf16.mxu1 %vm17493_vm13, %v17492_v3  ;;  %vm17507_vm13 = vmmov %vm17351_vm1  ;;  %v6231_v3 = vld [vmem:[#allocation3 + $0x121] sm:$0xff] }
 0x4ec   : > { %11899 = vmatmul.mubr.msk.bf16.gmra.mrb[28].mxu1 %vm17494_vm14, %v5635_v11  ;;  %vm17508_vm14 = vmmov %vm17351_vm1  ;;  %v6263_v11 = vsel %vm17368_vm0, %v6231_v3, 0.0  ;;  %vm17540_vm0 = vcmask 523264  }
 0x4ed   : > { %11906 = vmatprep.mubr.msk.bf16.mxu1 %vm17495_vm2, %v5926_v14  ;;  %vm17509_vm2 = vmmov %vm17351_vm1  ;;  %v6279_v12 = vpack.c.bf16 %v6263_v11, %v6230_v57  ;;  %v12850_v14 = vld [vmem:[%s16471_s5 + $0x20] sm:$0xff]  }
 0x4ee   : > { %11974 = vmatprep.subr.bf16.mxu0 %v12850_v14 }
 0x4ef   : > { %11975 = vmatpush3.bf16.msra.mxu0 %v12850_v14 }
 0x4f0   : > { %11976 = vmatprep.subr.bf16.mxu0 %v12851_v37 }
 0x4f3   : > { %11977 = vmatpush3.bf16.msra.mxu0 %v12851_v37 }
 0x4f4   : > { %11907 = vmatmul.mubr.msk.bf16.vlgmr.msra.gmra.mrb[0].mxu1 %vm17496_vm9, %v5927_v36  ;;  %vm17511_vm9 = vmmov %vm17351_vm1  ;;  %11978 = vmatprep.subr.bf16.mxu0 %v12852_v26  ;;  %v15347_v36 = vld [vmem:[%s16470_s4] ss:$0 sm:$0xff] }
 0x4f5   : > { %11939 = vmatpush3.bf16.msra.mxu1 %v12848_v20  ;;  %11910 = vmatprep.mubr.msk.bf16.mxu1 %vm17497_vm6, %v5928_v53  ;;  %v5941_v20 = vpack.c.bf16 %v5925_v39, %v5924_v55  ;;  %vm17513_vm6 = vmmov %vm17351_vm1 }
 0x4f6   : > { %11940 = vmatprep.subr.bf16.mxu1 %v12849_v35 }
 0x4f7   : > { %11979 = vmatpush3.bf16.msra.mxu0 %v12852_v26 }
 0x4f8   : > { %11980 = vmatprep.subr.bf16.mxu0 %v12853_v41 }
 0x4f9   : > { %11941 = vmatpush3.bf16.msra.mxu1 %v12849_v35 }
 0x4fb   : > { %11981 = vmatpush3.bf16.msra.mxu0 %v12853_v41 }
 0x4fc   : > { %11911 = vmatmul.mubr.msk.bf16.gmra.mrb[4].mxu1 %vm17498_vm11, %v5929_v8  ;;  %vm17515_vm11 = vmmov %vm17351_vm1  ;;  %11990 = vmatprep.subr.bf16.mxu0 %v15341_v62 }
 0x4fd   : > { %11914 = vmatprep.mubr.msk.bf16.mxu1 %vm17499_vm4, %v5930_v58  ;;  %vm17517_vm4 = vmmov %vm17351_vm1 }
 0x504   : > { %11915 = vmatmul.mubr.msk.bf16.gmra.mrb[8].mxu1 %vm17351_vm1, %v5931_v33 }
 0x505   : > { %11918 = vmatprep.mubr.msk.bf16.mxu1 %vm17500_vm10, %v5932_v1  ;;  %vm17520_vm10 = vmmov %vm17351_vm1 }
 0x50c   : > { %11919 = vmatmul.mubr.msk.bf16.gmra.mrb[12].mxu1 %vm17501_vm3, %v5933_v17  ;;  %vm17522_vm3 = vmmov %vm17351_vm1 }
 0x50d   : > { %11922 = vmatprep.mubr.msk.bf16.mxu1 %vm17502_vm7, %v5934_v60  ;;  %vm17524_vm7 = vmmov %vm17351_vm1 }
 0x514   : > { %11923 = vmatmul.mubr.msk.bf16.gmra.mrb[16].mxu1 %vm17503_vm8, %v5935_v23  ;;  %vm17526_vm8 = vmmov %vm17351_vm1 }
 0x515   : > { %11926 = vmatprep.mubr.msk.bf16.mxu1 %vm17504_vm5, %v5936_v18  ;;  %vm17528_vm5 = vmmov %vm17351_vm1 }
 0x51c   : > { %11927 = vmatmul.mubr.msk.bf16.gmra.mrb[20].mxu1 %vm17505_vm15, %v5937_v13  ;;  %vm17530_vm15 = vmmov %vm17351_vm1 }
 0x51d   : > { %11930 = vmatprep.mubr.msk.bf16.mxu1 %vm17506_vm12, %v5938_v61  ;;  %vm17532_vm12 = vmmov %vm17351_vm1 }
 0x524   : > { %11931 = vmatmul.mubr.msk.bf16.gmra.mrb[24].mxu1 %vm17507_vm13, %v5939_v5  ;;  %vm17534_vm13 = vmmov %vm17351_vm1 }
 0x525   : > { %11934 = vmatprep.mubr.msk.bf16.mxu1 %vm17508_vm14, %v15189_v45  ;;  %v17519_v45 = vld [vmem:[#allocation136_spill] sm:$0xff]  ;;  %vm17536_vm14 = vmmov %vm17351_vm1 }
 0x52c   : > { %11935 = vmatmul.mubr.msk.bf16.gmra.mrb[28].mxu1 %vm17509_vm2, %v5941_v20  ;;  %vm17538_vm2 = vmmov %vm17351_vm1 }
 0x52d   : > { %11942 = vmatprep.mubr.msk.bf16.mxu1 %vm17511_vm9, %v17510_v19  ;;  %vm17539_vm9 = vmmov %vm17351_vm1 }
 0x534   : > { %11943 = vmatmul.mubr.msk.bf16.vlgmr.msra.gmra.mrb[0].mxu1 %vm17513_vm6, %v17512_v32  ;;  %vm17541_vm6 = vmmov %vm17540_vm0 }
 0x535   : > { %11946 = vmatprep.mubr.msk.bf16.mxu1 %vm17515_vm11, %v17514_v48  ;;  %vm17542_vm11 = vmmov %vm17540_vm0 }
 0x53c   : > { %11947 = vmatmul.mubr.msk.bf16.gmra.mrb[4].mxu1 %vm17517_vm4, %v17516_v10  ;;  %vm17543_vm4 = vmmov %vm17540_vm0 }
 0x53d   : > { %11950 = vmatprep.mubr.msk.bf16.mxu1 %vm17351_vm1, %v17518_v28  ;;  %vm17544_vm1 = vmmov %vm17540_vm0 }
 0x544   : > { %11951 = vmatmul.mubr.msk.bf16.gmra.mrb[8].mxu1 %vm17520_vm10, %v17519_v45  ;;  %vm17545_vm10 = vmmov %vm17540_vm0 }
 0x545   : > { %11954 = vmatprep.mubr.msk.bf16.mxu1 %vm17522_vm3, %v17521_v30  ;;  %vm17546_vm3 = vmmov %vm17540_vm0 }
 0x54c   : > { %11955 = vmatmul.mubr.msk.bf16.gmra.mrb[12].mxu1 %vm17524_vm7, %v17523_v0  ;;  %vm17547_vm7 = vmmov %vm17540_vm0 }
 0x54d   : > { %11958 = vmatprep.mubr.msk.bf16.mxu1 %vm17526_vm8, %v17525_v38  ;;  %vm17548_vm8 = vmmov %vm17540_vm0 }
 0x554   : > { %11959 = vmatmul.mubr.msk.bf16.gmra.mrb[16].mxu1 %vm17528_vm5, %v17527_v42  ;;  %vm17549_vm5 = vmmov %vm17540_vm0 }
 0x555   : > { %11962 = vmatprep.mubr.msk.bf16.mxu1 %vm17530_vm15, %v17529_v40  ;;  %vm17550_vm15 = vmmov %vm17540_vm0 }
 0x55c   : > { %11963 = vmatmul.mubr.msk.bf16.gmra.mrb[20].mxu1 %vm17532_vm12, %v17531_v54  ;;  %v6844_v54 = vld [vmem:[#allocation4 + $0x8] sm:$0xff]  ;;  %vm17551_vm12 = vmmov %vm17540_vm0 }
 0x55d   : > { %11966 = vmatprep.mubr.msk.bf16.mxu1 %vm17534_vm13, %v17533_v43  ;;  %vm17552_vm13 = vmmov %vm17540_vm0 }
 0x564   : > { %11967 = vmatmul.mubr.msk.bf16.gmra.mrb[24].mxu1 %vm17536_vm14, %v17535_v21  ;;  %vm17555_vm14 = vmmov %vm17540_vm0 }
 0x565   : > { %11970 = vmatprep.mubr.msk.bf16.mxu1 %vm17538_vm2, %v17537_v27  ;;  %vm17556_vm2 = vmmov %vm17540_vm0 }
 0x56c   : > { %11971 = vmatmul.mubr.msk.bf16.gmra.mrb[28].mxu1 %vm17539_vm9, %v6279_v12 }
 0x607   : > { %v11944_v2 = vpop.f32.mrb[0].mxu1 }
 0x608   : > { %v6547_v35 = vadd.f32 %v11944_v2, %v15347_v36  ;;  %v6379_v53 = vpop.f32.mrb[1].mxu1 }
 0x609   : > { %v6545_v56 = vadd.f32 %v15347_v36, %v6379_v53  ;;  %v11945_v15 = vpop.f32.mrb[2].mxu1 }
 0x60a   : > { %v6579_v4 = vmax.f32 %v6547_v35, 0.0  ;;  %v6548_v8 = vadd.f32 %v11945_v15, %v15347_v36  ;;  %v6382_v52 = vpop.f32.mrb[3].mxu1 }
 0x60b   : > { %v6577_v58 = vmax.f32 %v6545_v56, 0.0  ;;  %v6546_v25 = vadd.f32 %v15347_v36, %v6382_v52 }
 0x60c   : > { %v6580_v16 = vmax.f32 %v6548_v8, 0.0 }
 0x60d   : > { %v6609_v9 = vmax.f32 %v6577_v58, %v6579_v4  ;;  %v6578_v33 = vmax.f32 %v6546_v25, 0.0 }
 0x60f   : > { %6611 = vst.msk [vmem:[#allocation6] sm:$0xff] %vm17540_vm0, %v6609_v9  ;;  %v6610_v44 = vmax.f32 %v6578_v33, %v6580_v16  ;;  %v11948_v1 = vpop.f32.mrb[4].mxu1 }
 0x610   : > { %v6551_v24 = vadd.f32 %v11948_v1, %v15347_v36  ;;  %v6395_v63 = vpop.f32.mrb[5].mxu1 }
 0x611   : > { %6612 = vst.msk [vmem:[#allocation6 + $0x8] sm:$0xff] %vm17541_vm6, %v6610_v44  ;;  %v6549_v49 = vadd.f32 %v15347_v36, %v6395_v63  ;;  %v11949_v17 = vpop.f32.mrb[6].mxu1 }
 0x612   : > { %v6583_v46 = vmax.f32 %v6551_v24, 0.0  ;;  %v6552_v60 = vadd.f32 %v11949_v17, %v15347_v36  ;;  %v6398_v34 = vpop.f32.mrb[7].mxu1 }
 0x613   : > { %v6581_v6 = vmax.f32 %v6549_v49, 0.0  ;;  %v6550_v29 = vadd.f32 %v15347_v36, %v6398_v34 }
 0x614   : > { %v6584_v23 = vmax.f32 %v6552_v60, 0.0 }
 0x615   : > { %v6613_v31 = vmax.f32 %v6581_v6, %v6583_v46  ;;  %v6582_v18 = vmax.f32 %v6550_v29, 0.0  ;;  %v17553_v29 = vld [vmem:[#allocation27_spill] sm:$0xff] }
 0x617   : > { %6615 = vst.msk [vmem:[#allocation6 + $0x10] sm:$0xff] %vm17542_vm11, %v6613_v31  ;;  %v6614_v59 = vmax.f32 %v6582_v18, %v6584_v23  ;;  %v11952_v7 = vpop.f32.mrb[8].mxu1  ;;  %v6692_v23 = vand.u32 7, %v17553_v29  ;;  %vm17563_vm11 = vmmov %vm17544_vm1 }
 0x618   : > { %v6641_v47 = vld [vmem:[#allocation6] ss:$2 sm:$0xff]  ;;  %v6657_v13 = vld [vmem:[#allocation6 + $0x1] ss:$2 sm:$0xff]  ;;  %v6555_v50 = vadd.f32 %v11952_v7, %v15347_v36  ;;  %v6411_v61 = vpop.f32.mrb[9].mxu1 }
 0x619   : > { %v6672_v51 = vmax.f32 %v6641_v47, %v6657_v13  ;;  %6616 = vst.msk [vmem:[#allocation6 + $0x18] sm:$0xff] %vm17543_vm4, %v6614_v59  ;;  %v6553_v22 = vadd.f32 %v15347_v36, %v6411_v61  ;;  %v11953_v5 = vpop.f32.mrb[10].mxu1  ;;  %v17554_v47 = vld [vmem:[#allocation48_spill] sm:$0xff]  ;;  %vm15412_vm9 = vcmp.ge.s32.totalorder %v6692_v23, 1  ;;  %vm15420_vm6 = vcmp.le.s32.totalorder %v6692_v23, 6  ;;  %vm17564_vm4 = vmmov %vm17544_vm1 }
 0x61a   : > { %v6587_v55 = vmax.f32 %v6555_v50, 0.0  ;;  %v6556_v39 = vadd.f32 %v11953_v5, %v15347_v36  ;;  %v6414_v20 = vpop.f32.mrb[11].mxu1  ;;  %v6699_v13 = vand.u32 7, %v17554_v47 }
 0x61b   : > { %6680 = vst.msk [vmem:[#allocation4 + $0x10] sm:$0xff] %vm17544_vm1, %v6672_v51  ;;  %v6585_v19 = vmax.f32 %v6553_v22, 0.0  ;;  %v6554_v32 = vadd.f32 %v15347_v36, %v6414_v20 }
 0x61c   : > { %v6588_v48 = vmax.f32 %v6556_v39, 0.0  ;;  %vm15416_vm0 = vcmp.ge.s32.totalorder %v6699_v13, 1 }
 0x61d   : > { %v6617_v10 = vmax.f32 %v6585_v19, %v6587_v55  ;;  %v6586_v28 = vmax.f32 %v6554_v32, 0.0 }
 0x61f   : > { %6619 = vst.msk [vmem:[#allocation6 + $0x20] sm:$0xff] %vm17545_vm10, %v6617_v10  ;;  %v6618_v45 = vmax.f32 %v6586_v28, %v6588_v48  ;;  %v11956_v30 = vpop.f32.mrb[12].mxu1  ;;  %v12855_v28 = vld [vmem:[%s16471_s5 + $0x8] sm:$0xff]   ;;  %vm17566_vm10 = vmmov %vm17544_vm1 }
 0x620   : > { %v6643_v0 = vld [vmem:[#allocation6 + $0x10] ss:$2 sm:$0xff]  ;;  %v6659_v38 = vld [vmem:[#allocation6 + $0x11] ss:$2 sm:$0xff]  ;;  %v6559_v42 = vadd.f32 %v11956_v30, %v15347_v36  ;;  %v6427_v40 = vpop.f32.mrb[13].mxu1 }
 0x621   : > { %v6673_v43 = vmax.f32 %v6643_v0, %v6659_v38  ;;  %6620 = vst.msk [vmem:[#allocation6 + $0x28] sm:$0xff] %vm17546_vm3, %v6618_v45  ;;  %v6557_v3 = vadd.f32 %v15347_v36, %v6427_v40  ;;  %v11957_v21 = vpop.f32.mrb[14].mxu1 }
 0x622   : > { %v6591_v27 = vmax.f32 %v6559_v42, 0.0  ;;  %v6560_v57 = vadd.f32 %v11957_v21, %v15347_v36  ;;  %v6430_v11 = vpop.f32.mrb[15].mxu1  ;;  %v15371_v12 = vld [vmem:[#allocation4 + $0x10] sm:$0xff] }
 0x623   : > { %6681 = vst.msk [vmem:[#allocation4 + $0x18] sm:$0xff] %vm17547_vm7, %v6673_v43  ;;  %v6589_v14 = vmax.f32 %v6557_v3, 0.0  ;;  %v6558_v37 = vadd.f32 %v15347_v36, %v6430_v11  ;;  %v6852_v26 = vpack.c.bf16 %v15371_v12, %v6844_v54  ;;  %vm15464_vm7 = vcmp.le.s32.totalorder %v6699_v13, 6 }
 0x624   : > { %v6592_v41 = vmax.f32 %v6560_v57, 0.0 }
 0x625   : > { %v6621_v2 = vmax.f32 %v6589_v14, %v6591_v27  ;;  %v6590_v35 = vmax.f32 %v6558_v37, 0.0  ;;  %11982 = vmatprep.mubr.msk.bf16.mxu0 %vm17548_vm8, %v6852_v26  ;;  %v12856_v14 = vld [vmem:[%s16471_s5 + $0x10] sm:$0xff]   ;;  %vm17571_vm8 = vmmov %vm17544_vm1 }
 0x627   : > { %6623 = vst.msk [vmem:[#allocation6 + $0x30] sm:$0xff] %vm17549_vm5, %v6621_v2  ;;  %v6622_v53 = vmax.f32 %v6590_v35, %v6592_v41  ;;  %v11960_v56 = vpop.f32.mrb[16].mxu1  ;;  %vm17573_vm5 = vmmov %vm17544_vm1 }
 0x628   : > { %v6645_v15 = vld [vmem:[#allocation6 + $0x20] ss:$2 sm:$0xff]  ;;  %v6661_v4 = vld [vmem:[#allocation6 + $0x21] ss:$2 sm:$0xff]  ;;  %v6563_v8 = vadd.f32 %v11960_v56, %v15347_v36  ;;  %v6443_v52 = vpop.f32.mrb[17].mxu1 }
 0x629   : > { %v6674_v58 = vmax.f32 %v6645_v15, %v6661_v4  ;;  %6624 = vst.msk [vmem:[#allocation6 + $0x38] sm:$0xff] %vm17550_vm15, %v6622_v53  ;;  %v6561_v25 = vadd.f32 %v15347_v36, %v6443_v52  ;;  %v11961_v16 = vpop.f32.mrb[18].mxu1  ;;  %v17565_v56 = vld [vmem:[#allocation30_spill] sm:$0xff]  ;;  %vm17574_vm15 = vmmov %vm17544_vm1 }
 0x62a   : > { %v6595_v9 = vmax.f32 %v6563_v8, 0.0  ;;  %v6564_v33 = vadd.f32 %v11961_v16, %v15347_v36  ;;  %v6446_v44 = vpop.f32.mrb[19].mxu1  ;;  %v15382_v1 = vld [vmem:[#allocation4 + $0x18] sm:$0xff]  ;;  %v6706_v15 = vand.u32 7, %v17565_v56  ;;  %v17581_v56 = vld [vmem:[#allocation31_spill] sm:$0xff] }
 0x62b   : > { %6682 = vst.msk [vmem:[#allocation4 + $0x20] sm:$0xff] %vm17551_vm12, %v6674_v58  ;;  %v6593_v24 = vmax.f32 %v6561_v25, 0.0  ;;  %v6562_v63 = vadd.f32 %v15347_v36, %v6446_v44  ;;  %v7367_v17 = vpack.c.bf16 %v15382_v1, %v15371_v12  ;;  %v15397_v20 = vld [vmem:[#allocation4 + $0x17] sm:$0xff] }
 0x62c   : > { %v6596_v49 = vmax.f32 %v6564_v33, 0.0  ;;  %v7635_v43 = vsel %vm15412_vm9, %v15397_v20, 0.0  ;;  %vm15460_vm3 = vcmp.ge.s32.totalorder %v6706_v15, 1  ;;  %v12872_v12 = vld [vmem:[%s16471_s5 + $0xb0] sm:$0xff]  }
 0x62d   : > { %v6625_v46 = vmax.f32 %v6593_v24, %v6595_v9  ;;  %v6594_v60 = vmax.f32 %v6562_v63, 0.0  ;;  %v12857_v9 = vld [vmem:[%s16471_s5 + $0x18] sm:$0xff]  }
 0x62f   : > { %6627 = vst.msk [vmem:[#allocation6 + $0x40] sm:$0xff] %vm17552_vm13, %v6625_v46  ;;  %v6626_v34 = vmax.f32 %v6594_v60, %v6596_v49  ;;  %v11964_v6 = vpop.f32.mrb[20].mxu1  ;;  %vm17577_vm13 = vmmov %vm17544_vm1 }
 0x630   : > { %v6647_v31 = vld [vmem:[#allocation6 + $0x30] ss:$2 sm:$0xff]  ;;  %v6663_v18 = vld [vmem:[#allocation6 + $0x31] ss:$2 sm:$0xff]  ;;  %v6567_v59 = vadd.f32 %v11964_v6, %v15347_v36  ;;  %v6459_v7 = vpop.f32.mrb[21].mxu1 }
 0x631   : > { %v6675_v50 = vmax.f32 %v6647_v31, %v6663_v18  ;;  %6628 = vst.msk [vmem:[#allocation6 + $0x48] sm:$0xff] %vm17555_vm14, %v6626_v34  ;;  %v6565_v61 = vadd.f32 %v15347_v36, %v6459_v7  ;;  %v11965_v51 = vpop.f32.mrb[22].mxu1  ;;  %vm15506_vm14 = vcmp.le.s32.totalorder %v6706_v15, 6 }
 0x632   : > { %v6599_v22 = vmax.f32 %v6567_v59, 0.0  ;;  %v6568_v5 = vadd.f32 %v11965_v51, %v15347_v36  ;;  %v6462_v55 = vpop.f32.mrb[23].mxu1  ;;  %v15395_v39 = vld [vmem:[#allocation4 + $0x20] sm:$0xff] }
 0x633   : > { %v15399_v19 = vld [vmem:[#allocation4 + $0x1f] sm:$0xff]  ;;  %6683 = vst.msk [vmem:[#allocation4 + $0x28] sm:$0xff] %vm17556_vm2, %v6675_v50  ;;  %v6597_v32 = vmax.f32 %v6565_v61, 0.0  ;;  %v6566_v48 = vadd.f32 %v15347_v36, %v6462_v55  ;;  %v15405_v10 = vpack.c.bf16 %v15395_v39, %v15382_v1  ;;  %vm17580_vm2 = vmmov %vm17544_vm1 }
 0x634   : > { %v15410_v45 = vld [vmem:[#allocation4 + $0x19] sm:$0xff]  ;;  %v6600_v30 = vmax.f32 %v6568_v5, 0.0  ;;  %v7636_v3 = vsel %vm15416_vm0, %v15399_v19, 0.0 }
 0x635   : > { %v6629_v40 = vmax.f32 %v6597_v32, %v6599_v22  ;;  %v6598_v54 = vmax.f32 %v6566_v48, 0.0  ;;  %11983 = vmatmul.mubr.msk.bf16.vlgmr.msra.gmra.mrb[32].mxu0 %vm17563_vm11, %v15405_v10  ;;  %v15433_v21 = vpack.c.bf16 %v7636_v3, %v7635_v43  ;;  %v7903_v27 = vsel %vm15420_vm6, %v15410_v45, 0.0  ;;  %v15478_v59 = vld [vmem:[%s16471_s5 + $0x40] sm:$0xff]   ;;  %vm17582_vm11 = vmmov %vm17544_vm1 }
 0x636   : > { %11991 = vmatpush3.bf16.msra.mxu0 %v15341_v62  ;;  %v17572_v22 = vld [vmem:[#allocation51_spill] sm:$0xff] }
 0x637   : > { %6631 = vst.msk [vmem:[#allocation6 + $0x50] sm:$0xff] %vm17564_vm4, %v6629_v40  ;;  %v6630_v57 = vmax.f32 %v6598_v54, %v6600_v30  ;;  %v11968_v11 = vpop.f32.mrb[24].mxu1  ;;  %11992 = vmatprep.subr.bf16.mxu0 %v12855_v28  ;;  %v6713_v5 = vand.u32 7, %v17572_v22  ;;  %vm17583_vm4 = vmmov %vm17544_vm1 }
 0x638   : > { %v6649_v37 = vld [vmem:[#allocation6 + $0x40] ss:$2 sm:$0xff]  ;;  %v6665_v26 = vld [vmem:[#allocation6 + $0x41] ss:$2 sm:$0xff]  ;;  %v6571_v41 = vadd.f32 %v11968_v11, %v15347_v36  ;;  %v6475_v62 = vpop.f32.mrb[25].mxu1 }
 0x639   : > { %v6676_v2 = vmax.f32 %v6649_v37, %v6665_v26  ;;  %6632 = vst.msk [vmem:[#allocation6 + $0x58] sm:$0xff] %vm17544_vm1, %v6630_v57  ;;  %v6569_v35 = vadd.f32 %v15347_v36, %v6475_v62  ;;  %v11969_v53 = vpop.f32.mrb[26].mxu1  ;;  %vm15500_vm12 = vcmp.ge.s32.totalorder %v6713_v5, 1  ;;  %v12867_v37 = vld [vmem:[%s16471_s5 + $0x88] sm:$0xff]  }
 0x63a   : > { %v6603_v4 = vmax.f32 %v6571_v41, 0.0  ;;  %v6572_v8 = vadd.f32 %v11969_v53, %v15347_v36  ;;  %v6478_v52 = vpop.f32.mrb[27].mxu1  ;;  %v15447_v58 = vld [vmem:[#allocation4 + $0x28] sm:$0xff]  ;;  %11993 = vmatpush3.bf16.msra.mxu0 %v12855_v28 }
 0x63b   : > { %6684 = vst.msk [vmem:[#allocation4 + $0x30] sm:$0xff] %vm17566_vm10, %v6676_v2  ;;  %v6601_v25 = vmax.f32 %v6569_v35, 0.0  ;;  %v6570_v16 = vadd.f32 %v15347_v36, %v6478_v52  ;;  %11994 = vmatprep.subr.bf16.mxu0 %v12856_v14  ;;  %v15454_v33 = vld [vmem:[#allocation4 + $0x27] sm:$0xff]  ;;  %v7368_v63 = vpack.c.bf16 %v15447_v58, %v15395_v39  ;;  %vm15530_vm10 = vcmp.le.s32.totalorder %v6713_v5, 6 }
 0x63c   : > { %v15456_v44 = vld [vmem:[#allocation4 + $0x21] sm:$0xff]  ;;  %v6604_v24 = vmax.f32 %v6572_v8, 0.0  ;;  %v7637_v6 = vsel %vm15460_vm3, %v15454_v33, 0.0  ;;  %v7232_v0 = vsel %vm15500_vm12, %v15454_v33, 0.0 }
 0x63d   : > { %v6633_v49 = vmax.f32 %v6601_v25, %v6603_v4  ;;  %v6602_v46 = vmax.f32 %v6570_v16, 0.0  ;;  %v7904_v23 = vsel %vm15464_vm7, %v15456_v44, 0.0  ;;  %v6720_v4 = vand.u32 7, %v17581_v56 }
 0x63e   : > { %11995 = vmatpush3.bf16.msra.mxu0 %v12856_v14  ;;  %v15480_v7 = vpack.c.bf16 %v7904_v23, %v7903_v27  ;;  %v15540_v23 = vld [vmem:[#allocation4 + $0xf] sm:$0xff] }
 0x63f   : > { %6635 = vst.msk [vmem:[#allocation6 + $0x60] sm:$0xff] %vm17571_vm8, %v6633_v49  ;;  %v6634_v31 = vmax.f32 %v6602_v46, %v6604_v24  ;;  %v11972_v18 = vpop.f32.mrb[28].mxu1  ;;  %11996 = vmatprep.subr.bf16.mxu0 %v12857_v9  ;;  %vm15526_vm1 = vcmp.ge.s32.totalorder %v6720_v4, 1  ;;  %vm17589_vm8 = vmmov %vm17580_vm2  ;;  %v12875_v24 = vld [vmem:[%s16471_s5 + $0xc8] sm:$0xff]  }
 0x640   : > { %v6651_v13 = vld [vmem:[#allocation6 + $0x50] ss:$2 sm:$0xff]  ;;  %v6667_v50 = vld [vmem:[#allocation6 + $0x51] ss:$2 sm:$0xff]  ;;  %v6575_v61 = vadd.f32 %v11972_v18, %v15347_v36  ;;  %v6491_v51 = vpop.f32.mrb[29].mxu1 }
 0x641   : > { %v6677_v55 = vmax.f32 %v6651_v13, %v6667_v50  ;;  %6636 = vst.msk [vmem:[#allocation6 + $0x68] sm:$0xff] %vm17573_vm5, %v6634_v31  ;;  %v6573_v32 = vadd.f32 %v15347_v36, %v6491_v51  ;;  %v11973_v48 = vpop.f32.mrb[30].mxu1  ;;  %v17588_v18 = vld [vmem:[#allocation53_spill] sm:$0xff] }
 0x642   : > { %v6607_v28 = vmax.f32 %v6575_v61, 0.0  ;;  %v6576_v30 = vadd.f32 %v11973_v48, %v15347_v36  ;;  %v6494_v40 = vpop.f32.mrb[31].mxu1  ;;  %v15487_v54 = vld [vmem:[#allocation4 + $0x30] sm:$0xff]  ;;  %11997 = vmatpush3.bf16.msra.mxu0 %v12857_v9  ;;  %v6727_v13 = vand.u32 7, %v17588_v18  ;;  %v12869_v9 = vld [vmem:[%s16471_s5 + $0x98] sm:$0xff]  }
 0x643   : > { %v15489_v43 = vld [vmem:[#allocation4 + $0x2f] sm:$0xff]  ;;  %6685 = vst.msk [vmem:[#allocation4 + $0x38] sm:$0xff] %vm17574_vm15, %v6677_v55  ;;  %v6605_v3 = vmax.f32 %v6573_v32, 0.0  ;;  %v6574_v27 = vadd.f32 %v15347_v36, %v6494_v40  ;;  %v15495_v57 = vpack.c.bf16 %v15487_v54, %v15447_v58  ;;  %12006 = vmatprep.subr.bf16.mxu0 %v15478_v59  ;;  %v6825_v55 = vsel %vm15416_vm0, %v15540_v23, 0.0  ;;  %v12870_v40 = vld [vmem:[%s16471_s5 + $0xa0] sm:$0xff]  }
 0x644   : > { %v15498_v11 = vld [vmem:[#allocation4 + $0x29] sm:$0xff]  ;;  %v6608_v14 = vmax.f32 %v6576_v30, 0.0  ;;  %v7638_v62 = vsel %vm15500_vm12, %v15489_v43, 0.0  ;;  %vm15563_vm5 = vcmp.ge.s32.totalorder %v6727_v13, 1  ;;  %vm15567_vm15 = vcmp.le.s32.totalorder %v6720_v4, 6 }
 0x645   : > { %v6637_v26 = vmax.f32 %v6605_v3, %v6607_v28  ;;  %v6606_v41 = vmax.f32 %v6574_v27, 0.0  ;;  %11986 = vmatprep.mubr.msk.bf16.mxu0 %vm17577_vm13, %v15495_v57  ;;  %v15513_v2 = vpack.c.bf16 %v7638_v62, %v7637_v6  ;;  %v7905_v35 = vsel %vm15506_vm14, %v15498_v11, 0.0  ;;  %v6800_v6 = vld [vmem:[#allocation4 + $0x7] sm:$0xff]  ;;  %vm17594_vm13 = vmmov %vm17580_vm2 }
 0x646   : > { %v6824_v5 = vsel %vm15412_vm9, %v6800_v6, 0.0  ;;  %v17592_v3 = vmov 0  ;;  %v12886_v62 = vld [vmem:[%s16473_s7 + $0x20] sm:$0xff]   ;;  %v12887_v4 = vld [vmem:[%s16473_s7 + $0x28] sm:$0xff]   ;;  %v7500_v42 = vsel %vm15530_vm10, %v15498_v11, 0.0 }
 0x647   : > { %6639 = vst.msk [vmem:[#allocation6 + $0x70] sm:$0xff] %vm17580_vm2, %v6637_v26  ;;  %v6638_v53 = vmax.f32 %v6606_v41, %v6608_v14  ;;  %v17593_v3 = vsel %vm15567_vm15, 4294967295, %v17592_v3  ;;  %v6832_v27 = vpack.c.bf16 %v6825_v55, %v6824_v5 }
 0x648   : > { %v6653_v8 = vld [vmem:[#allocation6 + $0x60] ss:$2 sm:$0xff]  ;;  %v6669_v15 = vld [vmem:[#allocation6 + $0x61] ss:$2 sm:$0xff] }
 0x649   : > { %v6678_v52 = vmax.f32 %v6653_v8, %v6669_v15  ;;  %6640 = vst.msk [vmem:[#allocation6 + $0x78] sm:$0xff] %vm17582_vm11, %v6638_v53  ;;  %v17595_v53 = vld [vmem:[#allocation32_spill] sm:$0xff]  ;;  %v6827_v8 = vsel %vm15500_vm12, %v15399_v19, 0.0  ;;  %v17596_v15 = vld [vmem:[#allocation57_spill] sm:$0xff] }
 0x64a   : > { %v15521_v25 = vld [vmem:[#allocation4 + $0x37] sm:$0xff]  ;;  %v6734_v56 = vand.u32 7, %v17595_v53 }
 0x64b   : > { %v15523_v16 = vld [vmem:[#allocation4 + $0x31] sm:$0xff]  ;;  %6686 = vst.msk [vmem:[#allocation4 + $0x40] sm:$0xff] %vm17583_vm4, %v6678_v52  ;;  %v7639_v49 = vsel %vm15526_vm1, %v15521_v25, 0.0  ;;  %v6741_v52 = vand.u32 7, %v17596_v15  ;;  %v7234_v38 = vsel %vm15563_vm5, %v15521_v25, 0.0 }
 0x64c   : > { %v7906_v46 = vsel %vm15530_vm10, %v15523_v16, 0.0  ;;  %v15545_v22 = vld [vmem:[#allocation4 + $0x38] sm:$0xff]  ;;  %vm15611_vm11 = vcmp.ge.s32.totalorder %v6734_v56, 1 }
 0x64d   : > { %v15542_v31 = vpack.c.bf16 %v7906_v46, %v7905_v35  ;;  %v13167_v35 = vmov 0.0   ;;  %v6826_v46 = vsel %vm15460_vm3, %v15397_v20, 0.0  ;;  %vm15615_vm4 = vcmp.ge.s32.totalorder %v6741_v52, 1 }
 0x64e   : > { %12118 = vmatprep.subr.bf16.mxu1 %v13167_v35 }
 0x64f   : > { %12119 = vmatpush3.bf16.msra.mxu1 %v12886_v62  ;;  %v17601_v62 = vmov 0 }
 0x650   : > { %v6655_v50 = vld [vmem:[#allocation6 + $0x70] ss:$2 sm:$0xff]  ;;  %v6671_v61 = vld [vmem:[#allocation6 + $0x71] ss:$2 sm:$0xff]  ;;  %12120 = vmatprep.subr.bf16.mxu1 %v13167_v35 }
 0x651   : > { %v6679_v51 = vmax.f32 %v6655_v50, %v6671_v61  ;;  %v6833_v50 = vpack.c.bf16 %v6827_v8, %v6826_v46  ;;  %v6828_v61 = vsel %vm15526_vm1, %v15454_v33, 0.0  ;;  %v12860_v46 = vld [vmem:[%s16471_s5 + $0x50] sm:$0xff]  }
 0x652   : > { %v15552_v32 = vld [vmem:[#allocation4 + $0x40] sm:$0xff] }
 0x653   : > { %v15554_v48 = vld [vmem:[#allocation4 + $0x3f] sm:$0xff]  ;;  %6687 = vst.msk [vmem:[#allocation4 + $0x48] sm:$0xff] %vm17589_vm8, %v6679_v51  ;;  %v15561_v30 = vpack.c.bf16 %v15552_v32, %v15545_v22  ;;  %v12859_v51 = vld [vmem:[%s16471_s5 + $0x48] sm:$0xff]   ;;  %12121 = vmatpush3.bf16.msra.mxu1 %v12887_v4  ;;  %vm15619_vm8 = vcmp.le.s32.totalorder %v6727_v13, 6  ;;  %v15635_v13 = vld [vmem:[#allocation4 + $0x11] sm:$0xff] }
 0x654   : > { %v15556_v28 = vld [vmem:[#allocation4 + $0x39] sm:$0xff]  ;;  %v7640_v14 = vsel %vm15563_vm5, %v15554_v48, 0.0  ;;  %v17602_v62 = vsel %vm15619_vm8, 4294967295, %v17601_v62  ;;  %12122 = vmatprep.subr.bf16.mxu1 %v13167_v35  ;;  %v7497_v58 = vsel %vm15420_vm6, %v15635_v13, 0.0 }
 0x655   : > { %v7907_v26 = vsel %vm15567_vm15, %v15556_v28, 0.0  ;;  %11987 = vmatmul.mubr.msk.bf16.gmra.mrb[36].mxu0 %vm17594_vm13, %v15561_v30  ;;  %v15579_v41 = vpack.c.bf16 %v7640_v14, %v7639_v49  ;;  %v6829_v49 = vsel %vm15563_vm5, %v15489_v43, 0.0  ;;  %vm17603_vm13 = vmmov %vm17580_vm2 }
 0x656   : > { %11998 = vmatprep.mubr.msk.bf16.mxu0 %vm17580_vm2, %v6832_v27  ;;  %v6834_v27 = vpack.c.bf16 %v6829_v49, %v6828_v61  ;;  %v7067_v61 = vld [vmem:[#allocation4 + $0x9] sm:$0xff] }
 0x65a   : > { %v15601_v6 = vld [vmem:[#allocation4 + $0x41] sm:$0xff]  ;;  %v7634_v55 = vld [vmem:[#allocation4 + $0x4f] sm:$0xff] }
 0x65b   : > { %v15603_v18 = vld [vmem:[#allocation4 + $0x47] sm:$0xff]  ;;  %v7642_v4 = vsel %vm15615_vm4, %v7634_v55, 0.0  ;;  %v7908_v8 = vsel %vm15619_vm8, %v15601_v6, 0.0 }
 0x65c   : > { %v7641_v53 = vsel %vm15611_vm11, %v15603_v18, 0.0  ;;  %v15639_v49 = vpack.c.bf16 %v7908_v8, %v7907_v26  ;;  %v6830_v26 = vsel %vm15611_vm11, %v15521_v25, 0.0  ;;  %v7094_v8 = vsel %vm15530_vm10, %v15456_v44, 0.0  ;;  %v15761_v1 = vld [vmem:[#allocation4 + $0x48] sm:$0xff] }
 0x65d   : > { %11999 = vmatmul.mubr.msk.bf16.vlgmr.msra.gmra.mrb[32].mxu0 %vm17603_vm13, %v6833_v50  ;;  %v15637_v15 = vpack.c.bf16 %v7642_v4, %v7641_v53  ;;  %v6831_v50 = vsel %vm15615_vm4, %v15554_v48, 0.0  ;;  %v12861_v53 = vld [vmem:[%s16471_s5 + $0x58] sm:$0xff]   ;;  %vm17604_vm13 = vmmov %vm17580_vm2  ;;  %v7236_v60 = vsel %vm15615_vm4, %v15603_v18, 0.0  ;;  %v7369_v18 = vpack.c.bf16 %v15545_v22, %v15487_v54  ;;  %v7496_v14 = vld [vmem:[#allocation4 + $0x49] sm:$0xff] }
 0x65e   : > { %12007 = vmatpush3.bf16.msra.mxu0 %v15478_v59  ;;  %12002 = vmatprep.mubr.msk.bf16.mxu0 %vm17580_vm2, %v6834_v27  ;;  %v7092_v59 = vsel %vm15464_vm7, %v15635_v13, 0.0  ;;  %v6835_v55 = vpack.c.bf16 %v6831_v50, %v6830_v26  ;;  %v7091_v27 = vsel %vm15420_vm6, %v7067_v61, 0.0  ;;  %v7096_v50 = vsel %vm15619_vm8, %v15523_v16, 0.0  ;;  %v12863_v26 = vld [vmem:[%s16471_s5 + $0x68] sm:$0xff]   ;;  %v12881_v13 = vld [vmem:[%s16471_s5 + $0xf8] sm:$0xff]  }
 0x65f   : > { %12008 = vmatprep.subr.bf16.mxu0 %v12859_v51  ;;  %v7099_v4 = vpack.c.bf16 %v7092_v59, %v7091_v27  ;;  %v7095_v59 = vsel %vm15567_vm15, %v15498_v11, 0.0  ;;  %vm15687_vm15 = vcmp.le.s32.totalorder %v6734_v56, 6  ;;  %v7229_v56 = vsel %vm15412_vm9, %v15540_v23, 0.0 }
 0x660   : > { %v7231_v23 = vsel %vm15460_vm3, %v15399_v19, 0.0  ;;  %v12868_v19 = vld [vmem:[%s16471_s5 + $0x90] sm:$0xff]   ;;  %v7370_v39 = vpack.c.bf16 %v15761_v1, %v15552_v32  ;;  %vm17620_vm6 = vnez %v17602_v62  ;;  %v7499_v22 = vsel %vm15506_vm14, %v15456_v44, 0.0  ;;  %v12879_v62 = vld [vmem:[%s16471_s5 + $0xe8] sm:$0xff]  }
 0x661   : > { %v7502_v34 = vsel %vm17620_vm6, %v15556_v28, 0.0  ;;  %v7506_v32 = vpack.c.bf16 %v7500_v42, %v7499_v22  ;;  %v12876_v44 = vld [vmem:[%s16471_s5 + $0xd0] sm:$0xff]   ;;  %v7503_v36 = vsel %vm15687_vm15, %v15601_v6, 0.0 }
 0x662   : > { %12009 = vmatpush3.bf16.msra.mxu0 %v12859_v51  ;;  %v12862_v51 = vld [vmem:[%s16471_s5 + $0x60] sm:$0xff]  }
 0x663   : > { %12010 = vmatprep.subr.bf16.mxu0 %v12860_v46 }
 0x665   : > { %12003 = vmatmul.mubr.msk.bf16.gmra.mrb[36].mxu0 %vm17604_vm13, %v6835_v55  ;;  %v7101_v55 = vpack.c.bf16 %v7096_v50, %v7095_v59  ;;  %vm17605_vm13 = vmmov %vm17580_vm2  ;;  %v7238_v59 = vpack.c.bf16 %v7232_v0, %v7231_v23 }
 0x666   : > { %12011 = vmatpush3.bf16.msra.mxu0 %v12860_v46  ;;  %12014 = vmatprep.mubr.msk.bf16.mxu0 %vm17580_vm2, %v7099_v4  ;;  %v7093_v46 = vsel %vm15506_vm14, %v15410_v45, 0.0  ;;  %vm15679_vm2 = vcmp.le.s32.totalorder %v6741_v52, 6  ;;  %vm17608_vm8 = vmmov %vm17605_vm13  ;;  %v7230_v52 = vsel %vm15416_vm0, %v15397_v20, 0.0  ;;  %v12866_v20 = vld [vmem:[%s16471_s5 + $0x80] sm:$0xff]  }
 0x667   : > { %12012 = vmatprep.subr.bf16.mxu0 %v12861_v53  ;;  %v7100_v61 = vpack.c.bf16 %v7094_v8, %v7093_v46  ;;  %v7098_v8 = vsel %vm15679_vm2, %v15601_v6, 0.0  ;;  %v12865_v46 = vld [vmem:[%s16471_s5 + $0x78] sm:$0xff]   ;;  %vm17611_vm0 = vmmov %vm17608_vm8  ;;  %v12878_v6 = vld [vmem:[%s16471_s5 + $0xe0] sm:$0xff]  }
 0x668   : > { %vm17612_vm9 = vmmov %vm17611_vm0 }
 0x669   : > { %vm17613_vm12 = vmmov %vm17611_vm0 }
 0x66a   : > { %12013 = vmatpush3.bf16.msra.mxu0 %v12861_v53  ;;  %v12864_v53 = vld [vmem:[%s16471_s5 + $0x70] sm:$0xff]   ;;  %vm17614_vm3 = vmmov %vm17611_vm0 }
 0x66b   : > { %12022 = vmatprep.subr.bf16.mxu0 %v12862_v51  ;;  %vm17616_vm5 = vmmov %vm17611_vm0 }
 0x66c   : > { %vm17618_vm4 = vmmov %vm17611_vm0 }
 0x66d   : > { %12015 = vmatmul.mubr.msk.bf16.vlgmr.msra.gmra.mrb[32].mxu0 %vm17605_vm13, %v7100_v61  ;;  %v7237_v61 = vpack.c.bf16 %v7230_v52, %v7229_v56  ;;  %vm17619_vm13 = vmmov %vm17611_vm0 }
 0x66e   : > { %12023 = vmatpush3.bf16.msra.mxu0 %v12862_v51  ;;  %12018 = vmatprep.mubr.msk.bf16.mxu0 %vm17608_vm8, %v7101_v55  ;;  %v7097_v51 = vsel %vm15687_vm15, %v15556_v28, 0.0  ;;  %vm17622_vm10 = vmmov %vm17611_vm0 }
 0x66f   : > { %12024 = vmatprep.subr.bf16.mxu0 %v12863_v26  ;;  %v7102_v50 = vpack.c.bf16 %v7098_v8, %v7097_v51  ;;  %vm17624_vm14 = vmmov %vm17611_vm0 }
 0x670   : > { %vm17633_vm6 = vmmov %vm17611_vm0 }
 0x672   : > { %12025 = vmatpush3.bf16.msra.mxu0 %v12863_v26  ;;  %v7233_v26 = vsel %vm15526_vm1, %v15489_v43, 0.0  ;;  %v7235_v43 = vsel %vm15611_vm11, %v15554_v48, 0.0  ;;  %vm17615_vm1 = vmmov %vm17611_vm0  ;;  %v12871_v48 = vld [vmem:[%s16471_s5 + $0xa8] sm:$0xff]  }
 0x673   : > { %12026 = vmatprep.subr.bf16.mxu0 %v12864_v53  ;;  %v7239_v33 = vpack.c.bf16 %v7234_v38, %v7233_v26  ;;  %v7240_v25 = vpack.c.bf16 %v7236_v60, %v7235_v43  ;;  %vm17617_vm11 = vmmov %vm17611_vm0 }
 0x675   : > { %12019 = vmatmul.mubr.msk.bf16.gmra.mrb[36].mxu0 %vm17608_vm8, %v7102_v50  ;;  %vm17623_vm8 = vmmov %vm17611_vm0 }
 0x676   : > { %12027 = vmatpush3.bf16.msra.mxu0 %v12864_v53  ;;  %12030 = vmatprep.mubr.msk.bf16.mxu0 %vm17611_vm0, %v7237_v61  ;;  %v12885_v53 = vld [vmem:[%s16471_s5 + $0x118] sm:$0xff]  }
 0x677   : > { %12028 = vmatprep.subr.bf16.mxu0 %v12865_v46 }
 0x67a   : > { %12029 = vmatpush3.bf16.msra.mxu0 %v12865_v46 }
 0x67b   : > { %12038 = vmatprep.subr.bf16.mxu0 %v12866_v20 }
 0x67d   : > { %12031 = vmatmul.mubr.msk.bf16.vlgmr.msra.gmra.mrb[32].mxu0 %vm17612_vm9, %v7238_v59  ;;  %vm17625_vm9 = vmmov %vm17611_vm0 }
 0x67e   : > { %12039 = vmatpush3.bf16.msra.mxu0 %v12866_v20  ;;  %12034 = vmatprep.mubr.msk.bf16.mxu0 %vm17613_vm12, %v7239_v33  ;;  %vm17626_vm12 = vmmov %vm17611_vm0 }
 0x67f   : > { %12040 = vmatprep.subr.bf16.mxu0 %v12867_v37 }
 0x682   : > { %12041 = vmatpush3.bf16.msra.mxu0 %v12867_v37 }
 0x683   : > { %12042 = vmatprep.subr.bf16.mxu0 %v12868_v19 }
 0x685   : > { %12035 = vmatmul.mubr.msk.bf16.gmra.mrb[36].mxu0 %vm17614_vm3, %v7240_v25  ;;  %vm17627_vm3 = vmmov %vm17611_vm0 }
 0x686   : > { %12043 = vmatpush3.bf16.msra.mxu0 %v12868_v19  ;;  %12046 = vmatprep.mubr.msk.bf16.mxu0 %vm17615_vm1, %v7367_v17  ;;  %v7498_v17 = vsel %vm15464_vm7, %v15410_v45, 0.0  ;;  %v12874_v45 = vld [vmem:[%s16471_s5 + $0xc0] sm:$0xff]   ;;  %vm17621_vm7 = vnez %v17593_v3  ;;  %v12877_v3 = vld [vmem:[%s16471_s5 + $0xd8] sm:$0xff]   ;;  %vm17628_vm1 = vmmov %vm17611_vm0 }
 0x687   : > { %12044 = vmatprep.subr.bf16.mxu0 %v12869_v9  ;;  %v7505_v54 = vpack.c.bf16 %v7498_v17, %v7497_v58  ;;  %v7501_v5 = vsel %vm17621_vm7, %v15523_v16, 0.0  ;;  %v7504_v16 = vsel %vm15679_vm2, %v7496_v14, 0.0  ;;  %vm17634_vm7 = vmmov %vm17611_vm0 }
 0x688   : > { %v7507_v11 = vpack.c.bf16 %v7502_v34, %v7501_v5  ;;  %v7508_v28 = vpack.c.bf16 %v7504_v16, %v7503_v36  ;;  %v8086_v5 = vand.u32 3, %v17554_v47 }
 0x68a   : > { %12045 = vmatpush3.bf16.msra.mxu0 %v12869_v9 }
 0x68b   : > { %12054 = vmatprep.subr.bf16.mxu0 %v12870_v40 }
 0x68d   : > { %12047 = vmatmul.mubr.msk.bf16.vlgmr.msra.gmra.mrb[32].mxu0 %vm17616_vm5, %v7368_v63  ;;  %v12873_v63 = vld [vmem:[%s16471_s5 + $0xb8] sm:$0xff]   ;;  %vm17629_vm5 = vmmov %vm17611_vm0 }
 0x68e   : > { %12055 = vmatpush3.bf16.msra.mxu0 %v12870_v40  ;;  %12050 = vmatprep.mubr.msk.bf16.mxu0 %vm17617_vm11, %v7369_v18  ;;  %vm17630_vm11 = vmmov %vm17611_vm0 }
 0x68f   : > { %12056 = vmatprep.subr.bf16.mxu0 %v12871_v48 }
 0x692   : > { %12057 = vmatpush3.bf16.msra.mxu0 %v12871_v48 }
 0x693   : > { %12058 = vmatprep.subr.bf16.mxu0 %v12872_v12 }
 0x695   : > { %12051 = vmatmul.mubr.msk.bf16.gmra.mrb[36].mxu0 %vm17618_vm4, %v7370_v39  ;;  %vm17631_vm4 = vmmov %vm17611_vm0 }
 0x696   : > { %12059 = vmatpush3.bf16.msra.mxu0 %v12872_v12  ;;  %12062 = vmatprep.mubr.msk.bf16.mxu0 %vm17619_vm13, %v7505_v54  ;;  %vm17632_vm13 = vmmov %vm17611_vm0 }
 0x697   : > { %12060 = vmatprep.subr.bf16.mxu0 %v12873_v63 }
 0x69a   : > { %12061 = vmatpush3.bf16.msra.mxu0 %v12873_v63 }
 0x69b   : > { %12070 = vmatprep.subr.bf16.mxu0 %v12874_v45 }
 0x69d   : > { %12063 = vmatmul.mubr.msk.bf16.vlgmr.msra.gmra.mrb[32].mxu0 %vm17622_vm10, %v7506_v32  ;;  %vm17635_vm10 = vmmov %vm17611_vm0  ;;  %v8079_v32 = vand.u32 3, %v17553_v29 }
 0x69e   : > { %12071 = vmatpush3.bf16.msra.mxu0 %v12874_v45  ;;  %12066 = vmatprep.mubr.msk.bf16.mxu0 %vm17623_vm8, %v7507_v11  ;;  %vm13168_vm8 = vmmov 0  }
 0x69f   : > { %12072 = vmatprep.subr.bf16.mxu0 %v12875_v24  ;;  %12126 = vmatprep.mubr.msk.bf16.mxu1 %vm13168_vm8, %v13167_v35 }
 0x6a2   : > { %12073 = vmatpush3.bf16.msra.mxu0 %v12875_v24  ;;  %v12890_v24 = vld [vmem:[%s16473_s7] sm:$0xff]  }
 0x6a3   : > { %12074 = vmatprep.subr.bf16.mxu0 %v12876_v44 }
 0x6a5   : > { %12067 = vmatmul.mubr.msk.bf16.gmra.mrb[36].mxu0 %vm17624_vm14, %v7508_v28  ;;  %vm17638_vm14 = vmmov %vm17611_vm0 }
 0x6a6   : > { %12075 = vmatpush3.bf16.msra.mxu0 %v12876_v44  ;;  %12078 = vmatprep.mubr.msk.bf16.mxu0 %vm17611_vm0, %v15433_v21  ;;  %v12880_v21 = vld [vmem:[%s16471_s5 + $0xf0] sm:$0xff]   ;;  %v12917_v44 = vld [vmem:[%s16473_s7 + $0xf8] sm:$0xff]  }
 0x6a7   : > { %12076 = vmatprep.subr.bf16.mxu0 %v12877_v3 }
 0x6aa   : > { %12077 = vmatpush3.bf16.msra.mxu0 %v12877_v3 }
 0x6ab   : > { %12086 = vmatprep.subr.bf16.mxu0 %v12878_v6 }
 0x6ad   : > { %12079 = vmatmul.mubr.msk.bf16.vlgmr.msra.gmra.mrb[32].mxu0 %vm17625_vm9, %v15513_v2  ;;  %v12882_v2 = vld [vmem:[%s16471_s5 + $0x100] sm:$0xff]   ;;  %vm17639_vm9 = vmmov %vm17611_vm0 }
 0x6ae   : > { %12087 = vmatpush3.bf16.msra.mxu0 %v12878_v6  ;;  %12082 = vmatprep.mubr.msk.bf16.mxu0 %vm17626_vm12, %v15579_v41  ;;  %v12883_v41 = vld [vmem:[%s16471_s5 + $0x108] sm:$0xff]   ;;  %vm17640_vm12 = vmmov %vm17611_vm0 }
 0x6af   : > { %12088 = vmatprep.subr.bf16.mxu0 %v12879_v62 }
 0x6b2   : > { %12089 = vmatpush3.bf16.msra.mxu0 %v12879_v62 }
 0x6b3   : > { %12090 = vmatprep.subr.bf16.mxu0 %v12880_v21 }
 0x6b5   : > { %12083 = vmatmul.mubr.msk.bf16.gmra.mrb[36].mxu0 %vm17627_vm3, %v15637_v15  ;;  %v7772_v15 = vld [vmem:[#allocation4 + $0x50] sm:$0xff]  ;;  %vm15885_vm3 = vcmp.ge.s32.totalorder %v8079_v32, 1 }
 0x6b6   : > { %12091 = vmatpush3.bf16.msra.mxu0 %v12880_v21  ;;  %12094 = vmatprep.mubr.msk.bf16.mxu0 %vm17628_vm1, %v15405_v10  ;;  %v12884_v10 = vld [vmem:[%s16471_s5 + $0x110] sm:$0xff]   ;;  %v7776_v55 = vpack.c.bf16 %v7772_v15, %v15761_v1  ;;  %vm15889_vm1 = vcmp.ge.s32.totalorder %v8086_v5, 1 }
 0x6b7   : > { %12092 = vmatprep.subr.bf16.mxu0 %v12881_v13 }
 0x6ba   : > { %12093 = vmatpush3.bf16.msra.mxu0 %v12881_v13 }
 0x6bb   : > { %12102 = vmatprep.subr.bf16.mxu0 %v12882_v2 }
 0x6bd   : > { %12095 = vmatmul.mubr.msk.bf16.vlgmr.msra.gmra.mrb[32].mxu0 %vm17629_vm5, %v15495_v57  ;;  %v7902_v57 = vld [vmem:[#allocation4 + $0x51] sm:$0xff]  ;;  %vm15896_vm5 = vcmp.le.s32.totalorder %v8086_v5, 2  ;;  %v12914_v5 = vld [vmem:[%s16473_s7 + $0xe0] sm:$0xff]  }
 0x6be   : > { %12103 = vmatpush3.bf16.msra.mxu0 %v12882_v2  ;;  %12098 = vmatprep.mubr.msk.bf16.mxu0 %vm17630_vm11, %v15561_v30  ;;  %v7909_v30 = vsel %vm15687_vm15, %v7496_v14, 0.0  ;;  %v7910_v8 = vsel %vm15679_vm2, %v7902_v57, 0.0  ;;  %vm17636_vm15 = vmmov %vm17611_vm0  ;;  %v12891_v2 = vld [vmem:[%s16473_s7 + $0x8] sm:$0xff]   ;;  %v12893_v57 = vld [vmem:[%s16473_s7 + $0x18] sm:$0xff]  }
 0x6bf   : > { %12104 = vmatprep.subr.bf16.mxu0 %v12883_v41  ;;  %v7914_v52 = vpack.c.bf16 %v7910_v8, %v7909_v30  ;;  %vm17637_vm2 = vmmov %vm17611_vm0 }
 0x6c0   : > { %vm17647_vm11 = vmmov %vm17611_vm0 }
 0x6c2   : > { %12105 = vmatpush3.bf16.msra.mxu0 %v12883_v41 }
 0x6c3   : > { %12106 = vmatprep.subr.bf16.mxu0 %v12884_v10 }
 0x6c5   : > { %12099 = vmatmul.mubr.msk.bf16.gmra.mrb[36].mxu0 %vm17631_vm4, %v7776_v55  ;;  %vm15901_vm4 = vcmp.le.s32.totalorder %v8079_v32, 2  ;;  %v12913_v32 = vld [vmem:[%s16473_s7 + $0xd8] sm:$0xff]  }
 0x6c6   : > { %12107 = vmatpush3.bf16.msra.mxu0 %v12884_v10  ;;  %12110 = vmatprep.mubr.msk.bf16.mxu0 %vm17632_vm13, %v15480_v7  ;;  %v12888_v7 = vld [vmem:[%s16473_s7 + $0x30] sm:$0xff]   ;;  %vm17650_vm13 = vmmov %vm17611_vm0 }
 0x6c7   : > { %12108 = vmatprep.subr.bf16.mxu0 %v12885_v53  ;;  %12123 = vmatpush3.bf16.msra.mxu1 %v12888_v7  ;;  %v12894_v7 = vld [vmem:[%s16473_s7 + $0x40] sm:$0xff]  }
 0x6c8   : > { %12124 = vmatprep.subr.bf16.mxu1 %v13167_v35 }
 0x6ca   : > { %12109 = vmatpush3.bf16.msra.mxu0 %v12885_v53  ;;  %v12892_v53 = vld [vmem:[%s16473_s7 + $0x10] sm:$0xff]  }
 0x6cd   : > { %12111 = vmatmul.mubr.msk.bf16.vlgmr.msra.gmra.mrb[32].mxu0 %vm17633_vm6, %v15542_v31  ;;  %v12889_v31 = vld [vmem:[%s16473_s7 + $0x38] sm:$0xff]   ;;  %vm17651_vm6 = vmmov %vm17611_vm0 }
 0x6ce   : > { %12114 = vmatprep.mubr.msk.bf16.mxu0 %vm17634_vm7, %v15639_v49  ;;  %12125 = vmatpush3.bf16.msra.mxu1 %v12889_v31  ;;  %v10633_v49 = vld [vmem:[%s16472_s6] ss:$0 sm:$0xff]  ;;  %vm17652_vm7 = vmmov %vm17611_vm0 }
 0x6cf   : > { %12130 = vmatprep.subr.bf16.mxu1 %v13167_v35 }
 0x6d5   : > { %12115 = vmatmul.mubr.msk.bf16.gmra.mrb[36].mxu0 %vm17635_vm10, %v7914_v52  ;;  %vm17653_vm10 = vmmov %vm17611_vm0 }
 0x7a0   : > { %v12112_v27 = vpop.f32.mrb[32].mxu0 }
 0x7a1   : > { %v8042_v4 = vadd.f32 %v12112_v27, %v10633_v49  ;;  %v7994_v51 = vpop.f32.mrb[33].mxu0  ;;  %v12896_v27 = vld [vmem:[%s16473_s7 + $0x50] sm:$0xff]  }
 0x7a2   : > { %v8040_v50 = vadd.f32 %v10633_v49, %v7994_v51  ;;  %v12113_v56 = vpop.f32.mrb[34].mxu0 }
 0x7a3   : > { %v8043_v46 = vadd.f32 %v12113_v56, %v10633_v49  ;;  %v7997_v61 = vpop.f32.mrb[35].mxu0  ;;  %v8050_v0 = vmax.f32 %v8042_v4, 0.0  ;;  %v12897_v4 = vld [vmem:[%s16473_s7 + $0x58] sm:$0xff]  }
 0x7a4   : > { %v8041_v20 = vadd.f32 %v10633_v49, %v7997_v61  ;;  %v8048_v23 = vmax.f32 %v8040_v50, 0.0 }
 0x7a5   : > { %v8051_v38 = vmax.f32 %v8043_v46, 0.0  ;;  %v12898_v46 = vld [vmem:[%s16473_s7 + $0x60] sm:$0xff]  }
 0x7a6   : > { %v8049_v59 = vmax.f32 %v8041_v20, 0.0  ;;  %v12899_v20 = vld [vmem:[%s16473_s7 + $0x68] sm:$0xff]  }
 0x7a7   : > { %v8058_v26 = vmax.f32 %v8050_v0, %v8051_v38  ;;  %v12900_v0 = vld [vmem:[%s16473_s7 + $0x70] sm:$0xff]  }
 0x7a8   : > { %v8056_v37 = vmax.f32 %v8048_v23, %v8049_v59  ;;  %v12116_v33 = vpop.f32.mrb[36].mxu0  ;;  %v12901_v23 = vld [vmem:[%s16473_s7 + $0x78] sm:$0xff]  }
 0x7a9   : > { %8059 = vst.msk [vmem:[#allocation7 + $0x8] sm:$0xff] %vm17636_vm15, %v8058_v26  ;;  %v8046_v19 = vadd.f32 %v12116_v33, %v10633_v49  ;;  %v8010_v60 = vpop.f32.mrb[37].mxu0  ;;  %v12902_v33 = vld [vmem:[%s16473_s7 + $0x80] sm:$0xff]   ;;  %vm17654_vm15 = vmmov %vm17611_vm0 }
 0x7aa   : > { %8057 = vst.msk [vmem:[#allocation7] sm:$0xff] %vm17637_vm2, %v8056_v37  ;;  %v8044_v43 = vadd.f32 %v10633_v49, %v8010_v60  ;;  %v12117_v25 = vpop.f32.mrb[38].mxu0  ;;  %v12903_v60 = vld [vmem:[%s16473_s7 + $0x88] sm:$0xff]   ;;  %vm17655_vm2 = vmmov %vm17611_vm0 }
 0x7ab   : > { %v8047_v9 = vadd.f32 %v12117_v25, %v10633_v49  ;;  %v8013_v40 = vpop.f32.mrb[39].mxu0  ;;  %v8054_v18 = vmax.f32 %v8046_v19, 0.0  ;;  %v12905_v25 = vld [vmem:[%s16473_s7 + $0x98] sm:$0xff]  }
 0x7ac   : > { %v8045_v48 = vadd.f32 %v10633_v49, %v8013_v40  ;;  %v8052_v1 = vmax.f32 %v8044_v43, 0.0  ;;  %v12895_v49 = vld [vmem:[%s16473_s7 + $0x48] sm:$0xff]   ;;  %v12904_v43 = vld [vmem:[%s16473_s7 + $0x90] sm:$0xff]  }
 0x7ad   : > { %v8055_v12 = vmax.f32 %v8047_v9, 0.0 }
 0x7ae   : > { %v8053_v17 = vmax.f32 %v8045_v48, 0.0  ;;  %v12906_v48 = vld [vmem:[%s16473_s7 + $0xa0] sm:$0xff]  }
 0x7af   : > { %v8062_v39 = vmax.f32 %v8054_v18, %v8055_v12  ;;  %v12907_v12 = vld [vmem:[%s16473_s7 + $0xa8] sm:$0xff]  }
 0x7b0   : > { %v8060_v58 = vmax.f32 %v8052_v1, %v8053_v17  ;;  %v12908_v1 = vld [vmem:[%s16473_s7 + $0xb0] sm:$0xff]  }
 0x7b1   : > { %v8064_v63 = vld [vmem:[#allocation7] ss:$2 sm:$0xff]  ;;  %v8068_v54 = vld [vmem:[#allocation7 + $0x1] ss:$2 sm:$0xff]  ;;  %8063 = vst.msk [vmem:[#allocation7 + $0x18] sm:$0xff] %vm17638_vm14, %v8062_v39  ;;  %vm17656_vm14 = vmmov %vm17611_vm0 }
 0x7b2   : > { %v8071_v45 = vmax.f32 %v8064_v63, %v8068_v54  ;;  %8061 = vst.msk [vmem:[#allocation7 + $0x10] sm:$0xff] %vm17611_vm0, %v8060_v58  ;;  %v12909_v58 = vld [vmem:[%s16473_s7 + $0xb8] sm:$0xff]  }
 0x7b4   : > { %8073 = vst.msk [vmem:[#allocation5 + $0x8] sm:$0xff] %vm17639_vm9, %v8071_v45  ;;  %v12910_v45 = vld [vmem:[%s16473_s7 + $0xc0] sm:$0xff]   ;;  %vm17657_vm9 = vcmask (%p101_p2), 261120  }
 0x7b9   : > { %v8066_v42 = vld [vmem:[#allocation7 + $0x10] ss:$2 sm:$0xff]  ;;  %v8070_v34 = vld [vmem:[#allocation7 + $0x11] ss:$2 sm:$0xff] }
 0x7ba   : > { %v8072_v22 = vmax.f32 %v8066_v42, %v8070_v34  ;;  %v12911_v34 = vld [vmem:[%s16473_s7 + $0xc8] sm:$0xff]  }
 0x7bb   : > { %v8120_v11 = vld [vmem:[#allocation5 + $0x4] sm:$0xff] }
 0x7bc   : > { %8074 = vst.msk [vmem:[#allocation5 + $0x10] sm:$0xff] %vm17640_vm12, %v8072_v22  ;;  %v8103_v30 = vld [vmem:[#allocation5 + $0x3] sm:$0xff]  ;;  %v12912_v22 = vld [vmem:[%s16473_s7 + $0xd0] sm:$0xff]   ;;  %vm17658_vm12 = vmmov (%p101_p2), %vm17657_vm9 }
 0x7bd   : > { %v8109_v52 = vsel %vm15885_vm3, %v8103_v30, 0.0  ;;  %v8268_v51 = vld [vmem:[#allocation5 + $0x5] sm:$0xff] }
 0x7be   : > { %v8274_v56 = vsel %vm15901_vm4, %v8268_v51, 0.0  ;;  %v8356_v59 = vld [vmem:[#allocation5 + $0x7] sm:$0xff] }
 0x7bf   : > { %v8358_v37 = vsel %vm15885_vm3, %v8356_v59, 0.0  ;;  %v8440_v40 = vld [vmem:[#allocation5 + $0x8] sm:$0xff] }
 0x7c3   : > { %v15883_v14 = vld [vmem:[#allocation5 + $0xc] sm:$0xff]  ;;  %v8773_v13 = vld [vmem:[#allocation5 + $0x15] sm:$0xff] }
 0x7c4   : > { %v8104_v16 = vld [vmem:[#allocation5 + $0xb] sm:$0xff]  ;;  %v8122_v29 = vpack.c.bf16 %v15883_v14, %v8120_v11  ;;  %v8607_v6 = vld [vmem:[#allocation5 + $0x13] sm:$0xff]  ;;  %v8775_v15 = vsel %vm15896_vm5, %v8773_v13, 0.0 }
 0x7c5   : > { %v8269_v28 = vld [vmem:[#allocation5 + $0xd] sm:$0xff]  ;;  %v8608_v47 = vsel %vm15885_vm3, %v8104_v16, 0.0  ;;  %v8609_v21 = vsel %vm15889_vm1, %v8607_v6, 0.0  ;;  %v8110_v8 = vsel %vm15889_vm1, %v8104_v16, 0.0  ;;  %v12918_v16 = vld [vmem:[%s16473_s7 + $0x100] sm:$0xff]   ;;  %vm17659_vm3 = vmmov (%p101_p2), %vm17657_vm9 }
 0x7c6   : > { %12127 = vmatmul.mubr.msk.bf16.vlgmr.msra.gmra.mrb[32].mxu1 %vm17647_vm11, %v8122_v29  ;;  %v15912_v41 = vpack.c.bf16 %v8609_v21, %v8608_v47  ;;  %v8774_v10 = vsel %vm15901_vm4, %v8269_v28, 0.0  ;;  %v8111_v31 = vpack.c.bf16 %v8110_v8, %v8109_v52  ;;  %v8275_v50 = vsel %vm15896_vm5, %v8269_v28, 0.0  ;;  %v8357_v38 = vld [vmem:[#allocation5 + $0xf] sm:$0xff] }
 0x7c7   : > { %12131 = vmatpush3.bf16.msra.mxu1 %v12890_v24  ;;  %12138 = vmatprep.mubr.msk.bf16.mxu1 %vm13168_vm8, %v13167_v35  ;;  %v15919_v55 = vpack.c.bf16 %v8775_v15, %v8774_v10  ;;  %v8276_v61 = vpack.c.bf16 %v8275_v50, %v8274_v56  ;;  %v8359_v26 = vsel %vm15889_vm1, %v8357_v38, 0.0  ;;  %v8441_v9 = vld [vmem:[#allocation5 + $0x10] sm:$0xff]  ;;  %v12915_v24 = vld [vmem:[%s16473_s7 + $0xe8] sm:$0xff]   ;;  %vm17660_vm1 = vmmov (%p101_p2), %vm17659_vm3 }
 0x7c8   : > { %12132 = vmatprep.subr.bf16.mxu1 %v13167_v35  ;;  %v8360_v19 = vpack.c.bf16 %v8359_v26, %v8358_v37  ;;  %v8442_v18 = vpack.c.bf16 %v8441_v9, %v8440_v40  ;;  %v8522_v17 = vld [vmem:[#allocation5 + $0x9] sm:$0xff]  ;;  %v8523_v39 = vld [vmem:[#allocation5 + $0x11] sm:$0xff]  ;;  %vm17662_vm11 = vmmov (%p101_p2), %vm17660_vm1 }
 0x7c9   : > { %v8524_v63 = vsel %vm15901_vm4, %v8522_v17, 0.0  ;;  %v8525_v54 = vsel %vm15896_vm5, %v8523_v39, 0.0  ;;  %v12916_v11 = vld [vmem:[%s16473_s7 + $0xf0] sm:$0xff]   ;;  %v12919_v28 = vld [vmem:[%s16473_s7 + $0x108] sm:$0xff]   ;;  %vm17661_vm5 = vmmov (%p101_p2), %vm17660_vm1 }
 0x7ca   : > { %v8526_v42 = vpack.c.bf16 %v8525_v54, %v8524_v63  ;;  %v8691_v36 = vld [vmem:[#allocation5 + $0x14] sm:$0xff]  ;;  %v10743_v63 = vld [vmem:[%s16474_s8] ss:$0 sm:$0xff]  ;;  %vm17663_vm4 = vmmov (%p101_p2), %vm17660_vm1 }
 0x7cb   : > { %12133 = vmatpush3.bf16.msra.mxu1 %v12891_v2  ;;  %v8692_v29 = vpack.c.bf16 %v8691_v36, %v15883_v14  ;;  %v12920_v47 = vld [vmem:[%s16473_s7 + $0x110] sm:$0xff]   ;;  %v12921_v14 = vld [vmem:[%s16473_s7 + $0x118] sm:$0xff]  }
 0x7cc   : > { %12134 = vmatprep.subr.bf16.mxu1 %v13167_v35 }
 0x7cf   : > { %12135 = vmatpush3.bf16.msra.mxu1 %v12892_v53 }
 0x7d0   : > { %12136 = vmatprep.subr.bf16.mxu1 %v13167_v35 }
 0x7d3   : > { %12137 = vmatpush3.bf16.msra.mxu1 %v12893_v57 }
 0x7d4   : > { %12142 = vmatprep.subr.bf16.mxu1 %v13167_v35 }
 0x7d6   : > { %12139 = vmatmul.mubr.msk.bf16.vlgmr.msra.gmra.mrb[36].mxu1 %vm17650_vm13, %v8111_v31  ;;  %vm17664_vm13 = vmmov (%p101_p2), %vm17660_vm1 }
 0x7d7   : > { %12143 = vmatpush3.bf16.msra.mxu1 %v12894_v7  ;;  %12150 = vmatprep.mubr.msk.bf16.mxu1 %vm13168_vm8, %v13167_v35 }
 0x7d8   : > { %12144 = vmatprep.subr.bf16.mxu1 %v13167_v35 }
 0x7db   : > { %12145 = vmatpush3.bf16.msra.mxu1 %v12895_v49 }
 0x7dc   : > { %12146 = vmatprep.subr.bf16.mxu1 %v13167_v35 }
 0x7df   : > { %12147 = vmatpush3.bf16.msra.mxu1 %v12896_v27 }
 0x7e0   : > { %12148 = vmatprep.subr.bf16.mxu1 %v13167_v35 }
 0x7e3   : > { %12149 = vmatpush3.bf16.msra.mxu1 %v12897_v4 }
 0x7e4   : > { %12154 = vmatprep.subr.bf16.mxu1 %v13167_v35 }
 0x7e6   : > { %12151 = vmatmul.mubr.msk.bf16.vlgmr.msra.gmra.mrb[40].mxu1 %vm17651_vm6, %v8276_v61 }
 0x7e7   : > { %12155 = vmatpush3.bf16.msra.mxu1 %v12898_v46  ;;  %12162 = vmatprep.mubr.msk.bf16.mxu1 %vm13168_vm8, %v13167_v35 }
 0x7e8   : > { %12156 = vmatprep.subr.bf16.mxu1 %v13167_v35 }
 0x7eb   : > { %12157 = vmatpush3.bf16.msra.mxu1 %v12899_v20 }
 0x7ec   : > { %12158 = vmatprep.subr.bf16.mxu1 %v13167_v35 }
 0x7ef   : > { %12159 = vmatpush3.bf16.msra.mxu1 %v12900_v0 }
 0x7f0   : > { %12160 = vmatprep.subr.bf16.mxu1 %v13167_v35 }
 0x7f3   : > { %12161 = vmatpush3.bf16.msra.mxu1 %v12901_v23 }
 0x7f4   : > { %12166 = vmatprep.subr.bf16.mxu1 %v13167_v35 }
 0x7f6   : > { %12163 = vmatmul.mubr.msk.bf16.vlgmr.msra.gmra.mrb[44].mxu1 %vm17652_vm7, %v8360_v19 }
 0x7f7   : > { %12167 = vmatpush3.bf16.msra.mxu1 %v12902_v33  ;;  %12174 = vmatprep.mubr.msk.bf16.mxu1 %vm13168_vm8, %v13167_v35 }
 0x7f8   : > { %12168 = vmatprep.subr.bf16.mxu1 %v13167_v35 }
 0x7fb   : > { %12169 = vmatpush3.bf16.msra.mxu1 %v12903_v60 }
 0x7fc   : > { %12170 = vmatprep.subr.bf16.mxu1 %v13167_v35 }
 0x7ff   : > { %12171 = vmatpush3.bf16.msra.mxu1 %v12904_v43 }
 0x800   : > { %12172 = vmatprep.subr.bf16.mxu1 %v13167_v35 }
 0x803   : > { %12173 = vmatpush3.bf16.msra.mxu1 %v12905_v25 }
 0x804   : > { %12178 = vmatprep.subr.bf16.mxu1 %v13167_v35 }
 0x806   : > { %12175 = vmatmul.mubr.msk.bf16.vlgmr.msra.gmra.mrb[48].mxu1 %vm17653_vm10, %v8442_v18 }
 0x807   : > { %12179 = vmatpush3.bf16.msra.mxu1 %v12906_v48  ;;  %12186 = vmatprep.mubr.msk.bf16.mxu1 %vm13168_vm8, %v13167_v35 }
 0x808   : > { %12180 = vmatprep.subr.bf16.mxu1 %v13167_v35 }
 0x80b   : > { %12181 = vmatpush3.bf16.msra.mxu1 %v12907_v12 }
 0x80c   : > { %12182 = vmatprep.subr.bf16.mxu1 %v13167_v35 }
 0x80f   : > { %12183 = vmatpush3.bf16.msra.mxu1 %v12908_v1 }
 0x810   : > { %12184 = vmatprep.subr.bf16.mxu1 %v13167_v35 }
 0x813   : > { %12185 = vmatpush3.bf16.msra.mxu1 %v12909_v58 }
 0x814   : > { %12190 = vmatprep.subr.bf16.mxu1 %v13167_v35 }
 0x816   : > { %12187 = vmatmul.mubr.msk.bf16.vlgmr.msra.gmra.mrb[52].mxu1 %vm17654_vm15, %v8526_v42 }
 0x817   : > { %12191 = vmatpush3.bf16.msra.mxu1 %v12910_v45  ;;  %12198 = vmatprep.mubr.msk.bf16.mxu1 %vm13168_vm8, %v13167_v35 }
 0x818   : > { %12192 = vmatprep.subr.bf16.mxu1 %v13167_v35 }
 0x81b   : > { %12193 = vmatpush3.bf16.msra.mxu1 %v12911_v34 }
 0x81c   : > { %12194 = vmatprep.subr.bf16.mxu1 %v13167_v35 }
 0x81f   : > { %12195 = vmatpush3.bf16.msra.mxu1 %v12912_v22 }
 0x820   : > { %12196 = vmatprep.subr.bf16.mxu1 %v13167_v35 }
 0x823   : > { %12197 = vmatpush3.bf16.msra.mxu1 %v12913_v32 }
 0x824   : > { %12202 = vmatprep.subr.bf16.mxu1 %v13167_v35 }
 0x826   : > { %12199 = vmatmul.mubr.msk.bf16.vlgmr.msra.gmra.mrb[56].mxu1 %vm17655_vm2, %v15912_v41 }
 0x827   : > { %12203 = vmatpush3.bf16.msra.mxu1 %v12914_v5  ;;  %12210 = vmatprep.mubr.msk.bf16.mxu1 %vm13168_vm8, %v13167_v35 }
 0x828   : > { %12204 = vmatprep.subr.bf16.mxu1 %v13167_v35 }
 0x82b   : > { %12205 = vmatpush3.bf16.msra.mxu1 %v12915_v24 }
 0x82c   : > { %12206 = vmatprep.subr.bf16.mxu1 %v13167_v35 }
 0x82f   : > { %12207 = vmatpush3.bf16.msra.mxu1 %v12916_v11 }
 0x830   : > { %12208 = vmatprep.subr.bf16.mxu1 %v13167_v35 }
 0x833   : > { %12209 = vmatpush3.bf16.msra.mxu1 %v12917_v44 }
 0x834   : > { %12214 = vmatprep.subr.bf16.mxu1 %v13167_v35 }
 0x836   : > { %12211 = vmatmul.mubr.msk.bf16.vlgmr.msra.gmra.mrb[60].mxu1 %vm17656_vm14, %v8692_v29 }
 0x837   : > { %12215 = vmatpush3.bf16.msra.mxu1 %v12918_v16  ;;  %12222 = vmatprep.mubr.msk.bf16.mxu1 %vm13168_vm8, %v13167_v35  ;;  %vm8872_vm8 = vcmask 257024  }
 0x838   : > { %12216 = vmatprep.subr.bf16.mxu1 %v13167_v35 }
 0x83b   : > { %12217 = vmatpush3.bf16.msra.mxu1 %v12919_v28 }
 0x83c   : > { %12218 = vmatprep.subr.bf16.mxu1 %v13167_v35 }
 0x83f   : > { %12219 = vmatpush3.bf16.msra.mxu1 %v12920_v47 }
 0x840   : > { %12220 = vmatprep.subr.bf16.mxu1 %v13167_v35 }
 0x843   : > { %12221 = vmatpush3.bf16.msra.mxu1 %v12921_v14 }
 0x846   : > { %12223 = vmatmul.mubr.msk.bf16.vlgmr.msra.gmra.mrb[64].mxu1 %vm17611_vm0, %v15919_v55 }
 0x899   : > { %v8193_v3 = vpop.f32.mrb[32].mxu1 }
 0x89a   : > { %v12128_v6 = vpop.f32.mrb[33].mxu1 }
 0x89b   : > { %v8196_v62 = vpop.f32.mrb[34].mxu1  ;;  %v12924_v6 = vld [vmem:[%s16475_s9 + $0x40] ss:$16 sps:$4 sm:$0xff] (%p101_p2)  }
 0x89c   : > { %v12129_v21 = vpop.f32.mrb[35].mxu1 }
 0x89d   :  { %v12925_v21 = vld [vmem:[%s16475_s9 + $0x64] ss:$16 sps:$4 sm:$0xff] (%p101_p2)  }
 0x8a9   : > { %v8261_v13 = vpop.f32.mrb[36].mxu1 }
 0x8aa   : > { %v8262_v2 = vadd.f32 %v8261_v13, %v8193_v3  ;;  %v12140_v41 = vpop.f32.mrb[37].mxu1  ;;  %v12922_v3 = vld [vmem:[%s16475_s9 + $0x44] ss:$16 sps:$4 sm:$0xff] (%p101_p2)   ;;  %v12927_v13 = vld [vmem:[%s16475_s9 + $0x60] ss:$16 sps:$4 sm:$0xff] (%p101_p2)  }
 0x8ab   : > { %v8264_v10 = vpop.f32.mrb[38].mxu1  ;;  %8950 = vmatprep.subr.bf16.mxu0 (%p101_p2), %v12922_v3  ;;  %v12930_v41 = vld [vmem:[%s16475_s9 + $0x4c] ss:$16 sps:$4 sm:$0xff] (%p101_p2)  }
 0x8ac   : > { %v8265_v15 = vadd.f32 %v8264_v10, %v8196_v62  ;;  %v12141_v53 = vpop.f32.mrb[39].mxu1  ;;  %v13169_v62 = vmov (%p101_p2), 0   ;;  %8951 = vmatpush1.bf16.msra.mxu0 (%p101_p2), %v12924_v6  ;;  %v13008_v3 = vld [vmem:[%s16477_s11 + $0x174] ss:$8 sps:$4 sm:$0xff] (%p101_p2)   ;;  %v13003_v6 = vld [vmem:[%s16477_s11 + $0x40] ss:$8 sps:$4 sm:$0xff] (%p101_p2)  }
 0x8ad   :  { %8982 = vmatprep.mubr.bf16.mxu0 (%p101_p2), %v13169_v62  ;;  %9285 = vmatprep.mubr.bf16.mxu1 (%p101_p2), %v13169_v62  ;;  %v12933_v53 = vld [vmem:[%s16475_s9 + $0x6c] ss:$16 sps:$4 sm:$0xff] (%p101_p2)  }
 0x8ae   :  { %8952 = vmatprep.subr.bf16.mxu0 (%p101_p2), %v12925_v21  ;;  %v13011_v21 = vld [vmem:[%s16477_s11 + $0x54] ss:$8 sps:$4 sm:$0xff] (%p101_p2)  }
 0x8b0   :  { %8953 = vmatpush1.bf16.msra.mxu0 (%p101_p2), %v12927_v13  ;;  %v13009_v13 = vld [vmem:[%s16477_s11 + $0x50] ss:$8 sps:$4 sm:$0xff] (%p101_p2)  }
 0x8b1   :  { %8991 = vmatprep.subr.bf16.mxu0 (%p101_p2), %v12930_v41  ;;  %v13014_v41 = vld [vmem:[%s16477_s11 + $0x184] ss:$8 sps:$4 sm:$0xff] (%p101_p2)  }
 0x8b9   : > { %v8347_v57 = vpop.f32.mrb[40].mxu1 }
 0x8ba   : > { %v8354_v30 = vadd.f32 %v8347_v57, %v8262_v2  ;;  %v12152_v8 = vpop.f32.mrb[41].mxu1  ;;  %v12940_v57 = vld [vmem:[%s16475_s9 + $0x8c] ss:$16 sps:$4 sm:$0xff] (%p101_p2)  }
 0x8bb   : > { %v8350_v52 = vpop.f32.mrb[42].mxu1  ;;  %v12931_v8 = vld [vmem:[%s16475_s9 + $0x68] ss:$16 sps:$4 sm:$0xff] (%p101_p2)   ;;  %9253 = vmatprep.subr.bf16.mxu1 (%p101_p2), %v12940_v57 }
 0x8bc   : > { %v8355_v7 = vadd.f32 %v8350_v52, %v8265_v15  ;;  %v12153_v35 = vpop.f32.mrb[43].mxu1  ;;  %v12928_v15 = vld [vmem:[%s16475_s9 + $0x48] ss:$16 sps:$4 sm:$0xff] (%p101_p2)   ;;  %v12936_v52 = vld [vmem:[%s16475_s9 + $0x4] ss:$16 sps:$4 sm:$0xff] (%p101_p2)  }
 0x8bd   :  { %v12948_v35 = vld [vmem:[%s16475_s9 + $0xa8] ss:$16 sps:$4 sm:$0xff] (%p101_p2)  }
 0x8be   :  { %v13018_v57 = vld [vmem:[%s16477_s11 + $0x190] ss:$8 sps:$4 sm:$0xff] (%p101_p2)  }
 0x8c9   : > { %v8431_v31 = vpop.f32.mrb[44].mxu1 }
 0x8ca   : > { %v8438_v49 = vadd.f32 %v8431_v31, %v8354_v30  ;;  %v12164_v27 = vpop.f32.mrb[45].mxu1  ;;  %v12942_v30 = vld [vmem:[%s16475_s9 + $0x88] ss:$16 sps:$4 sm:$0xff] (%p101_p2)  }
 0x8cb   : > { %v8434_v55 = vpop.f32.mrb[46].mxu1  ;;  %9254 = vmatpush1.bf16.msra.mxu1 (%p101_p2), %v12942_v30  ;;  %v12954_v27 = vld [vmem:[%s16475_s9 + $0xcc] ss:$16 sps:$4 sm:$0xff] (%p101_p2)  }
 0x8cc   : > { %v8439_v4 = vadd.f32 %v8434_v55, %v8355_v7  ;;  %v12165_v51 = vpop.f32.mrb[47].mxu1  ;;  %v12946_v7 = vld [vmem:[%s16475_s9 + $0xac] ss:$16 sps:$4 sm:$0xff] (%p101_p2)   ;;  %v12939_v55 = vld [vmem:[%s16475_s9 + $0x24] ss:$16 sps:$4 sm:$0xff] (%p101_p2)  }
 0x8cd   :  { %9255 = vmatprep.subr.bf16.mxu1 (%p101_p2), %v12946_v7  ;;  %v12952_v51 = vld [vmem:[%s16475_s9 + $0xc8] ss:$16 sps:$4 sm:$0xff] (%p101_p2)   ;;  %v13023_v30 = vld [vmem:[%s16477_s11 + $0x74] ss:$8 sps:$4 sm:$0xff] (%p101_p2)   ;;  %v13026_v7 = vld [vmem:[%s16477_s11 + $0x1a4] ss:$8 sps:$4 sm:$0xff] (%p101_p2)  }
 0x8cf   :  { %9256 = vmatpush1.bf16.msra.mxu1 (%p101_p2), %v12948_v35  ;;  %v13029_v35 = vld [vmem:[%s16477_s11 + $0x84] ss:$8 sps:$4 sm:$0xff] (%p101_p2)  }
 0x8d0   :  { %9394 = vmatprep.subr.bf16.mxu1 (%p101_p2), %v12954_v27  ;;  %v13030_v27 = vld [vmem:[%s16477_s11 + $0x1b0] ss:$8 sps:$4 sm:$0xff] (%p101_p2)  }
 0x8d9   : > { %v8513_v50 = vpop.f32.mrb[48].mxu1 }
 0x8da   : > { %v8520_v56 = vadd.f32 %v8513_v50, %v8438_v49  ;;  %v12176_v46 = vpop.f32.mrb[49].mxu1  ;;  %v12934_v49 = vld [vmem:[%s16475_s9] ss:$16 sps:$4 sm:$0xff] (%p101_p2)   ;;  %v12960_v50 = vld [vmem:[%s16475_s9 + $0xec] ss:$16 sps:$4 sm:$0xff] (%p101_p2)  }
 0x8db   : > { %v8516_v61 = vpop.f32.mrb[50].mxu1 }
 0x8dc   : > { %v8521_v20 = vadd.f32 %v8516_v61, %v8439_v4  ;;  %v12177_v0 = vpop.f32.mrb[51].mxu1  ;;  %v12945_v61 = vld [vmem:[%s16475_s9 + $0xc] ss:$16 sps:$4 sm:$0xff] (%p101_p2)  }
 0x8e9   : > { %v8597_v38 = vpop.f32.mrb[52].mxu1 }
 0x8ea   : > { %v8604_v23 = vadd.f32 %v8597_v38, %v8520_v56  ;;  %v12188_v59 = vpop.f32.mrb[53].mxu1  ;;  %v12937_v56 = vld [vmem:[%s16475_s9 + $0x20] ss:$16 sps:$4 sm:$0xff] (%p101_p2)  }
 0x8eb   : > { %v8600_v26 = vpop.f32.mrb[54].mxu1  ;;  %v12951_v59 = vld [vmem:[%s16475_s9 + $0x2c] ss:$16 sps:$4 sm:$0xff] (%p101_p2)  }
 0x8ec   : > { %v8605_v37 = vadd.f32 %v8600_v26, %v8521_v20  ;;  %v12189_v33 = vpop.f32.mrb[55].mxu1  ;;  %v12958_v20 = vld [vmem:[%s16475_s9 + $0xe8] ss:$16 sps:$4 sm:$0xff] (%p101_p2)  }
 0x8ed   :  { %v12979_v33 = vld [vmem:[%s16477_s11] ss:$8 sps:$4 sm:$0xff] (%p101_p2)  }
 0x8f9   : > { %v8681_v19 = vpop.f32.mrb[56].mxu1 }
 0x8fa   : > { %v8688_v60 = vadd.f32 %v8681_v19, %v8604_v23  ;;  %v12200_v43 = vpop.f32.mrb[57].mxu1  ;;  %v12943_v23 = vld [vmem:[%s16475_s9 + $0x8] ss:$16 sps:$4 sm:$0xff] (%p101_p2)   ;;  %v12981_v19 = vld [vmem:[%s16477_s11 + $0x4] ss:$8 sps:$4 sm:$0xff] (%p101_p2)  }
 0x8fb   : > { %v8684_v25 = vpop.f32.mrb[58].mxu1  ;;  %v12985_v43 = vld [vmem:[%s16477_s11 + $0x10] ss:$8 sps:$4 sm:$0xff] (%p101_p2)  }
 0x8fc   : > { %v8689_v9 = vadd.f32 %v8684_v25, %v8605_v37  ;;  %v12201_v40 = vpop.f32.mrb[59].mxu1  ;;  %v12949_v37 = vld [vmem:[%s16475_s9 + $0x28] ss:$16 sps:$4 sm:$0xff] (%p101_p2)   ;;  %v12987_v25 = vld [vmem:[%s16477_s11 + $0x14] ss:$8 sps:$4 sm:$0xff] (%p101_p2)  }
 0x8fd   :  { %v12963_v40 = vld [vmem:[%s16475_s9 + $0xa4] ss:$16 sps:$4 sm:$0xff] (%p101_p2)  }
 0x909   : > { %v8763_v48 = vpop.f32.mrb[60].mxu1 }
 0x90a   : > { %v8770_v18 = vadd.f32 %v8763_v48, %v8688_v60  ;;  %v12212_v12 = vpop.f32.mrb[61].mxu1  ;;  %v12957_v60 = vld [vmem:[%s16475_s9 + $0x84] ss:$16 sps:$4 sm:$0xff] (%p101_p2)  }
 0x90b   : > { %v8766_v1 = vpop.f32.mrb[62].mxu1  ;;  %v12993_v48 = vld [vmem:[%s16477_s11 + $0x24] ss:$8 sps:$4 sm:$0xff] (%p101_p2)   ;;  %v12961_v12 = vld [vmem:[%s16475_s9 + $0xa0] ss:$16 sps:$4 sm:$0xff] (%p101_p2)  }
 0x90c   : > { %v8771_v17 = vadd.f32 %v8766_v1, %v8689_v9  ;;  %v12213_v39 = vpop.f32.mrb[63].mxu1  ;;  %v12955_v9 = vld [vmem:[%s16475_s9 + $0x80] ss:$16 sps:$4 sm:$0xff] (%p101_p2)   ;;  %v12999_v1 = vld [vmem:[%s16477_s11 + $0x34] ss:$8 sps:$4 sm:$0xff] (%p101_p2)  }
 0x90d   :  { %v12964_v39 = vld [vmem:[%s16475_s9 + $0xc0] ss:$16 sps:$4 sm:$0xff] (%p101_p2)  }
 0x919   : > { %v8847_v58 = vpop.f32.mrb[64].mxu1 }
 0x91a   : > { %v8854_v54 = vadd.f32 %v8847_v58, %v8770_v18  ;;  %v12224_v45 = vpop.f32.mrb[65].mxu1  ;;  %v12991_v18 = vld [vmem:[%s16477_s11 + $0x20] ss:$8 sps:$4 sm:$0xff] (%p101_p2)   ;;  %v12997_v58 = vld [vmem:[%s16477_s11 + $0x30] ss:$8 sps:$4 sm:$0xff] (%p101_p2)  }
 0x91b   : > { %v8850_v42 = vpop.f32.mrb[66].mxu1  ;;  %v12972_v45 = vld [vmem:[%s16477_s11 + $0x104] ss:$8 sps:$4 sm:$0xff] (%p101_p2)  }
 0x91c   : > { %v8863_v34 = vadd.f32 %v10743_v63, %v8854_v54  ;;  %v8855_v22 = vadd.f32 %v8850_v42, %v8771_v17  ;;  %v12225_v32 = vpop.f32.mrb[67].mxu1  ;;  %v12966_v17 = vld [vmem:[%s16475_s9 + $0xc4] ss:$16 sps:$4 sm:$0xff] (%p101_p2)   ;;  %v12967_v54 = vld [vmem:[%s16475_s9 + $0xe0] ss:$16 sps:$4 sm:$0xff] (%p101_p2)  }
 0x91d   :  { %v12970_v42 = vld [vmem:[%s16477_s11 + $0x100] ss:$8 sps:$4 sm:$0xff] (%p101_p2)   ;;  %v12978_v32 = vld [vmem:[%s16477_s11 + $0x124] ss:$8 sps:$4 sm:$0xff] (%p101_p2)  }
 0x91e   : > { %v8865_v5 = vmax.f32 %v8863_v34, 0.0  ;;  %v8864_v24 = vadd.f32 %v10743_v63, %v8855_v22  ;;  %v12969_v63 = vld [vmem:[%s16475_s9 + $0xe4] ss:$16 sps:$4 sm:$0xff] (%p101_p2)   ;;  %v12973_v22 = vld [vmem:[%s16477_s11 + $0x110] ss:$8 sps:$4 sm:$0xff] (%p101_p2)  }
 0x91f   :  { %v12975_v34 = vld [vmem:[%s16477_s11 + $0x114] ss:$8 sps:$4 sm:$0xff] (%p101_p2)  }
 0x920   : > { %v8869_v11 = vrot.slane %v8865_v5, 4  ;;  %v8866_v44 = vmax.f32 %v8864_v24, 0.0  ;;  %v12984_v24 = vld [vmem:[%s16477_s11 + $0x134] ss:$8 sps:$4 sm:$0xff] (%p101_p2)  }
 0x922   : > { %v8871_v36 = vmax.f32 %v8865_v5, %v8869_v11  ;;  %v8875_v16 = vrot.slane %v8866_v44, 4  ;;  %v12976_v5 = vld [vmem:[%s16477_s11 + $0x120] ss:$8 sps:$4 sm:$0xff] (%p101_p2)   ;;  %v12982_v11 = vld [vmem:[%s16477_s11 + $0x130] ss:$8 sps:$4 sm:$0xff] (%p101_p2)  }
 0x924   : > { %8873 = vst.msk [vmem:[#allocation8] sm:$0xf] %vm8872_vm8, %v8871_v36  ;;  %v8877_v29 = vmax.f32 %v8866_v44, %v8875_v16  ;;  %v12990_v44 = vld [vmem:[%s16477_s11 + $0x144] ss:$8 sps:$4 sm:$0xff] (%p101_p2)   ;;  %v12988_v36 = vld [vmem:[%s16477_s11 + $0x140] ss:$8 sps:$4 sm:$0xff] (%p101_p2)  }
 0x925   :  { %v12996_v16 = vld [vmem:[%s16477_s11 + $0x154] ss:$8 sps:$4 sm:$0xff] (%p101_p2)  }
 0x926   : > { %8878 = vst.msk [vmem:[#allocation8 + $0x4] sm:$0xf] %vm8872_vm8, %v8877_v29  ;;  %v12994_v29 = vld [vmem:[%s16477_s11 + $0x150] ss:$8 sps:$4 sm:$0xff] (%p101_p2)  }
 0x92a   :  { %103 = sbr.rel (!%p101_p2) target bundleno = 49 (0x31), region = 154 }
 0x92d   : > { %v8879_v28 = vld [vmem:[#allocation8] ss:$2 sm:$0xf]  ;;  %v8881_v47 = vld [vmem:[#allocation8 + $0x1] ss:$2 sm:$0xf] }
 0x92e   : > { %v8882_v14 = vmax.f32 %v8879_v28, %v8881_v47  ;;  %v13002_v28 = vld [vmem:[%s16477_s11 + $0x164] ss:$8 sps:$4 sm:$0xff] (%p101_p2)   ;;  %v13000_v47 = vld [vmem:[%s16477_s11 + $0x160] ss:$8 sps:$4 sm:$0xff] (%p101_p2)  }
 0x930   : > { %8884 = vst.msk [vmem:[%s8883_s28] sm:$0xf] %vm8872_vm8, %v8882_v14  ;;  %v13005_v14 = vld [vmem:[%s16477_s11 + $0x44] ss:$8 sps:$4 sm:$0xff] (%p101_p2)  }
 0x937   :  { %v8896_v2 = vld [vmem:[#allocation9 + $0x1] ss:$4 sm:$0x3]  ;;  %v9158_v31 = vld [vmem:[#allocation9 + $0x2] ss:$4 sm:$0x3] }
 0x938   :  { %v8897_v10 = vpack.c.bf16 %v8896_v2, %v8896_v2  ;;  %v9159_v4 = vpack.c.bf16 %v9158_v31, %v9158_v31  ;;  %v8885_v46 = vld [vmem:[#allocation9] ss:$4 sm:$0x3]  ;;  %v9299_v0 = vld [vmem:[#allocation9 + $0x3] ss:$4 sm:$0x3] }
 0x939   :  { %v8886_v38 = vpack.c.bf16 %v8885_v46, %v8885_v46  ;;  %v9300_v26 = vpack.c.bf16 %v9299_v0, %v9299_v0  ;;  %v13012_v2 = vld [vmem:[%s16477_s11 + $0x180] ss:$8 sps:$4 sm:$0xff]   ;;  %v13032_v31 = vld [vmem:[%s16477_s11 + $0x1b4] ss:$8 sps:$4 sm:$0xff]  }
 0x93a   :  { %10761 = vmatmul.mubr.msk.bf16.vlgmr.msra.gmra.mrb[0].mxu0 %vm17657_vm9, %v8897_v10  ;;  %10790 = vmatmul.mubr.msk.bf16.vlgmr.msra.gmra.mrb[0].mxu1 %vm17659_vm3, %v9159_v4  ;;  %v13044_v46 = vld [vmem:[%s16477_s11 + $0x1d4] ss:$8 sps:$4 sm:$0xff]  }
 0x93b   :  { %8992 = vmatpush1.bf16.msra.mxu0 %v12928_v15  ;;  %9023 = vmatprep.mubr.bf16.mxu0 %v13169_v62  ;;  %v13020_v15 = vld [vmem:[%s16477_s11 + $0x194] ss:$8 sps:$4 sm:$0xff]  }
 0x93c   :  { %8993 = vmatprep.subr.bf16.mxu0 %v12933_v53  ;;  %9395 = vmatpush1.bf16.msra.mxu1 %v12952_v51  ;;  %v13015_v53 = vld [vmem:[%s16477_s11 + $0x60] ss:$8 sps:$4 sm:$0xff]   ;;  %v13047_v0 = vld [vmem:[%s16477_s11 + $0xb4] ss:$8 sps:$4 sm:$0xff]  }
 0x93d   :  { %9426 = vmatprep.mubr.bf16.mxu1 %v13169_v62  ;;  %9396 = vmatprep.subr.bf16.mxu1 %v12960_v50  ;;  %v13036_v51 = vld [vmem:[%s16477_s11 + $0x1c0] ss:$8 sps:$4 sm:$0xff]   ;;  %v13038_v50 = vld [vmem:[%s16477_s11 + $0x1c4] ss:$8 sps:$4 sm:$0xff]  }
 0x93f   :  { %8994 = vmatpush1.bf16.msra.mxu0 %v12931_v8  ;;  %v13021_v8 = vld [vmem:[%s16477_s11 + $0x70] ss:$8 sps:$4 sm:$0xff]  }
 0x940   :  { %9075 = vmatprep.subr.bf16.mxu0 %v12936_v52  ;;  %9397 = vmatpush1.bf16.msra.mxu1 %v12958_v20  ;;  %v13024_v52 = vld [vmem:[%s16477_s11 + $0x1a0] ss:$8 sps:$4 sm:$0xff]   ;;  %v13042_v20 = vld [vmem:[%s16477_s11 + $0x1d0] ss:$8 sps:$4 sm:$0xff]  }
 0x941   :  { %9869 = vmatprep.subr.bf16.mxu1 %v12981_v19  ;;  %v13054_v19 = vld [vmem:[%s16477_s11 + $0x1f0] ss:$8 sps:$4 sm:$0xff]  }
 0x942   :  { %10762 = vmatmul.mubr.msk.bf16.vlgmr.msra.gmra.mrb[4].mxu0 %vm17658_vm12, %v8897_v10  ;;  %v13017_v10 = vld [vmem:[%s16477_s11 + $0x64] ss:$8 sps:$4 sm:$0xff]  }
 0x943   :  { %9076 = vmatpush1.bf16.msra.mxu0 %v12934_v49  ;;  %9107 = vmatprep.mubr.bf16.mxu0 %v13169_v62  ;;  %v13027_v49 = vld [vmem:[%s16477_s11 + $0x80] ss:$8 sps:$4 sm:$0xff]  }
 0x944   :  { %9077 = vmatprep.subr.bf16.mxu0 %v12939_v55  ;;  %10808 = vmatmul.mubr.msk.bf16.vlgmr.msra.gmra.mrb[4].mxu1 %vm17661_vm5, %v9300_v26  ;;  %v13035_v55 = vld [vmem:[%s16477_s11 + $0x94] ss:$8 sps:$4 sm:$0xff]  }
 0x945   :  { %9870 = vmatpush1.bf16.msra.mxu1 %v12979_v33  ;;  %v13051_v33 = vld [vmem:[%s16477_s11 + $0xc0] ss:$8 sps:$4 sm:$0xff]  }
 0x946   :  { %9871 = vmatprep.subr.bf16.mxu1 %v12987_v25  ;;  %v13062_v25 = vld [vmem:[%s16477_s11 + $0xe4] ss:$8 sps:$4 sm:$0xff]  }
 0x947   :  { %9078 = vmatpush1.bf16.msra.mxu0 %v12937_v56  ;;  %v13041_v56 = vld [vmem:[%s16477_s11 + $0xa4] ss:$8 sps:$4 sm:$0xff]  }
 0x948   :  { %9116 = vmatprep.subr.bf16.mxu0 %v12945_v61  ;;  %v13039_v61 = vld [vmem:[%s16477_s11 + $0xa0] ss:$8 sps:$4 sm:$0xff]  }
 0x949   :  { %9872 = vmatpush1.bf16.msra.mxu1 %v12985_v43  ;;  %v13057_v43 = vld [vmem:[%s16477_s11 + $0xd0] ss:$8 sps:$4 sm:$0xff]  }
 0x94a   :  { %10771 = vmatmul.mubr.msk.bf16.vlgmr.msra.gmra.mrb[8].mxu0 %vm17660_vm1, %v8886_v38  ;;  %9873 = vmatprep.subr.bf16.mxu1 %v12993_v48  ;;  %v13063_v48 = vld [vmem:[%s16477_s11 + $0xf0] ss:$8 sps:$4 sm:$0xff]  }
 0x94b   :  { %9117 = vmatpush1.bf16.msra.mxu0 %v12943_v23  ;;  %9148 = vmatprep.mubr.bf16.mxu0 %v13169_v62  ;;  %v13045_v23 = vld [vmem:[%s16477_s11 + $0xb0] ss:$8 sps:$4 sm:$0xff]  }
 0x94c   :  { %9118 = vmatprep.subr.bf16.mxu0 %v12951_v59  ;;  %v13048_v59 = vld [vmem:[%s16477_s11 + $0x1e0] ss:$8 sps:$4 sm:$0xff]  }
 0x94d   :  { %9874 = vmatpush1.bf16.msra.mxu1 %v12991_v18  ;;  %v13066_v18 = vld [vmem:[%s16479_s13 + $0x40] sm:$0xff]  }
 0x94e   :  { %9875 = vmatprep.subr.bf16.mxu1 %v12999_v1 }
 0x94f   :  { %9119 = vmatpush1.bf16.msra.mxu0 %v12949_v37  ;;  %v13056_v37 = vld [vmem:[%s16477_s11 + $0x1f4] ss:$8 sps:$4 sm:$0xff]  }
 0x950   :  { %9212 = vmatprep.subr.bf16.mxu0 %v12957_v60  ;;  %v13059_v60 = vld [vmem:[%s16477_s11 + $0xd4] ss:$8 sps:$4 sm:$0xff]  }
 0x951   :  { %9876 = vmatpush1.bf16.msra.mxu1 %v12997_v58 }
 0x952   :  { %10772 = vmatmul.mubr.msk.bf16.vlgmr.msra.gmra.mrb[12].mxu0 %vm17662_vm11, %v8886_v38  ;;  %9877 = vmatprep.subr.bf16.mxu1 %v13005_v14  ;;  %v13050_v38 = vld [vmem:[%s16477_s11 + $0x1e4] ss:$8 sps:$4 sm:$0xff]  }
 0x953   :  { %9213 = vmatpush1.bf16.msra.mxu0 %v12955_v9  ;;  %9244 = vmatprep.mubr.bf16.mxu0 %v13169_v62  ;;  %v13060_v9 = vld [vmem:[%s16477_s11 + $0xe0] ss:$8 sps:$4 sm:$0xff]  }
 0x954   :  { %9214 = vmatprep.subr.bf16.mxu0 %v12963_v40  ;;  %v13065_v40 = vld [vmem:[%s16477_s11 + $0xf4] ss:$8 sps:$4 sm:$0xff]  }
 0x955   :  { %9878 = vmatpush1.bf16.msra.mxu1 %v13003_v6 }
 0x956   :  { %9879 = vmatprep.subr.bf16.mxu1 %v13011_v21  ;;  %v9439_v21 = vld [vmem:[%s16476_s10] sm:$0xf] }
 0x957   :  { %9215 = vmatpush1.bf16.msra.mxu0 %v12961_v12 }
 0x958   :  { %9353 = vmatprep.subr.bf16.mxu0 %v12966_v17 }
 0x959   :  { %9880 = vmatpush1.bf16.msra.mxu1 %v13009_v13 }
 0x95a   :  { %10789 = vmatmul.mubr.msk.bf16.vlgmr.msra.gmra.mrb[16].mxu0 %vm17663_vm4, %v9159_v4  ;;  %9881 = vmatprep.subr.bf16.mxu1 %v13017_v10  ;;  %v13033_v4 = vld [vmem:[%s16477_s11 + $0x90] ss:$8 sps:$4 sm:$0xff]  }
 0x95b   :  { %9354 = vmatpush1.bf16.msra.mxu0 %v12964_v39  ;;  %9385 = vmatprep.mubr.bf16.mxu0 %v13169_v62  ;;  %v13006_v62 = vld [vmem:[%s16477_s11 + $0x170] ss:$8 sps:$4 sm:$0xff]  }
 0x95c   :  { %9355 = vmatprep.subr.bf16.mxu0 %v12969_v63 }
 0x95d   :  { %9882 = vmatpush1.bf16.msra.mxu1 %v13015_v53 }
 0x95e   :  { %9883 = vmatprep.subr.bf16.mxu1 %v13023_v30 }
 0x95f   :  { %9356 = vmatpush1.bf16.msra.mxu0 %v12967_v54 }
 0x960   :  { %9910 = vmatprep.subr.bf16.mxu0 %v12972_v45 }
 0x961   :  { %9884 = vmatpush1.bf16.msra.mxu1 %v13021_v8 }
 0x962   :  { %10807 = vmatmul.mubr.msk.bf16.vlgmr.msra.gmra.mrb[20].mxu0 %vm17664_vm13, %v9300_v26  ;;  %9885 = vmatprep.subr.bf16.mxu1 %v13029_v35  ;;  %v13053_v26 = vld [vmem:[%s16477_s11 + $0xc4] ss:$8 sps:$4 sm:$0xff]  }
 0x963   :  { %9911 = vmatpush1.bf16.msra.mxu0 %v12970_v42 }
 0x964   :  { %9912 = vmatprep.subr.bf16.mxu0 %v12975_v34 }
 0x965   :  { %9886 = vmatpush1.bf16.msra.mxu1 %v13027_v49 }
 0x966   :  { %9887 = vmatprep.subr.bf16.mxu1 %v13035_v55 }
 0x967   :  { %9913 = vmatpush1.bf16.msra.mxu0 %v12973_v22 }
 0x968   :  { %9914 = vmatprep.subr.bf16.mxu0 %v12978_v32 }
 0x969   :  { %9888 = vmatpush1.bf16.msra.mxu1 %v13033_v4 }
 0x96a   :  { %9889 = vmatprep.subr.bf16.mxu1 %v13041_v56 }
 0x96b   :  { %9915 = vmatpush1.bf16.msra.mxu0 %v12976_v5 }
 0x96c   :  { %9916 = vmatprep.subr.bf16.mxu0 %v12984_v24 }
 0x96d   :  { %9890 = vmatpush1.bf16.msra.mxu1 %v13039_v61 }
 0x96e   :  { %9891 = vmatprep.subr.bf16.mxu1 %v13047_v0 }
 0x96f   :  { %9917 = vmatpush1.bf16.msra.mxu0 %v12982_v11 }
 0x970   :  { %9918 = vmatprep.subr.bf16.mxu0 %v12990_v44 }
 0x971   :  { %9892 = vmatpush1.bf16.msra.mxu1 %v13045_v23 }
 0x972   :  { %9893 = vmatprep.subr.bf16.mxu1 %v13053_v26 }
 0x973   :  { %9919 = vmatpush1.bf16.msra.mxu0 %v12988_v36 }
 0x974   :  { %9920 = vmatprep.subr.bf16.mxu0 %v12996_v16 }
 0x975   :  { %9894 = vmatpush1.bf16.msra.mxu1 %v13051_v33 }
 0x976   :  { %9895 = vmatprep.subr.bf16.mxu1 %v13059_v60 }
 0x977   :  { %9921 = vmatpush1.bf16.msra.mxu0 %v12994_v29 }
 0x978   :  { %9922 = vmatprep.subr.bf16.mxu0 %v13002_v28 }
 0x979   :  { %9896 = vmatpush1.bf16.msra.mxu1 %v13057_v43 }
 0x97a   :  { %9897 = vmatprep.subr.bf16.mxu1 %v13062_v25 }
 0x97b   :  { %9923 = vmatpush1.bf16.msra.mxu0 %v13000_v47 }
 0x97c   :  { %9924 = vmatprep.subr.bf16.mxu0 %v13008_v3  ;;  %v17665_v3 = vld [vmem:[#allocation27_spill] sm:$0xff] }
 0x97d   :  { %9898 = vmatpush1.bf16.msra.mxu1 %v13060_v9  ;;  %v9451_v6 = vsub.s32 2, %v17665_v3  ;;  %v9455_v13 = vsub.s32 3, %v17665_v3 }
 0x97e   :  { %9899 = vmatprep.subr.bf16.mxu1 %v13065_v40 }
 0x97f   :  { %9925 = vmatpush1.bf16.msra.mxu0 %v13006_v62  ;;  %v9452_v30 = vrot.slane %v9439_v21, %v9451_v6 }
 0x980   :  { %9926 = vmatprep.subr.bf16.mxu0 %v13014_v41 }
 0x981   :  { %9900 = vmatpush1.bf16.msra.mxu1 %v13063_v48 }
 0x982   :  { %11322 = vmatprep.subr.bf16.mxu1 %v13066_v18 }
 0x983   :  { %9927 = vmatpush1.bf16.msra.mxu0 %v13012_v2 }
 0x984   :  { %9928 = vmatprep.subr.bf16.mxu0 %v13020_v15 }
 0x987   :  { %9929 = vmatpush1.bf16.msra.mxu0 %v13018_v57 }
 0x988   :  { %9930 = vmatprep.subr.bf16.mxu0 %v13026_v7 }
 0x98b   :  { %9931 = vmatpush1.bf16.msra.mxu0 %v13024_v52  ;;  %v9456_v52 = vrot.slane %v9439_v21, %v9455_v13 }
 0x98c   :  { %9932 = vmatprep.subr.bf16.mxu0 %v13032_v31 }
 0x98f   :  { %9933 = vmatpush1.bf16.msra.mxu0 %v13030_v27 }
 0x990   :  { %9934 = vmatprep.subr.bf16.mxu0 %v13038_v50 }
 0x993   :  { %9935 = vmatpush1.bf16.msra.mxu0 %v13036_v51 }
 0x994   :  { %9936 = vmatprep.subr.bf16.mxu0 %v13044_v46 }
 0x997   :  { %9937 = vmatpush1.bf16.msra.mxu0 %v13042_v20  ;;  %v9443_v20 = vsub.s32 0, %v17665_v3 }
 0x998   :  { %9938 = vmatprep.subr.bf16.mxu0 %v13050_v38  ;;  %v9447_v38 = vsub.s32 1, %v17665_v3 }
 0x99b   :  { %9939 = vmatpush1.bf16.msra.mxu0 %v13048_v59  ;;  %v9444_v59 = vrot.slane %v9439_v21, %v9443_v20 }
 0x99c   :  { %9940 = vmatprep.subr.bf16.mxu0 %v13056_v37  ;;  %v9448_v37 = vrot.slane %v9439_v21, %v9447_v38 }
 0x99f   :  { %9941 = vmatpush1.bf16.msra.mxu0 %v13054_v19 }
 0xa0d   :  { %v8984_v12 = vpop.f32.mrb[0].mxu0  ;;  %v9287_v45 = vpop.f32.mrb[0].mxu1 }
 0xa0e   :  { %v8986_v1 = vpop.f32.mrb[1].mxu0  ;;  %v9289_v34 = vpop.f32.mrb[1].mxu1 }
 0xa0f   :  { %v8988_v17 = vpop.f32.mrb[2].mxu0  ;;  %v9291_v22 = vpop.f32.mrb[2].mxu1 }
 0xa10   :  { %v8989_v39 = vpop.f32.mrb[3].mxu0  ;;  %v9292_v32 = vpop.f32.mrb[3].mxu1  ;;  %v13075_v22 = vld [vmem:[%s16479_s13 + $0x20] sm:$0xff]  }
 0xa11   :  { %v13068_v39 = vld [vmem:[%s16479_s13 + $0x48] sm:$0xff]  }
 0xa12   :  { %v13076_v32 = vld [vmem:[%s16479_s13 + $0x68] sm:$0xff]  }
 0xa15   :  { %v9025_v58 = vpop.f32.mrb[4].mxu0 }
 0xa16   :  { %v9027_v63 = vpop.f32.mrb[5].mxu0 }
 0xa17   :  { %v9029_v54 = vpop.f32.mrb[6].mxu0  ;;  %v9428_v16 = vpop.f32.mrb[4].mxu1 }
 0xa18   :  { %v9030_v42 = vpop.f32.mrb[7].mxu0  ;;  %v9430_v28 = vpop.f32.mrb[5].mxu1  ;;  %v13071_v54 = vld [vmem:[%s16479_s13 + $0x10] sm:$0xff]  }
 0xa19   :  { %v9432_v47 = vpop.f32.mrb[6].mxu1  ;;  %v13073_v42 = vld [vmem:[%s16479_s13 + $0x18] sm:$0xff]  }
 0xa1a   :  { %v9433_v14 = vpop.f32.mrb[7].mxu1 }
 0xa1b   :  { %v9537_v14 = vld [vmem:[%s16478_s12] sm:$0x3] }
 0xa1c   :  { %v9542_v3 = vrot.slane %v9537_v14, %v9443_v20  ;;  %v9546_v6 = vrot.slane %v9537_v14, %v9447_v38 }
 0xa1d   :  { %v9109_v5 = vpop.f32.mrb[8].mxu0 }
 0xa1e   :  { %v9110_v24 = vadd.f32 %v9109_v5, %v8984_v12  ;;  %v9111_v11 = vpop.f32.mrb[9].mxu0  ;;  %v13077_v5 = vld [vmem:[%s16479_s13 + $0x28] sm:$0xff]  }
 0xa1f   :  { %v9112_v44 = vadd.f32 %v9111_v11, %v8986_v1  ;;  %v9113_v36 = vpop.f32.mrb[10].mxu0  ;;  %v13067_v1 = vld [vmem:[%s16479_s13] sm:$0xff]   ;;  %v13079_v11 = vld [vmem:[%s16479_s13 + $0x30] sm:$0xff]  }
 0xa20   :  { %v9114_v29 = vpop.f32.mrb[11].mxu0  ;;  %v13081_v36 = vld [vmem:[%s16479_s13 + $0x38] sm:$0xff]  }
 0xa25   :  { %v9150_v62 = vpop.f32.mrb[12].mxu0 }
 0xa26   :  { %v9151_v2 = vadd.f32 %v9150_v62, %v9025_v58  ;;  %v9152_v41 = vpop.f32.mrb[13].mxu0  ;;  %v13069_v58 = vld [vmem:[%s16479_s13 + $0x8] sm:$0xff]  }
 0xa27   :  { %v9153_v10 = vadd.f32 %v9152_v41, %v9027_v63  ;;  %v9154_v15 = vpop.f32.mrb[14].mxu0  ;;  %v13070_v63 = vld [vmem:[%s16479_s13 + $0x50] sm:$0xff]  }
 0xa28   :  { %v9296_v53 = vadd.f32 %v9287_v45, %v9151_v2  ;;  %v9155_v57 = vpop.f32.mrb[15].mxu0  ;;  %v13072_v45 = vld [vmem:[%s16479_s13 + $0x58] sm:$0xff]  }
 0xa29   :  { %v9297_v8 = vadd.f32 %v9289_v34, %v9153_v10  ;;  %v13074_v34 = vld [vmem:[%s16479_s13 + $0x60] sm:$0xff]  }
 0xa2a   :  { %v9437_v7 = vadd.f32 %v9428_v16, %v9296_v53 }
 0xa2b   :  { %v9438_v35 = vadd.f32 %v9430_v28, %v9297_v8 }
 0xa2c   :  { %v9463_v31 = vadd.f32 %v9452_v30, %v9437_v7 }
 0xa2d   :  { %v9464_v49 = vadd.f32 %v9456_v52, %v9438_v35  ;;  %v9246_v27 = vpop.f32.mrb[16].mxu0 }
 0xa2e   :  { %v9467_v55 = vmax.f32 %v9463_v31, 0.0  ;;  %v9294_v4 = vadd.f32 %v9246_v27, %v9110_v24  ;;  %v9248_v51 = vpop.f32.mrb[17].mxu0  ;;  %v13078_v24 = vld [vmem:[%s16479_s13 + $0x70] sm:$0xff]   ;;  %v10873_v31 = vld [vmem:[%s16480_s14] ss:$0 sm:$0xff] }
 0xa2f   :  { %v9468_v50 = vmax.f32 %v9464_v49, 0.0  ;;  %v9295_v56 = vadd.f32 %v9248_v51, %v9112_v44  ;;  %v9250_v46 = vpop.f32.mrb[18].mxu0  ;;  %v13080_v44 = vld [vmem:[%s16479_s13 + $0x78] sm:$0xff]  }
 0xa30   :  { %v9251_v61 = vpop.f32.mrb[19].mxu0  ;;  %v9471_v23 = vpack.c.bf16 %v9467_v55, %v9467_v55 }
 0xa31   :  { %v9472_v0 = vpack.c.bf16 %v9468_v50, %v9468_v50 }
 0xa33   :  { %9942 = vmatprep.mubr.bf16.mxu0 %v9472_v0 }
 0xa34   :  { %9943 = vmatmul.mubr.bf16.vlgmr.msra.gmra.mrb[24].mxu0 %v9471_v23 }
 0xa35   :  { %v9387_v26 = vpop.f32.mrb[20].mxu0 }
 0xa36   :  { %v9435_v33 = vadd.f32 %v9387_v26, %v9294_v4  ;;  %v9389_v19 = vpop.f32.mrb[21].mxu0 }
 0xa37   :  { %v9436_v60 = vadd.f32 %v9389_v19, %v9295_v56  ;;  %v9391_v43 = vpop.f32.mrb[22].mxu0 }
 0xa38   :  { %v9461_v25 = vadd.f32 %v9444_v59, %v9435_v33  ;;  %v9392_v9 = vpop.f32.mrb[23].mxu0 }
 0xa39   :  { %v9462_v40 = vadd.f32 %v9448_v37, %v9436_v60 }
 0xa3a   :  { %v9465_v48 = vmax.f32 %v9461_v25, 0.0 }
 0xa3b   :  { %v9466_v18 = vmax.f32 %v9462_v40, 0.0 }
 0xa3c   :  { %v9469_v17 = vpack.c.bf16 %v9465_v48, %v9465_v48 }
 0xa3d   :  { %v9470_v12 = vpack.c.bf16 %v9466_v18, %v9466_v18 }
 0xa3f   :  { %9901 = vmatprep.mubr.bf16.mxu1 %v9470_v12 }
 0xa40   :  { %9902 = vmatmul.mubr.bf16.vlgmr.msra.gmra.mrb[8].mxu1 %v9469_v17 }
 0xa41   :  { %11323 = vmatpush3.bf16.msra.mxu1 %v13067_v1 }
 0xa42   :  { %11324 = vmatprep.subr.bf16.mxu1 %v13068_v39 }
 0xa45   :  { %11325 = vmatpush3.bf16.msra.mxu1 %v13069_v58 }
 0xa46   :  { %11326 = vmatprep.subr.bf16.mxu1 %v13070_v63 }
 0xa49   :  { %11327 = vmatpush3.bf16.msra.mxu1 %v13071_v54 }
 0xa4a   :  { %11328 = vmatprep.subr.bf16.mxu1 %v13072_v45 }
 0xa4d   :  { %11329 = vmatpush3.bf16.msra.mxu1 %v13073_v42 }
 0xa4e   :  { %11330 = vmatprep.subr.bf16.mxu1 %v13074_v34 }
 0xa51   :  { %11331 = vmatpush3.bf16.msra.mxu1 %v13075_v22 }
 0xa52   :  { %11332 = vmatprep.subr.bf16.mxu1 %v13076_v32 }
 0xa55   :  { %11333 = vmatpush3.bf16.msra.mxu1 %v13077_v5 }
 0xa56   :  { %11334 = vmatprep.subr.bf16.mxu1 %v13078_v24 }
 0xa59   :  { %11335 = vmatpush3.bf16.msra.mxu1 %v13079_v11 }
 0xa5a   :  { %11336 = vmatprep.subr.bf16.mxu1 %v13080_v44 }
 0xa5d   :  { %11337 = vmatpush3.bf16.msra.mxu1 %v13081_v36 }
 0xb07   :  { %v9944_v16 = vpop.f32.mrb[24].mxu0 }
 0xb08   :  { %v9946_v29 = vpop.f32.mrb[25].mxu0 }
 0xb09   :  { %v9948_v28 = vpop.f32.mrb[26].mxu0 }
 0xb0a   :  { %v9949_v47 = vpop.f32.mrb[27].mxu0 }
 0xb13   :  { %v9903_v62 = vpop.f32.mrb[8].mxu1 }
 0xb14   :  { %v9904_v21 = vadd.f32 %v9903_v62, %v9542_v3  ;;  %v9905_v13 = vpop.f32.mrb[9].mxu1 }
 0xb15   :  { %v9906_v2 = vadd.f32 %v9905_v13, %v9546_v6  ;;  %v9907_v41 = vpop.f32.mrb[10].mxu1 }
 0xb16   :  { %v9945_v10 = vadd.f32 %v9944_v16, %v9904_v21  ;;  %v9908_v15 = vpop.f32.mrb[11].mxu1 }
 0xb17   :  { %v9947_v53 = vadd.f32 %v9946_v29, %v9906_v2 }
 0xb18   :  { %v9951_v57 = vmax.f32 %v9945_v10, 0.0 }
 0xb19   :  { %v9952_v30 = vmax.f32 %v9947_v53, 0.0 }
 0xb1a   :  { %v9953_v52 = vpack.c.bf16 %v9951_v57, %v9951_v57 }
 0xb1b   :  { %v9954_v8 = vpack.c.bf16 %v9952_v30, %v9952_v30 }
 0xb1d   :  { %10122 = vmatprep.mubr.bf16.mxu1 %v9954_v8 }
 0xb1e   :  { %10123 = vmatmul.mubr.bf16.vlgmr.msra.gmra.mrb[12].mxu1 %v9953_v52 }
 0xbf1   :  { %v11338_v7 = vpop.f32.mrb[12].mxu1 }
 0xbf2   :  { %v11339_v35 = vpop.f32.mrb[13].mxu1 }
 0xbf3   :  { %v11340_v49 = vadd.f32 %v11339_v35, %v11338_v7  ;;  %v11341_v27 = vpop.f32.mrb[14].mxu1 }
 0xbf4   :  { %v11342_v55 = vpop.f32.mrb[15].mxu1 }
 0xbf5   :  { %v10125_v4 = vadd.f32 %v11340_v49, %v10873_v31 }
 0xbf7   :  { %10130 = vst [vmem:[#allocation15] sm:$0x3] %v10125_v4 }
 0xbf8   :  { %13137 = shalt.err (!%p13134_p7)
}
 0xbf9   :  { %s13138_s0 = scalar_lea.hbm %s16481_s15, 32 }
 0xbfa   :  { %p13139_p8 = scmp.ne.s32.totalorder %s16481_s15, %s13138_s0  ;;  %p13142_p9 = scmp.lt.u32.totalorder %s13138_s0, %s16481_s15 }
 0xbfc   :  { %p13144_p10 = pnand %p13142_p9, %p13139_p8 }
 0xbfe   :  { %13147 = shalt.err (!%p13144_p10)
}
 0xbff   :  { %10140 = dma.vmem_to_hbm [thread:$0]  %s10138_s17, 32, %s16481_s15, [#allocation12]  }
 0xc00   :  { %13156 = dma.done.wait [#allocation12], 32  }
 0xc01   :  { %13157 = vsyncadd [#allocation12], 4294967264 }
 0xc02   :  { %10144 = vsyncpa [#allocation11], 1 }
 0xc03   :  { %10145 = vsyncpa [#allocation14], 1 }
 0xc04   :  { %10146 = vsyncpa [#allocation12], 1 }

</bundles_post_ra>
